<compile_context>
chip_gen: v5e
topology: v5e:2x2
jax: 0.10.0
libtpu: 0.0.40
codegen_flags: <defaults>
</compile_context>

<pallas_src>
import jax
import jax.numpy as jnp
from jax import lax
from jax.experimental import pallas as pl
from jax.experimental.pallas import tpu as pltpu

EPS = 1e-5
EXPANSION = 1  # Block.expansion


# ----------------------------------------------------------------------------
# helpers
# ----------------------------------------------------------------------------
def _fold_bn(gamma, beta, mean, var):
    """Fold eval-mode BatchNorm into per-channel scale/bias, shape (1, C) f32."""
    scale = gamma / jnp.sqrt(var + EPS)
    bias = beta - mean * scale
    return (scale.reshape(1, -1).astype(jnp.float32),
            bias.reshape(1, -1).astype(jnp.float32))


# ----------------------------------------------------------------------------
# Pallas kernel
# ----------------------------------------------------------------------------
def _make_kernel(Nb, H, W, Cin, P, stride, has_shortcut):
    Ho = (H - 1) // stride + 1
    Wo = (W - 1) // stride + 1
    M = Nb * Ho * Wo
    f32 = jnp.float32
    bf16 = jnp.bfloat16

    def _tap(ref, dy, dx):
        # (Nb, Ho, Wo, C) window of the pre-padded input for 3x3 tap (dy, dx).
        if stride == 1:
            return ref[:, pl.ds(dy, Ho), pl.ds(dx, Wo), :]
        return ref[:, pl.ds(dy, Ho, stride), pl.ds(dx, Wo, stride), :]

    def body(x_ref, s1_ref, b1_ref, w1_ref, s2_ref, b2_ref, w2_ref,
             wsc_ref, ssc_ref, bsc_ref, out_ref):
        # ---- conv1: 3x3 / stride as a single im2col matmul -----------------
        taps = []
        for dy in range(3):
            for dx in range(3):
                taps.append(_tap(x_ref, dy, dx).reshape(M, Cin))
        patches = jnp.concatenate(taps, axis=-1)                # (M, 9*Cin) f32
        t = jnp.dot(patches.astype(bf16), w1_ref[...],
                    preferred_element_type=f32)                 # (M, P) f32
        t = jnp.maximum(t * s1_ref[...] + b1_ref[...], 0.0)     # n1 + ReLU

        # ---- shortcut: reuse the centre tap of the conv1 patch slab --------
        center = taps[4]                                        # x[n, h*s, w*s, :]
        if has_shortcut:
            sc = jnp.dot(center.astype(bf16), wsc_ref[...],
                         preferred_element_type=f32)            # 1x1 / stride
            sc = sc * ssc_ref[...] + bsc_ref[...]               # shortcut BN
        else:
            sc = center                                         # identity (stride==1, Cin==P)

        # ---- conv2: 3x3 / 1; halo built as values (no scratch round trip) --
        tr = t.reshape(Nb, Ho, Wo, P)
        zrow = jnp.zeros((Nb, 1, Wo, P), f32)
        zcol = jnp.zeros((Nb, Ho + 2, 1, P), f32)
        tp = jnp.concatenate([zrow, tr, zrow], axis=1)
        tp = jnp.concatenate([zcol, tp, zcol], axis=2)          # (Nb, Ho+2, Wo+2, P)
        taps2 = [tp[:, dy:dy + Ho, dx:dx + Wo, :].reshape(M, P)
                 for dy in range(3) for dx in range(3)]
        patches2 = jnp.concatenate(taps2, axis=-1)              # (M, 9*P) f32
        t = jnp.dot(patches2.astype(bf16), w2_ref[...],
                    preferred_element_type=f32)                 # (M, P) f32
        t = jnp.maximum(t * s2_ref[...] + b2_ref[...], 0.0)     # n2 + ReLU

        # ---- residual add (ReLU is applied before the add in this Block) ---
        out_ref[...] = (t + sc).reshape(Nb, Ho, Wo, P)

    if has_shortcut:
        def kernel(x_ref, s1, b1, w1, s2, b2, w2, wsc, ssc, bsc, out_ref):
            body(x_ref, s1, b1, w1, s2, b2, w2, wsc, ssc, bsc, out_ref)
    else:
        def kernel(x_ref, s1, b1, w1, s2, b2, w2, out_ref):
            body(x_ref, s1, b1, w1, s2, b2, w2, None, None, None, out_ref)

    return kernel, Ho, Wo


# ----------------------------------------------------------------------------
# wrapper: parameter folding + pallas_call
# ----------------------------------------------------------------------------
def block_forward(x_nchw, params, in_planes, planes, stride, *, batch_block=None):
    """Fused Pallas forward of Block. x is NCHW f32; returns NCHW f32."""
    N, Cin, H, W = x_nchw.shape
    assert Cin == in_planes
    P = planes
    has_shortcut = (stride != 1) or (in_planes != EXPANSION * planes)
    if not has_shortcut:
        assert stride == 1 and Cin == P

    Nb = batch_block if batch_block is not None else (2 if N % 2 == 0 else 1)
    assert N % Nb == 0, (N, Nb)

    # NCHW -> NHWC; pre-pad the conv1 halo HBM-side (border is statically zero).
    x = jnp.transpose(x_nchw, (0, 2, 3, 1)).astype(jnp.float32)
    xpad = jnp.pad(x, ((0, 0), (1, 1), (1, 1), (0, 0)))

    s1, b1 = _fold_bn(*params["n1"])
    s2, b2 = _fold_bn(*params["n2"])
    # HWIO 3x3 weights -> (9*C, P) im2col layout, bf16 on the MXU path.
    w1 = params["w1"].reshape(9 * Cin, P).astype(jnp.bfloat16)
    w2 = params["w2"].reshape(9 * P, P).astype(jnp.bfloat16)

    kernel, Ho, Wo = _make_kernel(Nb, H, W, Cin, P, stride, has_shortcut)

    def _full(shape):
        return pl.BlockSpec(shape, lambda n: (0,) * len(shape))

    inputs = [xpad, s1, b1, w1, s2, b2, w2]
    in_specs = [
        pl.BlockSpec((Nb, H + 2, W + 2, Cin), lambda n: (n, 0, 0, 0)),   # x (padded)
        _full((1, P)), _full((1, P)),                                    # n1 scale/bias
        _full((9 * Cin, P)),                                             # conv1 weight
        _full((1, P)), _full((1, P)),                                    # n2 scale/bias
        _full((9 * P, P)),                                               # conv2 weight
    ]
    if has_shortcut:
        ssc, bsc = _fold_bn(*params["nsc"])
        wsc = params["wsc"].astype(jnp.bfloat16)
        inputs += [wsc, ssc, bsc]
        in_specs += [_full((Cin, P)), _full((1, P)), _full((1, P))]

    out = pl.pallas_call(
        kernel,
        out_shape=jax.ShapeDtypeStruct((N, Ho, Wo, P), jnp.float32),
        grid_spec=pltpu.PrefetchScalarGridSpec(
            num_scalar_prefetch=0,
            grid=(N // Nb,),
            in_specs=in_specs,
            out_specs=pl.BlockSpec((Nb, Ho, Wo, P), lambda n: (n, 0, 0, 0)),
        ),
        compiler_params=pltpu.CompilerParams(
            dimension_semantics=("parallel",),          # batch blocks are independent
            vmem_limit_bytes=48 * 1024 * 1024,          # headroom under v7x's 64 MiB
        ),
    )(*inputs)

    # TODO(synk): for channel widths < 128, repack the output to a lane-dense
    # (Nb, Ho, Wo*C) layout to avoid masked partial stores.
    return jnp.transpose(out, (0, 3, 1, 2))             # NHWC -> NCHW


# ----------------------------------------------------------------------------
# pure-JAX reference (lax.conv), mirroring the kernel's bf16 matmul inputs
# ----------------------------------------------------------------------------
def block_reference(x_nchw, params, in_planes, planes, stride):
    has_shortcut = (stride != 1) or (in_planes != EXPANSION * planes)
    x = jnp.transpose(x_nchw, (0, 2, 3, 1)).astype(jnp.float32)
    xb = x.astype(jnp.bfloat16)
    dn = ("NHWC", "HWIO", "NHWC")

    s1, b1 = _fold_bn(*params["n1"])
    s2, b2 = _fold_bn(*params["n2"])

    t = lax.conv_general_dilated(
        xb, params["w1"].astype(jnp.bfloat16), (stride, stride), ((1, 1), (1, 1)),
        dimension_numbers=dn, preferred_element_type=jnp.float32)
    t = jnp.maximum(t * s1 + b1, 0.0)
    t = lax.conv_general_dilated(
        t.astype(jnp.bfloat16), params["w2"].astype(jnp.bfloat16), (1, 1),
        ((1, 1), (1, 1)), dimension_numbers=dn, preferred_element_type=jnp.float32)
    t = jnp.maximum(t * s2 + b2, 0.0)

    if has_shortcut:
        ssc, bsc = _fold_bn(*params["nsc"])
        wsc = params["wsc"][None, None].astype(jnp.bfloat16)     # (1,1,Cin,P)
        sc = lax.conv_general_dilated(
            xb, wsc, (stride, stride), "VALID",
            dimension_numbers=dn, preferred_element_type=jnp.float32)
        sc = sc * ssc + bsc
    else:
        sc = x
    out = t + sc
    return jnp.transpose(out, (0, 3, 1, 2))


# ----------------------------------------------------------------------------
# deterministic synthetic parameters
# ----------------------------------------------------------------------------
def init_params(key, in_planes, planes):
    ks = jax.random.split(key, 8)

    def bn_params(k, C):
        k1, k2, k3, k4 = jax.random.split(k, 4)
        gamma = jax.random.uniform(k1, (C,), minval=0.5, maxval=1.5)
        beta = 0.1 * jax.random.normal(k2, (C,))
        mean = 0.1 * jax.random.normal(k3, (C,))
        var = jax.random.uniform(k4, (C,), minval=0.5, maxval=1.5)
        return gamma, beta, mean, var

    params = {
        "w1": 0.1 * jax.random.normal(ks[0], (3, 3, in_planes, planes)),   # 3x3 HWIO
        "n1": bn_params(ks[1], planes),
        "w2": 0.1 * jax.random.normal(ks[2], (3, 3, planes, planes)),      # 3x3 HWIO
        "n2": bn_params(ks[3], planes),
        "wsc": 0.1 * jax.random.normal(ks[4], (in_planes, planes)),        # 1x1 shortcut
        "nsc": bn_params(ks[5], planes),
    }
    return jax.tree.map(lambda a: a.astype(jnp.float32), params)


# ----------------------------------------------------------------------------
# smoke test
# ----------------------------------------------------------------------------
def _run_case(key, N, in_planes, planes, stride, H, W, batch_block):
    kx, kp = jax.random.split(key)
    x = jax.random.normal(kx, (N, in_planes, H, W), dtype=jnp.float32)
    params = init_params(kp, in_planes, planes)
    out = jax.block_until_ready(
        block_forward(x, params, in_planes, planes, stride, batch_block=batch_block))
    ref = jax.block_until_ready(
        block_reference(x, params, in_planes, planes, stride))
    Ho = (H - 1) // stride + 1
    Wo = (W - 1) // stride + 1
    assert out.shape == (N, EXPANSION * planes, Ho, Wo), out.shape
    err = float(jnp.max(jnp.abs(out - ref)))
    assert jnp.allclose(out, ref, atol=1e-2, rtol=1e-2), err
    return err


if __name__ == "__main__":
    key = jax.random.PRNGKey(0)
    k1, k2 = jax.random.split(key)

    # Case A: identity shortcut (stride=1, in_planes == planes); Nb=2 -> grid of 1.
    _run_case(k1, N=2, in_planes=4, planes=4, stride=1, H=16, W=16, batch_block=2)

    # Case B: projection shortcut (in_planes != planes); Nb=2 -> grid of 2 steps.
    # TODO(synk): stride=2 is implemented via strided pl.ds taps but not exercised here.
    _run_case(k2, N=4, in_planes=4, planes=16, stride=1, H=16, W=16, batch_block=2)

    print("KERNEL_OK")
</pallas_src>

<mosaic_0001>
module attributes {stable_mosaic.version = 11 : i64} {
  func.func @kernel(%arg0: i32, %arg1: memref<2x18x18x4xf32, #tpu.memory_space<vmem>>, %arg2: memref<1x4xf32, #tpu.memory_space<vmem>>, %arg3: memref<1x4xf32, #tpu.memory_space<vmem>>, %arg4: memref<36x4xbf16, #tpu.memory_space<vmem>>, %arg5: memref<1x4xf32, #tpu.memory_space<vmem>>, %arg6: memref<1x4xf32, #tpu.memory_space<vmem>>, %arg7: memref<36x4xbf16, #tpu.memory_space<vmem>>, %arg8: memref<2x16x16x4xf32, #tpu.memory_space<vmem>>) attributes {dimension_semantics = [#tpu.dimension_semantics<parallel>], iteration_bounds = array<i64: 1>, scalar_prefetch = 0 : i64, scratch_operands = 0 : i64, tpu.core_type = #tpu.core_type<tc>, window_params = [{transform_indices = @transform_0, window_bounds = array<i64: 2, 18, 18, 4>}, {pipeline_mode = #tpu.pipeline_mode<synchronous>, transform_indices = @transform_1, window_bounds = array<i64: 1, 4>}, {pipeline_mode = #tpu.pipeline_mode<synchronous>, transform_indices = @transform_2, window_bounds = array<i64: 1, 4>}, {pipeline_mode = #tpu.pipeline_mode<synchronous>, transform_indices = @transform_3, window_bounds = array<i64: 36, 4>}, {pipeline_mode = #tpu.pipeline_mode<synchronous>, transform_indices = @transform_4, window_bounds = array<i64: 1, 4>}, {pipeline_mode = #tpu.pipeline_mode<synchronous>, transform_indices = @transform_5, window_bounds = array<i64: 1, 4>}, {pipeline_mode = #tpu.pipeline_mode<synchronous>, transform_indices = @transform_6, window_bounds = array<i64: 36, 4>}, {transform_indices = @transform_7, window_bounds = array<i64: 2, 16, 16, 4>}]} {
    %c0 = arith.constant 0 : index
    %c0_0 = arith.constant 0 : index
    %c0_1 = arith.constant 0 : index
    %c0_2 = arith.constant 0 : index
    %0 = vector.load %arg1[%c0, %c0_0, %c0_1, %c0_2] : memref<2x18x18x4xf32, #tpu.memory_space<vmem>>, vector<2x16x16x4xf32>
    %1 = vector.shape_cast %0 : vector<2x16x16x4xf32> to vector<512x4xf32>
    %c0_3 = arith.constant 0 : index
    %c0_4 = arith.constant 0 : index
    %c1 = arith.constant 1 : index
    %c0_5 = arith.constant 0 : index
    %2 = vector.load %arg1[%c0_3, %c0_4, %c1, %c0_5] : memref<2x18x18x4xf32, #tpu.memory_space<vmem>>, vector<2x16x16x4xf32>
    %3 = vector.shape_cast %2 : vector<2x16x16x4xf32> to vector<512x4xf32>
    %c0_6 = arith.constant 0 : index
    %c0_7 = arith.constant 0 : index
    %c2 = arith.constant 2 : index
    %c0_8 = arith.constant 0 : index
    %4 = vector.load %arg1[%c0_6, %c0_7, %c2, %c0_8] : memref<2x18x18x4xf32, #tpu.memory_space<vmem>>, vector<2x16x16x4xf32>
    %5 = vector.shape_cast %4 : vector<2x16x16x4xf32> to vector<512x4xf32>
    %c0_9 = arith.constant 0 : index
    %c1_10 = arith.constant 1 : index
    %c0_11 = arith.constant 0 : index
    %c0_12 = arith.constant 0 : index
    %6 = vector.load %arg1[%c0_9, %c1_10, %c0_11, %c0_12] : memref<2x18x18x4xf32, #tpu.memory_space<vmem>>, vector<2x16x16x4xf32>
    %7 = vector.shape_cast %6 : vector<2x16x16x4xf32> to vector<512x4xf32>
    %c0_13 = arith.constant 0 : index
    %c1_14 = arith.constant 1 : index
    %c1_15 = arith.constant 1 : index
    %c0_16 = arith.constant 0 : index
    %8 = vector.load %arg1[%c0_13, %c1_14, %c1_15, %c0_16] : memref<2x18x18x4xf32, #tpu.memory_space<vmem>>, vector<2x16x16x4xf32>
    %9 = vector.shape_cast %8 : vector<2x16x16x4xf32> to vector<512x4xf32>
    %c0_17 = arith.constant 0 : index
    %c1_18 = arith.constant 1 : index
    %c2_19 = arith.constant 2 : index
    %c0_20 = arith.constant 0 : index
    %10 = vector.load %arg1[%c0_17, %c1_18, %c2_19, %c0_20] : memref<2x18x18x4xf32, #tpu.memory_space<vmem>>, vector<2x16x16x4xf32>
    %11 = vector.shape_cast %10 : vector<2x16x16x4xf32> to vector<512x4xf32>
    %c0_21 = arith.constant 0 : index
    %c2_22 = arith.constant 2 : index
    %c0_23 = arith.constant 0 : index
    %c0_24 = arith.constant 0 : index
    %12 = vector.load %arg1[%c0_21, %c2_22, %c0_23, %c0_24] : memref<2x18x18x4xf32, #tpu.memory_space<vmem>>, vector<2x16x16x4xf32>
    %13 = vector.shape_cast %12 : vector<2x16x16x4xf32> to vector<512x4xf32>
    %c0_25 = arith.constant 0 : index
    %c2_26 = arith.constant 2 : index
    %c1_27 = arith.constant 1 : index
    %c0_28 = arith.constant 0 : index
    %14 = vector.load %arg1[%c0_25, %c2_26, %c1_27, %c0_28] : memref<2x18x18x4xf32, #tpu.memory_space<vmem>>, vector<2x16x16x4xf32>
    %15 = vector.shape_cast %14 : vector<2x16x16x4xf32> to vector<512x4xf32>
    %c0_29 = arith.constant 0 : index
    %c2_30 = arith.constant 2 : index
    %c2_31 = arith.constant 2 : index
    %c0_32 = arith.constant 0 : index
    %16 = vector.load %arg1[%c0_29, %c2_30, %c2_31, %c0_32] : memref<2x18x18x4xf32, #tpu.memory_space<vmem>>, vector<2x16x16x4xf32>
    %17 = vector.shape_cast %16 : vector<2x16x16x4xf32> to vector<512x4xf32>
    %18 = tpu.concatenate %1, %3, %5, %7, %9, %11, %13, %15, %17 in 1 : vector<512x4xf32>, vector<512x4xf32>, vector<512x4xf32>, vector<512x4xf32>, vector<512x4xf32>, vector<512x4xf32>, vector<512x4xf32>, vector<512x4xf32>, vector<512x4xf32> -> vector<512x36xf32>
    %19 = arith.truncf %18 : vector<512x36xf32> to vector<512x36xbf16>
    %c0_33 = arith.constant 0 : index
    %c0_34 = arith.constant 0 : index
    %20 = vector.load %arg4[%c0_33, %c0_34] : memref<36x4xbf16, #tpu.memory_space<vmem>>, vector<36x4xbf16>
    %cst = arith.constant dense<0.000000e+00> : vector<512x4xf32>
    %21 = tpu.matmul %19, %20, %cst {dimension_numbers = #tpu.dot_dimension_numbers<[1], [0], [0], [1], [0, 0, 1, 1], [], []>} : vector<512x36xbf16>, vector<36x4xbf16>, vector<512x4xf32> -> vector<512x4xf32>
    %c0_35 = arith.constant 0 : index
    %c0_36 = arith.constant 0 : index
    %22 = vector.load %arg2[%c0_35, %c0_36] : memref<1x4xf32, #tpu.memory_space<vmem>>, vector<1x4xf32>
    %23 = vector.broadcast %22 : vector<1x4xf32> to vector<512x4xf32>
    %24 = arith.mulf %21, %23 : vector<512x4xf32>
    %c0_37 = arith.constant 0 : index
    %c0_38 = arith.constant 0 : index
    %25 = vector.load %arg3[%c0_37, %c0_38] : memref<1x4xf32, #tpu.memory_space<vmem>>, vector<1x4xf32>
    %26 = vector.broadcast %25 : vector<1x4xf32> to vector<512x4xf32>
    %27 = arith.addf %24, %26 : vector<512x4xf32>
    %cst_39 = arith.constant 0.000000e+00 : f32
    %28 = vector.broadcast %cst_39 : f32 to vector<512x4xf32>
    %29 = arith.maximumf %27, %28 : vector<512x4xf32>
    %30 = vector.shape_cast %29 : vector<512x4xf32> to vector<2x16x16x4xf32>
    %cst_40 = arith.constant 0.000000e+00 : f32
    %31 = vector.broadcast %cst_40 : f32 to vector<2x1x16x4xf32>
    %cst_41 = arith.constant 0.000000e+00 : f32
    %32 = vector.broadcast %cst_41 : f32 to vector<2x18x1x4xf32>
    %33 = tpu.concatenate %31, %30, %31 in 1 : vector<2x1x16x4xf32>, vector<2x16x16x4xf32>, vector<2x1x16x4xf32> -> vector<2x18x16x4xf32>
    %34 = tpu.concatenate %32, %33, %32 in 2 : vector<2x18x1x4xf32>, vector<2x18x16x4xf32>, vector<2x18x1x4xf32> -> vector<2x18x18x4xf32>
    %35 = vector.extract_strided_slice %34 {offsets = [0, 0, 0, 0], sizes = [2, 16, 16, 4], strides = [1, 1, 1, 1]} : vector<2x18x18x4xf32> to vector<2x16x16x4xf32>
    %36 = vector.shape_cast %35 : vector<2x16x16x4xf32> to vector<512x4xf32>
    %37 = vector.extract_strided_slice %34 {offsets = [0, 0, 1, 0], sizes = [2, 16, 16, 4], strides = [1, 1, 1, 1]} : vector<2x18x18x4xf32> to vector<2x16x16x4xf32>
    %38 = vector.shape_cast %37 : vector<2x16x16x4xf32> to vector<512x4xf32>
    %39 = vector.extract_strided_slice %34 {offsets = [0, 0, 2, 0], sizes = [2, 16, 16, 4], strides = [1, 1, 1, 1]} : vector<2x18x18x4xf32> to vector<2x16x16x4xf32>
    %40 = vector.shape_cast %39 : vector<2x16x16x4xf32> to vector<512x4xf32>
    %41 = vector.extract_strided_slice %34 {offsets = [0, 1, 0, 0], sizes = [2, 16, 16, 4], strides = [1, 1, 1, 1]} : vector<2x18x18x4xf32> to vector<2x16x16x4xf32>
    %42 = vector.shape_cast %41 : vector<2x16x16x4xf32> to vector<512x4xf32>
    %43 = vector.extract_strided_slice %34 {offsets = [0, 1, 1, 0], sizes = [2, 16, 16, 4], strides = [1, 1, 1, 1]} : vector<2x18x18x4xf32> to vector<2x16x16x4xf32>
    %44 = vector.shape_cast %43 : vector<2x16x16x4xf32> to vector<512x4xf32>
    %45 = vector.extract_strided_slice %34 {offsets = [0, 1, 2, 0], sizes = [2, 16, 16, 4], strides = [1, 1, 1, 1]} : vector<2x18x18x4xf32> to vector<2x16x16x4xf32>
    %46 = vector.shape_cast %45 : vector<2x16x16x4xf32> to vector<512x4xf32>
    %47 = vector.extract_strided_slice %34 {offsets = [0, 2, 0, 0], sizes = [2, 16, 16, 4], strides = [1, 1, 1, 1]} : vector<2x18x18x4xf32> to vector<2x16x16x4xf32>
    %48 = vector.shape_cast %47 : vector<2x16x16x4xf32> to vector<512x4xf32>
    %49 = vector.extract_strided_slice %34 {offsets = [0, 2, 1, 0], sizes = [2, 16, 16, 4], strides = [1, 1, 1, 1]} : vector<2x18x18x4xf32> to vector<2x16x16x4xf32>
    %50 = vector.shape_cast %49 : vector<2x16x16x4xf32> to vector<512x4xf32>
    %51 = vector.extract_strided_slice %34 {offsets = [0, 2, 2, 0], sizes = [2, 16, 16, 4], strides = [1, 1, 1, 1]} : vector<2x18x18x4xf32> to vector<2x16x16x4xf32>
    %52 = vector.shape_cast %51 : vector<2x16x16x4xf32> to vector<512x4xf32>
    %53 = tpu.concatenate %36, %38, %40, %42, %44, %46, %48, %50, %52 in 1 : vector<512x4xf32>, vector<512x4xf32>, vector<512x4xf32>, vector<512x4xf32>, vector<512x4xf32>, vector<512x4xf32>, vector<512x4xf32>, vector<512x4xf32>, vector<512x4xf32> -> vector<512x36xf32>
    %54 = arith.truncf %53 : vector<512x36xf32> to vector<512x36xbf16>
    %c0_42 = arith.constant 0 : index
    %c0_43 = arith.constant 0 : index
    %55 = vector.load %arg7[%c0_42, %c0_43] : memref<36x4xbf16, #tpu.memory_space<vmem>>, vector<36x4xbf16>
    %cst_44 = arith.constant dense<0.000000e+00> : vector<512x4xf32>
    %56 = tpu.matmul %54, %55, %cst_44 {dimension_numbers = #tpu.dot_dimension_numbers<[1], [0], [0], [1], [0, 0, 1, 1], [], []>} : vector<512x36xbf16>, vector<36x4xbf16>, vector<512x4xf32> -> vector<512x4xf32>
    %c0_45 = arith.constant 0 : index
    %c0_46 = arith.constant 0 : index
    %57 = vector.load %arg5[%c0_45, %c0_46] : memref<1x4xf32, #tpu.memory_space<vmem>>, vector<1x4xf32>
    %58 = vector.broadcast %57 : vector<1x4xf32> to vector<512x4xf32>
    %59 = arith.mulf %56, %58 : vector<512x4xf32>
    %c0_47 = arith.constant 0 : index
    %c0_48 = arith.constant 0 : index
    %60 = vector.load %arg6[%c0_47, %c0_48] : memref<1x4xf32, #tpu.memory_space<vmem>>, vector<1x4xf32>
    %61 = vector.broadcast %60 : vector<1x4xf32> to vector<512x4xf32>
    %62 = arith.addf %59, %61 : vector<512x4xf32>
    %cst_49 = arith.constant 0.000000e+00 : f32
    %63 = vector.broadcast %cst_49 : f32 to vector<512x4xf32>
    %64 = arith.maximumf %62, %63 : vector<512x4xf32>
    %65 = arith.addf %64, %9 : vector<512x4xf32>
    %66 = vector.shape_cast %65 : vector<512x4xf32> to vector<2x16x16x4xf32>
    %c0_50 = arith.constant 0 : index
    %c0_51 = arith.constant 0 : index
    %c0_52 = arith.constant 0 : index
    %c0_53 = arith.constant 0 : index
    %67 = vector.load %arg8[%c0_50, %c0_51, %c0_52, %c0_53] : memref<2x16x16x4xf32, #tpu.memory_space<vmem>>, vector<2x16x16x4xf32>
    tpu.vector_store %arg8[%c0_50, %c0_51, %c0_52, %c0_53], %66 {strides = array<i32>} : memref<2x16x16x4xf32, #tpu.memory_space<vmem>>, vector<2x16x16x4xf32>,
    return
  }
  func.func @transform_0(%arg0: i32) -> (i32, i32, i32, i32) {
    %c0_i32 = arith.constant 0 : i32
    %c0_i32_0 = arith.constant 0 : i32
    %c0_i32_1 = arith.constant 0 : i32
    %c0_i32_2 = arith.constant 0 : i32
    return %arg0, %c0_i32, %c0_i32_0, %c0_i32_1 : i32, i32, i32, i32
  }
  func.func @transform_1(%arg0: i32) -> (i32, i32) {
    %c0_i32 = arith.constant 0 : i32
    %c0_i32_0 = arith.constant 0 : i32
    %c0_i32_1 = arith.constant 0 : i32
    return %c0_i32, %c0_i32_0 : i32, i32
  }
  func.func @transform_2(%arg0: i32) -> (i32, i32) {
    %c0_i32 = arith.constant 0 : i32
    %c0_i32_0 = arith.constant 0 : i32
    %c0_i32_1 = arith.constant 0 : i32
    return %c0_i32, %c0_i32_0 : i32, i32
  }
  func.func @transform_3(%arg0: i32) -> (i32, i32) {
    %c0_i32 = arith.constant 0 : i32
    %c0_i32_0 = arith.constant 0 : i32
    %c0_i32_1 = arith.constant 0 : i32
    return %c0_i32, %c0_i32_0 : i32, i32
  }
  func.func @transform_4(%arg0: i32) -> (i32, i32) {
    %c0_i32 = arith.constant 0 : i32
    %c0_i32_0 = arith.constant 0 : i32
    %c0_i32_1 = arith.constant 0 : i32
    return %c0_i32, %c0_i32_0 : i32, i32
  }
  func.func @transform_5(%arg0: i32) -> (i32, i32) {
    %c0_i32 = arith.constant 0 : i32
    %c0_i32_0 = arith.constant 0 : i32
    %c0_i32_1 = arith.constant 0 : i32
    return %c0_i32, %c0_i32_0 : i32, i32
  }
  func.func @transform_6(%arg0: i32) -> (i32, i32) {
    %c0_i32 = arith.constant 0 : i32
    %c0_i32_0 = arith.constant 0 : i32
    %c0_i32_1 = arith.constant 0 : i32
    return %c0_i32, %c0_i32_0 : i32, i32
  }
  func.func @transform_7(%arg0: i32) -> (i32, i32, i32, i32) {
    %c0_i32 = arith.constant 0 : i32
    %c0_i32_0 = arith.constant 0 : i32
    %c0_i32_1 = arith.constant 0 : i32
    %c0_i32_2 = arith.constant 0 : i32
    return %arg0, %c0_i32, %c0_i32_0, %c0_i32_1 : i32, i32, i32, i32
  }
}

</mosaic_0001>

<bundles_post_ra>
// kernel: tpu_custom_call.1
= control target key start
LH: loop header
LB: loop body
LE: loop exit
PB: predicated region body
PF: predicated region fallthrough
CT: control target
= control target key end

     0   :  { %s10233_s13 = smov 4   ;;  %s10234_s24 = smov 8   ;;  %vm2653_vm0 = vcmask 31744   ;;  %vm2718_vm1 = vcmask 64512   ;;  %vm2783_vm2 = vcmask 97280   ;;  %vm2848_vm3 = vcmask 130048   ;;  %s19029_s0 = inlined_call_operand.vmem [shape: f32[2,18,18,4], index: 0, kind: input, shape index: {}]   ;;  %s19030_s3 = inlined_call_operand.vmem [shape: bf16[36,4], index: 3, kind: input, shape index: {}]   ;;  %s19031_s1 = inlined_call_operand.vmem [shape: f32[1,4], index: 1, kind: input, shape index: {}]   ;;  %s19032_s2 = inlined_call_operand.vmem [shape: f32[1,4], index: 2, kind: input, shape index: {}]   ;;  %s19033_s6 = inlined_call_operand.vmem [shape: bf16[36,4], index: 6, kind: input, shape index: {}]   ;;  %s19034_s4 = inlined_call_operand.vmem [shape: f32[1,4], index: 4, kind: input, shape index: {}]   ;;  %s19035_s5 = inlined_call_operand.vmem [shape: f32[1,4], index: 5, kind: input, shape index: {}]   ;;  %s19036_s7 = inlined_call_operand.vmem [shape: f32[2,16,16,4], index: 7, kind: output, shape index: {}]  }
   0x1   :  { %v99_v0 = vld [vmem:[%s19029_s0 + $0x61] sm:$0xff]  ;;  %v100_v1 = vld [vmem:[%s19029_s0 + $0x69] sm:$0xff]  ;;  %v95_v2 = vld [vmem:[%s19029_s0 + $0x31] sm:$0xff]  ;;  %s10235_s8 = smov 12   ;;  %s10236_s22 = smov 16   ;;  %vm3322_vm4 = vcmask 1041408  }
   0x2   :  { %v7588_v3 = vpack.i.bf16 %v100_v1, %v99_v0  ;;  %v96_v4 = vld [vmem:[%s19029_s0 + $0x39] sm:$0xff]  ;;  %v91_v5 = vld [vmem:[%s19029_s0 + $0x1] sm:$0xff]  ;;  %v92_v6 = vld [vmem:[%s19029_s0 + $0x9] sm:$0xff]  ;;  %s10237_s30 = smov 20   ;;  %s10238_s16 = smov 24   ;;  %vm2913_vm5 = vcmask 162816  }
   0x3   :  { %v7578_v7 = vpack.i.bf16 %v96_v4, %v95_v2  ;;  %v7568_v8 = vpack.i.bf16 %v92_v6, %v91_v5  ;;  %v101_v9 = vld [vmem:[%s19029_s0 + $0x79] sm:$0xff]  ;;  %v102_v10 = vld [vmem:[%s19029_s0 + $0x81] sm:$0xff]  ;;  %v97_v11 = vld [vmem:[%s19029_s0 + $0x49] sm:$0xff]  ;;  %s10239_s11 = smov 28   ;;  %s10240_s23 = smov 32   ;;  %vm2978_vm6 = vcmask 195584  }
   0x4   :  { %7589 = vrot.lane.b32.xlu2 %v7588_v3, %s10233_s13  ;;  %v98_v12 = vld [vmem:[%s19029_s0 + $0x51] sm:$0xff]  ;;  %v93_v13 = vld [vmem:[%s19029_s0 + $0x19] sm:$0xff]  ;;  %v94_v14 = vld [vmem:[%s19029_s0 + $0x21] sm:$0xff]  ;;  %v7593_v15 = vpack.i.bf16 %v102_v10, %v101_v9  ;;  %vm3108_vm7 = vcmask 261120   ;;  %vm3043_vm8 = vcmask 228352   ;;  %vm3225_vm9 = vcmask 293888  }
   0x5   :  { %7579 = vrot.lane.b32.xlu1 %v7578_v7, %s10233_s13  ;;  %7569 = vrot.lane.b32.xlu0 %v7568_v8, %s10233_s13  ;;  %v7583_v16 = vpack.i.bf16 %v98_v12, %v97_v11  ;;  %v7573_v17 = vpack.i.bf16 %v94_v14, %v93_v13  ;;  %v107_v18 = vld [vmem:[%s19029_s0 + $0xc1] sm:$0xff]  ;;  %v108_v19 = vld [vmem:[%s19029_s0 + $0xc9] sm:$0xff]  ;;  %vm3760_vm10 = vcmask 1040384   ;;  %vm4083_vm11 = vcmask 1046528  }
   0x6   :  { %v105_v20 = vld [vmem:[%s19029_s0 + $0xa9] sm:$0xff]  ;;  %v106_v21 = vld [vmem:[%s19029_s0 + $0xb1] sm:$0xff]  ;;  %v104_v23 = vld [vmem:[%s19029_s0 + $0x99] sm:$0xff]  ;;  %v7608_v24 = vpack.i.bf16 %v108_v19, %v107_v18  ;;  %vm4239_vm12 = vcmask 1045504  }
   0x7   :  { %v103_v22 = vld [vmem:[%s19029_s0 + $0x91] sm:$0xff]  ;;  %v7603_v25 = vpack.i.bf16 %v106_v21, %v105_v20  ;;  %v113_v27 = vld [vmem:[%s19029_s0 + $0x109] sm:$0xff]  ;;  %v112_v30 = vld [vmem:[%s19029_s0 + $0xf9] sm:$0xff] }
   0x8   :  { %v7598_v26 = vpack.i.bf16 %v104_v23, %v103_v22  ;;  %v114_v28 = vld [vmem:[%s19029_s0 + $0x111] sm:$0xff]  ;;  %v109_v31 = vld [vmem:[%s19029_s0 + $0xd9] sm:$0xff]  ;;  %v110_v32 = vld [vmem:[%s19029_s0 + $0xe1] sm:$0xff] }
   0x9   :  { %v111_v29 = vld [vmem:[%s19029_s0 + $0xf1] sm:$0xff]  ;;  %v7623_v33 = vpack.i.bf16 %v114_v28, %v113_v27  ;;  %v7613_v35 = vpack.i.bf16 %v110_v32, %v109_v31  ;;  %v120_v37 = vld [vmem:[%s19029_s0 + $0x159] sm:$0xff]  ;;  %v118_v39 = vld [vmem:[%s19029_s0 + $0x141] sm:$0xff] }
   0xa   :  { %v7618_v34 = vpack.i.bf16 %v112_v30, %v111_v29  ;;  %v119_v36 = vld [vmem:[%s19029_s0 + $0x151] sm:$0xff]  ;;  %v117_v38 = vld [vmem:[%s19029_s0 + $0x139] sm:$0xff]  ;;  %v115_v40 = vld [vmem:[%s19029_s0 + $0x121] sm:$0xff] }
   0xb   :  { %v116_v41 = vld [vmem:[%s19029_s0 + $0x129] sm:$0xff]  ;;  %v7638_v42 = vpack.i.bf16 %v120_v37, %v119_v36  ;;  %v7633_v43 = vpack.i.bf16 %v118_v39, %v117_v38  ;;  %v126_v46 = vld [vmem:[%s19029_s0 + $0x1d1] sm:$0xff]  ;;  %v124_v48 = vld [vmem:[%s19029_s0 + $0x1b9] sm:$0xff] }
   0xc   :  { %7594 = vrot.lane.b32.xlu2 %v7593_v15, %s10233_s13  ;;  %v7628_v44 = vpack.i.bf16 %v116_v41, %v115_v40  ;;  %v125_v45 = vld [vmem:[%s19029_s0 + $0x1c9] sm:$0xff]  ;;  %v123_v47 = vld [vmem:[%s19029_s0 + $0x1b1] sm:$0xff]  ;;  %v132_v55 = vld [vmem:[%s19029_s0 + $0x219] sm:$0xff] }
   0xd   :  { %7584 = vrot.lane.b32.xlu1 %v7583_v16, %s10233_s13  ;;  %7574 = vrot.lane.b32.xlu0 %v7573_v17, %s10233_s13  ;;  %v121_v49 = vld [vmem:[%s19029_s0 + $0x169] sm:$0xff]  ;;  %v122_v50 = vld [vmem:[%s19029_s0 + $0x171] sm:$0xff]  ;;  %v7653_v51 = vpack.i.bf16 %v126_v46, %v125_v45  ;;  %v7648_v52 = vpack.i.bf16 %v124_v48, %v123_v47 }
   0xe   :  { %v7643_v53 = vpack.i.bf16 %v122_v50, %v121_v49  ;;  %v131_v54 = vld [vmem:[%s19029_s0 + $0x211] sm:$0xff]  ;;  %v129_v56 = vld [vmem:[%s19029_s0 + $0x1f9] sm:$0xff]  ;;  %v130_v57 = vld [vmem:[%s19029_s0 + $0x201] sm:$0xff] }
   0xf   :  { %v127_v58 = vld [vmem:[%s19029_s0 + $0x1e1] sm:$0xff]  ;;  %v128_v59 = vld [vmem:[%s19029_s0 + $0x1e9] sm:$0xff]  ;;  %v7668_v60 = vpack.i.bf16 %v132_v55, %v131_v54  ;;  %v7663_v61 = vpack.i.bf16 %v130_v57, %v129_v56  ;;  %v137_v63 = vld [vmem:[%s19029_s0 + $0x259] sm:$0xff] }
  0x10   :  { %v7658_v62 = vpack.i.bf16 %v128_v59, %v127_v58  ;;  %v138_v0 = vld [vmem:[%s19029_s0 + $0x261] sm:$0xff]  ;;  %v136_v2 = vld [vmem:[%s19029_s0 + $0x249] sm:$0xff]  ;;  %v134_v4 = vld [vmem:[%s19029_s0 + $0x231] sm:$0xff] }
  0x11   :  { %v135_v1 = vld [vmem:[%s19029_s0 + $0x241] sm:$0xff]  ;;  %v133_v3 = vld [vmem:[%s19029_s0 + $0x229] sm:$0xff]  ;;  %v7683_v5 = vpack.i.bf16 %v138_v0, %v137_v63  ;;  %v142_v11 = vld [vmem:[%s19029_s0 + $0x291] sm:$0xff] }
  0x12   :  { %v7678_v6 = vpack.i.bf16 %v136_v2, %v135_v1  ;;  %v7673_v7 = vpack.i.bf16 %v134_v4, %v133_v3  ;;  %v143_v8 = vld [vmem:[%s19029_s0 + $0x2a1] sm:$0xff]  ;;  %v144_v9 = vld [vmem:[%s19029_s0 + $0x2a9] sm:$0xff]  ;;  %v139_v12 = vld [vmem:[%s19029_s0 + $0x271] sm:$0xff] }
  0x13   :  { %v141_v10 = vld [vmem:[%s19029_s0 + $0x289] sm:$0xff]  ;;  %v140_v13 = vld [vmem:[%s19029_s0 + $0x279] sm:$0xff]  ;;  %v7698_v14 = vpack.i.bf16 %v144_v9, %v143_v8  ;;  %v150_v18 = vld [vmem:[%s19029_s0 + $0x2f1] sm:$0xff] }
  0x14   :  { %7609 = vrot.lane.b32.xlu2 %v7608_v24, %s10233_s13  ;;  %v7693_v15 = vpack.i.bf16 %v142_v11, %v141_v10  ;;  %v7688_v16 = vpack.i.bf16 %v140_v13, %v139_v12  ;;  %v149_v17 = vld [vmem:[%s19029_s0 + $0x2e9] sm:$0xff]  ;;  %v147_v19 = vld [vmem:[%s19029_s0 + $0x2d1] sm:$0xff]  ;;  %v148_v20 = vld [vmem:[%s19029_s0 + $0x2d9] sm:$0xff] }
  0x15   :  { %7604 = vrot.lane.b32.xlu1 %v7603_v25, %s10233_s13  ;;  %7599 = vrot.lane.b32.xlu0 %v7598_v26, %s10233_s13  ;;  %v145_v21 = vld [vmem:[%s19029_s0 + $0x2b9] sm:$0xff]  ;;  %v146_v22 = vld [vmem:[%s19029_s0 + $0x2c1] sm:$0xff]  ;;  %v7713_v23 = vpack.i.bf16 %v150_v18, %v149_v17  ;;  %v7708_v24 = vpack.i.bf16 %v148_v20, %v147_v19 }
  0x16   :  { %v7703_v25 = vpack.i.bf16 %v146_v22, %v145_v21  ;;  %v155_v26 = vld [vmem:[%s19029_s0 + $0x2] sm:$0xff]  ;;  %v156_v27 = vld [vmem:[%s19029_s0 + $0xa] sm:$0xff]  ;;  %v153_v28 = vld [vmem:[%s19029_s0 + $0x319] sm:$0xff] }
  0x17   :  { %v154_v29 = vld [vmem:[%s19029_s0 + $0x321] sm:$0xff]  ;;  %v152_v31 = vld [vmem:[%s19029_s0 + $0x309] sm:$0xff]  ;;  %v7728_v32 = vpack.i.bf16 %v156_v27, %v155_v26  ;;  %v162_v36 = vld [vmem:[%s19029_s0 + $0x52] sm:$0xff] }
  0x18   :  { %v151_v30 = vld [vmem:[%s19029_s0 + $0x301] sm:$0xff]  ;;  %v159_v37 = vld [vmem:[%s19029_s0 + $0x32] sm:$0xff]  ;;  %v164_v50 = vld [vmem:[%s19029_s0 + $0x6a] sm:$0xff] }
  0x19   :  { %v160_v38 = vld [vmem:[%s19029_s0 + $0x3a] sm:$0xff]  ;;  %v158_v40 = vld [vmem:[%s19029_s0 + $0x22] sm:$0xff]  ;;  %v172_v58 = vld [vmem:[%s19029_s0 + $0xca] sm:$0xff] }
  0x1a   :  { %v157_v39 = vld [vmem:[%s19029_s0 + $0x1a] sm:$0xff]  ;;  %v166_v48 = vld [vmem:[%s19029_s0 + $0x82] sm:$0xff]  ;;  %v169_v59 = vld [vmem:[%s19029_s0 + $0xaa] sm:$0xff] }
  0x1b   :  { %v168_v45 = vld [vmem:[%s19029_s0 + $0x9a] sm:$0xff]  ;;  %v163_v49 = vld [vmem:[%s19029_s0 + $0x62] sm:$0xff]  ;;  %v180_v1 = vld [vmem:[%s19029_s0 + $0x12a] sm:$0xff] }
  0x1c   :  { %7624 = vrot.lane.b32.xlu2 %v7623_v33, %s10233_s13  ;;  %v7723_v33 = vpack.i.bf16 %v154_v29, %v153_v28  ;;  %v165_v46 = vld [vmem:[%s19029_s0 + $0x7a] sm:$0xff]  ;;  %v174_v55 = vld [vmem:[%s19029_s0 + $0xe2] sm:$0xff]  ;;  %v177_v2 = vld [vmem:[%s19029_s0 + $0x10a] sm:$0xff] }
  0x1d   :  { %7619 = vrot.lane.b32.xlu1 %v7618_v34, %s10233_s13  ;;  %7614 = vrot.lane.b32.xlu0 %v7613_v35, %s10233_s13  ;;  %v7718_v34 = vpack.i.bf16 %v152_v31, %v151_v30  ;;  %v161_v35 = vld [vmem:[%s19029_s0 + $0x4a] sm:$0xff]  ;;  %v173_v54 = vld [vmem:[%s19029_s0 + $0xda] sm:$0xff] }
  0x1e   :  { %v7743_v41 = vpack.i.bf16 %v162_v36, %v161_v35  ;;  %v171_v56 = vld [vmem:[%s19029_s0 + $0xc2] sm:$0xff]  ;;  %v178_v4 = vld [vmem:[%s19029_s0 + $0x112] sm:$0xff]  ;;  %v185_v10 = vld [vmem:[%s19029_s0 + $0x16a] sm:$0xff] }
  0x1f   :  { %v179_v0 = vld [vmem:[%s19029_s0 + $0x122] sm:$0xff]  ;;  %v7783_v8 = vpack.i.bf16 %v178_v4, %v177_v2  ;;  %v186_v11 = vld [vmem:[%s19029_s0 + $0x172] sm:$0xff]  ;;  %v188_v28 = vld [vmem:[%s19029_s0 + $0x1ba] sm:$0xff] }
  0x20   :  { %v183_v12 = vld [vmem:[%s19029_s0 + $0x152] sm:$0xff]  ;;  %v7803_v19 = vpack.i.bf16 %v186_v11, %v185_v10  ;;  %v191_v22 = vld [vmem:[%s19029_s0 + $0x1e2] sm:$0xff]  ;;  %v216_v10 = vld [vmem:[%s19029_s0 + $0x30a] sm:$0xff] }
  0x21   :  { %v190_v26 = vld [vmem:[%s19029_s0 + $0x1d2] sm:$0xff]  ;;  %v213_v11 = vld [vmem:[%s19029_s0 + $0x2ea] sm:$0xff] }
  0x22   :  { %v187_v27 = vld [vmem:[%s19029_s0 + $0x1b2] sm:$0xff] }
  0x23   :  { %v198_v35 = vld [vmem:[%s19029_s0 + $0x232] sm:$0xff] }
  0x24   :  { %7639 = vrot.lane.b32.xlu2 %v7638_v42, %s10233_s13  ;;  %v7738_v42 = vpack.i.bf16 %v160_v38, %v159_v37  ;;  %v195_v36 = vld [vmem:[%s19029_s0 + $0x212] sm:$0xff]  ;;  %v196_v38 = vld [vmem:[%s19029_s0 + $0x21a] sm:$0xff] }
  0x25   :  { %7634 = vrot.lane.b32.xlu1 %v7633_v43, %s10233_s13  ;;  %7629 = vrot.lane.b32.xlu0 %v7628_v44, %s10233_s13  ;;  %v7733_v43 = vpack.i.bf16 %v158_v40, %v157_v39  ;;  %v167_v44 = vld [vmem:[%s19029_s0 + $0x92] sm:$0xff]  ;;  %v193_v39 = vld [vmem:[%s19029_s0 + $0x1fa] sm:$0xff] }
  0x26   :  { %v194_v40 = vld [vmem:[%s19029_s0 + $0x202] sm:$0xff]  ;;  %v206_v2 = vld [vmem:[%s19029_s0 + $0x292] sm:$0xff] }
  0x2c   :  { %7654 = vrot.lane.b32.xlu2 %v7653_v51, %s10233_s13  ;;  %v7758_v51 = vpack.i.bf16 %v168_v45, %v167_v44  ;;  %v7828_v44 = vpack.i.bf16 %v196_v38, %v195_v36  ;;  %v7823_v45 = vpack.i.bf16 %v194_v40, %v193_v39 }
  0x2d   :  { %7649 = vrot.lane.b32.xlu1 %v7648_v52, %s10233_s13  ;;  %7644 = vrot.lane.b32.xlu0 %v7643_v53, %s10233_s13  ;;  %v7753_v52 = vpack.i.bf16 %v166_v48, %v165_v46  ;;  %v7748_v53 = vpack.i.bf16 %v164_v50, %v163_v49  ;;  %v203_v46 = vld [vmem:[%s19029_s0 + $0x272] sm:$0xff]  ;;  %v204_v48 = vld [vmem:[%s19029_s0 + $0x27a] sm:$0xff] }
  0x2e   :  { %v201_v49 = vld [vmem:[%s19029_s0 + $0x25a] sm:$0xff] }
  0x34   :  { %7669 = vrot.lane.b32.xlu2 %v7668_v60, %s10233_s13  ;;  %v170_v60 = vld [vmem:[%s19029_s0 + $0xb2] sm:$0xff] }
  0x35   :  { %7664 = vrot.lane.b32.xlu1 %v7663_v61, %s10233_s13  ;;  %7659 = vrot.lane.b32.xlu0 %v7658_v62, %s10233_s13  ;;  %v7773_v61 = vpack.i.bf16 %v174_v55, %v173_v54  ;;  %v7768_v62 = vpack.i.bf16 %v172_v58, %v171_v56  ;;  %v7763_v63 = vpack.i.bf16 %v170_v60, %v169_v59  ;;  %v209_v60 = vld [vmem:[%s19029_s0 + $0x2ba] sm:$0xff] }
  0x36   :  { %v7848_v56 = vpack.i.bf16 %v204_v48, %v203_v46 }
  0x3c   :  { %7684 = vrot.lane.b32.xlu2 %v7683_v5, %s10233_s13  ;;  %v175_v5 = vld [vmem:[%s19029_s0 + $0xf2] sm:$0xff] }
  0x3d   :  { %7679 = vrot.lane.b32.xlu1 %v7678_v6, %s10233_s13  ;;  %7674 = vrot.lane.b32.xlu0 %v7673_v7, %s10233_s13  ;;  %v176_v6 = vld [vmem:[%s19029_s0 + $0xfa] sm:$0xff]  ;;  %v7788_v7 = vpack.i.bf16 %v180_v1, %v179_v0  ;;  %v208_v0 = vld [vmem:[%s19029_s0 + $0x2aa] sm:$0xff] }
  0x3e   :  { %v7778_v9 = vpack.i.bf16 %v176_v6, %v175_v5  ;;  %v205_v1 = vld [vmem:[%s19029_s0 + $0x28a] sm:$0xff] }
  0x44   :  { %7699 = vrot.lane.b32.xlu2 %v7698_v14, %s10233_s13  ;;  %v184_v14 = vld [vmem:[%s19029_s0 + $0x15a] sm:$0xff] }
  0x45   :  { %7694 = vrot.lane.b32.xlu1 %v7693_v15, %s10233_s13  ;;  %7689 = vrot.lane.b32.xlu0 %v7688_v16, %s10233_s13  ;;  %v181_v15 = vld [vmem:[%s19029_s0 + $0x13a] sm:$0xff]  ;;  %v182_v16 = vld [vmem:[%s19029_s0 + $0x142] sm:$0xff]  ;;  %v7798_v20 = vpack.i.bf16 %v184_v14, %v183_v12 }
  0x46   :  { %v7793_v21 = vpack.i.bf16 %v182_v16, %v181_v15  ;;  %v214_v14 = vld [vmem:[%s19029_s0 + $0x2f2] sm:$0xff]  ;;  %v212_v16 = vld [vmem:[%s19029_s0 + $0x2da] sm:$0xff] }
  0x47   :  { %v211_v15 = vld [vmem:[%s19029_s0 + $0x2d2] sm:$0xff] }
  0x4c   :  { %7714 = vrot.lane.b32.xlu2 %v7713_v23, %s10233_s13  ;;  %v192_v23 = vld [vmem:[%s19029_s0 + $0x1ea] sm:$0xff] }
  0x4d   :  { %7709 = vrot.lane.b32.xlu1 %v7708_v24, %s10233_s13  ;;  %7704 = vrot.lane.b32.xlu0 %v7703_v25, %s10233_s13  ;;  %v189_v24 = vld [vmem:[%s19029_s0 + $0x1ca] sm:$0xff]  ;;  %v7818_v31 = vpack.i.bf16 %v192_v23, %v191_v22  ;;  %v7873_v22 = vpack.i.bf16 %v214_v14, %v213_v11  ;;  %v7868_v23 = vpack.i.bf16 %v212_v16, %v211_v15 }
  0x4e   :  { %v49_v14 = vld [vmem:[%s19029_s0 + $0x108] sm:$0xff]  ;;  %v50_v15 = vld [vmem:[%s19029_s0 + $0x110] sm:$0xff] }
  0x4f   :  { %v47_v16 = vld [vmem:[%s19029_s0 + $0xf0] sm:$0xff] }
  0x54   :  { %7729 = vrot.lane.b32.xlu2 %v7728_v32, %s10234_s24  ;;  %v7813_v32 = vpack.i.bf16 %v190_v26, %v189_v24  ;;  %v217_v26 = vld [vmem:[%s19029_s0 + $0x31a] sm:$0xff] }
  0x55   :  { %7724 = vrot.lane.b32.xlu1 %v7723_v33, %s10233_s13  ;;  %7719 = vrot.lane.b32.xlu0 %v7718_v34, %s10233_s13  ;;  %v7808_v33 = vpack.i.bf16 %v188_v28, %v187_v27  ;;  %v197_v34 = vld [vmem:[%s19029_s0 + $0x22a] sm:$0xff]  ;;  %v218_v27 = vld [vmem:[%s19029_s0 + $0x322] sm:$0xff] }
  0x56   :  { %v31_v28 = vld [vmem:[%s19029_s0 + $0x30] sm:$0xff]  ;;  %v7883_v39 = vpack.i.bf16 %v218_v27, %v217_v26  ;;  %v45_v26 = vld [vmem:[%s19029_s0 + $0xd8] sm:$0xff]  ;;  %v46_v27 = vld [vmem:[%s19029_s0 + $0xe0] sm:$0xff] }
  0x5c   :  { %7744 = vrot.lane.b32.xlu2 %v7743_v41, %s10234_s24 }
  0x5d   :  { %7739 = vrot.lane.b32.xlu1 %v7738_v42, %s10234_s24  ;;  %7734 = vrot.lane.b32.xlu0 %v7733_v43, %s10234_s24  ;;  %v7833_v43 = vpack.i.bf16 %v198_v35, %v197_v34  ;;  %v29_v34 = vld [vmem:[%s19029_s0 + $0x18] sm:$0xff]  ;;  %v30_v35 = vld [vmem:[%s19029_s0 + $0x20] sm:$0xff] }
  0x5e   :  { %v10543_v47 = vpop.permute.xlu2 %7589  ;;  %v7888_v38 = vpack.i.bf16 %v30_v35, %v29_v34  ;;  %v7928_v34 = vpack.i.bf16 %v46_v27, %v45_v26  ;;  %v68_v26 = vld [vmem:[%s19029_s0 + $0x218] sm:$0xff] }
  0x5f   :  { %v65_v27 = vld [vmem:[%s19029_s0 + $0x1f8] sm:$0xff] }
  0x64   :  { %7759 = vrot.lane.b32.xlu2 %v7758_v51, %s10234_s24  ;;  %v202_v51 = vld [vmem:[%s19029_s0 + $0x262] sm:$0xff] }
  0x65   :  { %7754 = vrot.lane.b32.xlu1 %v7753_v52, %s10234_s24  ;;  %7749 = vrot.lane.b32.xlu0 %v7748_v53, %s10234_s24  ;;  %v199_v52 = vld [vmem:[%s19029_s0 + $0x242] sm:$0xff]  ;;  %v200_v53 = vld [vmem:[%s19029_s0 + $0x24a] sm:$0xff]  ;;  %v7843_v58 = vpack.i.bf16 %v202_v51, %v201_v49 }
  0x66   :  { %v10566_v57 = vpop.permute.xlu2 %7594  ;;  %v7838_v59 = vpack.i.bf16 %v200_v53, %v199_v52  ;;  %v36_v49 = vld [vmem:[%s19029_s0 + $0x68] sm:$0xff]  ;;  %v34_v52 = vld [vmem:[%s19029_s0 + $0x50] sm:$0xff] }
  0x67   :  { %v33_v51 = vld [vmem:[%s19029_s0 + $0x48] sm:$0xff] }
  0x6c   :  { %7774 = vrot.lane.b32.xlu2 %v7773_v61, %s10234_s24  ;;  %v210_v61 = vld [vmem:[%s19029_s0 + $0x2c2] sm:$0xff] }
  0x6d   :  { %7769 = vrot.lane.b32.xlu1 %v7768_v62, %s10234_s24  ;;  %7764 = vrot.lane.b32.xlu0 %v7763_v63, %s10234_s24  ;;  %v207_v62 = vld [vmem:[%s19029_s0 + $0x2a2] sm:$0xff]  ;;  %v7863_v6 = vpack.i.bf16 %v210_v61, %v209_v60 }
  0x6e   :  { %v10589_v3 = vpop.permute.xlu2 %7609  ;;  %v43_v60 = vld [vmem:[%s19029_s0 + $0xc0] sm:$0xff]  ;;  %v44_v61 = vld [vmem:[%s19029_s0 + $0xc8] sm:$0xff] }
  0x74   :  { %7789 = vrot.lane.b32.xlu2 %v7788_v7, %s10234_s24  ;;  %v7858_v7 = vpack.i.bf16 %v208_v0, %v207_v62  ;;  %v41_v62 = vld [vmem:[%s19029_s0 + $0xa8] sm:$0xff] }
  0x75   :  { %7784 = vrot.lane.b32.xlu1 %v7783_v8, %s10234_s24  ;;  %7779 = vrot.lane.b32.xlu0 %v7778_v9, %s10234_s24  ;;  %v7853_v8 = vpack.i.bf16 %v206_v2, %v205_v1  ;;  %v215_v9 = vld [vmem:[%s19029_s0 + $0x302] sm:$0xff]  ;;  %v42_v2 = vld [vmem:[%s19029_s0 + $0xb0] sm:$0xff] }
  0x76   :  { %v10612_v13 = vpop.permute.xlu2 %7624 }
  0x77   :  { %v10623_v17 = vpop.permute.xlu1 %7579  ;;  %v10625_v18 = vpop.permute.xlu0 %7569 }
  0x7c   :  { %7804 = vrot.lane.b32.xlu2 %v7803_v19, %s10234_s24 }
  0x7d   :  { %7799 = vrot.lane.b32.xlu1 %v7798_v20, %s10234_s24  ;;  %7794 = vrot.lane.b32.xlu0 %v7793_v21, %s10234_s24  ;;  %v7878_v21 = vpack.i.bf16 %v216_v10, %v215_v9  ;;  %v7918_v9 = vpack.i.bf16 %v42_v2, %v41_v62  ;;  %v61_v62 = vld [vmem:[%s19029_s0 + $0x1c8] sm:$0xff]  ;;  %v62_v2 = vld [vmem:[%s19029_s0 + $0x1d0] sm:$0xff] }
  0x7e   :  { %v10639_v25 = vpop.permute.xlu2 %7639 }
  0x7f   :  { %v10650_v29 = vpop.permute.xlu1 %7584  ;;  %v10652_v30 = vpop.permute.xlu0 %7574 }
  0x84   :  { %7819 = vrot.lane.b32.xlu2 %v7818_v31, %s10234_s24  ;;  %v32_v31 = vld [vmem:[%s19029_s0 + $0x38] sm:$0xff] }
  0x85   :  { %7814 = vrot.lane.b32.xlu1 %v7813_v32, %s10234_s24  ;;  %7809 = vrot.lane.b32.xlu0 %v7808_v33, %s10234_s24  ;;  %v7893_v36 = vpack.i.bf16 %v32_v31, %v31_v28  ;;  %v7938_v28 = vpack.i.bf16 %v50_v15, %v49_v14 }
  0x86   :  { %v10666_v37 = vpop.permute.xlu2 %7654 }
  0x87   :  { %v10677_v41 = vpop.permute.xlu1 %7604  ;;  %v10679_v42 = vpop.permute.xlu0 %7599 }
  0x8c   :  { %7834 = vrot.lane.b32.xlu2 %v7833_v43, %s10234_s24  ;;  %v35_v43 = vld [vmem:[%s19029_s0 + $0x60] sm:$0xff] }
  0x8d   :  { %7829 = vrot.lane.b32.xlu1 %v7828_v44, %s10234_s24  ;;  %7824 = vrot.lane.b32.xlu0 %v7823_v45, %s10234_s24  ;;  %v37_v44 = vld [vmem:[%s19029_s0 + $0x78] sm:$0xff]  ;;  %v38_v45 = vld [vmem:[%s19029_s0 + $0x80] sm:$0xff] }
  0x8e   :  { %v10693_v50 = vpop.permute.xlu2 %7669  ;;  %v7908_v53 = vpack.i.bf16 %v38_v45, %v37_v44  ;;  %v54_v45 = vld [vmem:[%s19029_s0 + $0x140] sm:$0xff] }
  0x8f   :  { %v10704_v54 = vpop.permute.xlu1 %7619  ;;  %v10706_v55 = vpop.permute.xlu0 %7614 }
  0x94   :  { %7849 = vrot.lane.b32.xlu2 %v7848_v56, %s10234_s24  ;;  %v7903_v56 = vpack.i.bf16 %v36_v49, %v35_v43  ;;  %v51_v49 = vld [vmem:[%s19029_s0 + $0x120] sm:$0xff] }
  0x95   :  { %7844 = vrot.lane.b32.xlu1 %v7843_v58, %s10234_s24  ;;  %7839 = vrot.lane.b32.xlu0 %v7838_v59, %s10234_s24  ;;  %v7898_v58 = vpack.i.bf16 %v34_v52, %v33_v51  ;;  %v52_v51 = vld [vmem:[%s19029_s0 + $0x128] sm:$0xff] }
  0x96   :  { %v10720_v63 = vpop.permute.xlu2 %7684 }
  0x97   :  { %v10731_v4 = vpop.permute.xlu1 %7634  ;;  %v10733_v5 = vpop.permute.xlu0 %7629 }
  0x9c   :  { %7864 = vrot.lane.b32.xlu2 %v7863_v6, %s10234_s24  ;;  %v39_v6 = vld [vmem:[%s19029_s0 + $0x90] sm:$0xff] }
  0x9d   :  { %7859 = vrot.lane.b32.xlu1 %v7858_v7, %s10234_s24  ;;  %7854 = vrot.lane.b32.xlu0 %v7853_v8, %s10234_s24  ;;  %v40_v7 = vld [vmem:[%s19029_s0 + $0x98] sm:$0xff]  ;;  %v7923_v8 = vpack.i.bf16 %v44_v61, %v43_v60  ;;  %v7115_v60 = vld [vmem:[%s19029_s0 + $0x180] sm:$0xff] }
  0x9e   :  { %v10747_v12 = vpop.permute.xlu2 %7699  ;;  %v7913_v10 = vpack.i.bf16 %v40_v7, %v39_v6  ;;  %v7116_v61 = vld [vmem:[%s19029_s0 + $0x188] sm:$0xff] }
  0x9f   :  { %v10758_v19 = vpop.permute.xlu1 %7649  ;;  %v10760_v20 = vpop.permute.xlu0 %7644  ;;  %v7963_v14 = vpack.i.bf16 %v7116_v61, %v7115_v60 }
  0xa4   :  { %7879 = vrot.lane.b32.xlu2 %v7878_v21, %s10234_s24 }
  0xa5   :  { %7874 = vrot.lane.b32.xlu1 %v7873_v22, %s10234_s24  ;;  %7869 = vrot.lane.b32.xlu0 %v7868_v23, %s10234_s24  ;;  %v48_v23 = vld [vmem:[%s19029_s0 + $0xf8] sm:$0xff] }
  0xa6   :  { %v10765_v24 = vpop.permute.xlu2 %7714  ;;  %v7933_v31 = vpack.i.bf16 %v48_v23, %v47_v16  ;;  %v67_v23 = vld [vmem:[%s19029_s0 + $0x210] sm:$0xff] }
  0xa7   :  { %v10779_v32 = vpop.permute.xlu1 %7664  ;;  %v10781_v33 = vpop.permute.xlu0 %7659 }
  0xac   :  { %7894 = vrot.lane.b32.xlu2 %v7893_v36, %s10235_s8  ;;  %v55_v36 = vld [vmem:[%s19029_s0 + $0x150] sm:$0xff] }
  0xad   :  { %7889 = vrot.lane.b32.xlu1 %v7888_v38, %s10235_s8  ;;  %7884 = vrot.lane.b32.xlu0 %v7883_v39, %s10234_s24  ;;  %v56_v38 = vld [vmem:[%s19029_s0 + $0x158] sm:$0xff] }
  0xae   :  { %v10792_v40 = vpop.permute.xlu2 %7729  ;;  %v53_v39 = vld [vmem:[%s19029_s0 + $0x138] sm:$0xff]  ;;  %v7953_v52 = vpack.i.bf16 %v56_v38, %v55_v36  ;;  %v63_v36 = vld [vmem:[%s19029_s0 + $0x1e0] sm:$0xff]  ;;  %v64_v38 = vld [vmem:[%s19029_s0 + $0x1e8] sm:$0xff] }
  0xaf   :  { %v10803_v46 = vpop.permute.xlu1 %7679  ;;  %v10805_v48 = vpop.permute.xlu0 %7674 }
  0xb4   :  { %7909 = vrot.lane.b32.xlu2 %v7908_v53, %s10235_s8  ;;  %v7948_v53 = vpack.i.bf16 %v54_v45, %v53_v39  ;;  %v7983_v39 = vpack.i.bf16 %v68_v26, %v67_v23  ;;  %v79_v23 = vld [vmem:[%s19029_s0 + $0x2a0] sm:$0xff]  ;;  %v80_v26 = vld [vmem:[%s19029_s0 + $0x2a8] sm:$0xff] }
  0xb5   :  { %7904 = vrot.lane.b32.xlu1 %v7903_v56, %s10235_s8  ;;  %7899 = vrot.lane.b32.xlu0 %v7898_v58, %s10235_s8  ;;  %v7943_v56 = vpack.i.bf16 %v52_v51, %v51_v49  ;;  %v7973_v49 = vpack.i.bf16 %v64_v38, %v63_v36  ;;  %v78_v38 = vld [vmem:[%s19029_s0 + $0x290] sm:$0xff] }
  0xb6   :  { %v10819_v59 = vpop.permute.xlu2 %7744 }
  0xb7   :  { %v10830_v0 = vpop.permute.xlu1 %7694  ;;  %v10832_v1 = vpop.permute.xlu0 %7689 }
  0xbc   :  { %7924 = vrot.lane.b32.xlu2 %v7923_v8, %s10235_s8  ;;  %v57_v8 = vld [vmem:[%s19029_s0 + $0x168] sm:$0xff] }
  0xbd   :  { %7919 = vrot.lane.b32.xlu1 %v7918_v9, %s10235_s8  ;;  %7914 = vrot.lane.b32.xlu0 %v7913_v10, %s10235_s8  ;;  %v58_v9 = vld [vmem:[%s19029_s0 + $0x170] sm:$0xff]  ;;  %v7968_v10 = vpack.i.bf16 %v62_v2, %v61_v62  ;;  %v72_v62 = vld [vmem:[%s19029_s0 + $0x248] sm:$0xff] }
  0xbe   :  { %v10846_v11 = vpop.permute.xlu2 %7759  ;;  %v7958_v15 = vpack.i.bf16 %v58_v9, %v57_v8  ;;  %v69_v2 = vld [vmem:[%s19029_s0 + $0x228] sm:$0xff]  ;;  %v70_v8 = vld [vmem:[%s19029_s0 + $0x230] sm:$0xff] }
  0xbf   :  { %v10857_v21 = vpop.permute.xlu1 %7709  ;;  %v10859_v22 = vpop.permute.xlu0 %7704 }
  0xc4   :  { %7939 = vrot.lane.b32.xlu2 %v7938_v28, %s10235_s8 }
  0xc5   :  { %7934 = vrot.lane.b32.xlu1 %v7933_v31, %s10235_s8  ;;  %7929 = vrot.lane.b32.xlu0 %v7928_v34, %s10235_s8  ;;  %v66_v34 = vld [vmem:[%s19029_s0 + $0x200] sm:$0xff] }
  0xc6   :  { %v10873_v35 = vpop.permute.xlu2 %7774  ;;  %v7978_v45 = vpack.i.bf16 %v66_v34, %v65_v27  ;;  %v77_v27 = vld [vmem:[%s19029_s0 + $0x288] sm:$0xff] }
  0xc7   :  { %v10884_v43 = vpop.permute.xlu1 %7724  ;;  %v10886_v44 = vpop.permute.xlu0 %7719 }
  0xcc   :  { %7954 = vrot.lane.b32.xlu2 %v7953_v52, %s10235_s8  ;;  %v73_v52 = vld [vmem:[%s19029_s0 + $0x258] sm:$0xff] }
  0xcd   :  { %7949 = vrot.lane.b32.xlu1 %v7948_v53, %s10235_s8  ;;  %7944 = vrot.lane.b32.xlu0 %v7943_v56, %s10235_s8  ;;  %v74_v53 = vld [vmem:[%s19029_s0 + $0x260] sm:$0xff] }
  0xce   :  { %v10900_v58 = vpop.permute.xlu2 %7789  ;;  %v71_v56 = vld [vmem:[%s19029_s0 + $0x240] sm:$0xff]  ;;  %v7998_v9 = vpack.i.bf16 %v74_v53, %v73_v52  ;;  %v8008_v52 = vpack.i.bf16 %v78_v38, %v77_v27 }
  0xcf   :  { %v10914_v6 = vpop.permute.xlu1 %7739  ;;  %v10916_v7 = vpop.permute.xlu0 %7734 }
  0xd4   :  { %7969 = vrot.lane.b32.xlu2 %v7968_v10, %s10235_s8  ;;  %v7993_v10 = vpack.i.bf16 %v72_v62, %v71_v56  ;;  %v85_v62 = vld [vmem:[%s19029_s0 + $0x2e8] sm:$0xff] }
  0xd5   :  { %7964 = vrot.lane.b32.xlu1 %v7963_v14, %s10235_s8  ;;  %7959 = vrot.lane.b32.xlu0 %v7958_v15, %s10235_s8  ;;  %v7988_v14 = vpack.i.bf16 %v70_v8, %v69_v2  ;;  %v86_v2 = vld [vmem:[%s19029_s0 + $0x2f0] sm:$0xff] }
  0xd6   :  { %v10927_v16 = vpop.permute.xlu2 %7804  ;;  %v83_v8 = vld [vmem:[%s19029_s0 + $0x2d0] sm:$0xff]  ;;  %v8028_v27 = vpack.i.bf16 %v86_v2, %v85_v62 }
  0xd7   :  { %v10938_v28 = vpop.permute.xlu1 %7754  ;;  %v10940_v31 = vpop.permute.xlu0 %7749 }
  0xdc   :  { %7984 = vrot.lane.b32.xlu2 %v7983_v39, %s10235_s8  ;;  %v75_v39 = vld [vmem:[%s19029_s0 + $0x270] sm:$0xff] }
  0xdd   :  { %7979 = vrot.lane.b32.xlu1 %v7978_v45, %s10235_s8  ;;  %7974 = vrot.lane.b32.xlu0 %v7973_v49, %s10235_s8  ;;  %v76_v45 = vld [vmem:[%s19029_s0 + $0x278] sm:$0xff]  ;;  %v8013_v49 = vpack.i.bf16 %v80_v26, %v79_v23  ;;  %v82_v26 = vld [vmem:[%s19029_s0 + $0x2c0] sm:$0xff] }
  0xde   :  { %v10954_v51 = vpop.permute.xlu2 %7819  ;;  %v8003_v53 = vpack.i.bf16 %v76_v45, %v75_v39  ;;  %v81_v23 = vld [vmem:[%s19029_s0 + $0x2b8] sm:$0xff]  ;;  %v7147_v45 = vld [vmem:[%s19029_s0 + $0x330] sm:$0xff] }
  0xdf   :  { %19575 = vst [vmem:[#allocation2_spill] sm:$0xff] %v10954_v51  ;;  %v10965_v60 = vpop.permute.xlu1 %7769  ;;  %v10967_v61 = vpop.permute.xlu0 %7764  ;;  %v8018_v39 = vpack.i.bf16 %v82_v26, %v81_v23  ;;  %v88_v23 = vld [vmem:[%s19029_s0 + $0x308] sm:$0xff] }
  0xe0   :  { %19576 = vst [vmem:[#allocation3_spill] sm:$0xff] %v10965_v60  ;;  %v7602_v60 = vunpack.i.h.bf16 %v10679_v42 }
  0xe1   :  { %19577 = vst [vmem:[#allocation4_spill] sm:$0xff] %v10967_v61 }
  0xe4   :  { %7999 = vrot.lane.b32.xlu2 %v7998_v9, %s10235_s8 }
  0xe5   :  { %7994 = vrot.lane.b32.xlu1 %v7993_v10, %s10235_s8  ;;  %7989 = vrot.lane.b32.xlu0 %v7988_v14, %s10235_s8  ;;  %v84_v14 = vld [vmem:[%s19029_s0 + $0x2d8] sm:$0xff] }
  0xe6   :  { %v10981_v15 = vpop.permute.xlu2 %7834  ;;  %v8023_v38 = vpack.i.bf16 %v84_v14, %v83_v8  ;;  %v90_v8 = vld [vmem:[%s19029_s0 + $0x320] sm:$0xff] }
  0xe7   :  { %19578 = vst [vmem:[#allocation5_spill] sm:$0xff] %v10981_v15  ;;  %v10992_v34 = vpop.permute.xlu1 %7784  ;;  %v10994_v36 = vpop.permute.xlu0 %7779  ;;  %v87_v14 = vld [vmem:[%s19029_s0 + $0x300] sm:$0xff]  ;;  %v7571_v15 = vunpack.i.l.bf16 %v10625_v18 }
  0xe8   :  { %19579 = vst [vmem:[#allocation6_spill] sm:$0xff] %v10992_v34  ;;  %v7581_v34 = vunpack.i.l.bf16 %v10623_v17 }
  0xe9   :  { %19580 = vst [vmem:[#allocation7_spill] sm:$0xff] %v10994_v36 }
  0xec   :  { %8014 = vrot.lane.b32.xlu2 %v8013_v49, %s10235_s8  ;;  %v7148_v49 = vld [vmem:[%s19029_s0 + $0x338] sm:$0xff] }
  0xed   :  { %8009 = vrot.lane.b32.xlu1 %v8008_v52, %s10235_s8  ;;  %8004 = vrot.lane.b32.xlu0 %v8003_v53, %s10235_s8  ;;  %v89_v53 = vld [vmem:[%s19029_s0 + $0x318] sm:$0xff]  ;;  %v8043_v26 = vpack.i.bf16 %v7148_v49, %v7147_v45 }
  0xee   :  { %v11008_v56 = vpop.permute.xlu2 %7849  ;;  %v7151_v45 = vld [vmem:[%s19029_s0 + $0x31] sm:$0xff] }
  0xef   :  { %19581 = vst [vmem:[#allocation8_spill] sm:$0xff] %v11008_v56  ;;  %v11019_v9 = vpop.permute.xlu1 %7799  ;;  %v11021_v10 = vpop.permute.xlu0 %7794  ;;  %v7582_v56 = vunpack.i.h.bf16 %v10623_v17  ;;  %v10108_v17 = vld [vmem:[%s19029_s0 + $0x68] sm:$0xff] }
  0xf0   :  { %19582 = vst [vmem:[#allocation9_spill] sm:$0xff] %v11019_v9  ;;  %v7626_v9 = vunpack.i.l.bf16 %v10612_v13 }
  0xf1   :  { %19583 = vst [vmem:[#allocation10_spill] sm:$0xff] %v11021_v10  ;;  %v7627_v10 = vunpack.i.h.bf16 %v10612_v13  ;;  %v10107_v13 = vld [vmem:[%s19029_s0 + $0x60] sm:$0xff] }
  0xf4   :  { %8029 = vrot.lane.b32.xlu2 %v8028_v27, %s10235_s8  ;;  %v8038_v27 = vpack.i.bf16 %v90_v8, %v89_v53  ;;  %v7152_v53 = vld [vmem:[%s19029_s0 + $0x39] sm:$0xff] }
  0xf5   :  { %8024 = vrot.lane.b32.xlu1 %v8023_v38, %s10235_s8  ;;  %8019 = vrot.lane.b32.xlu0 %v8018_v39, %s10235_s8  ;;  %v8033_v38 = vpack.i.bf16 %v88_v23, %v87_v14  ;;  %v7153_v39 = vld [vmem:[%s19029_s0 + $0x49] sm:$0xff]  ;;  %v7149_v8 = vld [vmem:[%s19029_s0 + $0x19] sm:$0xff] }
  0xf6   :  { %v11041_v52 = vpop.permute.xlu2 %7864  ;;  %v7150_v14 = vld [vmem:[%s19029_s0 + $0x21] sm:$0xff] }
  0xf7   :  { %19584 = vst [vmem:[#allocation11_spill] sm:$0xff] %v11041_v52  ;;  %v11046_v62 = vpop.permute.xlu1 %7814  ;;  %v11048_v2 = vpop.permute.xlu0 %7809  ;;  %v7166_v52 = vld [vmem:[%s19029_s0 + $0xe1] sm:$0xff] }
  0xf8   :  { %19585 = vst [vmem:[#allocation12_spill] sm:$0xff] %v11046_v62  ;;  %v8048_v62 = vpack.i.bf16 %v7150_v14, %v7149_v8 }
  0xf9   :  { %19586 = vst [vmem:[#allocation13_spill] sm:$0xff] %v11048_v2  ;;  %v7154_v2 = vld [vmem:[%s19029_s0 + $0x51] sm:$0xff] }
  0xfc   :  { %8044 = vrot.lane.b32.xlu2 %v8043_v26, %s10235_s8 }
  0xfd   :  { %8039 = vrot.lane.b32.xlu1 %v8038_v27, %s10235_s8  ;;  %8034 = vrot.lane.b32.xlu0 %v8033_v38, %s10235_s8  ;;  %v8058_v27 = vpack.i.bf16 %v7154_v2, %v7153_v39  ;;  %v8053_v38 = vpack.i.bf16 %v7152_v53, %v7151_v45  ;;  %v7157_v2 = vld [vmem:[%s19029_s0 + $0x79] sm:$0xff]  ;;  %v7158_v45 = vld [vmem:[%s19029_s0 + $0x81] sm:$0xff] }
  0xfe   :  { %v11071_v49 = vpop.permute.xlu2 %7879  ;;  %v7155_v53 = vld [vmem:[%s19029_s0 + $0x61] sm:$0xff] }
  0xff   :  { %19587 = vst [vmem:[#allocation14_spill] sm:$0xff] %v11071_v49  ;;  %v11082_v23 = vpop.permute.xlu1 %7829  ;;  %v11084_v26 = vpop.permute.xlu0 %7824  ;;  %v7159_v49 = vld [vmem:[%s19029_s0 + $0x91] sm:$0xff] }
 0x100   :  { %19588 = vst [vmem:[#allocation15_spill] sm:$0xff] %v11082_v23  ;;  %v7160_v23 = vld [vmem:[%s19029_s0 + $0x99] sm:$0xff] }
 0x101   :  { %19589 = vst [vmem:[#allocation16_spill] sm:$0xff] %v11084_v26 }
 0x104   :  { %8059 = vrot.lane.b32.xlu2 %v8058_v27, %s10236_s22  ;;  %v8073_v27 = vpack.i.bf16 %v7160_v23, %v7159_v49  ;;  %v7163_v49 = vld [vmem:[%s19029_s0 + $0xc1] sm:$0xff] }
 0x105   :  { %8054 = vrot.lane.b32.xlu1 %v8053_v38, %s10236_s22  ;;  %8049 = vrot.lane.b32.xlu0 %v8048_v62, %s10236_s22  ;;  %v7156_v62 = vld [vmem:[%s19029_s0 + $0x69] sm:$0xff]  ;;  %v8068_v38 = vpack.i.bf16 %v7158_v45, %v7157_v2 }
 0x106   :  { %v11098_v39 = vpop.permute.xlu2 %7894  ;;  %v8063_v26 = vpack.i.bf16 %v7156_v62, %v7155_v53  ;;  %v7164_v2 = vld [vmem:[%s19029_s0 + $0xc9] sm:$0xff] }
 0x107   :  { %19590 = vst [vmem:[#allocation17_spill] sm:$0xff] %v11098_v39  ;;  %v11109_v8 = vpop.permute.xlu1 %7844  ;;  %v11111_v14 = vpop.permute.xlu0 %7839  ;;  %v7165_v39 = vld [vmem:[%s19029_s0 + $0xd9] sm:$0xff]  ;;  %v7161_v45 = vld [vmem:[%s19029_s0 + $0xa9] sm:$0xff] }
 0x108   :  { %19591 = vst [vmem:[#allocation18_spill] sm:$0xff] %v11109_v8  ;;  %v7172_v8 = vld [vmem:[%s19029_s0 + $0x129] sm:$0xff] }
 0x109   :  { %19592 = vst [vmem:[#allocation19_spill] sm:$0xff] %v11111_v14 }
 0x10c   :  { %8074 = vrot.lane.b32.xlu2 %v8073_v27, %s10236_s22  ;;  %v8088_v27 = vpack.i.bf16 %v7166_v52, %v7165_v39  ;;  %v7169_v52 = vld [vmem:[%s19029_s0 + $0x109] sm:$0xff] }
 0x10d   :  { %8069 = vrot.lane.b32.xlu1 %v8068_v38, %s10236_s22  ;;  %8064 = vrot.lane.b32.xlu0 %v8063_v26, %s10236_s22  ;;  %v7162_v26 = vld [vmem:[%s19029_s0 + $0xb1] sm:$0xff]  ;;  %v8083_v38 = vpack.i.bf16 %v7164_v2, %v7163_v49 }
 0x10e   :  { %v11125_v23 = vpop.permute.xlu2 %7909  ;;  %v8078_v14 = vpack.i.bf16 %v7162_v26, %v7161_v45  ;;  %v7170_v49 = vld [vmem:[%s19029_s0 + $0x111] sm:$0xff] }
 0x10f   :  { %19593 = vst [vmem:[#allocation20_spill] sm:$0xff] %v11125_v23  ;;  %v11136_v53 = vpop.permute.xlu1 %7859  ;;  %v11138_v62 = vpop.permute.xlu0 %7854  ;;  %v7171_v23 = vld [vmem:[%s19029_s0 + $0x121] sm:$0xff]  ;;  %v7167_v2 = vld [vmem:[%s19029_s0 + $0xf1] sm:$0xff] }
 0x110   :  { %19594 = vst [vmem:[#allocation21_spill] sm:$0xff] %v11136_v53  ;;  %v7178_v53 = vld [vmem:[%s19029_s0 + $0x171] sm:$0xff] }
 0x111   :  { %19595 = vst [vmem:[#allocation22_spill] sm:$0xff] %v11138_v62 }
 0x114   :  { %8089 = vrot.lane.b32.xlu2 %v8088_v27, %s10236_s22  ;;  %v8103_v27 = vpack.i.bf16 %v7172_v8, %v7171_v23  ;;  %v7175_v8 = vld [vmem:[%s19029_s0 + $0x151] sm:$0xff] }
 0x115   :  { %8084 = vrot.lane.b32.xlu1 %v8083_v38, %s10236_s22  ;;  %8079 = vrot.lane.b32.xlu0 %v8078_v14, %s10236_s22  ;;  %v7168_v14 = vld [vmem:[%s19029_s0 + $0xf9] sm:$0xff]  ;;  %v8098_v38 = vpack.i.bf16 %v7170_v49, %v7169_v52 }
 0x116   :  { %v11152_v39 = vpop.permute.xlu2 %7924  ;;  %v8093_v62 = vpack.i.bf16 %v7168_v14, %v7167_v2  ;;  %v7176_v52 = vld [vmem:[%s19029_s0 + $0x159] sm:$0xff] }
 0x117   :  { %19596 = vst [vmem:[#allocation23_spill] sm:$0xff] %v11152_v39  ;;  %v11163_v45 = vpop.permute.xlu1 %7874  ;;  %v11165_v26 = vpop.permute.xlu0 %7869  ;;  %v7177_v39 = vld [vmem:[%s19029_s0 + $0x169] sm:$0xff]  ;;  %v7173_v49 = vld [vmem:[%s19029_s0 + $0x139] sm:$0xff] }
 0x118   :  { %19597 = vst [vmem:[#allocation24_spill] sm:$0xff] %v11163_v45  ;;  %v7184_v45 = vld [vmem:[%s19029_s0 + $0x1e9] sm:$0xff] }
 0x119   :  { %19598 = vst [vmem:[#allocation25_spill] sm:$0xff] %v11165_v26 }
 0x11c   :  { %8104 = vrot.lane.b32.xlu2 %v8103_v27, %s10236_s22  ;;  %v8118_v27 = vpack.i.bf16 %v7178_v53, %v7177_v39  ;;  %v7181_v53 = vld [vmem:[%s19029_s0 + $0x1c9] sm:$0xff] }
 0x11d   :  { %8099 = vrot.lane.b32.xlu1 %v8098_v38, %s10236_s22  ;;  %8094 = vrot.lane.b32.xlu0 %v8093_v62, %s10236_s22  ;;  %v7174_v62 = vld [vmem:[%s19029_s0 + $0x141] sm:$0xff]  ;;  %v8113_v38 = vpack.i.bf16 %v7176_v52, %v7175_v8  ;;  %v7182_v8 = vld [vmem:[%s19029_s0 + $0x1d1] sm:$0xff] }
 0x11e   :  { %v11179_v23 = vpop.permute.xlu2 %7939  ;;  %v8108_v26 = vpack.i.bf16 %v7174_v62, %v7173_v49  ;;  %v7179_v52 = vld [vmem:[%s19029_s0 + $0x181] sm:$0xff] }
 0x11f   :  { %19599 = vst [vmem:[#allocation26_spill] sm:$0xff] %v11179_v23  ;;  %v11190_v2 = vpop.permute.xlu1 %7889  ;;  %v11192_v14 = vpop.permute.xlu0 %7884  ;;  %v7183_v23 = vld [vmem:[%s19029_s0 + $0x1e1] sm:$0xff] }
 0x120   :  { %19600 = vst [vmem:[#allocation27_spill] sm:$0xff] %v11190_v2  ;;  %v7190_v2 = vld [vmem:[%s19029_s0 + $0x231] sm:$0xff] }
 0x121   :  { %19601 = vst [vmem:[#allocation28_spill] sm:$0xff] %v11192_v14 }
 0x124   :  { %8119 = vrot.lane.b32.xlu2 %v8118_v27, %s10236_s22  ;;  %v8133_v27 = vpack.i.bf16 %v7184_v45, %v7183_v23  ;;  %v7187_v45 = vld [vmem:[%s19029_s0 + $0x211] sm:$0xff] }
 0x125   :  { %8114 = vrot.lane.b32.xlu1 %v8113_v38, %s10236_s22  ;;  %8109 = vrot.lane.b32.xlu0 %v8108_v26, %s10236_s22  ;;  %v7180_v26 = vld [vmem:[%s19029_s0 + $0x189] sm:$0xff]  ;;  %v8128_v38 = vpack.i.bf16 %v7182_v8, %v7181_v53  ;;  %v7188_v53 = vld [vmem:[%s19029_s0 + $0x219] sm:$0xff] }
 0x126   :  { %v11206_v39 = vpop.permute.xlu2 %7954  ;;  %v8123_v14 = vpack.i.bf16 %v7180_v26, %v7179_v52  ;;  %v7185_v8 = vld [vmem:[%s19029_s0 + $0x1f9] sm:$0xff] }
 0x127   :  { %19602 = vst [vmem:[#allocation29_spill] sm:$0xff] %v11206_v39  ;;  %v11217_v49 = vpop.permute.xlu1 %7904  ;;  %v11219_v62 = vpop.permute.xlu0 %7899  ;;  %v7189_v39 = vld [vmem:[%s19029_s0 + $0x229] sm:$0xff] }
 0x128   :  { %19603 = vst [vmem:[#allocation30_spill] sm:$0xff] %v11217_v49  ;;  %v7196_v49 = vld [vmem:[%s19029_s0 + $0x279] sm:$0xff] }
 0x129   :  { %19604 = vst [vmem:[#allocation31_spill] sm:$0xff] %v11219_v62 }
 0x12c   :  { %8134 = vrot.lane.b32.xlu2 %v8133_v27, %s10236_s22  ;;  %v8148_v27 = vpack.i.bf16 %v7190_v2, %v7189_v39  ;;  %v7193_v2 = vld [vmem:[%s19029_s0 + $0x259] sm:$0xff] }
 0x12d   :  { %8129 = vrot.lane.b32.xlu1 %v8128_v38, %s10236_s22  ;;  %8124 = vrot.lane.b32.xlu0 %v8123_v14, %s10236_s22  ;;  %v7186_v14 = vld [vmem:[%s19029_s0 + $0x201] sm:$0xff]  ;;  %v8143_v38 = vpack.i.bf16 %v7188_v53, %v7187_v45 }
 0x12e   :  { %v11233_v23 = vpop.permute.xlu2 %7969  ;;  %v8138_v62 = vpack.i.bf16 %v7186_v14, %v7185_v8  ;;  %v7194_v45 = vld [vmem:[%s19029_s0 + $0x261] sm:$0xff] }
 0x12f   :  { %19605 = vst [vmem:[#allocation32_spill] sm:$0xff] %v11233_v23  ;;  %v11244_v52 = vpop.permute.xlu1 %7919  ;;  %v11246_v26 = vpop.permute.xlu0 %7914  ;;  %v7195_v23 = vld [vmem:[%s19029_s0 + $0x271] sm:$0xff]  ;;  %v7191_v53 = vld [vmem:[%s19029_s0 + $0x241] sm:$0xff] }
 0x130   :  { %19606 = vst [vmem:[#allocation33_spill] sm:$0xff] %v11244_v52  ;;  %v7202_v52 = vld [vmem:[%s19029_s0 + $0x2c1] sm:$0xff] }
 0x131   :  { %19607 = vst [vmem:[#allocation34_spill] sm:$0xff] %v11246_v26 }
 0x134   :  { %8149 = vrot.lane.b32.xlu2 %v8148_v27, %s10236_s22  ;;  %v8163_v27 = vpack.i.bf16 %v7196_v49, %v7195_v23  ;;  %v7199_v49 = vld [vmem:[%s19029_s0 + $0x2a1] sm:$0xff] }
 0x135   :  { %8144 = vrot.lane.b32.xlu1 %v8143_v38, %s10236_s22  ;;  %8139 = vrot.lane.b32.xlu0 %v8138_v62, %s10236_s22  ;;  %v7192_v62 = vld [vmem:[%s19029_s0 + $0x249] sm:$0xff]  ;;  %v8158_v38 = vpack.i.bf16 %v7194_v45, %v7193_v2 }
 0x136   :  { %v11260_v39 = vpop.permute.xlu2 %7984  ;;  %v8153_v26 = vpack.i.bf16 %v7192_v62, %v7191_v53  ;;  %v7200_v2 = vld [vmem:[%s19029_s0 + $0x2a9] sm:$0xff] }
 0x137   :  { %19608 = vst [vmem:[#allocation35_spill] sm:$0xff] %v11260_v39  ;;  %v11271_v8 = vpop.permute.xlu1 %7934  ;;  %v11273_v14 = vpop.permute.xlu0 %7929  ;;  %v7201_v39 = vld [vmem:[%s19029_s0 + $0x2b9] sm:$0xff]  ;;  %v7197_v45 = vld [vmem:[%s19029_s0 + $0x289] sm:$0xff] }
 0x138   :  { %19609 = vst [vmem:[#allocation36_spill] sm:$0xff] %v11271_v8  ;;  %v7208_v8 = vld [vmem:[%s19029_s0 + $0x309] sm:$0xff] }
 0x139   :  { %19610 = vst [vmem:[#allocation37_spill] sm:$0xff] %v11273_v14 }
 0x13c   :  { %8164 = vrot.lane.b32.xlu2 %v8163_v27, %s10236_s22  ;;  %v8178_v27 = vpack.i.bf16 %v7202_v52, %v7201_v39  ;;  %v7205_v52 = vld [vmem:[%s19029_s0 + $0x2e9] sm:$0xff] }
 0x13d   :  { %8159 = vrot.lane.b32.xlu1 %v8158_v38, %s10236_s22  ;;  %8154 = vrot.lane.b32.xlu0 %v8153_v26, %s10236_s22  ;;  %v7198_v26 = vld [vmem:[%s19029_s0 + $0x291] sm:$0xff]  ;;  %v8173_v38 = vpack.i.bf16 %v7200_v2, %v7199_v49 }
 0x13e   :  { %v11287_v23 = vpop.permute.xlu2 %7999  ;;  %v8168_v14 = vpack.i.bf16 %v7198_v26, %v7197_v45  ;;  %v7206_v49 = vld [vmem:[%s19029_s0 + $0x2f1] sm:$0xff] }
 0x13f   :  { %19611 = vst [vmem:[#allocation38_spill] sm:$0xff] %v11287_v23  ;;  %v11298_v53 = vpop.permute.xlu1 %7949  ;;  %v11300_v62 = vpop.permute.xlu0 %7944  ;;  %v7207_v23 = vld [vmem:[%s19029_s0 + $0x301] sm:$0xff]  ;;  %v7203_v2 = vld [vmem:[%s19029_s0 + $0x2d1] sm:$0xff] }
 0x140   :  { %19612 = vst [vmem:[#allocation39_spill] sm:$0xff] %v11298_v53  ;;  %v7214_v53 = vld [vmem:[%s19029_s0 + $0x22] sm:$0xff] }
 0x141   :  { %19613 = vst [vmem:[#allocation40_spill] sm:$0xff] %v11300_v62 }
 0x144   :  { %8179 = vrot.lane.b32.xlu2 %v8178_v27, %s10236_s22  ;;  %v8193_v27 = vpack.i.bf16 %v7208_v8, %v7207_v23  ;;  %v7211_v8 = vld [vmem:[%s19029_s0 + $0x331] sm:$0xff] }
 0x145   :  { %8174 = vrot.lane.b32.xlu1 %v8173_v38, %s10236_s22  ;;  %8169 = vrot.lane.b32.xlu0 %v8168_v14, %s10236_s22  ;;  %v7204_v14 = vld [vmem:[%s19029_s0 + $0x2d9] sm:$0xff]  ;;  %v8188_v38 = vpack.i.bf16 %v7206_v49, %v7205_v52 }
 0x146   :  { %v11314_v39 = vpop.permute.xlu2 %8014  ;;  %v8183_v62 = vpack.i.bf16 %v7204_v14, %v7203_v2  ;;  %v7212_v52 = vld [vmem:[%s19029_s0 + $0x339] sm:$0xff] }
 0x147   :  { %19614 = vst [vmem:[#allocation41_spill] sm:$0xff] %v11314_v39  ;;  %v11325_v45 = vpop.permute.xlu1 %7964  ;;  %v11327_v26 = vpop.permute.xlu0 %7959  ;;  %v7213_v39 = vld [vmem:[%s19029_s0 + $0x1a] sm:$0xff] }
 0x148   :  { %19615 = vst [vmem:[#allocation42_spill] sm:$0xff] %v11325_v45  ;;  %v7209_v49 = vld [vmem:[%s19029_s0 + $0x319] sm:$0xff] }
 0x149   :  { %19616 = vst [vmem:[#allocation43_spill] sm:$0xff] %v11327_v26  ;;  %v7226_v45 = vld [vmem:[%s19029_s0 + $0xb2] sm:$0xff] }
 0x14c   :  { %8194 = vrot.lane.b32.xlu2 %v8193_v27, %s10236_s22  ;;  %v8208_v27 = vpack.i.bf16 %v7214_v53, %v7213_v39  ;;  %v7217_v53 = vld [vmem:[%s19029_s0 + $0x4a] sm:$0xff] }
 0x14d   :  { %8189 = vrot.lane.b32.xlu1 %v8188_v38, %s10236_s22  ;;  %8184 = vrot.lane.b32.xlu0 %v8183_v62, %s10236_s22  ;;  %v7210_v62 = vld [vmem:[%s19029_s0 + $0x321] sm:$0xff]  ;;  %v8203_v38 = vpack.i.bf16 %v7212_v52, %v7211_v8  ;;  %v7218_v8 = vld [vmem:[%s19029_s0 + $0x52] sm:$0xff] }
 0x14e   :  { %v11341_v23 = vpop.permute.xlu2 %8029  ;;  %v8198_v26 = vpack.i.bf16 %v7210_v62, %v7209_v49  ;;  %v7215_v52 = vld [vmem:[%s19029_s0 + $0x32] sm:$0xff] }
 0x14f   :  { %19617 = vst [vmem:[#allocation44_spill] sm:$0xff] %v11341_v23  ;;  %v11352_v2 = vpop.permute.xlu1 %7979  ;;  %v11354_v14 = vpop.permute.xlu0 %7974  ;;  %v7219_v23 = vld [vmem:[%s19029_s0 + $0x62] sm:$0xff] }
 0x150   :  { %19618 = vst [vmem:[#allocation45_spill] sm:$0xff] %v11352_v2  ;;  %v7220_v2 = vld [vmem:[%s19029_s0 + $0x6a] sm:$0xff] }
 0x151   :  { %19619 = vst [vmem:[#allocation46_spill] sm:$0xff] %v11354_v14 }
 0x154   :  { %8209 = vrot.lane.b32.xlu2 %v8208_v27, %s10237_s30  ;;  %v8223_v27 = vpack.i.bf16 %v7220_v2, %v7219_v23  ;;  %v7223_v23 = vld [vmem:[%s19029_s0 + $0x92] sm:$0xff] }
 0x155   :  { %8204 = vrot.lane.b32.xlu1 %v8203_v38, %s10236_s22  ;;  %8199 = vrot.lane.b32.xlu0 %v8198_v26, %s10236_s22  ;;  %v7216_v26 = vld [vmem:[%s19029_s0 + $0x3a] sm:$0xff]  ;;  %v8218_v38 = vpack.i.bf16 %v7218_v8, %v7217_v53 }
 0x156   :  { %v11368_v39 = vpop.permute.xlu2 %8044  ;;  %v8213_v14 = vpack.i.bf16 %v7216_v26, %v7215_v52  ;;  %v7224_v53 = vld [vmem:[%s19029_s0 + $0x9a] sm:$0xff] }
 0x157   :  { %19620 = vst [vmem:[#allocation47_spill] sm:$0xff] %v11368_v39  ;;  %v11379_v49 = vpop.permute.xlu1 %7994  ;;  %v11381_v62 = vpop.permute.xlu0 %7989  ;;  %v7225_v39 = vld [vmem:[%s19029_s0 + $0xaa] sm:$0xff]  ;;  %v7221_v8 = vld [vmem:[%s19029_s0 + $0x7a] sm:$0xff] }
 0x158   :  { %19621 = vst [vmem:[#allocation48_spill] sm:$0xff] %v11379_v49  ;;  %v7232_v49 = vld [vmem:[%s19029_s0 + $0xfa] sm:$0xff] }
 0x159   :  { %19622 = vst [vmem:[#allocation49_spill] sm:$0xff] %v11381_v62 }
 0x15c   :  { %8224 = vrot.lane.b32.xlu2 %v8223_v27, %s10237_s30  ;;  %v8238_v27 = vpack.i.bf16 %v7226_v45, %v7225_v39  ;;  %v7229_v45 = vld [vmem:[%s19029_s0 + $0xda] sm:$0xff] }
 0x15d   :  { %8219 = vrot.lane.b32.xlu1 %v8218_v38, %s10237_s30  ;;  %8214 = vrot.lane.b32.xlu0 %v8213_v14, %s10237_s30  ;;  %v7222_v14 = vld [vmem:[%s19029_s0 + $0x82] sm:$0xff]  ;;  %v8233_v38 = vpack.i.bf16 %v7224_v53, %v7223_v23 }
 0x15e   :  { %v11395_v2 = vpop.permute.xlu2 %8059  ;;  %v8228_v62 = vpack.i.bf16 %v7222_v14, %v7221_v8  ;;  %v7230_v23 = vld [vmem:[%s19029_s0 + $0xe2] sm:$0xff] }
 0x15f   :  { %19623 = vst [vmem:[#allocation50_spill] sm:$0xff] %v11395_v2  ;;  %v11406_v52 = vpop.permute.xlu1 %8009  ;;  %v11408_v26 = vpop.permute.xlu0 %8004  ;;  %v7231_v2 = vld [vmem:[%s19029_s0 + $0xf2] sm:$0xff]  ;;  %v7227_v53 = vld [vmem:[%s19029_s0 + $0xc2] sm:$0xff] }
 0x160   :  { %19624 = vst [vmem:[#allocation51_spill] sm:$0xff] %v11406_v52  ;;  %v7238_v52 = vld [vmem:[%s19029_s0 + $0x142] sm:$0xff] }
 0x161   :  { %19625 = vst [vmem:[#allocation52_spill] sm:$0xff] %v11408_v26 }
 0x164   :  { %8239 = vrot.lane.b32.xlu2 %v8238_v27, %s10237_s30  ;;  %v8253_v27 = vpack.i.bf16 %v7232_v49, %v7231_v2  ;;  %v7235_v49 = vld [vmem:[%s19029_s0 + $0x122] sm:$0xff] }
 0x165   :  { %8234 = vrot.lane.b32.xlu1 %v8233_v38, %s10237_s30  ;;  %8229 = vrot.lane.b32.xlu0 %v8228_v62, %s10237_s30  ;;  %v7228_v62 = vld [vmem:[%s19029_s0 + $0xca] sm:$0xff]  ;;  %v8248_v38 = vpack.i.bf16 %v7230_v23, %v7229_v45 }
 0x166   :  { %v11422_v39 = vpop.permute.xlu2 %8074  ;;  %v8243_v26 = vpack.i.bf16 %v7228_v62, %v7227_v53  ;;  %v7236_v45 = vld [vmem:[%s19029_s0 + $0x12a] sm:$0xff] }
 0x167   :  { %19626 = vst [vmem:[#allocation53_spill] sm:$0xff] %v11422_v39  ;;  %v11433_v8 = vpop.permute.xlu1 %8024  ;;  %v11435_v14 = vpop.permute.xlu0 %8019  ;;  %v7237_v39 = vld [vmem:[%s19029_s0 + $0x13a] sm:$0xff]  ;;  %v7233_v23 = vld [vmem:[%s19029_s0 + $0x10a] sm:$0xff] }
 0x168   :  { %19627 = vst [vmem:[#allocation54_spill] sm:$0xff] %v11433_v8  ;;  %v7244_v8 = vld [vmem:[%s19029_s0 + $0x18a] sm:$0xff] }
 0x169   :  { %19628 = vst [vmem:[#allocation55_spill] sm:$0xff] %v11435_v14 }
 0x16c   :  { %8254 = vrot.lane.b32.xlu2 %v8253_v27, %s10237_s30  ;;  %v8268_v27 = vpack.i.bf16 %v7238_v52, %v7237_v39  ;;  %v7241_v52 = vld [vmem:[%s19029_s0 + $0x16a] sm:$0xff] }
 0x16d   :  { %8249 = vrot.lane.b32.xlu1 %v8248_v38, %s10237_s30  ;;  %8244 = vrot.lane.b32.xlu0 %v8243_v26, %s10237_s30  ;;  %v7234_v26 = vld [vmem:[%s19029_s0 + $0x112] sm:$0xff]  ;;  %v8263_v38 = vpack.i.bf16 %v7236_v45, %v7235_v49 }
 0x16e   :  { %v11449_v2 = vpop.permute.xlu2 %8089  ;;  %v8258_v14 = vpack.i.bf16 %v7234_v26, %v7233_v23  ;;  %v7242_v49 = vld [vmem:[%s19029_s0 + $0x172] sm:$0xff] }
 0x16f   :  { %19629 = vst [vmem:[#allocation56_spill] sm:$0xff] %v11449_v2  ;;  %v11460_v53 = vpop.permute.xlu1 %8039  ;;  %v11462_v62 = vpop.permute.xlu0 %8034  ;;  %v7243_v2 = vld [vmem:[%s19029_s0 + $0x182] sm:$0xff]  ;;  %v7239_v45 = vld [vmem:[%s19029_s0 + $0x152] sm:$0xff] }
 0x170   :  { %19630 = vst [vmem:[#allocation57_spill] sm:$0xff] %v11460_v53  ;;  %v7250_v53 = vld [vmem:[%s19029_s0 + $0x202] sm:$0xff] }
 0x171   :  { %19631 = vst [vmem:[#allocation58_spill] sm:$0xff] %v11462_v62 }
 0x174   :  { %8269 = vrot.lane.b32.xlu2 %v8268_v27, %s10237_s30  ;;  %v8283_v27 = vpack.i.bf16 %v7244_v8, %v7243_v2  ;;  %v7247_v8 = vld [vmem:[%s19029_s0 + $0x1e2] sm:$0xff] }
 0x175   :  { %8264 = vrot.lane.b32.xlu1 %v8263_v38, %s10237_s30  ;;  %8259 = vrot.lane.b32.xlu0 %v8258_v14, %s10237_s30  ;;  %v7240_v14 = vld [vmem:[%s19029_s0 + $0x15a] sm:$0xff]  ;;  %v8278_v38 = vpack.i.bf16 %v7242_v49, %v7241_v52  ;;  %v7248_v52 = vld [vmem:[%s19029_s0 + $0x1ea] sm:$0xff] }
 0x176   :  { %v11476_v39 = vpop.permute.xlu2 %8104  ;;  %v8273_v62 = vpack.i.bf16 %v7240_v14, %v7239_v45  ;;  %v7245_v49 = vld [vmem:[%s19029_s0 + $0x1ca] sm:$0xff] }
 0x177   :  { %19632 = vst [vmem:[#allocation59_spill] sm:$0xff] %v11476_v39  ;;  %v11487_v23 = vpop.permute.xlu1 %8054  ;;  %v11489_v26 = vpop.permute.xlu0 %8049  ;;  %v7249_v39 = vld [vmem:[%s19029_s0 + $0x1fa] sm:$0xff] }
 0x178   :  { %19633 = vst [vmem:[#allocation60_spill] sm:$0xff] %v11487_v23  ;;  %v7256_v23 = vld [vmem:[%s19029_s0 + $0x24a] sm:$0xff] }
 0x179   :  { %19634 = vst [vmem:[#allocation61_spill] sm:$0xff] %v11489_v26 }
 0x17c   :  { %8284 = vrot.lane.b32.xlu2 %v8283_v27, %s10237_s30  ;;  %v8298_v27 = vpack.i.bf16 %v7250_v53, %v7249_v39  ;;  %v7253_v53 = vld [vmem:[%s19029_s0 + $0x22a] sm:$0xff] }
 0x17d   :  { %8279 = vrot.lane.b32.xlu1 %v8278_v38, %s10237_s30  ;;  %8274 = vrot.lane.b32.xlu0 %v8273_v62, %s10237_s30  ;;  %v7246_v62 = vld [vmem:[%s19029_s0 + $0x1d2] sm:$0xff]  ;;  %v8293_v38 = vpack.i.bf16 %v7248_v52, %v7247_v8 }
 0x17e   :  { %v11503_v2 = vpop.permute.xlu2 %8119  ;;  %v8288_v26 = vpack.i.bf16 %v7246_v62, %v7245_v49  ;;  %v7254_v8 = vld [vmem:[%s19029_s0 + $0x232] sm:$0xff] }
 0x17f   :  { %19635 = vst [vmem:[#allocation62_spill] sm:$0xff] %v11503_v2  ;;  %v11514_v45 = vpop.permute.xlu1 %8069  ;;  %v11516_v14 = vpop.permute.xlu0 %8064  ;;  %v7255_v2 = vld [vmem:[%s19029_s0 + $0x242] sm:$0xff]  ;;  %v7251_v52 = vld [vmem:[%s19029_s0 + $0x212] sm:$0xff] }
 0x180   :  { %19636 = vst [vmem:[#allocation63_spill] sm:$0xff] %v11514_v45  ;;  %v7262_v45 = vld [vmem:[%s19029_s0 + $0x292] sm:$0xff] }
 0x181   :  { %19637 = vst [vmem:[#allocation64_spill] sm:$0xff] %v11516_v14 }
 0x184   :  { %8299 = vrot.lane.b32.xlu2 %v8298_v27, %s10237_s30  ;;  %v8313_v27 = vpack.i.bf16 %v7256_v23, %v7255_v2  ;;  %v7259_v23 = vld [vmem:[%s19029_s0 + $0x272] sm:$0xff] }
 0x185   :  { %8294 = vrot.lane.b32.xlu1 %v8293_v38, %s10237_s30  ;;  %8289 = vrot.lane.b32.xlu0 %v8288_v26, %s10237_s30  ;;  %v7252_v26 = vld [vmem:[%s19029_s0 + $0x21a] sm:$0xff]  ;;  %v8308_v38 = vpack.i.bf16 %v7254_v8, %v7253_v53 }
 0x186   :  { %v11530_v39 = vpop.permute.xlu2 %8134  ;;  %v8303_v14 = vpack.i.bf16 %v7252_v26, %v7251_v52  ;;  %v7260_v53 = vld [vmem:[%s19029_s0 + $0x27a] sm:$0xff] }
 0x187   :  { %19638 = vst [vmem:[#allocation65_spill] sm:$0xff] %v11530_v39  ;;  %v11541_v49 = vpop.permute.xlu1 %8084  ;;  %v11543_v62 = vpop.permute.xlu0 %8079  ;;  %v7261_v39 = vld [vmem:[%s19029_s0 + $0x28a] sm:$0xff]  ;;  %v7257_v8 = vld [vmem:[%s19029_s0 + $0x25a] sm:$0xff] }
 0x188   :  { %19639 = vst [vmem:[#allocation66_spill] sm:$0xff] %v11541_v49  ;;  %v7268_v49 = vld [vmem:[%s19029_s0 + $0x2da] sm:$0xff] }
 0x189   :  { %19640 = vst [vmem:[#allocation67_spill] sm:$0xff] %v11543_v62 }
 0x18c   :  { %8314 = vrot.lane.b32.xlu2 %v8313_v27, %s10237_s30  ;;  %v8328_v27 = vpack.i.bf16 %v7262_v45, %v7261_v39  ;;  %v7265_v45 = vld [vmem:[%s19029_s0 + $0x2ba] sm:$0xff] }
 0x18d   :  { %8309 = vrot.lane.b32.xlu1 %v8308_v38, %s10237_s30  ;;  %8304 = vrot.lane.b32.xlu0 %v8303_v14, %s10237_s30  ;;  %v7258_v14 = vld [vmem:[%s19029_s0 + $0x262] sm:$0xff]  ;;  %v8323_v38 = vpack.i.bf16 %v7260_v53, %v7259_v23 }
 0x18e   :  { %v11557_v2 = vpop.permute.xlu2 %8149  ;;  %v8318_v62 = vpack.i.bf16 %v7258_v14, %v7257_v8  ;;  %v7266_v23 = vld [vmem:[%s19029_s0 + $0x2c2] sm:$0xff] }
 0x18f   :  { %19641 = vst [vmem:[#allocation68_spill] sm:$0xff] %v11557_v2  ;;  %v11568_v52 = vpop.permute.xlu1 %8099  ;;  %v11570_v26 = vpop.permute.xlu0 %8094  ;;  %v7267_v2 = vld [vmem:[%s19029_s0 + $0x2d2] sm:$0xff]  ;;  %v7263_v53 = vld [vmem:[%s19029_s0 + $0x2a2] sm:$0xff] }
 0x190   :  { %19642 = vst [vmem:[#allocation69_spill] sm:$0xff] %v11568_v52  ;;  %v7274_v52 = vld [vmem:[%s19029_s0 + $0x322] sm:$0xff] }
 0x191   :  { %19643 = vst [vmem:[#allocation70_spill] sm:$0xff] %v11570_v26 }
 0x194   :  { %8329 = vrot.lane.b32.xlu2 %v8328_v27, %s10237_s30  ;;  %v8343_v27 = vpack.i.bf16 %v7268_v49, %v7267_v2  ;;  %v7271_v49 = vld [vmem:[%s19029_s0 + $0x302] sm:$0xff] }
 0x195   :  { %8324 = vrot.lane.b32.xlu1 %v8323_v38, %s10237_s30  ;;  %8319 = vrot.lane.b32.xlu0 %v8318_v62, %s10237_s30  ;;  %v7264_v62 = vld [vmem:[%s19029_s0 + $0x2aa] sm:$0xff]  ;;  %v8338_v38 = vpack.i.bf16 %v7266_v23, %v7265_v45 }
 0x196   :  { %v11584_v39 = vpop.permute.xlu2 %8164  ;;  %v8333_v26 = vpack.i.bf16 %v7264_v62, %v7263_v53  ;;  %v7272_v45 = vld [vmem:[%s19029_s0 + $0x30a] sm:$0xff] }
 0x197   :  { %19644 = vst [vmem:[#allocation71_spill] sm:$0xff] %v11584_v39  ;;  %v11595_v8 = vpop.permute.xlu1 %8114  ;;  %v11597_v14 = vpop.permute.xlu0 %8109  ;;  %v7273_v39 = vld [vmem:[%s19029_s0 + $0x31a] sm:$0xff]  ;;  %v7269_v23 = vld [vmem:[%s19029_s0 + $0x2ea] sm:$0xff] }
 0x198   :  { %19645 = vst [vmem:[#allocation72_spill] sm:$0xff] %v11595_v8  ;;  %v7280_v8 = vld [vmem:[%s19029_s0 + $0x50] sm:$0xff] }
 0x199   :  { %19646 = vst [vmem:[#allocation73_spill] sm:$0xff] %v11597_v14 }
 0x19c   :  { %8344 = vrot.lane.b32.xlu2 %v8343_v27, %s10237_s30  ;;  %v8358_v27 = vpack.i.bf16 %v7274_v52, %v7273_v39  ;;  %v7277_v52 = vld [vmem:[%s19029_s0 + $0x30] sm:$0xff] }
 0x19d   :  { %8339 = vrot.lane.b32.xlu1 %v8338_v38, %s10237_s30  ;;  %8334 = vrot.lane.b32.xlu0 %v8333_v26, %s10237_s30  ;;  %v7270_v26 = vld [vmem:[%s19029_s0 + $0x2f2] sm:$0xff]  ;;  %v8353_v38 = vpack.i.bf16 %v7272_v45, %v7271_v49 }
 0x19e   :  { %v11611_v2 = vpop.permute.xlu2 %8179  ;;  %v8348_v14 = vpack.i.bf16 %v7270_v26, %v7269_v23  ;;  %v7278_v49 = vld [vmem:[%s19029_s0 + $0x38] sm:$0xff] }
 0x19f   :  { %19647 = vst [vmem:[#allocation74_spill] sm:$0xff] %v11611_v2  ;;  %v11622_v53 = vpop.permute.xlu1 %8129  ;;  %v11624_v62 = vpop.permute.xlu0 %8124  ;;  %v7279_v2 = vld [vmem:[%s19029_s0 + $0x48] sm:$0xff]  ;;  %v7275_v45 = vld [vmem:[%s19029_s0 + $0x332] sm:$0xff] }
 0x1a0   :  { %19648 = vst [vmem:[#allocation75_spill] sm:$0xff] %v11622_v53  ;;  %v7292_v53 = vld [vmem:[%s19029_s0 + $0xe0] sm:$0xff] }
 0x1a1   :  { %19649 = vst [vmem:[#allocation76_spill] sm:$0xff] %v11624_v62 }
 0x1a4   :  { %8359 = vrot.lane.b32.xlu2 %v8358_v27, %s10237_s30  ;;  %v8373_v27 = vpack.i.bf16 %v7280_v8, %v7279_v2  ;;  %v7283_v8 = vld [vmem:[%s19029_s0 + $0x78] sm:$0xff] }
 0x1a5   :  { %8354 = vrot.lane.b32.xlu1 %v8353_v38, %s10237_s30  ;;  %8349 = vrot.lane.b32.xlu0 %v8348_v14, %s10237_s30  ;;  %v7276_v14 = vld [vmem:[%s19029_s0 + $0x33a] sm:$0xff]  ;;  %v8368_v38 = vpack.i.bf16 %v7278_v49, %v7277_v52 }
 0x1a6   :  { %v11638_v39 = vpop.permute.xlu2 %8194  ;;  %v8363_v62 = vpack.i.bf16 %v7276_v14, %v7275_v45  ;;  %v7284_v52 = vld [vmem:[%s19029_s0 + $0x80] sm:$0xff] }
 0x1a7   :  { %19650 = vst [vmem:[#allocation77_spill] sm:$0xff] %v11638_v39  ;;  %v11649_v23 = vpop.permute.xlu1 %8144  ;;  %v11651_v26 = vpop.permute.xlu0 %8139  ;;  %v7285_v39 = vld [vmem:[%s19029_s0 + $0x90] sm:$0xff]  ;;  %v7281_v49 = vld [vmem:[%s19029_s0 + $0x60] sm:$0xff] }
 0x1a8   :  { %19651 = vst [vmem:[#allocation78_spill] sm:$0xff] %v11649_v23  ;;  %v7286_v23 = vld [vmem:[%s19029_s0 + $0x98] sm:$0xff] }
 0x1a9   :  { %19652 = vst [vmem:[#allocation79_spill] sm:$0xff] %v11651_v26 }
 0x1ac   :  { %8374 = vrot.lane.b32.xlu2 %v8373_v27, %s10238_s16  ;;  %v8388_v27 = vpack.i.bf16 %v7286_v23, %v7285_v39  ;;  %v7289_v39 = vld [vmem:[%s19029_s0 + $0xc0] sm:$0xff] }
 0x1ad   :  { %8369 = vrot.lane.b32.xlu1 %v8368_v38, %s10238_s16  ;;  %8364 = vrot.lane.b32.xlu0 %v8363_v62, %s10237_s30  ;;  %v7282_v62 = vld [vmem:[%s19029_s0 + $0x68] sm:$0xff]  ;;  %v8383_v38 = vpack.i.bf16 %v7284_v52, %v7283_v8 }
 0x1ae   :  { %v11665_v2 = vpop.permute.xlu2 %8209  ;;  %v8378_v26 = vpack.i.bf16 %v7282_v62, %v7281_v49  ;;  %v7290_v8 = vld [vmem:[%s19029_s0 + $0xc8] sm:$0xff] }
 0x1af   :  { %19653 = vst [vmem:[#allocation80_spill] sm:$0xff] %v11665_v2  ;;  %v11676_v45 = vpop.permute.xlu1 %8159  ;;  %v11678_v14 = vpop.permute.xlu0 %8154  ;;  %v7291_v2 = vld [vmem:[%s19029_s0 + $0xd8] sm:$0xff]  ;;  %v7287_v52 = vld [vmem:[%s19029_s0 + $0xa8] sm:$0xff] }
 0x1b0   :  { %19654 = vst [vmem:[#allocation81_spill] sm:$0xff] %v11676_v45  ;;  %v7298_v45 = vld [vmem:[%s19029_s0 + $0x128] sm:$0xff] }
 0x1b1   :  { %19655 = vst [vmem:[#allocation82_spill] sm:$0xff] %v11678_v14 }
 0x1b4   :  { %8389 = vrot.lane.b32.xlu2 %v8388_v27, %s10238_s16  ;;  %v8403_v27 = vpack.i.bf16 %v7292_v53, %v7291_v2  ;;  %v7295_v53 = vld [vmem:[%s19029_s0 + $0x108] sm:$0xff] }
 0x1b5   :  { %8384 = vrot.lane.b32.xlu1 %v8383_v38, %s10238_s16  ;;  %8379 = vrot.lane.b32.xlu0 %v8378_v26, %s10238_s16  ;;  %v7288_v26 = vld [vmem:[%s19029_s0 + $0xb0] sm:$0xff]  ;;  %v8398_v38 = vpack.i.bf16 %v7290_v8, %v7289_v39 }
 0x1b6   :  { %v11692_v23 = vpop.permute.xlu2 %8224  ;;  %v8393_v14 = vpack.i.bf16 %v7288_v26, %v7287_v52  ;;  %v7296_v39 = vld [vmem:[%s19029_s0 + $0x110] sm:$0xff] }
 0x1b7   :  { %19656 = vst [vmem:[#allocation83_spill] sm:$0xff] %v11692_v23  ;;  %v11703_v49 = vpop.permute.xlu1 %8174  ;;  %v11705_v62 = vpop.permute.xlu0 %8169  ;;  %v7297_v23 = vld [vmem:[%s19029_s0 + $0x120] sm:$0xff]  ;;  %v7293_v8 = vld [vmem:[%s19029_s0 + $0xf0] sm:$0xff] }
 0x1b8   :  { %19657 = vst [vmem:[#allocation84_spill] sm:$0xff] %v11703_v49  ;;  %v7304_v49 = vld [vmem:[%s19029_s0 + $0x170] sm:$0xff] }
 0x1b9   :  { %19658 = vst [vmem:[#allocation85_spill] sm:$0xff] %v11705_v62 }
 0x1bc   :  { %8404 = vrot.lane.b32.xlu2 %v8403_v27, %s10238_s16  ;;  %v8418_v27 = vpack.i.bf16 %v7298_v45, %v7297_v23  ;;  %v7301_v45 = vld [vmem:[%s19029_s0 + $0x150] sm:$0xff] }
 0x1bd   :  { %8399 = vrot.lane.b32.xlu1 %v8398_v38, %s10238_s16  ;;  %8394 = vrot.lane.b32.xlu0 %v8393_v14, %s10238_s16  ;;  %v7294_v14 = vld [vmem:[%s19029_s0 + $0xf8] sm:$0xff]  ;;  %v8413_v38 = vpack.i.bf16 %v7296_v39, %v7295_v53 }
 0x1be   :  { %v11719_v2 = vpop.permute.xlu2 %8239  ;;  %v8408_v62 = vpack.i.bf16 %v7294_v14, %v7293_v8  ;;  %v7302_v53 = vld [vmem:[%s19029_s0 + $0x158] sm:$0xff] }
 0x1bf   :  { %19659 = vst [vmem:[#allocation86_spill] sm:$0xff] %v11719_v2  ;;  %v11730_v52 = vpop.permute.xlu1 %8189  ;;  %v11732_v26 = vpop.permute.xlu0 %8184  ;;  %v7303_v2 = vld [vmem:[%s19029_s0 + $0x168] sm:$0xff]  ;;  %v7299_v39 = vld [vmem:[%s19029_s0 + $0x138] sm:$0xff] }
 0x1c0   :  { %19660 = vst [vmem:[#allocation87_spill] sm:$0xff] %v11730_v52 }
 0x1c1   :  { %19661 = vst [vmem:[#allocation88_spill] sm:$0xff] %v11732_v26  ;;  %v7310_v26 = vld [vmem:[%s19029_s0 + $0x1e8] sm:$0xff] }
 0x1c4   :  { %8419 = vrot.lane.b32.xlu2 %v8418_v27, %s10238_s16  ;;  %v8433_v27 = vpack.i.bf16 %v7304_v49, %v7303_v2  ;;  %v7307_v49 = vld [vmem:[%s19029_s0 + $0x198] sm:$0xff] }
 0x1c5   :  { %8414 = vrot.lane.b32.xlu1 %v8413_v38, %s10238_s16  ;;  %8409 = vrot.lane.b32.xlu0 %v8408_v62, %s10238_s16  ;;  %v7300_v62 = vld [vmem:[%s19029_s0 + $0x140] sm:$0xff]  ;;  %v8428_v38 = vpack.i.bf16 %v7302_v53, %v7301_v45 }
 0x1c6   :  { %v11746_v23 = vpop.permute.xlu2 %8254  ;;  %v8423_v52 = vpack.i.bf16 %v7300_v62, %v7299_v39  ;;  %v7308_v45 = vld [vmem:[%s19029_s0 + $0x1a0] sm:$0xff] }
 0x1c7   :  { %19662 = vst [vmem:[#allocation89_spill] sm:$0xff] %v11746_v23  ;;  %v11757_v8 = vpop.permute.xlu1 %8204  ;;  %v11759_v14 = vpop.permute.xlu0 %8199  ;;  %v7309_v23 = vld [vmem:[%s19029_s0 + $0x1e0] sm:$0xff] }
 0x1c8   :  { %19663 = vst [vmem:[#allocation90_spill] sm:$0xff] %v11757_v8  ;;  %v7305_v53 = vld [vmem:[%s19029_s0 + $0x180] sm:$0xff] }
 0x1c9   :  { %19664 = vst [vmem:[#allocation91_spill] sm:$0xff] %v11759_v14  ;;  %v7316_v14 = vld [vmem:[%s19029_s0 + $0x230] sm:$0xff] }
 0x1cc   :  { %8434 = vrot.lane.b32.xlu2 %v8433_v27, %s10238_s16  ;;  %v8448_v27 = vpack.i.bf16 %v7310_v26, %v7309_v23  ;;  %v7313_v26 = vld [vmem:[%s19029_s0 + $0x210] sm:$0xff] }
 0x1cd   :  { %8429 = vrot.lane.b32.xlu1 %v8428_v38, %s10238_s16  ;;  %8424 = vrot.lane.b32.xlu0 %v8423_v52, %s10238_s16  ;;  %v7306_v52 = vld [vmem:[%s19029_s0 + $0x188] sm:$0xff]  ;;  %v8443_v38 = vpack.i.bf16 %v7308_v45, %v7307_v49  ;;  %v7314_v49 = vld [vmem:[%s19029_s0 + $0x218] sm:$0xff] }
 0x1ce   :  { %v11773_v2 = vpop.permute.xlu2 %8269  ;;  %v8438_v8 = vpack.i.bf16 %v7306_v52, %v7305_v53  ;;  %v7311_v45 = vld [vmem:[%s19029_s0 + $0x1f8] sm:$0xff] }
 0x1cf   :  { %19665 = vst [vmem:[#allocation92_spill] sm:$0xff] %v11773_v2  ;;  %v11784_v39 = vpop.permute.xlu1 %8219  ;;  %v11786_v62 = vpop.permute.xlu0 %8214  ;;  %v7315_v2 = vld [vmem:[%s19029_s0 + $0x228] sm:$0xff] }
 0x1d0   :  { %19666 = vst [vmem:[#allocation93_spill] sm:$0xff] %v11784_v39  ;;  %v7322_v39 = vld [vmem:[%s19029_s0 + $0x278] sm:$0xff] }
 0x1d1   :  { %19667 = vst [vmem:[#allocation94_spill] sm:$0xff] %v11786_v62 }
 0x1d4   :  { %8449 = vrot.lane.b32.xlu2 %v8448_v27, %s10238_s16  ;;  %v8463_v27 = vpack.i.bf16 %v7316_v14, %v7315_v2  ;;  %v7319_v14 = vld [vmem:[%s19029_s0 + $0x258] sm:$0xff] }
 0x1d5   :  { %8444 = vrot.lane.b32.xlu1 %v8443_v38, %s10238_s16  ;;  %8439 = vrot.lane.b32.xlu0 %v8438_v8, %s10238_s16  ;;  %v7312_v8 = vld [vmem:[%s19029_s0 + $0x200] sm:$0xff]  ;;  %v8458_v38 = vpack.i.bf16 %v7314_v49, %v7313_v26 }
 0x1d6   :  { %v11800_v23 = vpop.permute.xlu2 %8284  ;;  %v8453_v62 = vpack.i.bf16 %v7312_v8, %v7311_v45  ;;  %v7320_v26 = vld [vmem:[%s19029_s0 + $0x260] sm:$0xff] }
 0x1d7   :  { %19668 = vst [vmem:[#allocation95_spill] sm:$0xff] %v11800_v23  ;;  %v11811_v53 = vpop.permute.xlu1 %8234  ;;  %v11813_v52 = vpop.permute.xlu0 %8229  ;;  %v7321_v23 = vld [vmem:[%s19029_s0 + $0x270] sm:$0xff]  ;;  %v7317_v49 = vld [vmem:[%s19029_s0 + $0x240] sm:$0xff] }
 0x1d8   :  { %19669 = vst [vmem:[#allocation96_spill] sm:$0xff] %v11811_v53  ;;  %v7328_v53 = vld [vmem:[%s19029_s0 + $0x2c0] sm:$0xff] }
 0x1d9   :  { %19670 = vst [vmem:[#allocation97_spill] sm:$0xff] %v11813_v52 }
 0x1dc   :  { %8464 = vrot.lane.b32.xlu2 %v8463_v27, %s10238_s16  ;;  %v8478_v27 = vpack.i.bf16 %v7322_v39, %v7321_v23  ;;  %v7325_v39 = vld [vmem:[%s19029_s0 + $0x2a0] sm:$0xff] }
 0x1dd   :  { %8459 = vrot.lane.b32.xlu1 %v8458_v38, %s10238_s16  ;;  %8454 = vrot.lane.b32.xlu0 %v8453_v62, %s10238_s16  ;;  %v7318_v62 = vld [vmem:[%s19029_s0 + $0x248] sm:$0xff]  ;;  %v8473_v38 = vpack.i.bf16 %v7320_v26, %v7319_v14 }
 0x1de   :  { %v11827_v2 = vpop.permute.xlu2 %8299  ;;  %v8468_v52 = vpack.i.bf16 %v7318_v62, %v7317_v49  ;;  %v7326_v14 = vld [vmem:[%s19029_s0 + $0x2a8] sm:$0xff] }
 0x1df   :  { %19671 = vst [vmem:[#allocation98_spill] sm:$0xff] %v11827_v2  ;;  %v11838_v45 = vpop.permute.xlu1 %8249  ;;  %v11840_v8 = vpop.permute.xlu0 %8244  ;;  %v7327_v2 = vld [vmem:[%s19029_s0 + $0x2b8] sm:$0xff]  ;;  %v7323_v26 = vld [vmem:[%s19029_s0 + $0x288] sm:$0xff] }
 0x1e0   :  { %19672 = vst [vmem:[#allocation99_spill] sm:$0xff] %v11838_v45  ;;  %v7334_v45 = vld [vmem:[%s19029_s0 + $0x308] sm:$0xff] }
 0x1e1   :  { %19673 = vst [vmem:[#allocation100_spill] sm:$0xff] %v11840_v8 }
 0x1e4   :  { %8479 = vrot.lane.b32.xlu2 %v8478_v27, %s10238_s16  ;;  %v8493_v27 = vpack.i.bf16 %v7328_v53, %v7327_v2  ;;  %v7331_v53 = vld [vmem:[%s19029_s0 + $0x2e8] sm:$0xff] }
 0x1e5   :  { %8474 = vrot.lane.b32.xlu1 %v8473_v38, %s10238_s16  ;;  %8469 = vrot.lane.b32.xlu0 %v8468_v52, %s10238_s16  ;;  %v7324_v52 = vld [vmem:[%s19029_s0 + $0x290] sm:$0xff]  ;;  %v8488_v38 = vpack.i.bf16 %v7326_v14, %v7325_v39 }
 0x1e6   :  { %v11854_v23 = vpop.permute.xlu2 %8314  ;;  %v8483_v8 = vpack.i.bf16 %v7324_v52, %v7323_v26  ;;  %v7332_v39 = vld [vmem:[%s19029_s0 + $0x2f0] sm:$0xff] }
 0x1e7   :  { %19674 = vst [vmem:[#allocation101_spill] sm:$0xff] %v11854_v23  ;;  %v11865_v49 = vpop.permute.xlu1 %8264  ;;  %v11867_v62 = vpop.permute.xlu0 %8259  ;;  %v7333_v23 = vld [vmem:[%s19029_s0 + $0x300] sm:$0xff]  ;;  %v7329_v14 = vld [vmem:[%s19029_s0 + $0x2d0] sm:$0xff] }
 0x1e8   :  { %19675 = vst [vmem:[#allocation102_spill] sm:$0xff] %v11865_v49  ;;  %v7340_v49 = vld [vmem:[%s19029_s0 + $0x350] sm:$0xff] }
 0x1e9   :  { %19676 = vst [vmem:[#allocation103_spill] sm:$0xff] %v11867_v62 }
 0x1ec   :  { %8494 = vrot.lane.b32.xlu2 %v8493_v27, %s10238_s16  ;;  %v8508_v27 = vpack.i.bf16 %v7334_v45, %v7333_v23  ;;  %v7337_v45 = vld [vmem:[%s19029_s0 + $0x330] sm:$0xff] }
 0x1ed   :  { %8489 = vrot.lane.b32.xlu1 %v8488_v38, %s10238_s16  ;;  %8484 = vrot.lane.b32.xlu0 %v8483_v8, %s10238_s16  ;;  %v7330_v8 = vld [vmem:[%s19029_s0 + $0x2d8] sm:$0xff]  ;;  %v8503_v38 = vpack.i.bf16 %v7332_v39, %v7331_v53 }
 0x1ee   :  { %v11881_v2 = vpop.permute.xlu2 %8329  ;;  %v8498_v62 = vpack.i.bf16 %v7330_v8, %v7329_v14  ;;  %v7338_v53 = vld [vmem:[%s19029_s0 + $0x338] sm:$0xff] }
 0x1ef   :  { %19677 = vst [vmem:[#allocation104_spill] sm:$0xff] %v11881_v2  ;;  %v11892_v26 = vpop.permute.xlu1 %8279  ;;  %v11894_v52 = vpop.permute.xlu0 %8274  ;;  %v7339_v2 = vld [vmem:[%s19029_s0 + $0x348] sm:$0xff]  ;;  %v7335_v39 = vld [vmem:[%s19029_s0 + $0x318] sm:$0xff] }
 0x1f0   :  { %19678 = vst [vmem:[#allocation105_spill] sm:$0xff] %v11892_v26  ;;  %v7346_v26 = vld [vmem:[%s19029_s0 + $0x69] sm:$0xff] }
 0x1f1   :  { %19679 = vst [vmem:[#allocation106_spill] sm:$0xff] %v11894_v52 }
 0x1f4   :  { %8509 = vrot.lane.b32.xlu2 %v8508_v27, %s10238_s16  ;;  %v8523_v27 = vpack.i.bf16 %v7340_v49, %v7339_v2  ;;  %v7343_v49 = vld [vmem:[%s19029_s0 + $0x49] sm:$0xff] }
 0x1f5   :  { %8504 = vrot.lane.b32.xlu1 %v8503_v38, %s10238_s16  ;;  %8499 = vrot.lane.b32.xlu0 %v8498_v62, %s10238_s16  ;;  %v7336_v62 = vld [vmem:[%s19029_s0 + $0x320] sm:$0xff]  ;;  %v8518_v38 = vpack.i.bf16 %v7338_v53, %v7337_v45  ;;  %v7344_v45 = vld [vmem:[%s19029_s0 + $0x51] sm:$0xff] }
 0x1f6   :  { %v11908_v23 = vpop.permute.xlu2 %8344  ;;  %v8513_v52 = vpack.i.bf16 %v7336_v62, %v7335_v39  ;;  %v7341_v53 = vld [vmem:[%s19029_s0 + $0x31] sm:$0xff] }
 0x1f7   :  { %19680 = vst [vmem:[#allocation107_spill] sm:$0xff] %v11908_v23  ;;  %v11919_v14 = vpop.permute.xlu1 %8294  ;;  %v11921_v8 = vpop.permute.xlu0 %8289  ;;  %v7345_v23 = vld [vmem:[%s19029_s0 + $0x61] sm:$0xff] }
 0x1f8   :  { %19681 = vst [vmem:[#allocation108_spill] sm:$0xff] %v11919_v14 }
 0x1f9   :  { %19682 = vst [vmem:[#allocation109_spill] sm:$0xff] %v11921_v8 }
 0x1fc   :  { %8524 = vrot.lane.b32.xlu2 %v8523_v27, %s10238_s16  ;;  %v8538_v27 = vpack.i.bf16 %v7346_v26, %v7345_v23  ;;  %v7349_v26 = vld [vmem:[%s19029_s0 + $0x91] sm:$0xff]  ;;  %v7592_v23 = vunpack.i.h.bf16 %v10543_v47 }
 0x1fd   :  { %8519 = vrot.lane.b32.xlu1 %v8518_v38, %s10238_s16  ;;  %8514 = vrot.lane.b32.xlu0 %v8513_v52, %s10238_s16  ;;  %v7342_v52 = vld [vmem:[%s19029_s0 + $0x39] sm:$0xff]  ;;  %v8533_v38 = vpack.i.bf16 %v7344_v45, %v7343_v49  ;;  %v7591_v49 = vunpack.i.l.bf16 %v10543_v47  ;;  %v7612_v47 = vunpack.i.h.bf16 %v10589_v3 }
 0x1fe   :  { %v11935_v2 = vpop.permute.xlu2 %8359  ;;  %v8528_v8 = vpack.i.bf16 %v7342_v52, %v7341_v53  ;;  %v7350_v53 = vld [vmem:[%s19029_s0 + $0x99] sm:$0xff]  ;;  %v7348_v52 = vld [vmem:[%s19029_s0 + $0x81] sm:$0xff] }
 0x1ff   :  { %19683 = vst [vmem:[#allocation110_spill] sm:$0xff] %v11935_v2  ;;  %v11946_v39 = vpop.permute.xlu1 %8309  ;;  %v11948_v62 = vpop.permute.xlu0 %8304  ;;  %v7351_v2 = vld [vmem:[%s19029_s0 + $0xa9] sm:$0xff] }
 0x200   :  { %19684 = vst [vmem:[#allocation111_spill] sm:$0xff] %v11946_v39  ;;  %v7352_v39 = vld [vmem:[%s19029_s0 + $0xb1] sm:$0xff] }
 0x201   :  { %19685 = vst [vmem:[#allocation112_spill] sm:$0xff] %v11948_v62  ;;  %v8553_v36 = vpack.i.bf16 %v7352_v39, %v7351_v2  ;;  %v12002_v2 = vsel %vm2653_vm0, %v10108_v17, %v7592_v23  ;;  %v10111_v23 = vld [vmem:[%s19029_s0 + $0xc0] sm:$0xff]  ;;  %v10114_v17 = vld [vmem:[%s19029_s0 + $0x110] sm:$0xff] }
 0x202   :  { %19689 = vst [vmem:[#allocation116_spill] sm:$0xff] %v12002_v2 }
 0x204   :  { %8539 = vrot.lane.b32.xlu2 %v8538_v27, %s10239_s11  ;;  %v7597_v27 = vunpack.i.h.bf16 %v10566_v57 }
 0x205   :  { %8534 = vrot.lane.b32.xlu1 %v8533_v38, %s10239_s11  ;;  %8529 = vrot.lane.b32.xlu0 %v8528_v8, %s10239_s11  ;;  %v7347_v8 = vld [vmem:[%s19029_s0 + $0x79] sm:$0xff]  ;;  %v7596_v38 = vunpack.i.l.bf16 %v10566_v57  ;;  %v8548_v57 = vpack.i.bf16 %v7350_v53, %v7349_v26  ;;  %v28_v53 = vld [vmem:[%s19029_s0 + $0x8] sm:$0xff] }
 0x206   :  { %v11964_v45 = vpop.permute.xlu2 %8374  ;;  %v8543_v61 = vpack.i.bf16 %v7348_v52, %v7347_v8  ;;  %v10110_v26 = vld [vmem:[%s19029_s0 + $0x80] sm:$0xff]  ;;  %v10112_v52 = vld [vmem:[%s19029_s0 + $0xc8] sm:$0xff] }
 0x207   :  { %19686 = vst [vmem:[#allocation113_spill] sm:$0xff] %v11964_v45  ;;  %v7611_v45 = vunpack.i.l.bf16 %v10589_v3  ;;  %v11979_v62 = vpop.permute.xlu1 %8324  ;;  %v11981_v14 = vpop.permute.xlu0 %8319  ;;  %v7572_v3 = vunpack.i.h.bf16 %v10625_v18  ;;  %v10109_v18 = vld [vmem:[%s19029_s0 + $0x78] sm:$0xff] }
 0x208   :  { %19687 = vst [vmem:[#allocation114_spill] sm:$0xff] %v11979_v62  ;;  %v11996_v62 = vsel %vm2653_vm0, %v10107_v13, %v7591_v49  ;;  %v12008_v39 = vsel %vm2653_vm0, %v10109_v18, %v7596_v38  ;;  %v12014_v49 = vsel %vm2653_vm0, %v10110_v26, %v7597_v27  ;;  %v12029_v38 = vsel %vm2653_vm0, %v10112_v52, %v7612_v47  ;;  %v10113_v27 = vld [vmem:[%s19029_s0 + $0x108] sm:$0xff]  ;;  %v7357_v47 = vld [vmem:[%s19029_s0 + $0xf1] sm:$0xff] }
 0x209   :  { %19688 = vst [vmem:[#allocation115_spill] sm:$0xff] %v11981_v14  ;;  %v27_v14 = vld [vmem:[%s19029_s0] sm:$0xff]  ;;  %v12023_v8 = vsel %vm2653_vm0, %v10111_v23, %v7611_v45  ;;  %v12035_v13 = vsel %vm2653_vm0, %v10113_v27, %v7626_v9  ;;  %v12041_v45 = vsel %vm2653_vm0, %v10114_v17, %v7627_v10  ;;  %v10115_v18 = vld [vmem:[%s19029_s0 + $0x30] sm:$0xff]  ;;  %v10116_v26 = vld [vmem:[%s19029_s0 + $0x38] sm:$0xff]  ;;  %v12071_v52 = vsel %vm2653_vm0, %v28_v53, %v7572_v3 }
 0x20a   :  { %19690 = vst [vmem:[#allocation117_spill] sm:$0xff] %v12023_v8  ;;  %v12051_v9 = vsel %vm2653_vm0, %v10115_v18, %v7581_v34  ;;  %v12057_v10 = vsel %vm2653_vm0, %v10116_v26, %v7582_v56  ;;  %v7358_v23 = vld [vmem:[%s19029_s0 + $0xf9] sm:$0xff]  ;;  %v7642_v56 = vunpack.i.h.bf16 %v10639_v25  ;;  %v7353_v27 = vld [vmem:[%s19029_s0 + $0xc1] sm:$0xff]  ;;  %v7354_v3 = vld [vmem:[%s19029_s0 + $0xc9] sm:$0xff]  ;;  %v7586_v53 = vunpack.i.l.bf16 %v10650_v29 }
 0x20b   :  { %19691 = vst [vmem:[#allocation118_spill] sm:$0xff] %v12029_v38  ;;  %v7355_v34 = vld [vmem:[%s19029_s0 + $0xd9] sm:$0xff]  ;;  %v7576_v17 = vunpack.i.l.bf16 %v10652_v30  ;;  %v7657_v18 = vunpack.i.h.bf16 %v10666_v37  ;;  %v7606_v38 = vunpack.i.l.bf16 %v10677_v41  ;;  %v8568_v8 = vpack.i.bf16 %v7358_v23, %v7357_v47  ;;  %v10119_v23 = vld [vmem:[%s19029_s0 + $0x48] sm:$0xff] }
 0x20c   :  { %19692 = vst [vmem:[#allocation119_spill] sm:$0xff] %v12035_v13  ;;  %8554 = vrot.lane.b32.xlu2 %v8553_v36, %s10239_s11  ;;  %v12060_v36 = vsel %vm2653_vm0, %v27_v14, %v7571_v15  ;;  %v7641_v15 = vunpack.i.l.bf16 %v10639_v25  ;;  %v7587_v14 = vunpack.i.h.bf16 %v10650_v29  ;;  %v7577_v25 = vunpack.i.h.bf16 %v10652_v30  ;;  %v10117_v30 = vld [vmem:[%s19029_s0 + $0x150] sm:$0xff] }
 0x20d   :  { %19693 = vst [vmem:[#allocation120_spill] sm:$0xff] %v12041_v45  ;;  %8549 = vrot.lane.b32.xlu1 %v8548_v57, %s10239_s11  ;;  %8544 = vrot.lane.b32.xlu0 %v8543_v61, %s10239_s11  ;;  %v7356_v61 = vld [vmem:[%s19029_s0 + $0xe1] sm:$0xff]  ;;  %v7656_v45 = vunpack.i.l.bf16 %v10666_v37  ;;  %v7607_v13 = vunpack.i.h.bf16 %v10677_v41  ;;  %v7601_v29 = vunpack.i.l.bf16 %v10679_v42  ;;  %v8558_v2 = vpack.i.bf16 %v7354_v3, %v7353_v27  ;;  %v10118_v37 = vld [vmem:[%s19029_s0 + $0x158] sm:$0xff] }
 0x20e   :  { %v12076_v57 = vpop.permute.xlu2 %8389  ;;  %v8563_v51 = vpack.i.bf16 %v7356_v61, %v7355_v34  ;;  %v12110_v41 = vsel %vm2653_vm0, %v10118_v37, %v7642_v56  ;;  %v7672_v47 = vunpack.i.h.bf16 %v10693_v50  ;;  %v7671_v42 = vunpack.i.l.bf16 %v10693_v50  ;;  %v10121_v56 = vld [vmem:[%s19029_s0 + $0x18] sm:$0xff]  ;;  %v10122_v27 = vld [vmem:[%s19029_s0 + $0x20] sm:$0xff]  ;;  %v10125_v37 = vld [vmem:[%s19029_s0 + $0xa8] sm:$0xff] }
 0x20f   :  { %19694 = vst [vmem:[#allocation121_spill] sm:$0xff] %v12076_v57  ;;  %v12091_v26 = vpop.permute.xlu1 %8339  ;;  %v12093_v57 = vpop.permute.xlu0 %8334  ;;  %v12118_v34 = vsel %vm2653_vm0, %v10119_v23, %v7586_v53  ;;  %v12130_v50 = vsel %vm2653_vm0, %v10121_v56, %v7576_v17  ;;  %v12136_v3 = vsel %vm2653_vm0, %v10122_v27, %v7577_v25  ;;  %v10123_v53 = vld [vmem:[%s19029_s0 + $0x1c8] sm:$0xff]  ;;  %v12154_v25 = vsel %vm2653_vm0, %v10125_v37, %v7606_v38  ;;  %v10126_v23 = vld [vmem:[%s19029_s0 + $0xb0] sm:$0xff]  ;;  %v10128_v56 = vld [vmem:[%s19029_s0 + $0x98] sm:$0xff] }
 0x210   :  { %19695 = vst [vmem:[#allocation122_spill] sm:$0xff] %v12091_v26  ;;  %v12104_v26 = vsel %vm2653_vm0, %v10117_v30, %v7641_v15  ;;  %v10120_v15 = vld [vmem:[%s19029_s0 + $0x50] sm:$0xff]  ;;  %v7621_v27 = vunpack.i.l.bf16 %v10704_v54  ;;  %v7616_v37 = vunpack.i.l.bf16 %v10706_v55 }
 0x211   :  { %19696 = vst [vmem:[#allocation123_spill] sm:$0xff] %v12093_v57  ;;  %v12124_v61 = vsel %vm2653_vm0, %v10120_v15, %v7587_v14  ;;  %v12142_v14 = vsel %vm2653_vm0, %v10123_v53, %v7656_v45  ;;  %v10124_v30 = vld [vmem:[%s19029_s0 + $0x1d0] sm:$0xff]  ;;  %v12160_v45 = vsel %vm2653_vm0, %v10126_v23, %v7607_v13  ;;  %v12176_v13 = vsel %vm2653_vm0, %v10128_v56, %v7602_v60  ;;  %v7361_v53 = vld [vmem:[%s19029_s0 + $0x121] sm:$0xff] }
 0x212   :  { %19697 = vst [vmem:[#allocation124_spill] sm:$0xff] %v12104_v26  ;;  %v12148_v17 = vsel %vm2653_vm0, %v10124_v30, %v7657_v18  ;;  %v7363_v18 = vld [vmem:[%s19029_s0 + $0x139] sm:$0xff]  ;;  %v10127_v15 = vld [vmem:[%s19029_s0 + $0x90] sm:$0xff]  ;;  %v7651_v26 = vunpack.i.l.bf16 %v10758_v19 }
 0x213   :  { %19698 = vst [vmem:[#allocation125_spill] sm:$0xff] %v12110_v41  ;;  %v12170_v38 = vsel %vm2653_vm0, %v10127_v15, %v7601_v29  ;;  %v7364_v29 = vld [vmem:[%s19029_s0 + $0x141] sm:$0xff]  ;;  %v10129_v60 = vld [vmem:[%s19029_s0 + $0x210] sm:$0xff]  ;;  %v7701_v41 = vunpack.i.l.bf16 %v10747_v12 }
 0x214   :  { %19699 = vst [vmem:[#allocation126_spill] sm:$0xff] %v12142_v14  ;;  %8569 = vrot.lane.b32.xlu2 %v8568_v8, %s10239_s11  ;;  %v7622_v8 = vunpack.i.h.bf16 %v10704_v54  ;;  %v12192_v30 = vsel %vm2653_vm0, %v10129_v60, %v7671_v42  ;;  %v10130_v54 = vld [vmem:[%s19029_s0 + $0x218] sm:$0xff]  ;;  %v7362_v15 = vld [vmem:[%s19029_s0 + $0x129] sm:$0xff]  ;;  %v7686_v60 = vunpack.i.l.bf16 %v10720_v63  ;;  %v8583_v14 = vpack.i.bf16 %v7364_v29, %v7363_v18 }
 0x215   :  { %19700 = vst [vmem:[#allocation127_spill] sm:$0xff] %v12148_v17  ;;  %8564 = vrot.lane.b32.xlu1 %v8563_v51, %s10239_s11  ;;  %8559 = vrot.lane.b32.xlu0 %v8558_v2, %s10239_s11  ;;  %v12198_v51 = vsel %vm2653_vm0, %v10130_v54, %v7672_v47  ;;  %v7617_v2 = vunpack.i.h.bf16 %v10706_v55  ;;  %v7359_v42 = vld [vmem:[%s19029_s0 + $0x109] sm:$0xff]  ;;  %v7360_v56 = vld [vmem:[%s19029_s0 + $0x111] sm:$0xff]  ;;  %v7687_v47 = vunpack.i.h.bf16 %v10720_v63  ;;  %v7637_v55 = vunpack.i.h.bf16 %v10731_v4 }
 0x216   :  { %19701 = vst [vmem:[#allocation128_spill] sm:$0xff] %v12160_v45  ;;  %v12202_v23 = vpop.permute.xlu2 %8404  ;;  %v7636_v54 = vunpack.i.l.bf16 %v10731_v4  ;;  %v7702_v17 = vunpack.i.h.bf16 %v10747_v12  ;;  %v8578_v63 = vpack.i.bf16 %v7362_v15, %v7361_v53  ;;  %v8573_v45 = vpack.i.bf16 %v7360_v56, %v7359_v42  ;;  %v10131_v4 = vld [vmem:[%s19029_s0 + $0xf0] sm:$0xff]  ;;  %v10133_v12 = vld [vmem:[%s19029_s0 + $0xd8] sm:$0xff]  ;;  %v10134_v15 = vld [vmem:[%s19029_s0 + $0xe0] sm:$0xff] }
 0x217   :  { %19702 = vst [vmem:[#allocation129_spill] sm:$0xff] %v12192_v30  ;;  %v12217_v57 = vpop.permute.xlu1 %8354  ;;  %v7631_v30 = vunpack.i.l.bf16 %v10733_v5  ;;  %v12242_v29 = vsel %vm2653_vm0, %v10133_v12, %v7616_v37  ;;  %v7652_v53 = vunpack.i.h.bf16 %v10758_v19  ;;  %v10135_v42 = vld [vmem:[%s19029_s0 + $0x258] sm:$0xff]  ;;  %v10136_v19 = vld [vmem:[%s19029_s0 + $0x260] sm:$0xff] }
 0x218   :  { %19703 = vst [vmem:[#allocation130_spill] sm:$0xff] %v12198_v51  ;;  %v7632_v51 = vunpack.i.h.bf16 %v10733_v5  ;;  %v10132_v5 = vld [vmem:[%s19029_s0 + $0xf8] sm:$0xff]  ;;  %v12258_v37 = vsel %vm2653_vm0, %v10135_v42, %v7686_v60  ;;  %v12264_v56 = vsel %vm2653_vm0, %v10136_v19, %v7687_v47  ;;  %v10138_v60 = vld [vmem:[%s19029_s0 + $0x140] sm:$0xff]  ;;  %v7647_v19 = vunpack.i.h.bf16 %v10760_v20 }
 0x219   :  { %19704 = vst [vmem:[#allocation131_spill] sm:$0xff] %v12202_v23  ;;  %v12219_v23 = vpop.permute.xlu0 %8349  ;;  %v12236_v18 = vsel %vm2653_vm0, %v10132_v5, %v7622_v8  ;;  %v12252_v8 = vsel %vm2653_vm0, %v10134_v15, %v7617_v2  ;;  %v60_v5 = vld [vmem:[%s19029_s0 + $0x1b8] sm:$0xff]  ;;  %v12279_v12 = vsel %vm2653_vm0, %v10138_v60, %v7637_v55  ;;  %v10139_v47 = vld [vmem:[%s19029_s0 + $0x120] sm:$0xff] }
 0x21a   :  { %19705 = vst [vmem:[#allocation132_spill] sm:$0xff] %v12217_v57  ;;  %v12285_v15 = vsel %vm2653_vm0, %v10139_v47, %v7631_v30  ;;  %v7369_v55 = vld [vmem:[%s19029_s0 + $0x181] sm:$0xff]  ;;  %v7646_v47 = vunpack.i.l.bf16 %v10760_v20  ;;  %v7667_v20 = vunpack.i.h.bf16 %v10779_v32  ;;  %v7732_v57 = vunpack.i.h.bf16 %v10792_v40 }
 0x21b   :  { %19706 = vst [vmem:[#allocation133_spill] sm:$0xff] %v12219_v23  ;;  %v12230_v23 = vsel %vm2653_vm0, %v10131_v4, %v7621_v27  ;;  %v59_v27 = vld [vmem:[%s19029_s0 + $0x1b0] sm:$0xff]  ;;  %v10137_v4 = vld [vmem:[%s19029_s0 + $0x138] sm:$0xff]  ;;  %v10141_v30 = vld [vmem:[%s19029_s0 + $0x2a0] sm:$0xff] }
 0x21c   :  { %19707 = vst [vmem:[#allocation134_spill] sm:$0xff] %v12258_v37  ;;  %v12270_v2 = vsel %vm2653_vm0, %v10137_v4, %v7636_v54  ;;  %v10140_v54 = vld [vmem:[%s19029_s0 + $0x128] sm:$0xff]  ;;  %8584 = vrot.lane.b32.xlu2 %v8583_v14, %s10239_s11  ;;  %v12302_v4 = vsel %vm2653_vm0, %v10141_v30, %v7701_v41  ;;  %v12311_v14 = vsel %vm2653_vm0, %v59_v27, %v7651_v26  ;;  %v7717_v26 = vunpack.i.h.bf16 %v10765_v24  ;;  %v7365_v30 = vld [vmem:[%s19029_s0 + $0x151] sm:$0xff] }
 0x21d   :  { %19708 = vst [vmem:[#allocation135_spill] sm:$0xff] %v12264_v56  ;;  %v12291_v42 = vsel %vm2653_vm0, %v10140_v54, %v7632_v51  ;;  %v10142_v51 = vld [vmem:[%s19029_s0 + $0x2a8] sm:$0xff]  ;;  %8579 = vrot.lane.b32.xlu1 %v8578_v63, %s10239_s11  ;;  %8574 = vrot.lane.b32.xlu0 %v8573_v45, %s10239_s11  ;;  %v7716_v27 = vunpack.i.l.bf16 %v10765_v24  ;;  %v7368_v45 = vld [vmem:[%s19029_s0 + $0x171] sm:$0xff]  ;;  %v7662_v24 = vunpack.i.h.bf16 %v10781_v33  ;;  %v7682_v56 = vunpack.i.h.bf16 %v10803_v46 }
 0x21e   :  { %19709 = vst [vmem:[#allocation136_spill] sm:$0xff] %v12270_v2  ;;  %v12308_v60 = vsel %vm2653_vm0, %v10142_v51, %v7702_v17  ;;  %v7370_v41 = vld [vmem:[%s19029_s0 + $0x189] sm:$0xff]  ;;  %v12323_v17 = vsel %vm2653_vm0, %v60_v5, %v7652_v53  ;;  %v12328_v63 = vpop.permute.xlu2 %8419  ;;  %v7366_v53 = vld [vmem:[%s19029_s0 + $0x159] sm:$0xff]  ;;  %v7666_v5 = vunpack.i.l.bf16 %v10779_v32  ;;  %v7661_v51 = vunpack.i.l.bf16 %v10781_v33 }
 0x21f   :  { %19710 = vst [vmem:[#allocation137_spill] sm:$0xff] %v12279_v12  ;;  %v7367_v54 = vld [vmem:[%s19029_s0 + $0x169] sm:$0xff]  ;;  %v7681_v37 = vunpack.i.l.bf16 %v10803_v46  ;;  %v7676_v32 = vunpack.i.l.bf16 %v10805_v48  ;;  %v8588_v2 = vpack.i.bf16 %v7366_v53, %v7365_v30  ;;  %v10149_v30 = vld [vmem:[%s19029_s0 + $0x1e0] sm:$0xff]  ;;  %v7746_v53 = vunpack.i.l.bf16 %v10819_v59 }
 0x220   :  { %19711 = vst [vmem:[#allocation138_spill] sm:$0xff] %v12302_v4  ;;  %v7731_v4 = vunpack.i.l.bf16 %v10792_v40  ;;  %v8593_v12 = vpack.i.bf16 %v7368_v45, %v7367_v54  ;;  %v10143_v33 = vld [vmem:[%s19029_s0 + $0x168] sm:$0xff]  ;;  %v10144_v40 = vld [vmem:[%s19029_s0 + $0x170] sm:$0xff]  ;;  %v10147_v54 = vld [vmem:[%s19029_s0 + $0x1f8] sm:$0xff] }
 0x221   :  { %19712 = vst [vmem:[#allocation139_spill] sm:$0xff] %v12308_v60  ;;  %v12345_v60 = vpop.permute.xlu0 %8364  ;;  %v12362_v46 = vsel %vm2653_vm0, %v10144_v40, %v7647_v19  ;;  %v12380_v19 = vsel %vm2653_vm0, %v10147_v54, %v7666_v5  ;;  %v10148_v45 = vld [vmem:[%s19029_s0 + $0x200] sm:$0xff]  ;;  %v10150_v5 = vld [vmem:[%s19029_s0 + $0x1e8] sm:$0xff]  ;;  %v12407_v40 = vsel %vm2718_vm1, %v12071_v52, %v7732_v57  ;;  %v7697_v54 = vunpack.i.h.bf16 %v10830_v0 }
 0x222   :  { %19713 = vst [vmem:[#allocation140_spill] sm:$0xff] %v12311_v14  ;;  %v7677_v14 = vunpack.i.h.bf16 %v10805_v48  ;;  %v10145_v48 = vld [vmem:[%s19029_s0 + $0x2e8] sm:$0xff] }
 0x223   :  { %19714 = vst [vmem:[#allocation141_spill] sm:$0xff] %v12323_v17  ;;  %v8598_v17 = vpack.i.bf16 %v7370_v41, %v7369_v55  ;;  %v12368_v55 = vsel %vm2653_vm0, %v10145_v48, %v7716_v27  ;;  %v10146_v41 = vld [vmem:[%s19029_s0 + $0x2f0] sm:$0xff]  ;;  %v12386_v27 = vsel %vm2653_vm0, %v10148_v45, %v7667_v20  ;;  %v12403_v20 = vsel %vm2718_vm1, %v12060_v36, %v7731_v4  ;;  %v10152_v36 = vld [vmem:[%s19029_s0 + $0x248] sm:$0xff] }
 0x224   :  { %19715 = vst [vmem:[#allocation142_spill] sm:$0xff] %v12328_v63  ;;  %v12343_v63 = vpop.permute.xlu1 %8369  ;;  %v12423_v52 = vsel %vm2653_vm0, %v10152_v36, %v7682_v56  ;;  %v10153_v57 = vld [vmem:[%s19029_s0 + $0x228] sm:$0xff]  ;;  %v10154_v4 = vld [vmem:[%s19029_s0 + $0x230] sm:$0xff]  ;;  %v7696_v45 = vunpack.i.l.bf16 %v10830_v0  ;;  %v12463_v0 = vsel %vm2718_vm1, %v12118_v34, %v7746_v53  ;;  %v7712_v36 = vunpack.i.h.bf16 %v10857_v21 }
 0x225   :  { %19716 = vst [vmem:[#allocation143_spill] sm:$0xff] %v12343_v63  ;;  %v12356_v63 = vsel %vm2653_vm0, %v10143_v33, %v7646_v47  ;;  %v12374_v47 = vsel %vm2653_vm0, %v10146_v41, %v7717_v26  ;;  %v12392_v26 = vsel %vm2653_vm0, %v10149_v30, %v7661_v51  ;;  %v12399_v33 = vsel %vm2653_vm0, %v10150_v5, %v7662_v24  ;;  %v10151_v51 = vld [vmem:[%s19029_s0 + $0x240] sm:$0xff] }
 0x226   :  { %19717 = vst [vmem:[#allocation144_spill] sm:$0xff] %v12345_v60  ;;  %v12413_v48 = vsel %vm2653_vm0, %v10151_v51, %v7681_v37  ;;  %8599 = vrot.lane.b32.xlu2 %v8598_v17, %s10239_s11  ;;  %v7375_v24 = vld [vmem:[%s19029_s0 + $0x1f9] sm:$0xff]  ;;  %v12429_v37 = vsel %vm2653_vm0, %v10153_v57, %v7676_v32  ;;  %v12435_v17 = vsel %vm2653_vm0, %v10154_v4, %v7677_v14  ;;  %v7747_v41 = vunpack.i.h.bf16 %v10819_v59  ;;  %v7376_v56 = vld [vmem:[%s19029_s0 + $0x201] sm:$0xff]  ;;  %v12450_v30 = vpop.permute.xlu2 %8434 }
 0x227   :  { %19718 = vst [vmem:[#allocation145_spill] sm:$0xff] %v12403_v20  ;;  %8594 = vrot.lane.b32.xlu1 %v8593_v12, %s10239_s11  ;;  %8589 = vrot.lane.b32.xlu0 %v8588_v2, %s10239_s11  ;;  %v7373_v32 = vld [vmem:[%s19029_s0 + $0x1e1] sm:$0xff]  ;;  %v7692_v14 = vunpack.i.h.bf16 %v10832_v1  ;;  %v7691_v59 = vunpack.i.l.bf16 %v10832_v1  ;;  %v7374_v2 = vld [vmem:[%s19029_s0 + $0x1e9] sm:$0xff]  ;;  %v7762_v1 = vunpack.i.h.bf16 %v10846_v11  ;;  %v7761_v51 = vunpack.i.l.bf16 %v10846_v11 }
 0x228   :  { %19719 = vst [vmem:[#allocation146_spill] sm:$0xff] %v12407_v40  ;;  %v7371_v12 = vld [vmem:[%s19029_s0 + $0x199] sm:$0xff]  ;;  %v7372_v5 = vld [vmem:[%s19029_s0 + $0x1a1] sm:$0xff]  ;;  %v7711_v60 = vunpack.i.l.bf16 %v10857_v21  ;;  %v7706_v40 = vunpack.i.l.bf16 %v10859_v22  ;;  %v8613_v20 = vpack.i.bf16 %v7376_v56, %v7375_v24  ;;  %v12477_v34 = vsel %vm2718_vm1, %v12124_v61, %v7747_v41  ;;  %v10156_v21 = vld [vmem:[%s19029_s0 + $0x290] sm:$0xff] }
 0x229   :  { %19720 = vst [vmem:[#allocation147_spill] sm:$0xff] %v12450_v30  ;;  %v12470_v4 = vpop.permute.xlu0 %8379  ;;  %v7707_v30 = vunpack.i.h.bf16 %v10859_v22  ;;  %v7776_v53 = vunpack.i.l.bf16 %v10873_v35  ;;  %v8608_v11 = vpack.i.bf16 %v7374_v2, %v7373_v32  ;;  %v12490_v22 = vsel %vm2653_vm0, %v10156_v21, %v7697_v54  ;;  %v10157_v41 = vld [vmem:[%s19029_s0 + $0x270] sm:$0xff]  ;;  %v10158_v32 = vld [vmem:[%s19029_s0 + $0x278] sm:$0xff] }
 0x22a   :  { %19721 = vst [vmem:[#allocation148_spill] sm:$0xff] %v12463_v0  ;;  %v8603_v0 = vpack.i.bf16 %v7372_v5, %v7371_v12  ;;  %v7777_v61 = vunpack.i.h.bf16 %v10873_v35  ;;  %v7726_v24 = vunpack.i.l.bf16 %v10884_v43  ;;  %v12498_v56 = vsel %vm2653_vm0, %v10157_v41, %v7691_v59  ;;  %v10159_v59 = vld [vmem:[%s19029_s0 + $0x2d0] sm:$0xff]  ;;  %v10162_v5 = vld [vmem:[%s19029_s0 + $0x2c0] sm:$0xff] }
 0x22b   :  { %19723 = vst [vmem:[#allocation150_spill] sm:$0xff] %v12470_v4  ;;  %v12508_v54 = vsel %vm2718_vm1, %v12170_v38, %v7761_v51  ;;  %v12512_v35 = vsel %vm2718_vm1, %v12176_v13, %v7762_v1  ;;  %v12518_v2 = vsel %vm2653_vm0, %v10159_v59, %v7711_v60  ;;  %v10161_v38 = vld [vmem:[%s19029_s0 + $0x2b8] sm:$0xff]  ;;  %v12536_v60 = vsel %vm2653_vm0, %v10162_v5, %v7707_v30  ;;  %v7381_v1 = vld [vmem:[%s19029_s0 + $0x241] sm:$0xff]  ;;  %v7379_v30 = vld [vmem:[%s19029_s0 + $0x229] sm:$0xff] }
 0x22c   :  { %v12468_v57 = vpop.permute.xlu1 %8384  ;;  %v12530_v13 = vsel %vm2653_vm0, %v10161_v38, %v7706_v40  ;;  %v12544_v51 = vsel %vm2718_vm1, %v12242_v29, %v7776_v53  ;;  %v7727_v40 = vunpack.i.h.bf16 %v10884_v43  ;;  %v12559_v29 = vsel %vm2718_vm1, %v12252_v8, %v7777_v61  ;;  %v10163_v43 = vld [vmem:[%s19029_s0 + $0x318] sm:$0xff] }
 0x22d   :  { %19722 = vst [vmem:[#allocation149_spill] sm:$0xff] %v12468_v57  ;;  %v10155_v57 = vld [vmem:[%s19029_s0 + $0x288] sm:$0xff]  ;;  %v7791_v53 = vunpack.i.l.bf16 %v10900_v58  ;;  %v7380_v21 = vld [vmem:[%s19029_s0 + $0x231] sm:$0xff]  ;;  %v7378_v61 = vld [vmem:[%s19029_s0 + $0x219] sm:$0xff]  ;;  %v7741_v41 = vunpack.i.l.bf16 %v10914_v6  ;;  %v7807_v38 = vunpack.i.h.bf16 %v10927_v16  ;;  %v7806_v5 = vunpack.i.l.bf16 %v10927_v16 }
 0x22e   :  { %v12484_v4 = vsel %vm2653_vm0, %v10155_v57, %v7696_v45  ;;  %v12504_v45 = vsel %vm2653_vm0, %v10158_v32, %v7692_v14  ;;  %v10160_v14 = vld [vmem:[%s19029_s0 + $0x2d8] sm:$0xff]  ;;  %8614 = vrot.lane.b32.xlu2 %v8613_v20, %s10239_s11  ;;  %19724 = vst [vmem:[#allocation151_spill] sm:$0xff] %v12544_v51  ;;  %v7721_v57 = vunpack.i.l.bf16 %v10886_v44  ;;  %v7382_v20 = vld [vmem:[%s19029_s0 + $0x249] sm:$0xff]  ;;  %v7736_v32 = vunpack.i.l.bf16 %v10916_v7  ;;  %v10165_v16 = vld [vmem:[%s19029_s0 + $0x300] sm:$0xff] }
 0x22f   :  { %v12524_v12 = vsel %vm2653_vm0, %v10160_v14, %v7712_v36  ;;  %v7722_v36 = vunpack.i.h.bf16 %v10886_v44  ;;  %8609 = vrot.lane.b32.xlu1 %v8608_v11, %s10239_s11  ;;  %8604 = vrot.lane.b32.xlu0 %v8603_v0, %s10239_s11  ;;  %19725 = vst [vmem:[#allocation152_spill] sm:$0xff] %v12559_v29  ;;  %v12565_v44 = vsel %vm2653_vm0, %v10163_v43, %v7726_v24  ;;  %v7792_v0 = vunpack.i.h.bf16 %v10900_v58  ;;  %v12569_v11 = vpop.permute.xlu2 %8449  ;;  %v7377_v8 = vld [vmem:[%s19029_s0 + $0x211] sm:$0xff] }
 0x230   :  { %19726 = vst [vmem:[#allocation153_spill] sm:$0xff] %v12565_v44  ;;  %v7742_v24 = vunpack.i.h.bf16 %v10914_v6  ;;  %v7737_v58 = vunpack.i.h.bf16 %v10916_v7  ;;  %v7757_v43 = vunpack.i.h.bf16 %v10938_v28  ;;  %v8628_v44 = vpack.i.bf16 %v7382_v20, %v7381_v1  ;;  %v10164_v7 = vld [vmem:[%s19029_s0 + $0x320] sm:$0xff] }
 0x231   :  { %19727 = vst [vmem:[#allocation154_spill] sm:$0xff] %v12569_v11  ;;  %v12586_v14 = vpop.permute.xlu0 %8394  ;;  %v7756_v11 = vunpack.i.l.bf16 %v10938_v28  ;;  %v7751_v29 = vunpack.i.l.bf16 %v10940_v31  ;;  %v8623_v6 = vpack.i.bf16 %v7380_v21, %v7379_v30  ;;  %v8618_v51 = vpack.i.bf16 %v7378_v61, %v7377_v8  ;;  %v10166_v28 = vld [vmem:[%s19029_s0 + $0x308] sm:$0xff]  ;;  %v7383_v8 = vld [vmem:[%s19029_s0 + $0x259] sm:$0xff] }
 0x232   :  { %19729 = vst [vmem:[#allocation156_spill] sm:$0xff] %v12586_v14  ;;  %v12603_v14 = vsel %vm2653_vm0, %v10165_v16, %v7721_v57  ;;  %v12609_v1 = vsel %vm2653_vm0, %v10166_v28, %v7722_v36  ;;  %v7752_v20 = vunpack.i.h.bf16 %v10940_v31  ;;  %v12618_v30 = vsel %vm2718_vm1, %v12291_v42, %v7792_v0  ;;  %v7384_v61 = vld [vmem:[%s19029_s0 + $0x261] sm:$0xff] }
 0x233   :  { %19731 = vst [vmem:[#allocation158_spill] sm:$0xff] %v12618_v30  ;;  %v12622_v57 = vsel %vm2718_vm1, %v12051_v9, %v7741_v41  ;;  %v12626_v21 = vsel %vm2718_vm1, %v12057_v10, %v7742_v24  ;;  %v12630_v36 = vsel %vm2718_vm1, %v12130_v50, %v7736_v32  ;;  %v12634_v31 = vsel %vm2718_vm1, %v12136_v3, %v7737_v58  ;;  %v7387_v10 = vld [vmem:[%s19029_s0 + $0x289] sm:$0xff]  ;;  %v19742_v16 = vld [vmem:[#allocation6_spill] sm:$0xff] }
 0x234   :  { %v12584_v59 = vpop.permute.xlu1 %8399  ;;  %v12642_v9 = vsel %vm2718_vm1, %v12362_v46, %v7807_v38  ;;  %v12650_v50 = vsel %vm2718_vm1, %v12008_v39, %v7756_v11  ;;  %v12654_v3 = vsel %vm2718_vm1, %v12014_v49, %v7757_v43  ;;  %v12658_v42 = vsel %vm2718_vm1, %v11996_v62, %v7751_v29  ;;  %v7385_v39 = vld [vmem:[%s19029_s0 + $0x271] sm:$0xff]  ;;  %v19736_v29 = vld [vmem:[#allocation3_spill] sm:$0xff] }
 0x235   :  { %19728 = vst [vmem:[#allocation155_spill] sm:$0xff] %v12584_v59  ;;  %v12597_v59 = vsel %vm2653_vm0, %v10164_v7, %v7727_v40  ;;  %v12614_v40 = vsel %vm2718_vm1, %v12285_v15, %v7791_v53  ;;  %v12638_v15 = vsel %vm2718_vm1, %v12356_v63, %v7806_v5  ;;  %v7388_v63 = vld [vmem:[%s19029_s0 + $0x291] sm:$0xff]  ;;  %v7772_v53 = vunpack.i.h.bf16 %v19736_v29 }
 0x236   :  { %19730 = vst [vmem:[#allocation157_spill] sm:$0xff] %v12597_v59  ;;  %8629 = vrot.lane.b32.xlu2 %v8628_v44, %s10239_s11  ;;  %v19734_v46 = vld [vmem:[#allocation116_spill] sm:$0xff]  ;;  %v19735_v44 = vld [vmem:[#allocation2_spill] sm:$0xff]  ;;  %v7771_v24 = vunpack.i.l.bf16 %v19736_v29  ;;  %v19739_v38 = vld [vmem:[#allocation5_spill] sm:$0xff]  ;;  %v7787_v28 = vunpack.i.h.bf16 %v19742_v16 }
 0x237   :  { %19732 = vst [vmem:[#allocation159_spill] sm:$0xff] %v12638_v15  ;;  %8624 = vrot.lane.b32.xlu1 %v8623_v6, %s10239_s11  ;;  %8619 = vrot.lane.b32.xlu0 %v8618_v51, %s10239_s11  ;;  %v12670_v49 = vsel %vm2718_vm1, %v19734_v46, %v7752_v20  ;;  %v7822_v0 = vunpack.i.h.bf16 %v19735_v44  ;;  %v7821_v62 = vunpack.i.l.bf16 %v19735_v44  ;;  %v12675_v11 = vpop.permute.xlu2 %8464  ;;  %v7386_v51 = vld [vmem:[%s19029_s0 + $0x279] sm:$0xff]  ;;  %v19738_v41 = vld [vmem:[#allocation4_spill] sm:$0xff]  ;;  %v7837_v5 = vunpack.i.h.bf16 %v19739_v38  ;;  %v19743_v44 = vld [vmem:[#allocation7_spill] sm:$0xff] }
 0x238   :  { %19733 = vst [vmem:[#allocation160_spill] sm:$0xff] %v12642_v9  ;;  %v7767_v58 = vunpack.i.h.bf16 %v19738_v41  ;;  %v7766_v32 = vunpack.i.l.bf16 %v19738_v41  ;;  %v7836_v7 = vunpack.i.l.bf16 %v19739_v38  ;;  %v7786_v20 = vunpack.i.l.bf16 %v19742_v16  ;;  %v19746_v38 = vld [vmem:[#allocation8_spill] sm:$0xff]  ;;  %v19747_v16 = vld [vmem:[#allocation117_spill] sm:$0xff] }
 0x239   :  { %19737 = vst [vmem:[#allocation116_spill] sm:$0xff] %v12675_v11  ;;  %v12692_v6 = vpop.permute.xlu0 %8409  ;;  %v8643_v46 = vpack.i.bf16 %v7388_v63, %v7387_v10  ;;  %v7782_v59 = vunpack.i.h.bf16 %v19743_v44  ;;  %v7781_v29 = vunpack.i.l.bf16 %v19743_v44  ;;  %v8638_v11 = vpack.i.bf16 %v7386_v51, %v7385_v39  ;;  %v19748_v63 = vld [vmem:[#allocation118_spill] sm:$0xff]  ;;  %v19771_v30 = vld [vmem:[#allocation136_spill] sm:$0xff] }
 0x23a   :  { %19741 = vst [vmem:[#allocation3_spill] sm:$0xff] %v12692_v6  ;;  %v8633_v9 = vpack.i.bf16 %v7384_v61, %v7383_v8  ;;  %v12701_v41 = vsel %vm2718_vm1, %v12392_v26, %v7821_v62  ;;  %v12705_v6 = vsel %vm2718_vm1, %v12399_v33, %v7822_v0  ;;  %v7851_v15 = vunpack.i.l.bf16 %v19746_v38  ;;  %v19749_v62 = vld [vmem:[#allocation128_spill] sm:$0xff]  ;;  %v19752_v8 = vld [vmem:[#allocation119_spill] sm:$0xff] }
 0x23b   :  { %19744 = vst [vmem:[#allocation4_spill] sm:$0xff] %v12701_v41  ;;  %v12711_v10 = vsel %vm2718_vm1, %v19747_v16, %v7771_v24  ;;  %v12715_v39 = vsel %vm2718_vm1, %v19748_v63, %v7772_v53  ;;  %v12719_v26 = vsel %vm2718_vm1, %v12154_v25, %v7766_v32  ;;  %v12723_v33 = vsel %vm2718_vm1, %v19749_v62, %v7767_v58  ;;  %v19754_v61 = vld [vmem:[#allocation120_spill] sm:$0xff]  ;;  %v19756_v58 = vld [vmem:[#allocation9_spill] sm:$0xff]  ;;  %v7389_v44 = vld [vmem:[%s19029_s0 + $0x2a1] sm:$0xff] }
 0x23c   :  { %v12690_v43 = vpop.permute.xlu1 %8414  ;;  %19745 = vst [vmem:[#allocation5_spill] sm:$0xff] %v12705_v6  ;;  %v12727_v0 = vsel %vm2718_vm1, %v12429_v37, %v7836_v7  ;;  %v12731_v51 = vsel %vm2718_vm1, %v12435_v17, %v7837_v5  ;;  %v12735_v53 = vsel %vm2718_vm1, %v19752_v8, %v7786_v20  ;;  %v12739_v25 = vsel %vm2718_vm1, %v19754_v61, %v7787_v28  ;;  %v7393_v24 = vld [vmem:[%s19029_s0 + $0x2d1] sm:$0xff]  ;;  %v7394_v7 = vld [vmem:[%s19029_s0 + $0x2d9] sm:$0xff] }
 0x23d   :  { %19740 = vst [vmem:[#allocation2_spill] sm:$0xff] %v12690_v43  ;;  %v7852_v43 = vunpack.i.h.bf16 %v19746_v38  ;;  %v12747_v37 = vsel %vm2718_vm1, %v12230_v23, %v7781_v29  ;;  %v12751_v17 = vsel %vm2718_vm1, %v12236_v18, %v7782_v59  ;;  %v7802_v32 = vunpack.i.h.bf16 %v19756_v58  ;;  %v7391_v23 = vld [vmem:[%s19029_s0 + $0x2b9] sm:$0xff]  ;;  %v19762_v29 = vld [vmem:[#allocation12_spill] sm:$0xff] }
 0x23e   :  { %19750 = vst [vmem:[#allocation6_spill] sm:$0xff] %v12727_v0  ;;  %8644 = vrot.lane.b32.xlu2 %v8643_v46, %s10239_s11  ;;  %v7801_v5 = vunpack.i.l.bf16 %v19756_v58  ;;  %v12765_v18 = vsel %vm2718_vm1, %v12498_v56, %v7851_v15  ;;  %v19759_v28 = vld [vmem:[#allocation10_spill] sm:$0xff]  ;;  %v7390_v56 = vld [vmem:[%s19029_s0 + $0x2a9] sm:$0xff]  ;;  %v7817_v38 = vunpack.i.h.bf16 %v19762_v29  ;;  %v7816_v16 = vunpack.i.l.bf16 %v19762_v29  ;;  %v19765_v8 = vld [vmem:[#allocation13_spill] sm:$0xff] }
 0x23f   :  { %19751 = vst [vmem:[#allocation7_spill] sm:$0xff] %v12731_v51  ;;  %8639 = vrot.lane.b32.xlu1 %v8638_v11, %s10239_s11  ;;  %8634 = vrot.lane.b32.xlu0 %v8633_v9, %s10239_s11  ;;  %v12769_v59 = vsel %vm2718_vm1, %v12504_v45, %v7852_v43  ;;  %v7797_v11 = vunpack.i.h.bf16 %v19759_v28  ;;  %v7796_v9 = vunpack.i.l.bf16 %v19759_v28  ;;  %v12773_v20 = vpop.permute.xlu2 %8479  ;;  %v7392_v46 = vld [vmem:[%s19029_s0 + $0x2c1] sm:$0xff]  ;;  %v7812_v61 = vunpack.i.h.bf16 %v19765_v8  ;;  %v19768_v41 = vld [vmem:[#allocation124_spill] sm:$0xff] }
 0x240   :  { %19753 = vst [vmem:[#allocation8_spill] sm:$0xff] %v12735_v53  ;;  %v19761_v45 = vld [vmem:[#allocation11_spill] sm:$0xff]  ;;  %v7811_v58 = vunpack.i.l.bf16 %v19765_v8  ;;  %v19766_v28 = vld [vmem:[#allocation14_spill] sm:$0xff]  ;;  %v8653_v0 = vpack.i.bf16 %v7392_v46, %v7391_v23  ;;  %v8648_v6 = vpack.i.bf16 %v7390_v56, %v7389_v44  ;;  %v12799_v29 = vsel %vm2718_vm1, %v19768_v41, %v7801_v5  ;;  %v19770_v8 = vld [vmem:[#allocation16_spill] sm:$0xff] }
 0x241   :  { %19755 = vst [vmem:[#allocation117_spill] sm:$0xff] %v12739_v25  ;;  %v7867_v15 = vunpack.i.h.bf16 %v19761_v45  ;;  %v7866_v43 = vunpack.i.l.bf16 %v19761_v45  ;;  %v12790_v62 = vpop.permute.xlu0 %8424  ;;  %v19767_v51 = vld [vmem:[#allocation15_spill] sm:$0xff]  ;;  %v7826_v53 = vunpack.i.l.bf16 %v19770_v8  ;;  %v19775_v5 = vld [vmem:[#allocation126_spill] sm:$0xff]  ;;  %v19778_v44 = vld [vmem:[#allocation141_spill] sm:$0xff] }
 0x242   :  { %19757 = vst [vmem:[#allocation118_spill] sm:$0xff] %v12765_v18  ;;  %v7881_v18 = vunpack.i.l.bf16 %v19766_v28  ;;  %v7831_v45 = vunpack.i.l.bf16 %v19767_v51  ;;  %v7832_v25 = vunpack.i.h.bf16 %v19767_v51  ;;  %v12825_v51 = vsel %vm2718_vm1, %v19775_v5, %v7816_v16  ;;  %v19776_v46 = vld [vmem:[#allocation127_spill] sm:$0xff] }
 0x243   :  { %19758 = vst [vmem:[#allocation128_spill] sm:$0xff] %v12769_v59  ;;  %v8658_v59 = vpack.i.bf16 %v7394_v7, %v7393_v24  ;;  %v12809_v24 = vsel %vm2718_vm1, %v19771_v30, %v7796_v9  ;;  %v19772_v7 = vld [vmem:[#allocation137_spill] sm:$0xff]  ;;  %v12817_v41 = vsel %vm2718_vm1, %v12530_v13, %v7866_v43  ;;  %v12829_v30 = vsel %vm2718_vm1, %v19776_v46, %v7817_v38  ;;  %v19777_v9 = vld [vmem:[#allocation140_spill] sm:$0xff] }
 0x244   :  { %19760 = vst [vmem:[#allocation119_spill] sm:$0xff] %v12773_v20  ;;  %v12788_v63 = vpop.permute.xlu1 %8429  ;;  %v7882_v20 = vunpack.i.h.bf16 %v19766_v28  ;;  %v12813_v23 = vsel %vm2718_vm1, %v19772_v7, %v7797_v11  ;;  %v12833_v11 = vsel %vm2718_vm1, %v19777_v9, %v7811_v58  ;;  %v12837_v13 = vsel %vm2718_vm1, %v19778_v44, %v7812_v61  ;;  %v19781_v43 = vld [vmem:[#allocation129_spill] sm:$0xff]  ;;  %v7398_v58 = vld [vmem:[%s19029_s0 + $0x309] sm:$0xff] }
 0x245   :  { %19763 = vst [vmem:[#allocation120_spill] sm:$0xff] %v12788_v63  ;;  %v19769_v63 = vld [vmem:[#allocation125_spill] sm:$0xff]  ;;  %v12845_v56 = vsel %vm2718_vm1, %v12603_v14, %v7881_v18  ;;  %v12853_v38 = vsel %vm2718_vm1, %v19781_v43, %v7831_v45  ;;  %v7827_v16 = vunpack.i.h.bf16 %v19770_v8  ;;  %v7397_v14 = vld [vmem:[%s19029_s0 + $0x301] sm:$0xff]  ;;  %v7395_v28 = vld [vmem:[%s19029_s0 + $0x2e9] sm:$0xff] }
 0x246   :  { %19764 = vst [vmem:[#allocation9_spill] sm:$0xff] %v12790_v62  ;;  %v12803_v62 = vsel %vm2718_vm1, %v19769_v63, %v7802_v32  ;;  %v12821_v32 = vsel %vm2718_vm1, %v12536_v60, %v7867_v15  ;;  %8659 = vrot.lane.b32.xlu2 %v8658_v59, %s10239_s11  ;;  %v7399_v60 = vld [vmem:[%s19029_s0 + $0x319] sm:$0xff]  ;;  %v12849_v15 = vsel %vm2718_vm1, %v12609_v1, %v7882_v20  ;;  %v7400_v59 = vld [vmem:[%s19029_s0 + $0x321] sm:$0xff]  ;;  %v19790_v44 = vld [vmem:[#allocation20_spill] sm:$0xff] }
 0x247   :  { %19773 = vst [vmem:[#allocation10_spill] sm:$0xff] %v12817_v41  ;;  %8654 = vrot.lane.b32.xlu1 %v8653_v0, %s10239_s11  ;;  %8649 = vrot.lane.b32.xlu0 %v8648_v6, %s10239_s11  ;;  %v19782_v1 = vld [vmem:[#allocation130_spill] sm:$0xff]  ;;  %v12870_v20 = vsel %vm2718_vm1, %v12380_v19, %v7826_v53  ;;  %v19784_v63 = vld [vmem:[#allocation17_spill] sm:$0xff]  ;;  %v12874_v61 = vpop.permute.xlu2 %8494  ;;  %v19787_v8 = vld [vmem:[#allocation19_spill] sm:$0xff]  ;;  %v7912_v43 = vunpack.i.h.bf16 %v19790_v44 }
 0x248   :  { %19774 = vst [vmem:[#allocation11_spill] sm:$0xff] %v12821_v32  ;;  %v12866_v18 = vsel %vm2718_vm1, %v19782_v1, %v7832_v25  ;;  %v7897_v0 = vunpack.i.h.bf16 %v19784_v63  ;;  %v7896_v6 = vunpack.i.l.bf16 %v19784_v63  ;;  %v7396_v25 = vld [vmem:[%s19029_s0 + $0x2f1] sm:$0xff]  ;;  %v19786_v19 = vld [vmem:[#allocation18_spill] sm:$0xff]  ;;  %v7842_v7 = vunpack.i.h.bf16 %v19787_v8 }
 0x249   :  { %19779 = vst [vmem:[#allocation12_spill] sm:$0xff] %v12845_v56  ;;  %v7847_v53 = vunpack.i.h.bf16 %v19786_v19  ;;  %v7846_v45 = vunpack.i.l.bf16 %v19786_v19  ;;  %v7841_v5 = vunpack.i.l.bf16 %v19787_v8  ;;  %v12891_v9 = vpop.permute.xlu0 %8439  ;;  %v7911_v1 = vunpack.i.l.bf16 %v19790_v44  ;;  %v19791_v63 = vld [vmem:[#allocation21_spill] sm:$0xff]  ;;  %v19792_v32 = vld [vmem:[#allocation22_spill] sm:$0xff] }
 0x24a   :  { %19780 = vst [vmem:[#allocation13_spill] sm:$0xff] %v12849_v15  ;;  %v8673_v15 = vpack.i.bf16 %v7400_v59, %v7399_v60  ;;  %v7861_v56 = vunpack.i.l.bf16 %v19791_v63  ;;  %v7856_v41 = vunpack.i.l.bf16 %v19792_v32  ;;  %v8668_v19 = vpack.i.bf16 %v7398_v58, %v7397_v14  ;;  %v19793_v59 = vld [vmem:[#allocation134_spill] sm:$0xff]  ;;  %v19794_v14 = vld [vmem:[#allocation135_spill] sm:$0xff] }
 0x24b   :  { %19783 = vst [vmem:[#allocation14_spill] sm:$0xff] %v12866_v18  ;;  %v8663_v18 = vpack.i.bf16 %v7396_v25, %v7395_v28  ;;  %v12900_v8 = vsel %vm2718_vm1, %v12386_v27, %v7827_v16  ;;  %v12908_v44 = vsel %vm2783_vm2, %v12634_v31, %v7897_v0  ;;  %v7857_v60 = vunpack.i.h.bf16 %v19792_v32  ;;  %v19795_v27 = vld [vmem:[#allocation23_spill] sm:$0xff] }
 0x24c   :  { %19785 = vst [vmem:[#allocation15_spill] sm:$0xff] %v12874_v61  ;;  %v12889_v46 = vpop.permute.xlu1 %8444  ;;  %v7862_v61 = vunpack.i.h.bf16 %v19791_v63  ;;  %v12913_v63 = vsel %vm2718_vm1, %v19793_v59, %v7846_v45  ;;  %v12917_v58 = vsel %vm2718_vm1, %v19794_v14, %v7847_v53  ;;  %v7927_v16 = vunpack.i.h.bf16 %v19795_v27  ;;  %v19804_v59 = vld [vmem:[#allocation26_spill] sm:$0xff] }
 0x24d   :  { %19788 = vst [vmem:[#allocation124_spill] sm:$0xff] %v12889_v46  ;;  %v7926_v28 = vunpack.i.l.bf16 %v19795_v27  ;;  %v12927_v31 = vsel %vm2718_vm1, %v12423_v52, %v7842_v7  ;;  %v12931_v32 = vsel %vm2783_vm2, %v12658_v42, %v7911_v1  ;;  %v12935_v0 = vsel %vm2783_vm2, %v12670_v49, %v7912_v43  ;;  %v19798_v52 = vld [vmem:[#allocation139_spill] sm:$0xff]  ;;  %v7406_v49 = vld [vmem:[%s19029_s0 + $0x3a] sm:$0xff]  ;;  %v7401_v43 = vld [vmem:[%s19029_s0 + $0x331] sm:$0xff] }
 0x24e   :  { %19789 = vst [vmem:[#allocation125_spill] sm:$0xff] %v12891_v9  ;;  %v12904_v9 = vsel %vm2783_vm2, %v12630_v36, %v7896_v6  ;;  %v12923_v36 = vsel %vm2718_vm1, %v12413_v48, %v7841_v5  ;;  %8674 = vrot.lane.b32.xlu2 %v8673_v15, %s10239_s11  ;;  %v7405_v6 = vld [vmem:[%s19029_s0 + $0x32] sm:$0xff]  ;;  %v19797_v48 = vld [vmem:[#allocation138_spill] sm:$0xff]  ;;  %v12947_v53 = vsel %vm2718_vm1, %v19798_v52, %v7862_v61  ;;  %v7942_v14 = vunpack.i.h.bf16 %v19804_v59 }
 0x24f   :  { %19796 = vst [vmem:[#allocation16_spill] sm:$0xff] %v12935_v0  ;;  %v12943_v25 = vsel %vm2718_vm1, %v19797_v48, %v7861_v56  ;;  %v12951_v42 = vsel %vm2718_vm1, %v12484_v4, %v7856_v41  ;;  %8669 = vrot.lane.b32.xlu1 %v8668_v19, %s10239_s11  ;;  %8664 = vrot.lane.b32.xlu0 %v8663_v18, %s10239_s11  ;;  %v7403_v56 = vld [vmem:[%s19029_s0 + $0x349] sm:$0xff]  ;;  %v19800_v41 = vld [vmem:[#allocation25_spill] sm:$0xff]  ;;  %v12968_v5 = vpop.permute.xlu2 %8509  ;;  %v7941_v52 = vunpack.i.l.bf16 %v19804_v59  ;;  %v19809_v59 = vld [vmem:[#allocation30_spill] sm:$0xff] }
 0x250   :  { %v12963_v15 = vsel %vm2718_vm1, %v12490_v22, %v7857_v60  ;;  %v19799_v61 = vld [vmem:[#allocation24_spill] sm:$0xff]  ;;  %v7872_v7 = vunpack.i.h.bf16 %v19800_v41  ;;  %19801 = vst [vmem:[#allocation136_spill] sm:$0xff] %v12968_v5  ;;  %v7402_v22 = vld [vmem:[%s19029_s0 + $0x339] sm:$0xff]  ;;  %v12981_v1 = vsel %vm2783_vm2, %v12719_v26, %v7926_v28  ;;  %v12985_v19 = vsel %vm2783_vm2, %v12723_v33, %v7927_v16 }
 0x251   :  { %v7877_v45 = vunpack.i.h.bf16 %v19799_v61  ;;  %v7876_v4 = vunpack.i.l.bf16 %v19799_v61  ;;  %v7404_v18 = vld [vmem:[%s19029_s0 + $0x351] sm:$0xff]  ;;  %19802 = vst [vmem:[#allocation137_spill] sm:$0xff] %v12981_v1  ;;  %v7871_v60 = vunpack.i.l.bf16 %v19800_v41  ;;  %v12991_v48 = vpop.permute.xlu0 %8454  ;;  %v19807_v61 = vld [vmem:[#allocation27_spill] sm:$0xff]  ;;  %v8688_v26 = vpack.i.bf16 %v7406_v49, %v7405_v6 }
 0x252   :  { %19803 = vst [vmem:[#allocation126_spill] sm:$0xff] %v12985_v19  ;;  %v7892_v5 = vunpack.i.h.bf16 %v19807_v61  ;;  %v7891_v46 = vunpack.i.l.bf16 %v19807_v61  ;;  %v19808_v28 = vld [vmem:[#allocation29_spill] sm:$0xff]  ;;  %v8683_v16 = vpack.i.bf16 %v7404_v18, %v7403_v56  ;;  %v8678_v19 = vpack.i.bf16 %v7402_v22, %v7401_v43  ;;  %v19814_v43 = vld [vmem:[#allocation146_spill] sm:$0xff] }
 0x253   :  { %19806 = vst [vmem:[#allocation140_spill] sm:$0xff] %v12991_v48  ;;  %v7957_v1 = vunpack.i.h.bf16 %v19808_v28  ;;  %v7956_v33 = vunpack.i.l.bf16 %v19808_v28  ;;  %v13000_v41 = vsel %vm2718_vm1, %v12368_v55, %v7876_v4  ;;  %v13004_v48 = vsel %vm2718_vm1, %v12374_v47, %v7877_v45  ;;  %v19813_v4 = vld [vmem:[#allocation145_spill] sm:$0xff]  ;;  %v7410_v28 = vld [vmem:[%s19029_s0 + $0x6a] sm:$0xff] }
 0x254   :  { %v12989_v27 = vpop.permute.xlu1 %8459  ;;  %v7906_v0 = vunpack.i.l.bf16 %v19809_v59  ;;  %v13010_v6 = vsel %vm2718_vm1, %v12518_v2, %v7871_v60  ;;  %v13014_v49 = vsel %vm2718_vm1, %v12524_v12, %v7872_v7  ;;  %v13020_v47 = vsel %vm2783_vm2, %v12747_v37, %v7941_v52  ;;  %v7411_v37 = vld [vmem:[%s19029_s0 + $0x7a] sm:$0xff]  ;;  %v7412_v60 = vld [vmem:[%s19029_s0 + $0x82] sm:$0xff]  ;;  %v19820_v52 = vld [vmem:[#allocation32_spill] sm:$0xff] }
 0x255   :  { %19805 = vst [vmem:[#allocation127_spill] sm:$0xff] %v12989_v27  ;;  %v7907_v27 = vunpack.i.h.bf16 %v19809_v59  ;;  %v13024_v45 = vsel %vm2783_vm2, %v12751_v17, %v7942_v14  ;;  %v13028_v2 = vsel %vm2783_vm2, %v19813_v4, %v7891_v46  ;;  %v13032_v12 = vsel %vm2783_vm2, %v19814_v43, %v7892_v5  ;;  %v19817_v46 = vld [vmem:[#allocation31_spill] sm:$0xff]  ;;  %v19818_v14 = vld [vmem:[#allocation148_spill] sm:$0xff]  ;;  %v19823_v59 = vld [vmem:[#allocation34_spill] sm:$0xff] }
 0x256   :  { %19811 = vst [vmem:[#allocation141_spill] sm:$0xff] %v13020_v47  ;;  %8689 = vrot.lane.b32.xlu2 %v8688_v26, %s10240_s23  ;;  %v13040_v7 = vsel %vm2783_vm2, %v12809_v24, %v7956_v33  ;;  %v13044_v17 = vsel %vm2783_vm2, %v12813_v23, %v7957_v1  ;;  %v7902_v22 = vunpack.i.h.bf16 %v19817_v46  ;;  %v7901_v5 = vunpack.i.l.bf16 %v19817_v46  ;;  %v7409_v24 = vld [vmem:[%s19029_s0 + $0x62] sm:$0xff]  ;;  %v7407_v33 = vld [vmem:[%s19029_s0 + $0x4a] sm:$0xff] }
 0x257   :  { %19812 = vst [vmem:[#allocation129_spill] sm:$0xff] %v13024_v45  ;;  %8684 = vrot.lane.b32.xlu1 %v8683_v16, %s10239_s11  ;;  %8679 = vrot.lane.b32.xlu0 %v8678_v19, %s10239_s11  ;;  %v13058_v23 = vsel %vm2783_vm2, %v19818_v14, %v7906_v0  ;;  %v13062_v1 = vsel %vm2783_vm2, %v12477_v34, %v7907_v27  ;;  %v7972_v61 = vunpack.i.h.bf16 %v19820_v52  ;;  %v7971_v19 = vunpack.i.l.bf16 %v19820_v52  ;;  %v13066_v26 = vpop.permute.xlu2 %8524  ;;  %v7408_v0 = vld [vmem:[%s19029_s0 + $0x52] sm:$0xff]  ;;  %v19826_v52 = vld [vmem:[#allocation35_spill] sm:$0xff] }
 0x258   :  { %19815 = vst [vmem:[#allocation130_spill] sm:$0xff] %v13040_v7  ;;  %v19822_v34 = vld [vmem:[#allocation33_spill] sm:$0xff]  ;;  %v7917_v4 = vunpack.i.h.bf16 %v19823_v59  ;;  %v7916_v43 = vunpack.i.l.bf16 %v19823_v59  ;;  %v7987_v18 = vunpack.i.h.bf16 %v19826_v52  ;;  %v7986_v55 = vunpack.i.l.bf16 %v19826_v52 }
 0x259   :  { %19816 = vst [vmem:[#allocation17_spill] sm:$0xff] %v13044_v17  ;;  %v7922_v27 = vunpack.i.h.bf16 %v19822_v34  ;;  %v7921_v16 = vunpack.i.l.bf16 %v19822_v34  ;;  %v13083_v14 = vpop.permute.xlu0 %8469  ;;  %v8703_v17 = vpack.i.bf16 %v7412_v60, %v7411_v37  ;;  %v19828_v45 = vld [vmem:[#allocation37_spill] sm:$0xff]  ;;  %v8698_v34 = vpack.i.bf16 %v7410_v28, %v7409_v24 }
 0x25a   :  { %19819 = vst [vmem:[#allocation18_spill] sm:$0xff] %v13062_v1  ;;  %v7931_v47 = vunpack.i.l.bf16 %v19828_v45  ;;  %v8693_v1 = vpack.i.bf16 %v7408_v0, %v7407_v33  ;;  %v13092_v59 = vsel %vm2783_vm2, %v12622_v57, %v7901_v5  ;;  %v13100_v52 = vsel %vm2783_vm2, %v12833_v11, %v7971_v19  ;;  %v7413_v28 = vld [vmem:[%s19029_s0 + $0x92] sm:$0xff] }
 0x25b   :  { %19821 = vst [vmem:[#allocation19_spill] sm:$0xff] %v13066_v26  ;;  %v19827_v26 = vld [vmem:[#allocation36_spill] sm:$0xff]  ;;  %v7932_v37 = vunpack.i.h.bf16 %v19828_v45  ;;  %v13105_v60 = vsel %vm2783_vm2, %v12837_v13, %v7972_v61  ;;  %v13109_v24 = vsel %vm2783_vm2, %v12508_v54, %v7921_v16  ;;  %v13113_v57 = vsel %vm2783_vm2, %v12512_v35, %v7922_v27  ;;  %v7417_v35 = vld [vmem:[%s19029_s0 + $0xc2] sm:$0xff]  ;;  %v19838_v27 = vld [vmem:[#allocation41_spill] sm:$0xff] }
 0x25c   :  { %v13081_v46 = vpop.permute.xlu1 %8474  ;;  %19825 = vst [vmem:[#allocation21_spill] sm:$0xff] %v13083_v14  ;;  %v7937_v56 = vunpack.i.h.bf16 %v19827_v26  ;;  %v7936_v7 = vunpack.i.l.bf16 %v19827_v26  ;;  %v13096_v14 = vsel %vm2783_vm2, %v12626_v21, %v7902_v22  ;;  %v19829_v21 = vld [vmem:[#allocation38_spill] sm:$0xff]  ;;  %v13118_v11 = vsel %vm2783_vm2, %v12650_v50, %v7916_v43  ;;  %v19832_v50 = vld [vmem:[#allocation151_spill] sm:$0xff] }
 0x25d   :  { %19824 = vst [vmem:[#allocation20_spill] sm:$0xff] %v13081_v46  ;;  %v8001_v22 = vunpack.i.l.bf16 %v19829_v21  ;;  %v13122_v45 = vsel %vm2783_vm2, %v12654_v3, %v7917_v4  ;;  %v13126_v13 = vsel %vm2783_vm2, %v12870_v20, %v7986_v55  ;;  %v13130_v54 = vsel %vm2783_vm2, %v12900_v8, %v7987_v18  ;;  %v19833_v3 = vld [vmem:[#allocation152_spill] sm:$0xff] }
 0x25e   :  { %19830 = vst [vmem:[#allocation22_spill] sm:$0xff] %v13126_v13  ;;  %8704 = vrot.lane.b32.xlu2 %v8703_v17, %s10240_s23  ;;  %v13138_v5 = vsel %vm2783_vm2, %v19832_v50, %v7936_v7  ;;  %v13142_v61 = vsel %vm2783_vm2, %v19833_v3, %v7937_v56  ;;  %v13146_v20 = vsel %vm2783_vm2, %v12711_v10, %v7931_v47  ;;  %v8002_v8 = vunpack.i.h.bf16 %v19829_v21  ;;  %v7418_v18 = vld [vmem:[%s19029_s0 + $0xca] sm:$0xff] }
 0x25f   :  { %19831 = vst [vmem:[#allocation134_spill] sm:$0xff] %v13130_v54  ;;  %8699 = vrot.lane.b32.xlu1 %v8698_v34, %s10240_s23  ;;  %8694 = vrot.lane.b32.xlu0 %v8693_v1, %s10240_s23  ;;  %v7415_v55 = vld [vmem:[%s19029_s0 + $0xaa] sm:$0xff]  ;;  %v13159_v56 = vsel %vm2783_vm2, %v12715_v39, %v7932_v37  ;;  %v13164_v26 = vpop.permute.xlu2 %8539  ;;  %v7416_v1 = vld [vmem:[%s19029_s0 + $0xb2] sm:$0xff]  ;;  %v13177_v33 = vsel %vm2783_vm2, %v12923_v36, %v8001_v22  ;;  %v8017_v16 = vunpack.i.h.bf16 %v19838_v27  ;;  %v8016_v4 = vunpack.i.l.bf16 %v19838_v27  ;;  %v19841_v37 = vld [vmem:[#allocation42_spill] sm:$0xff] }
 0x260   :  { %v19834_v10 = vld [vmem:[#allocation39_spill] sm:$0xff]  ;;  %v19835_v17 = vld [vmem:[#allocation40_spill] sm:$0xff]  ;;  %19836 = vst [vmem:[#allocation135_spill] sm:$0xff] %v13164_v26  ;;  %v7414_v39 = vld [vmem:[%s19029_s0 + $0x9a] sm:$0xff]  ;;  %v7967_v21 = vunpack.i.h.bf16 %v19841_v37  ;;  %v7966_v50 = vunpack.i.l.bf16 %v19841_v37  ;;  %v8718_v46 = vpack.i.bf16 %v7418_v18, %v7417_v35  ;;  %v13191_v36 = vsel %vm2783_vm2, %v12927_v31, %v8002_v8 }
 0x261   :  { %v7952_v47 = vunpack.i.h.bf16 %v19834_v10  ;;  %v7951_v7 = vunpack.i.l.bf16 %v19834_v10  ;;  %v7947_v19 = vunpack.i.h.bf16 %v19835_v17  ;;  %19837 = vst [vmem:[#allocation23_spill] sm:$0xff] %v13177_v33  ;;  %v7946_v0 = vunpack.i.l.bf16 %v19835_v17  ;;  %v13184_v34 = vpop.permute.xlu0 %8484  ;;  %v19842_v3 = vld [vmem:[#allocation43_spill] sm:$0xff]  ;;  %v19845_v33 = vld [vmem:[#allocation45_spill] sm:$0xff]  ;;  %v19846_v35 = vld [vmem:[#allocation158_spill] sm:$0xff] }
 0x262   :  { %19840 = vst [vmem:[#allocation139_spill] sm:$0xff] %v13184_v34  ;;  %v7961_v10 = vunpack.i.l.bf16 %v19842_v3  ;;  %v7962_v22 = vunpack.i.h.bf16 %v19842_v3  ;;  %v8713_v17 = vpack.i.bf16 %v7416_v1, %v7415_v55  ;;  %v8708_v27 = vpack.i.bf16 %v7414_v39, %v7413_v28  ;;  %v19844_v34 = vld [vmem:[#allocation44_spill] sm:$0xff]  ;;  %v19848_v55 = vld [vmem:[#allocation117_spill] sm:$0xff]  ;;  %v19851_v28 = vld [vmem:[#allocation159_spill] sm:$0xff] }
 0x263   :  { %19843 = vst [vmem:[#allocation24_spill] sm:$0xff] %v13191_v36  ;;  %v8032_v26 = vunpack.i.h.bf16 %v19844_v34  ;;  %v8031_v37 = vunpack.i.l.bf16 %v19844_v34  ;;  %v7981_v54 = vunpack.i.l.bf16 %v19845_v33  ;;  %v13203_v18 = vsel %vm2783_vm2, %v19846_v35, %v7952_v47  ;;  %v19847_v31 = vld [vmem:[#allocation8_spill] sm:$0xff] }
 0x264   :  { %v13182_v43 = vpop.permute.xlu1 %8489  ;;  %v13207_v8 = vsel %vm2783_vm2, %v19847_v31, %v7946_v0  ;;  %v13211_v1 = vsel %vm2783_vm2, %v19848_v55, %v7947_v19  ;;  %v13223_v47 = vsel %vm2783_vm2, %v19851_v28, %v7966_v50  ;;  %v19852_v39 = vld [vmem:[#allocation160_spill] sm:$0xff]  ;;  %v13231_v19 = vsel %vm2783_vm2, %v12799_v29, %v7961_v10  ;;  %v19861_v31 = vld [vmem:[#allocation50_spill] sm:$0xff] }
 0x265   :  { %19839 = vst [vmem:[#allocation138_spill] sm:$0xff] %v13182_v43  ;;  %v13196_v43 = vsel %vm2783_vm2, %v12614_v40, %v7951_v7  ;;  %v13215_v40 = vsel %vm2783_vm2, %v12951_v42, %v8016_v4  ;;  %v13219_v7 = vsel %vm2783_vm2, %v12963_v15, %v8017_v16  ;;  %v13227_v0 = vsel %vm2783_vm2, %v19852_v39, %v7967_v21  ;;  %v7423_v42 = vld [vmem:[%s19029_s0 + $0x10a] sm:$0xff]  ;;  %v19853_v4 = vld [vmem:[#allocation46_spill] sm:$0xff]  ;;  %v7424_v29 = vld [vmem:[%s19029_s0 + $0x112] sm:$0xff] }
 0x266   :  { %19849 = vst [vmem:[#allocation25_spill] sm:$0xff] %v13215_v40  ;;  %8719 = vrot.lane.b32.xlu2 %v8718_v46, %s10240_s23  ;;  %v13239_v15 = vsel %vm2783_vm2, %v12803_v62, %v7962_v22  ;;  %v7982_v16 = vunpack.i.h.bf16 %v19845_v33  ;;  %v7977_v34 = vunpack.i.h.bf16 %v19853_v4  ;;  %v7976_v21 = vunpack.i.l.bf16 %v19853_v4  ;;  %v7421_v46 = vld [vmem:[%s19029_s0 + $0xf2] sm:$0xff] }
 0x267   :  { %19850 = vst [vmem:[#allocation26_spill] sm:$0xff] %v13219_v7  ;;  %8714 = vrot.lane.b32.xlu1 %v8713_v17, %s10240_s23  ;;  %8709 = vrot.lane.b32.xlu0 %v8708_v27, %s10240_s23  ;;  %v13254_v62 = vsel %vm2783_vm2, %v13010_v6, %v8031_v37  ;;  %v13258_v33 = vsel %vm2783_vm2, %v13014_v49, %v8032_v26  ;;  %v19856_v50 = vld [vmem:[#allocation4_spill] sm:$0xff]  ;;  %v13265_v17 = vpop.permute.xlu2 %8554  ;;  %v7422_v27 = vld [vmem:[%s19029_s0 + $0xfa] sm:$0xff]  ;;  %v7420_v49 = vld [vmem:[%s19029_s0 + $0xe2] sm:$0xff]  ;;  %v8062_v55 = vunpack.i.h.bf16 %v19861_v31  ;;  %v8061_v4 = vunpack.i.l.bf16 %v19861_v31 }
 0x268   :  { %19854 = vst [vmem:[#allocation27_spill] sm:$0xff] %v13254_v62  ;;  %v13262_v3 = vsel %vm2783_vm2, %v19856_v50, %v7981_v54  ;;  %v19858_v10 = vld [vmem:[#allocation48_spill] sm:$0xff]  ;;  %v7419_v6 = vld [vmem:[%s19029_s0 + $0xda] sm:$0xff]  ;;  %v19864_v50 = vld [vmem:[#allocation51_spill] sm:$0xff]  ;;  %v8728_v36 = vpack.i.bf16 %v7422_v27, %v7421_v46  ;;  %v13299_v31 = vsel %vm2783_vm2, %v12829_v30, %v7977_v34 }
 0x269   :  { %19855 = vst [vmem:[#allocation29_spill] sm:$0xff] %v13258_v33  ;;  %v7997_v22 = vunpack.i.h.bf16 %v19858_v10  ;;  %v7996_v26 = vunpack.i.l.bf16 %v19858_v10  ;;  %v19860_v54 = vld [vmem:[#allocation49_spill] sm:$0xff]  ;;  %v13282_v39 = vpop.permute.xlu0 %8499  ;;  %v8012_v33 = vunpack.i.h.bf16 %v19864_v50  ;;  %v8011_v62 = vunpack.i.l.bf16 %v19864_v50  ;;  %v19865_v7 = vld [vmem:[#allocation52_spill] sm:$0xff]  ;;  %v19873_v27 = vld [vmem:[#allocation14_spill] sm:$0xff] }
 0x26a   :  { %19857 = vst [vmem:[#allocation30_spill] sm:$0xff] %v13262_v3  ;;  %v7992_v37 = vunpack.i.h.bf16 %v19860_v54  ;;  %v7991_v35 = vunpack.i.l.bf16 %v19860_v54  ;;  %v8007_v40 = vunpack.i.h.bf16 %v19865_v7  ;;  %v8006_v10 = vunpack.i.l.bf16 %v19865_v7  ;;  %v19866_v54 = vld [vmem:[#allocation5_spill] sm:$0xff]  ;;  %v19870_v7 = vld [vmem:[#allocation7_spill] sm:$0xff] }
 0x26b   :  { %19859 = vst [vmem:[#allocation145_spill] sm:$0xff] %v13265_v17  ;;  %v8733_v17 = vpack.i.bf16 %v7424_v29, %v7423_v42  ;;  %v8723_v3 = vpack.i.bf16 %v7420_v49, %v7419_v6  ;;  %v13291_v13 = vsel %vm2783_vm2, %v19866_v54, %v7982_v16  ;;  %v19868_v29 = vld [vmem:[#allocation6_spill] sm:$0xff]  ;;  %v13308_v46 = vsel %vm2783_vm2, %v19870_v7, %v7997_v22  ;;  %v7426_v54 = vld [vmem:[%s19029_s0 + $0x12a] sm:$0xff]  ;;  %v19923_v50 = vld [vmem:[#allocation73_spill] sm:$0xff] }
 0x26c   :  { %v13280_v28 = vpop.permute.xlu1 %8504  ;;  %19863 = vst [vmem:[#allocation31_spill] sm:$0xff] %v13282_v39  ;;  %v13295_v39 = vsel %vm2783_vm2, %v12825_v51, %v7976_v21  ;;  %v13312_v16 = vsel %vm2783_vm2, %v12853_v38, %v7991_v35  ;;  %v19872_v51 = vld [vmem:[#allocation53_spill] sm:$0xff]  ;;  %v13317_v30 = vsel %vm2783_vm2, %v19873_v27, %v7992_v37  ;;  %v13321_v34 = vsel %vm2848_vm3, %v13092_v59, %v8061_v4  ;;  %v19876_v22 = vld [vmem:[#allocation118_spill] sm:$0xff]  ;;  %v19884_v7 = vld [vmem:[#allocation56_spill] sm:$0xff] }
 0x26d   :  { %19862 = vst [vmem:[#allocation146_spill] sm:$0xff] %v13280_v28  ;;  %v13304_v28 = vsel %vm2783_vm2, %v19868_v29, %v7996_v26  ;;  %v8076_v21 = vunpack.i.l.bf16 %v19872_v51  ;;  %v13325_v6 = vsel %vm2848_vm3, %v13096_v14, %v8062_v55  ;;  %v13329_v49 = vsel %vm2783_vm2, %v19876_v22, %v8011_v62  ;;  %v7429_v38 = vld [vmem:[%s19029_s0 + $0x152] sm:$0xff] }
 0x26e   :  { %19869 = vst [vmem:[#allocation148_spill] sm:$0xff] %v13304_v28  ;;  %8734 = vrot.lane.b32.xlu2 %v8733_v17, %s10240_s23  ;;  %v19878_v26 = vld [vmem:[#allocation128_spill] sm:$0xff]  ;;  %v13341_v59 = vsel %vm2783_vm2, %v12913_v63, %v8006_v10  ;;  %v13345_v14 = vsel %vm2783_vm2, %v12917_v58, %v8007_v40  ;;  %v8077_v62 = vunpack.i.h.bf16 %v19872_v51  ;;  %v7430_v17 = vld [vmem:[%s19029_s0 + $0x15a] sm:$0xff]  ;;  %v19881_v58 = vld [vmem:[#allocation55_spill] sm:$0xff]  ;;  %v8092_v51 = vunpack.i.h.bf16 %v19884_v7 }
 0x26f   :  { %19871 = vst [vmem:[#allocation32_spill] sm:$0xff] %v13308_v46  ;;  %v13337_v37 = vsel %vm2783_vm2, %v19878_v26, %v8012_v33  ;;  %8729 = vrot.lane.b32.xlu1 %v8728_v36, %s10240_s23  ;;  %8724 = vrot.lane.b32.xlu0 %v8723_v3, %s10240_s23  ;;  %v7427_v33 = vld [vmem:[%s19029_s0 + $0x13a] sm:$0xff]  ;;  %v8022_v40 = vunpack.i.h.bf16 %v19881_v58  ;;  %v8021_v4 = vunpack.i.l.bf16 %v19881_v58  ;;  %v13360_v10 = vpop.permute.xlu2 %8569  ;;  %v7428_v36 = vld [vmem:[%s19029_s0 + $0x142] sm:$0xff]  ;;  %v13373_v29 = vsel %vm2848_vm3, %v13118_v11, %v8076_v21 }
 0x270   :  { %19874 = vst [vmem:[#allocation33_spill] sm:$0xff] %v13321_v34  ;;  %v19880_v63 = vld [vmem:[#allocation54_spill] sm:$0xff]  ;;  %v8091_v27 = vunpack.i.l.bf16 %v19884_v7  ;;  %v19885_v22 = vld [vmem:[#allocation57_spill] sm:$0xff]  ;;  %v13387_v11 = vsel %vm2848_vm3, %v13122_v45, %v8077_v62  ;;  %v19889_v21 = vld [vmem:[#allocation59_spill] sm:$0xff]  ;;  %v8743_v7 = vpack.i.bf16 %v7428_v36, %v7427_v33 }
 0x271   :  { %19875 = vst [vmem:[#allocation34_spill] sm:$0xff] %v13325_v6  ;;  %v8027_v35 = vunpack.i.h.bf16 %v19880_v63  ;;  %v8026_v55 = vunpack.i.l.bf16 %v19880_v63  ;;  %v7425_v3 = vld [vmem:[%s19029_s0 + $0x122] sm:$0xff]  ;;  %v8042_v26 = vunpack.i.h.bf16 %v19885_v22  ;;  %v13380_v58 = vpop.permute.xlu0 %8514  ;;  %v8041_v42 = vunpack.i.l.bf16 %v19885_v22  ;;  %v19895_v33 = vld [vmem:[#allocation12_spill] sm:$0xff] }
 0x272   :  { %19877 = vst [vmem:[#allocation35_spill] sm:$0xff] %v13329_v49  ;;  %v8738_v49 = vpack.i.bf16 %v7426_v54, %v7425_v3  ;;  %v19890_v46 = vld [vmem:[#allocation10_spill] sm:$0xff]  ;;  %v8107_v28 = vunpack.i.h.bf16 %v19889_v21  ;;  %v13402_v45 = vsel %vm2783_vm2, %v12943_v25, %v8021_v4  ;;  %v13406_v62 = vsel %vm2783_vm2, %v12947_v53, %v8022_v40  ;;  %v19898_v4 = vld [vmem:[#allocation61_spill] sm:$0xff] }
 0x273   :  { %19879 = vst [vmem:[#allocation36_spill] sm:$0xff] %v13337_v37  ;;  %v8748_v37 = vpack.i.bf16 %v7430_v17, %v7429_v38  ;;  %v13414_v17 = vsel %vm2848_vm3, %v13159_v56, %v8092_v51  ;;  %v7435_v56 = vld [vmem:[%s19029_s0 + $0x19a] sm:$0xff]  ;;  %v8052_v36 = vunpack.i.h.bf16 %v19898_v4  ;;  %v7431_v51 = vld [vmem:[%s19029_s0 + $0x16a] sm:$0xff] }
 0x274   :  { %19882 = vst [vmem:[#allocation37_spill] sm:$0xff] %v13360_v10  ;;  %v13378_v63 = vpop.permute.xlu1 %8519  ;;  %v19888_v10 = vld [vmem:[#allocation58_spill] sm:$0xff] }
 0x275   :  { %19883 = vst [vmem:[#allocation38_spill] sm:$0xff] %v13373_v29  ;;  %v8037_v6 = vunpack.i.h.bf16 %v19888_v10  ;;  %v8036_v34 = vunpack.i.l.bf16 %v19888_v10  ;;  %v8106_v29 = vunpack.i.l.bf16 %v19889_v21  ;;  %v19892_v10 = vld [vmem:[#allocation60_spill] sm:$0xff] }
 0x276   :  { %19886 = vst [vmem:[#allocation151_spill] sm:$0xff] %v13378_v63  ;;  %v13392_v63 = vsel %vm2783_vm2, %v19890_v46, %v8026_v55  ;;  %v8056_v38 = vunpack.i.l.bf16 %v19892_v10  ;;  %v13410_v46 = vsel %vm2848_vm3, %v13146_v20, %v8091_v27  ;;  %v19896_v55 = vld [vmem:[#allocation13_spill] sm:$0xff]  ;;  %8749 = vrot.lane.b32.xlu2 %v8748_v37, %s10240_s23  ;;  %v8057_v40 = vunpack.i.h.bf16 %v19892_v10  ;;  %v19900_v37 = vld [vmem:[#allocation62_spill] sm:$0xff] }
 0x277   :  { %19887 = vst [vmem:[#allocation152_spill] sm:$0xff] %v13380_v58  ;;  %v19891_v58 = vld [vmem:[#allocation11_spill] sm:$0xff]  ;;  %v13422_v25 = vsel %vm2783_vm2, %v19896_v55, %v8042_v26  ;;  %v13426_v53 = vsel %vm2783_vm2, %v13000_v41, %v8036_v34  ;;  %v13430_v20 = vsel %vm2783_vm2, %v13004_v48, %v8037_v6  ;;  %v8051_v41 = vunpack.i.l.bf16 %v19898_v4  ;;  %8744 = vrot.lane.b32.xlu1 %v8743_v7, %s10240_s23  ;;  %v13461_v54 = vpop.permute.xlu2 %8584  ;;  %v19903_v26 = vld [vmem:[#allocation64_spill] sm:$0xff]  ;;  %v19907_v4 = vld [vmem:[#allocation66_spill] sm:$0xff] }
 0x278   :  { %v13396_v22 = vsel %vm2783_vm2, %v19891_v58, %v8027_v35  ;;  %19893 = vst [vmem:[#allocation39_spill] sm:$0xff] %v13410_v46  ;;  %v13418_v35 = vsel %vm2783_vm2, %v19895_v33, %v8041_v42  ;;  %v13438_v42 = vsel %vm2848_vm3, %v13207_v8, %v8106_v29  ;;  %8739 = vrot.lane.b32.xlu0 %v8738_v49, %s10240_s23  ;;  %v7436_v48 = vld [vmem:[%s19029_s0 + $0x1a2] sm:$0xff]  ;;  %v8122_v3 = vunpack.i.h.bf16 %v19900_v37  ;;  %v7434_v29 = vld [vmem:[%s19029_s0 + $0x18a] sm:$0xff] }
 0x279   :  { %19894 = vst [vmem:[#allocation40_spill] sm:$0xff] %v13414_v17  ;;  %v7433_v34 = vld [vmem:[%s19029_s0 + $0x182] sm:$0xff]  ;;  %v13453_v8 = vsel %vm2848_vm3, %v13211_v1, %v8107_v28  ;;  %v13457_v6 = vsel %vm2848_vm3, %v12904_v9, %v8056_v38  ;;  %v8121_v49 = vunpack.i.l.bf16 %v19900_v37  ;;  %v7432_v1 = vld [vmem:[%s19029_s0 + $0x172] sm:$0xff]  ;;  %v8067_v58 = vunpack.i.h.bf16 %v19903_v26  ;;  %v13478_v10 = vpop.permute.xlu0 %8529 }
 0x27a   :  { %19897 = vst [vmem:[#allocation41_spill] sm:$0xff] %v13438_v42  ;;  %v19902_v9 = vld [vmem:[#allocation63_spill] sm:$0xff]  ;;  %v8066_v21 = vunpack.i.l.bf16 %v19903_v26  ;;  %v19906_v38 = vld [vmem:[#allocation65_spill] sm:$0xff]  ;;  %v8087_v37 = vunpack.i.h.bf16 %v19907_v4  ;;  %v8753_v46 = vpack.i.bf16 %v7432_v1, %v7431_v51  ;;  %v13487_v26 = vsel %vm2848_vm3, %v12908_v44, %v8057_v40  ;;  %v19915_v51 = vld [vmem:[#allocation68_spill] sm:$0xff] }
 0x27b   :  { %19899 = vst [vmem:[#allocation42_spill] sm:$0xff] %v13453_v8  ;;  %v8072_v28 = vunpack.i.h.bf16 %v19902_v9  ;;  %v8071_v27 = vunpack.i.l.bf16 %v19902_v9  ;;  %v8137_v33 = vunpack.i.h.bf16 %v19906_v38  ;;  %v8136_v55 = vunpack.i.l.bf16 %v19906_v38  ;;  %v19908_v42 = vld [vmem:[#allocation67_spill] sm:$0xff] }
 0x27c   :  { %19901 = vst [vmem:[#allocation43_spill] sm:$0xff] %v13461_v54  ;;  %v13476_v7 = vpop.permute.xlu1 %8534  ;;  %v8763_v54 = vpack.i.bf16 %v7436_v48, %v7435_v56  ;;  %v8086_v8 = vunpack.i.l.bf16 %v19907_v4  ;;  %v8081_v17 = vunpack.i.l.bf16 %v19908_v42  ;;  %v8758_v9 = vpack.i.bf16 %v7434_v29, %v7433_v34 }
 0x27d   :  { %19904 = vst [vmem:[#allocation44_spill] sm:$0xff] %v13476_v7  ;;  %v13491_v7 = vsel %vm2848_vm3, %v13028_v2, %v8051_v41  ;;  %v13495_v38 = vsel %vm2848_vm3, %v13032_v12, %v8052_v36  ;;  %v8082_v56 = vunpack.i.h.bf16 %v19908_v42  ;;  %v13500_v48 = vsel %vm2848_vm3, %v13231_v19, %v8121_v49  ;;  %v19909_v2 = vld [vmem:[#allocation16_spill] sm:$0xff]  ;;  %v19910_v42 = vld [vmem:[#allocation18_spill] sm:$0xff]  ;;  %v19913_v41 = vld [vmem:[#allocation137_spill] sm:$0xff] }
 0x27e   :  { %19905 = vst [vmem:[#allocation45_spill] sm:$0xff] %v13478_v10  ;;  %v13504_v34 = vsel %vm2848_vm3, %v13239_v15, %v8122_v3  ;;  %v13508_v44 = vsel %vm2848_vm3, %v12931_v32, %v8071_v27  ;;  %v13512_v40 = vsel %vm2848_vm3, %v19909_v2, %v8072_v28  ;;  %v13516_v12 = vsel %vm2848_vm3, %v13058_v23, %v8066_v21  ;;  %v7441_v36 = vld [vmem:[%s19029_s0 + $0x212] sm:$0xff]  ;;  %v19914_v49 = vld [vmem:[#allocation126_spill] sm:$0xff] }
 0x27f   :  { %v13520_v19 = vsel %vm2848_vm3, %v19910_v42, %v8067_v58  ;;  %v13524_v15 = vsel %vm2848_vm3, %v13295_v39, %v8136_v55  ;;  %v13528_v32 = vsel %vm2848_vm3, %v13299_v31, %v8137_v33  ;;  %8764 = vrot.lane.b32.xlu2 %v8763_v54, %s10240_s23  ;;  %v13537_v3 = vsel %vm2848_vm3, %v19913_v41, %v8086_v8  ;;  %v7442_v54 = vld [vmem:[%s19029_s0 + $0x21a] sm:$0xff]  ;;  %v7437_v58 = vld [vmem:[%s19029_s0 + $0x1e2] sm:$0xff]  ;;  %v19922_v41 = vld [vmem:[#allocation72_spill] sm:$0xff] }
 0x280   :  { %19911 = vst [vmem:[#allocation158_spill] sm:$0xff] %v13524_v15  ;;  %v13541_v39 = vsel %vm2848_vm3, %v19914_v49, %v8087_v37  ;;  %v13545_v31 = vsel %vm2848_vm3, %v13109_v24, %v8081_v17  ;;  %8759 = vrot.lane.b32.xlu1 %v8758_v9, %s10240_s23  ;;  %8754 = vrot.lane.b32.xlu0 %v8753_v46, %s10240_s23  ;;  %v7439_v8 = vld [vmem:[%s19029_s0 + $0x1fa] sm:$0xff]  ;;  %v8152_v1 = vunpack.i.h.bf16 %v19915_v51  ;;  %v8151_v24 = vunpack.i.l.bf16 %v19915_v51  ;;  %v13562_v27 = vpop.permute.xlu2 %8599  ;;  %v7440_v46 = vld [vmem:[%s19029_s0 + $0x202] sm:$0xff] }
 0x281   :  { %19912 = vst [vmem:[#allocation8_spill] sm:$0xff] %v13528_v32  ;;  %v13557_v29 = vsel %vm2848_vm3, %v13113_v57, %v8082_v56  ;;  %v19916_v17 = vld [vmem:[#allocation69_spill] sm:$0xff]  ;;  %v7438_v57 = vld [vmem:[%s19029_s0 + $0x1ea] sm:$0xff]  ;;  %v19918_v33 = vld [vmem:[#allocation70_spill] sm:$0xff]  ;;  %v13579_v2 = vpop.permute.xlu0 %8544  ;;  %v8117_v49 = vunpack.i.h.bf16 %v19922_v41  ;;  %v8116_v51 = vunpack.i.l.bf16 %v19922_v41  ;;  %v8778_v23 = vpack.i.bf16 %v7442_v54, %v7441_v36 }
 0x282   :  { %v8101_v28 = vunpack.i.l.bf16 %v19916_v17  ;;  %19917 = vst [vmem:[#allocation117_spill] sm:$0xff] %v13562_v27  ;;  %v8102_v21 = vunpack.i.h.bf16 %v19916_v17  ;;  %v8097_v55 = vunpack.i.h.bf16 %v19918_v33  ;;  %v8096_v4 = vunpack.i.l.bf16 %v19918_v33  ;;  %v19919_v37 = vld [vmem:[#allocation71_spill] sm:$0xff]  ;;  %v19927_v41 = vld [vmem:[#allocation74_spill] sm:$0xff]  ;;  %v19928_v54 = vld [vmem:[#allocation129_spill] sm:$0xff] }
 0x283   :  { %v8167_v9 = vunpack.i.h.bf16 %v19919_v37  ;;  %19921 = vst [vmem:[#allocation160_spill] sm:$0xff] %v13579_v2  ;;  %v8166_v42 = vunpack.i.l.bf16 %v19919_v37  ;;  %v8112_v27 = vunpack.i.h.bf16 %v19923_v50  ;;  %v8111_v17 = vunpack.i.l.bf16 %v19923_v50  ;;  %v19926_v37 = vld [vmem:[#allocation141_spill] sm:$0xff] }
 0x284   :  { %v13577_v56 = vpop.permute.xlu1 %8549  ;;  %v8773_v10 = vpack.i.bf16 %v7440_v46, %v7439_v8  ;;  %v8768_v32 = vpack.i.bf16 %v7438_v57, %v7437_v58  ;;  %v13588_v33 = vsel %vm2848_vm3, %v13312_v16, %v8151_v24  ;;  %v13596_v2 = vsel %vm2848_vm3, %v19926_v37, %v8101_v28  ;;  %v19931_v24 = vld [vmem:[#allocation130_spill] sm:$0xff]  ;;  %v19933_v57 = vld [vmem:[#allocation75_spill] sm:$0xff] }
 0x285   :  { %19920 = vst [vmem:[#allocation159_spill] sm:$0xff] %v13577_v56  ;;  %v13592_v56 = vsel %vm2848_vm3, %v13317_v30, %v8152_v1  ;;  %v8181_v36 = vunpack.i.l.bf16 %v19927_v41  ;;  %v13601_v15 = vsel %vm2848_vm3, %v19928_v54, %v8102_v21  ;;  %v13605_v50 = vsel %vm2848_vm3, %v13138_v5, %v8096_v4  ;;  %v19932_v5 = vld [vmem:[#allocation17_spill] sm:$0xff] }
 0x286   :  { %19924 = vst [vmem:[#allocation46_spill] sm:$0xff] %v13588_v33  ;;  %v13609_v16 = vsel %vm2848_vm3, %v13142_v61, %v8097_v55  ;;  %v8182_v30 = vunpack.i.h.bf16 %v19927_v41  ;;  %v13614_v8 = vsel %vm2848_vm3, %v13341_v59, %v8166_v42  ;;  %v13618_v1 = vsel %vm2848_vm3, %v13345_v14, %v8167_v9  ;;  %v7447_v61 = vld [vmem:[%s19029_s0 + $0x25a] sm:$0xff]  ;;  %v3209_v59 = vld [vmem:[%s19030_s3 + $0x10] sm:$0x3]  ;;  %v7445_v55 = vld [vmem:[%s19029_s0 + $0x242] sm:$0xff] }
 0x287   :  { %19925 = vst [vmem:[#allocation4_spill] sm:$0xff] %v13592_v56  ;;  %v13622_v28 = vsel %vm2848_vm3, %v19931_v24, %v8116_v51  ;;  %v13626_v46 = vsel %vm2848_vm3, %v19932_v5, %v8117_v49  ;;  %8779 = vrot.lane.b32.xlu2 %v8778_v23, %s10240_s23  ;;  %v13637_v14 = vsel %vm2848_vm3, %v13196_v43, %v8111_v17  ;;  %v8132_v21 = vunpack.i.h.bf16 %v19933_v57  ;;  %v7448_v23 = vld [vmem:[%s19029_s0 + $0x262] sm:$0xff]  ;;  %v7446_v42 = vld [vmem:[%s19029_s0 + $0x24a] sm:$0xff]  ;;  %v19938_v17 = vld [vmem:[#allocation77_spill] sm:$0xff] }
 0x288   :  { %19929 = vst [vmem:[#allocation48_spill] sm:$0xff] %v13614_v8  ;;  %v13641_v58 = vsel %vm2848_vm3, %v13203_v18, %v8112_v27  ;;  %8774 = vrot.lane.b32.xlu1 %v8773_v10, %s10240_s23  ;;  %8769 = vrot.lane.b32.xlu0 %v8768_v32, %s10240_s23  ;;  %v3219_v43 = vunpack.c.l.b16 %v3209_v59  ;;  %v13654_v4 = vsel %vm2848_vm3, %v13402_v45, %v8181_v36  ;;  %v8131_v18 = vunpack.i.l.bf16 %v19933_v57  ;;  %v19935_v27 = vld [vmem:[#allocation76_spill] sm:$0xff]  ;;  %v13659_v32 = vpop.permute.xlu2 %8614  ;;  %v19941_v5 = vld [vmem:[#allocation78_spill] sm:$0xff] }
 0x289   :  { %19930 = vst [vmem:[#allocation49_spill] sm:$0xff] %v13618_v1  ;;  %v8127_v9 = vunpack.i.h.bf16 %v19935_v27  ;;  %v8126_v10 = vunpack.i.l.bf16 %v19935_v27  ;;  %v7443_v49 = vld [vmem:[%s19029_s0 + $0x22a] sm:$0xff]  ;;  %v7444_v45 = vld [vmem:[%s19029_s0 + $0x232] sm:$0xff]  ;;  %v13672_v51 = vsel %vm2848_vm3, %v13406_v62, %v8182_v30  ;;  %v8197_v37 = vunpack.i.h.bf16 %v19938_v17  ;;  %v13678_v54 = vpop.permute.xlu0 %8559 }
 0x28a   :  { %19934 = vst [vmem:[#allocation50_spill] sm:$0xff] %v13654_v4  ;;  %v8196_v41 = vunpack.i.l.bf16 %v19938_v17  ;;  %v3222_v24 = vpack.c.b16 %v3219_v43, %v3219_v43  ;;  %v8147_v59 = vunpack.i.h.bf16 %v19941_v5  ;;  %v8146_v57 = vunpack.i.l.bf16 %v19941_v5  ;;  %v19942_v27 = vld [vmem:[#allocation79_spill] sm:$0xff]  ;;  %v19965_v56 = vld [vmem:[#allocation148_spill] sm:$0xff] }
 0x28b   :  { %19936 = vst [vmem:[#allocation51_spill] sm:$0xff] %v13659_v32  ;;  %v8142_v4 = vunpack.i.h.bf16 %v19942_v27  ;;  %v8793_v32 = vpack.i.bf16 %v7448_v23, %v7447_v61  ;;  %v8141_v1 = vunpack.i.l.bf16 %v19942_v27  ;;  %v8788_v62 = vpack.i.bf16 %v7446_v42, %v7445_v55  ;;  %v19951_v42 = vld [vmem:[#allocation81_spill] sm:$0xff]  ;;  %v19955_v27 = vld [vmem:[#allocation84_spill] sm:$0xff] }
 0x28c   :  { %19937 = vst [vmem:[#allocation52_spill] sm:$0xff] %v13672_v51  ;;  %v13676_v36 = vpop.permute.xlu1 %8564  ;;  %v8783_v30 = vpack.i.bf16 %v7444_v45, %v7443_v49  ;;  %v13686_v17 = vsel %vm2848_vm3, %v13100_v52, %v8131_v18  ;;  %v19943_v51 = vld [vmem:[#allocation80_spill] sm:$0xff]  ;;  %v13693_v5 = vsel %vm2848_vm3, %v13105_v60, %v8132_v21  ;;  %v13697_v61 = vsel %vm2848_vm3, %v13223_v47, %v8126_v10  ;;  %v19946_v60 = vld [vmem:[#allocation22_spill] sm:$0xff] }
 0x28d   :  { %19939 = vst [vmem:[#allocation5_spill] sm:$0xff] %v13676_v36  ;;  %v8212_v36 = vunpack.i.h.bf16 %v19943_v51  ;;  %v8211_v43 = vunpack.i.l.bf16 %v19943_v51  ;;  %v13701_v23 = vsel %vm2848_vm3, %v13227_v0, %v8127_v9  ;;  %v13705_v52 = vsel %vm2848_vm3, %v13426_v53, %v8196_v41  ;;  %v19948_v47 = vld [vmem:[#allocation134_spill] sm:$0xff]  ;;  %v7550_v53 = vld [vmem:[%s19030_s3 + $0x8] sm:$0xff]  ;;  %v19966_v33 = vld [vmem:[#allocation32_spill] sm:$0xff] }
 0x28e   :  { %19940 = vst [vmem:[#allocation6_spill] sm:$0xff] %v13678_v54  ;;  %v3324_v54 = vsel %vm3322_vm4, %v3222_v24, 0  ;;  %v13709_v55 = vsel %vm2848_vm3, %v13430_v20, %v8197_v37  ;;  %v13713_v21 = vsel %vm2848_vm3, %v19946_v60, %v8146_v57  ;;  %v13717_v18 = vsel %vm2848_vm3, %v19948_v47, %v8147_v59  ;;  %v7453_v0 = vld [vmem:[%s19029_s0 + $0x2a2] sm:$0xff]  ;;  %v7454_v45 = vld [vmem:[%s19029_s0 + $0x2aa] sm:$0xff]  ;;  %v7452_v24 = vld [vmem:[%s19029_s0 + $0x292] sm:$0xff] }
 0x28f   :  { %3331 = vmatpush.bf16.msra.mxu0 %v3324_v54  ;;  %7553 = vmatpush.bf16.msra.mxu2 %v3324_v54  ;;  %19944 = vst [vmem:[#allocation7_spill] sm:$0xff] %v13705_v52  ;;  %v19950_v20 = vld [vmem:[#allocation30_spill] sm:$0xff]  ;;  %v13732_v10 = vsel %vm2848_vm3, %v13291_v13, %v8142_v4  ;;  %v8162_v49 = vunpack.i.h.bf16 %v19951_v42  ;;  %v13746_v13 = vsel %vm2913_vm5, %v13491_v7, %v8211_v43  ;;  %v7449_v59 = vld [vmem:[%s19029_s0 + $0x272] sm:$0xff] }
 0x290   :  { %19945 = vst [vmem:[#allocation53_spill] sm:$0xff] %v13709_v55  ;;  %8794 = vrot.lane.b32.xlu2 %v8793_v32, %s10240_s23  ;;  %v13728_v9 = vsel %vm2848_vm3, %v19950_v20, %v8141_v1  ;;  %v8161_v32 = vunpack.i.l.bf16 %v19951_v42  ;;  %8789 = vrot.lane.b32.xlu1 %v8788_v62, %s10240_s23  ;;  %v7451_v1 = vld [vmem:[%s19029_s0 + $0x28a] sm:$0xff]  ;;  %v13750_v4 = vsel %vm2913_vm5, %v13495_v38, %v8212_v36  ;;  %v19952_v51 = vld [vmem:[#allocation82_spill] sm:$0xff]  ;;  %v13754_v54 = vpop.permute.xlu2 %8629  ;;  %v8177_v62 = vunpack.i.h.bf16 %v19955_v27  ;;  %v19958_v47 = vld [vmem:[#allocation85_spill] sm:$0xff] }
 0x291   :  { %19947 = vst [vmem:[#allocation14_spill] sm:$0xff] %v13713_v21  ;;  %8784 = vrot.lane.b32.xlu0 %v8783_v30, %s10240_s23  ;;  %v8157_v37 = vunpack.i.h.bf16 %v19952_v51  ;;  %v8156_v41 = vunpack.i.l.bf16 %v19952_v51  ;;  %v7450_v7 = vld [vmem:[%s19029_s0 + $0x27a] sm:$0xff]  ;;  %v19954_v38 = vld [vmem:[#allocation83_spill] sm:$0xff]  ;;  %v8176_v30 = vunpack.i.l.bf16 %v19955_v27  ;;  %v13771_v60 = vpop.permute.xlu0 %8574  ;;  %v8172_v20 = vunpack.i.h.bf16 %v19958_v47  ;;  %v19960_v27 = vld [vmem:[#allocation88_spill] sm:$0xff] }
 0x292   :  { %19949 = vst [vmem:[#allocation118_spill] sm:$0xff] %v13717_v18  ;;  %v8227_v36 = vunpack.i.h.bf16 %v19954_v38  ;;  %v8226_v57 = vunpack.i.l.bf16 %v19954_v38  ;;  %v8171_v42 = vunpack.i.l.bf16 %v19958_v47  ;;  %v19959_v51 = vld [vmem:[#allocation86_spill] sm:$0xff]  ;;  %v8808_v52 = vpack.i.bf16 %v7454_v45, %v7453_v0  ;;  %v19963_v21 = vld [vmem:[#allocation24_spill] sm:$0xff] }
 0x293   :  { %19953 = vst [vmem:[#allocation128_spill] sm:$0xff] %v13754_v54  ;;  %3332 = vmatpush.bf16.msra.mxu0 %v7550_v53  ;;  %7554 = vmatpush.bf16.msra.mxu2 %v7550_v53  ;;  %v8242_v55 = vunpack.i.h.bf16 %v19959_v51  ;;  %v7549_v38 = vld [vmem:[%s19030_s3] sm:$0xff]  ;;  %v8241_v54 = vunpack.i.l.bf16 %v19959_v51  ;;  %v8186_v8 = vunpack.i.l.bf16 %v19960_v27  ;;  %v8798_v18 = vpack.i.bf16 %v7450_v7, %v7449_v59  ;;  %v19973_v59 = vld [vmem:[#allocation36_spill] sm:$0xff] }
 0x294   :  { %v13769_v43 = vpop.permute.xlu1 %8579  ;;  %19957 = vst [vmem:[#allocation55_spill] sm:$0xff] %v13771_v60  ;;  %v19961_v60 = vld [vmem:[#allocation23_spill] sm:$0xff]  ;;  %v13787_v47 = vsel %vm2848_vm3, %v19963_v21, %v8162_v49  ;;  %v13791_v0 = vsel %vm2848_vm3, %v19965_v56, %v8156_v41  ;;  %v8187_v45 = vunpack.i.h.bf16 %v19960_v27  ;;  %v13796_v51 = vsel %vm2848_vm3, %v19966_v33, %v8157_v37  ;;  %v19967_v21 = vld [vmem:[#allocation89_spill] sm:$0xff] }
 0x295   :  { %19956 = vst [vmem:[#allocation54_spill] sm:$0xff] %v13769_v43  ;;  %v8803_v43 = vpack.i.bf16 %v7452_v24, %v7451_v1  ;;  %v13783_v53 = vsel %vm2848_vm3, %v19961_v60, %v8161_v32  ;;  %v13800_v1 = vsel %vm2913_vm5, %v13516_v12, %v8226_v57  ;;  %v13804_v32 = vsel %vm2913_vm5, %v13520_v19, %v8227_v36  ;;  %v19968_v56 = vld [vmem:[#allocation25_spill] sm:$0xff]  ;;  %v19970_v24 = vld [vmem:[#allocation26_spill] sm:$0xff]  ;;  %v19972_v37 = vld [vmem:[#allocation35_spill] sm:$0xff] }
 0x296   :  { %19962 = vst [vmem:[#allocation56_spill] sm:$0xff] %v13783_v53  ;;  %v8256_v49 = vunpack.i.l.bf16 %v19967_v21  ;;  %v13809_v41 = vsel %vm2848_vm3, %v19968_v56, %v8176_v30  ;;  %v13813_v33 = vsel %vm2848_vm3, %v19970_v24, %v8177_v62  ;;  %v13817_v12 = vsel %vm2848_vm3, %v19972_v37, %v8171_v42  ;;  %v7459_v7 = vld [vmem:[%s19029_s0 + $0x2ea] sm:$0xff] }
 0x297   :  { %19964 = vst [vmem:[#allocation57_spill] sm:$0xff] %v13787_v47  ;;  %3333 = vmatpush.bf16.msra.mxu0 %v7549_v38  ;;  %7555 = vmatpush.bf16.msra.mxu2 %v7549_v38  ;;  %v13821_v19 = vsel %vm2848_vm3, %v19973_v59, %v8172_v20  ;;  %v13829_v36 = vsel %vm2913_vm5, %v13545_v31, %v8241_v54  ;;  %v7457_v31 = vld [vmem:[%s19029_s0 + $0x2d2] sm:$0xff]  ;;  %v7455_v20 = vld [vmem:[%s19029_s0 + $0x2ba] sm:$0xff] }
 0x298   :  { %19969 = vst [vmem:[#allocation58_spill] sm:$0xff] %v13809_v41  ;;  %8809 = vrot.lane.b32.xlu2 %v8808_v52, %s10240_s23  ;;  %v13833_v57 = vsel %vm2913_vm5, %v13557_v29, %v8242_v55  ;;  %v13838_v60 = vsel %vm2848_vm3, %v13392_v63, %v8186_v8  ;;  %8804 = vrot.lane.b32.xlu1 %v8803_v43, %s10240_s23  ;;  %v7460_v52 = vld [vmem:[%s19029_s0 + $0x2f2] sm:$0xff]  ;;  %v8257_v55 = vunpack.i.h.bf16 %v19967_v21  ;;  %v19975_v63 = vld [vmem:[#allocation91_spill] sm:$0xff]  ;;  %v13855_v43 = vpop.permute.xlu2 %8644 }
 0x299   :  { %19971 = vst [vmem:[#allocation59_spill] sm:$0xff] %v13813_v33  ;;  %8799 = vrot.lane.b32.xlu0 %v8798_v18, %s10240_s23  ;;  %v13850_v29 = vsel %vm2848_vm3, %v13396_v22, %v8187_v45  ;;  %v8202_v8 = vunpack.i.h.bf16 %v19975_v63  ;;  %v8201_v54 = vunpack.i.l.bf16 %v19975_v63  ;;  %v7458_v18 = vld [vmem:[%s19029_s0 + $0x2da] sm:$0xff]  ;;  %v7456_v22 = vld [vmem:[%s19029_s0 + $0x2c2] sm:$0xff]  ;;  %v13868_v42 = vsel %vm2913_vm5, %v13605_v50, %v8256_v49  ;;  %v19977_v38 = vld [vmem:[#allocation92_spill] sm:$0xff]  ;;  %v13875_v37 = vpop.permute.xlu0 %8589 }
 0x29a   :  { %19976 = vst [vmem:[#allocation10_spill] sm:$0xff] %v13855_v43  ;;  %v8272_v27 = vunpack.i.h.bf16 %v19977_v38  ;;  %v8271_v45 = vunpack.i.l.bf16 %v19977_v38  ;;  %v19978_v21 = vld [vmem:[#allocation93_spill] sm:$0xff]  ;;  %v19981_v63 = vld [vmem:[#allocation94_spill] sm:$0xff]  ;;  %v8823_v41 = vpack.i.bf16 %v7460_v52, %v7459_v7  ;;  %v19982_v43 = vld [vmem:[#allocation95_spill] sm:$0xff]  ;;  %v8818_v47 = vpack.i.bf16 %v7458_v18, %v7457_v31 }
 0x29b   :  { %v8221_v56 = vunpack.i.l.bf16 %v19978_v21  ;;  %19980 = vst [vmem:[#allocation60_spill] sm:$0xff] %v13875_v37  ;;  %v8222_v59 = vunpack.i.h.bf16 %v19978_v21  ;;  %v8217_v30 = vunpack.i.h.bf16 %v19981_v63  ;;  %v8216_v33 = vunpack.i.l.bf16 %v19981_v63  ;;  %v19983_v63 = vld [vmem:[#allocation96_spill] sm:$0xff] }
 0x29c   :  { %v13873_v24 = vpop.permute.xlu1 %8594  ;;  %v8287_v50 = vunpack.i.h.bf16 %v19982_v43  ;;  %v8286_v49 = vunpack.i.l.bf16 %v19982_v43  ;;  %v8813_v53 = vpack.i.bf16 %v7456_v22, %v7455_v20  ;;  %v13884_v38 = vsel %vm2913_vm5, %v13609_v16, %v8257_v55  ;;  %v19984_v16 = vld [vmem:[#allocation33_spill] sm:$0xff] }
 0x29d   :  { %19979 = vst [vmem:[#allocation11_spill] sm:$0xff] %v13873_v24  ;;  %v13888_v24 = vsel %vm2848_vm3, %v13418_v35, %v8201_v54  ;;  %v13892_v21 = vsel %vm2848_vm3, %v13422_v25, %v8202_v8  ;;  %v8236_v7 = vunpack.i.l.bf16 %v19983_v63  ;;  %v13897_v52 = vsel %vm2913_vm5, %v13637_v14, %v8271_v45  ;;  %v19985_v54 = vld [vmem:[#allocation34_spill] sm:$0xff]  ;;  %v19986_v14 = vld [vmem:[#allocation97_spill] sm:$0xff] }
 0x29e   :  { %v13901_v31 = vsel %vm2913_vm5, %v13641_v58, %v8272_v27  ;;  %v13905_v55 = vsel %vm2913_vm5, %v19984_v16, %v8221_v56  ;;  %v8237_v35 = vunpack.i.h.bf16 %v19983_v63  ;;  %v13910_v25 = vsel %vm2913_vm5, %v19985_v54, %v8222_v59  ;;  %v7465_v58 = vld [vmem:[%s19029_s0 + $0x332] sm:$0xff]  ;;  %v19990_v27 = vld [vmem:[#allocation98_spill] sm:$0xff]  ;;  %v19991_v56 = vld [vmem:[#allocation99_spill] sm:$0xff] }
 0x29f   :  { %v13914_v8 = vsel %vm2913_vm5, %v13457_v6, %v8216_v33  ;;  %v8232_v43 = vunpack.i.h.bf16 %v19986_v14  ;;  %v8231_v18 = vunpack.i.l.bf16 %v19986_v14  ;;  %v13925_v22 = vsel %vm2913_vm5, %v13487_v26, %v8217_v30  ;;  %v7463_v26 = vld [vmem:[%s19029_s0 + $0x31a] sm:$0xff]  ;;  %v19993_v16 = vld [vmem:[#allocation100_spill] sm:$0xff] }
 0x2a0   :  { %8824 = vrot.lane.b32.xlu2 %v8823_v41, %s10240_s23  ;;  %v13929_v6 = vsel %vm2913_vm5, %v13697_v61, %v8286_v49  ;;  %v13933_v33 = vsel %vm2913_vm5, %v13701_v23, %v8287_v50  ;;  %8819 = vrot.lane.b32.xlu1 %v8818_v47, %s10240_s23  ;;  %v7466_v41 = vld [vmem:[%s19029_s0 + $0x33a] sm:$0xff]  ;;  %v8302_v45 = vunpack.i.h.bf16 %v19990_v27  ;;  %v8301_v23 = vunpack.i.l.bf16 %v19990_v27  ;;  %v13950_v59 = vpop.permute.xlu2 %8659  ;;  %v7461_v50 = vld [vmem:[%s19029_s0 + $0x302] sm:$0xff] }
 0x2a1   :  { %19987 = vst [vmem:[#allocation12_spill] sm:$0xff] %v13929_v6  ;;  %8814 = vrot.lane.b32.xlu0 %v8813_v53, %s10240_s23  ;;  %v19989_v30 = vld [vmem:[#allocation38_spill] sm:$0xff]  ;;  %v8251_v47 = vunpack.i.l.bf16 %v19991_v56  ;;  %v7462_v49 = vld [vmem:[%s19029_s0 + $0x30a] sm:$0xff]  ;;  %v13963_v63 = vsel %vm2913_vm5, %v13387_v11, %v8237_v35  ;;  %v8247_v54 = vunpack.i.h.bf16 %v19993_v16  ;;  %v8246_v14 = vunpack.i.l.bf16 %v19993_v16  ;;  %v13970_v27 = vpop.permute.xlu0 %8604  ;;  %v19995_v11 = vld [vmem:[#allocation101_spill] sm:$0xff] }
 0x2a2   :  { %19988 = vst [vmem:[#allocation13_spill] sm:$0xff] %v13933_v33  ;;  %v13945_v61 = vsel %vm2913_vm5, %v19989_v30, %v8236_v7  ;;  %v7464_v53 = vld [vmem:[%s19029_s0 + $0x322] sm:$0xff]  ;;  %v8252_v7 = vunpack.i.h.bf16 %v19991_v56  ;;  %v13974_v20 = vsel %vm2913_vm5, %v13508_v44, %v8231_v18  ;;  %v13978_v62 = vsel %vm2913_vm5, %v13512_v40, %v8232_v43 }
 0x2a3   :  { %19992 = vst [vmem:[#allocation61_spill] sm:$0xff] %v13950_v59  ;;  %v8316_v35 = vunpack.i.l.bf16 %v19995_v11  ;;  %v8838_v59 = vpack.i.bf16 %v7466_v41, %v7465_v58  ;;  %v8317_v56 = vunpack.i.h.bf16 %v19995_v11  ;;  %v19996_v33 = vld [vmem:[#allocation102_spill] sm:$0xff]  ;;  %v8833_v16 = vpack.i.bf16 %v7464_v53, %v7463_v26  ;;  %v19997_v18 = vld [vmem:[#allocation39_spill] sm:$0xff]  ;;  %v19998_v58 = vld [vmem:[#allocation40_spill] sm:$0xff] }
 0x2a4   :  { %v13968_v30 = vpop.permute.xlu1 %8609  ;;  %v8266_v6 = vunpack.i.l.bf16 %v19996_v33  ;;  %v8828_v37 = vpack.i.bf16 %v7462_v49, %v7461_v50  ;;  %v13989_v44 = vsel %vm2913_vm5, %v13732_v10, %v8302_v45  ;;  %v13993_v40 = vsel %vm2913_vm5, %v19997_v18, %v8251_v47  ;;  %v19999_v10 = vld [vmem:[#allocation103_spill] sm:$0xff]  ;;  %v20000_v47 = vld [vmem:[#allocation104_spill] sm:$0xff]  ;;  %v20004_v11 = vld [vmem:[#allocation106_spill] sm:$0xff] }
 0x2a5   :  { %19994 = vst [vmem:[#allocation62_spill] sm:$0xff] %v13968_v30  ;;  %v13985_v30 = vsel %vm2913_vm5, %v13728_v9, %v8301_v23  ;;  %v8267_v43 = vunpack.i.h.bf16 %v19996_v33  ;;  %v13998_v41 = vsel %vm2913_vm5, %v19998_v58, %v8252_v7  ;;  %v14002_v26 = vsel %vm2913_vm5, %v13537_v3, %v8246_v14  ;;  %v20002_v7 = vld [vmem:[#allocation105_spill] sm:$0xff]  ;;  %v20003_v14 = vld [vmem:[#allocation42_spill] sm:$0xff]  ;;  %v7467_v58 = vld [vmem:[%s19029_s0 + $0x34a] sm:$0xff] }
 0x2a6   :  { %v14006_v9 = vsel %vm2913_vm5, %v13541_v39, %v8247_v54  ;;  %v8261_v45 = vunpack.i.l.bf16 %v19999_v10  ;;  %v14011_v23 = vsel %vm2913_vm5, %v13791_v0, %v8316_v35  ;;  %v8262_v33 = vunpack.i.h.bf16 %v19999_v10  ;;  %v20001_v39 = vld [vmem:[#allocation41_spill] sm:$0xff]  ;;  %v20007_v10 = vld [vmem:[#allocation108_spill] sm:$0xff] }
 0x2a7   :  { %v8332_v53 = vunpack.i.h.bf16 %v20000_v47  ;;  %v8331_v50 = vunpack.i.l.bf16 %v20000_v47  ;;  %v14019_v3 = vsel %vm2913_vm5, %v13796_v51, %v8317_v56  ;;  %v14023_v49 = vsel %vm2913_vm5, %v20001_v39, %v8266_v6  ;;  %v20005_v56 = vld [vmem:[#allocation107_spill] sm:$0xff] }
 0x2a8   :  { %8839 = vrot.lane.b32.xlu2 %v8838_v59, %s10240_s23  ;;  %v8282_v54 = vunpack.i.h.bf16 %v20002_v7  ;;  %v8281_v0 = vunpack.i.l.bf16 %v20002_v7  ;;  %8834 = vrot.lane.b32.xlu1 %v8833_v16, %s10240_s23  ;;  %v14031_v59 = vsel %vm2913_vm5, %v20003_v14, %v8267_v43  ;;  %v8277_v51 = vunpack.i.h.bf16 %v20004_v11  ;;  %v14036_v18 = vpop.permute.xlu2 %8674 }
 0x2a9   :  { %8829 = vrot.lane.b32.xlu0 %v8828_v37, %s10240_s23  ;;  %v8276_v35 = vunpack.i.l.bf16 %v20004_v11  ;;  %v8346_v6 = vunpack.i.l.bf16 %v20005_v56  ;;  %20006 = vst [vmem:[#allocation63_spill] sm:$0xff] %v14036_v18  ;;  %v7468_v37 = vld [vmem:[%s19029_s0 + $0x352] sm:$0xff]  ;;  %v14046_v16 = vsel %vm2913_vm5, %v13596_v2, %v8261_v45  ;;  %v8347_v43 = vunpack.i.h.bf16 %v20005_v56  ;;  %v14053_v14 = vpop.permute.xlu0 %8619 }
 0x2aa   :  { %v8297_v47 = vunpack.i.h.bf16 %v20007_v10  ;;  %v8296_v39 = vunpack.i.l.bf16 %v20007_v10  ;;  %v14057_v11 = vsel %vm2913_vm5, %v13601_v15, %v8262_v33  ;;  %v14061_v18 = vsel %vm2913_vm5, %v13817_v12, %v8331_v50  ;;  %v20011_v45 = vld [vmem:[#allocation109_spill] sm:$0xff] }
 0x2ab   :  { %20009 = vst [vmem:[#allocation65_spill] sm:$0xff] %v14061_v18  ;;  %v14065_v2 = vsel %vm2913_vm5, %v13821_v19, %v8332_v53  ;;  %v8291_v56 = vunpack.i.l.bf16 %v20011_v45  ;;  %v14070_v10 = vsel %vm2913_vm5, %v13500_v48, %v8281_v0  ;;  %v8292_v15 = vunpack.i.h.bf16 %v20011_v45  ;;  %v20013_v48 = vld [vmem:[#allocation143_spill] sm:$0xff]  ;;  %v20026_v18 = vld [vmem:[#allocation46_spill] sm:$0xff] }
 0x2ac   :  { %v14051_v7 = vpop.permute.xlu1 %8624  ;;  %20010 = vst [vmem:[#allocation66_spill] sm:$0xff] %v14065_v2  ;;  %v8843_v33 = vpack.i.bf16 %v7468_v37, %v7467_v58  ;;  %v14079_v12 = vsel %vm2913_vm5, %v13622_v28, %v8276_v35  ;;  %v14083_v19 = vsel %vm2913_vm5, %v13626_v46, %v8277_v51  ;;  %v14087_v53 = vsel %vm2913_vm5, %v13838_v60, %v8346_v6  ;;  %v20016_v28 = vld [vmem:[#allocation8_spill] sm:$0xff]  ;;  %v20017_v51 = vld [vmem:[#allocation110_spill] sm:$0xff]  ;;  %v20018_v58 = vld [vmem:[#allocation45_spill] sm:$0xff] }
 0x2ad   :  { %20008 = vst [vmem:[#allocation64_spill] sm:$0xff] %v14051_v7  ;;  %v14074_v7 = vsel %vm2913_vm5, %v13504_v34, %v8282_v54  ;;  %v8371_v50 = vunpack.i.l.bf16 %v20013_v48  ;;  %v14092_v34 = vsel %vm2913_vm5, %v13850_v29, %v8347_v43  ;;  %v20015_v54 = vld [vmem:[#allocation158_spill] sm:$0xff]  ;;  %v14100_v35 = vsel %vm2913_vm5, %v20016_v28, %v8297_v47  ;;  %v20019_v47 = vld [vmem:[#allocation111_spill] sm:$0xff] }
 0x2ae   :  { %20012 = vst [vmem:[#allocation67_spill] sm:$0xff] %v14087_v53  ;;  %v14096_v0 = vsel %vm2913_vm5, %v20015_v54, %v8296_v39  ;;  %v8372_v46 = vunpack.i.h.bf16 %v20013_v48  ;;  %v14105_v60 = vsel %vm2913_vm5, %v13686_v17, %v8291_v56  ;;  %v8361_v6 = vunpack.i.l.bf16 %v20017_v51  ;;  %v20020_v17 = vld [vmem:[#allocation112_spill] sm:$0xff] }
 0x2af   :  { %20014 = vst [vmem:[#allocation16_spill] sm:$0xff] %v14092_v34  ;;  %v8532_v37 = vunpack.i.h.bf16 %v20018_v58  ;;  %v8531_v29 = vunpack.i.l.bf16 %v20018_v58  ;;  %v14112_v43 = vsel %vm2913_vm5, %v13693_v5, %v8292_v15  ;;  %v8362_v39 = vunpack.i.h.bf16 %v20017_v51 }
 0x2b0   :  { %v8312_v45 = vunpack.i.h.bf16 %v20019_v47  ;;  %v8311_v48 = vunpack.i.l.bf16 %v20019_v47  ;;  %v8307_v56 = vunpack.i.h.bf16 %v20020_v17  ;;  %v8306_v54 = vunpack.i.l.bf16 %v20020_v17  ;;  %v8690_v58 = vpop.permute.xlu2 %8689  ;;  %v20023_v17 = vld [vmem:[#allocation113_spill] sm:$0xff] }
 0x2b1   :  { %8844 = vrot.lane.b32.xlu0 %v8843_v33, %s10240_s23  ;;  %v2979_v28 = vsel %vm2978_vm6, %v13746_v13, %v8371_v50  ;;  %v2980_v5 = vsel %vm2978_vm6, %v13750_v4, %v8372_v46  ;;  %v8692_v15 = vunpack.i.h.bf16 %v8690_v58  ;;  %v8691_v51 = vunpack.i.l.bf16 %v8690_v58  ;;  %v14126_v47 = vpop.permute.xlu0 %8634 }
 0x2b2   :  { %v14130_v33 = vsel %vm2913_vm5, %v13888_v24, %v8361_v6  ;;  %v8377_v53 = vunpack.i.h.bf16 %v20023_v17  ;;  %v3044_v13 = vsel %vm3043_vm8, %v2979_v28, %v8531_v29  ;;  %v3045_v50 = vsel %vm3043_vm8, %v2980_v5, %v8532_v37  ;;  %v20028_v37 = vld [vmem:[#allocation4_spill] sm:$0xff]  ;;  %v20030_v5 = vld [vmem:[#allocation149_spill] sm:$0xff] }
 0x2b3   :  { %20022 = vst [vmem:[#allocation137_spill] sm:$0xff] %v14130_v33  ;;  %v8376_v2 = vunpack.i.l.bf16 %v20023_v17  ;;  %v3109_v4 = vsel %vm3108_vm7, %v3044_v13, %v8691_v51  ;;  %v3110_v46 = vsel %vm3108_vm7, %v3045_v50, %v8692_v15  ;;  %v14140_v58 = vsel %vm2913_vm5, %v13892_v21, %v8362_v39  ;;  %v20031_v17 = vld [vmem:[#allocation14_spill] sm:$0xff]  ;;  %v20034_v13 = vld [vmem:[#allocation160_spill] sm:$0xff] }
 0x2b4   :  { %v14124_v34 = vpop.permute.xlu1 %8639  ;;  %20024 = vst [vmem:[#allocation126_spill] sm:$0xff] %v14140_v58  ;;  %v3173_v33 = vpack.c.bf16 %v3110_v46, %v3109_v4  ;;  %v14146_v29 = vsel %vm2913_vm5, %v20026_v18, %v8311_v48  ;;  %v14150_v28 = vsel %vm2913_vm5, %v20028_v37, %v8312_v45  ;;  %v8387_v15 = vunpack.i.h.bf16 %v20030_v5  ;;  %v20032_v39 = vld [vmem:[#allocation118_spill] sm:$0xff]  ;;  %v20045_v58 = vld [vmem:[#allocation147_spill] sm:$0xff] }
 0x2b5   :  { %20021 = vst [vmem:[#allocation18_spill] sm:$0xff] %v14124_v34  ;;  %v20025_v34 = vld [vmem:[#allocation114_spill] sm:$0xff]  ;;  %v8386_v51 = vunpack.i.l.bf16 %v20030_v5  ;;  %v14156_v21 = vsel %vm2913_vm5, %v20031_v17, %v8306_v54  ;;  %v8547_v50 = vunpack.i.h.bf16 %v20034_v13  ;;  %v8546_v18 = vunpack.i.l.bf16 %v20034_v13  ;;  %v20038_v5 = vld [vmem:[#allocation49_spill] sm:$0xff] }
 0x2b6   :  { %v8327_v24 = vunpack.i.h.bf16 %v20025_v34  ;;  %v8326_v6 = vunpack.i.l.bf16 %v20025_v34  ;;  %20027 = vst [vmem:[#allocation68_spill] sm:$0xff] %v14146_v29  ;;  %v14160_v34 = vsel %vm2913_vm5, %v20032_v39, %v8307_v56  ;;  %7477 = vmatmul.msk.bf16.vlgmr.msra.gmra.mxu0 %vm3225_vm9, %v3173_v33  ;;  %v14167_v45 = vsel %vm2978_vm6, %v13914_v8, %v8376_v2  ;;  %v20036_v56 = vld [vmem:[#allocation48_spill] sm:$0xff]  ;;  %v20040_v33 = vld [vmem:[#allocation121_spill] sm:$0xff] }
 0x2b7   :  { %20029 = vst [vmem:[#allocation69_spill] sm:$0xff] %v14150_v28  ;;  %v14171_v48 = vsel %vm2978_vm6, %v13925_v22, %v8377_v53  ;;  %v8392_v39 = vunpack.i.h.bf16 %v20040_v33  ;;  %v8391_v8 = vunpack.i.l.bf16 %v20040_v33  ;;  %v2985_v22 = vsel %vm2978_vm6, %v13800_v1, %v8386_v51  ;;  %v20052_v29 = vld [vmem:[#allocation116_spill] sm:$0xff] }
 0x2b8   :  { %20033 = vst [vmem:[#allocation70_spill] sm:$0xff] %v14160_v34  ;;  %v14177_v37 = vsel %vm2913_vm5, %v20036_v56, %v8326_v6  ;;  %v14181_v17 = vsel %vm2913_vm5, %v20038_v5, %v8327_v24  ;;  %v8705_v2 = vpop.permute.xlu2 %8704  ;;  %v2986_v53 = vsel %vm2978_vm6, %v13804_v32, %v8387_v15  ;;  %v20042_v56 = vld [vmem:[#allocation131_spill] sm:$0xff]  ;;  %v8466_v34 = vunpack.i.l.bf16 %v20052_v29 }
 0x2b9   :  { %20037 = vst [vmem:[#allocation71_spill] sm:$0xff] %v14177_v37  ;;  %v8707_v13 = vunpack.i.h.bf16 %v8705_v2  ;;  %v8706_v4 = vunpack.i.l.bf16 %v8705_v2  ;;  %v14191_v6 = vpop.permute.xlu0 %8649  ;;  %v8407_v24 = vunpack.i.h.bf16 %v20042_v56  ;;  %v8406_v5 = vunpack.i.l.bf16 %v20042_v56  ;;  %v20043_v37 = vld [vmem:[#allocation142_spill] sm:$0xff] }
 0x2ba   :  { %20039 = vst [vmem:[#allocation72_spill] sm:$0xff] %v14181_v17  ;;  %v3050_v17 = vsel %vm3043_vm8, %v2985_v22, %v8546_v18  ;;  %v3051_v33 = vsel %vm3043_vm8, %v2986_v53, %v8547_v50  ;;  %v8422_v54 = vunpack.i.h.bf16 %v20043_v37  ;;  %v8421_v1 = vunpack.i.l.bf16 %v20043_v37  ;;  %v20046_v37 = vld [vmem:[#allocation155_spill] sm:$0xff] }
 0x2bb   :  { %v14200_v32 = vsel %vm3108_vm7, %v3050_v17, %v8706_v4  ;;  %v14203_v15 = vsel %vm3108_vm7, %v3051_v33, %v8707_v13  ;;  %v8436_v56 = vunpack.i.l.bf16 %v20045_v58  ;;  %v14212_v50 = vsel %vm2978_vm6, %v13974_v20, %v8391_v8  ;;  %v20047_v33 = vld [vmem:[#allocation6_spill] sm:$0xff] }
 0x2bc   :  { %v14189_v46 = vpop.permute.xlu1 %8654  ;;  %v14216_v4 = vsel %vm2978_vm6, %v13978_v62, %v8392_v39  ;;  %v8402_v17 = vunpack.i.h.bf16 %v20046_v37  ;;  %v8401_v22 = vunpack.i.l.bf16 %v20046_v37  ;;  %v14222_v53 = vsel %vm2978_vm6, %v14002_v26, %v8406_v5  ;;  %v20048_v26 = vld [vmem:[#allocation150_spill] sm:$0xff] }
 0x2bd   :  { %20041 = vst [vmem:[#allocation73_spill] sm:$0xff] %v14189_v46  ;;  %v14226_v13 = vsel %vm2978_vm6, %v14006_v9, %v8407_v24  ;;  %v8562_v2 = vunpack.i.h.bf16 %v20047_v33  ;;  %v8561_v20 = vunpack.i.l.bf16 %v20047_v33  ;;  %v14232_v62 = vsel %vm2978_vm6, %v14046_v16, %v8421_v1  ;;  %v20049_v37 = vld [vmem:[#allocation154_spill] sm:$0xff] }
 0x2be   :  { %v14236_v39 = vsel %vm2978_vm6, %v14057_v11, %v8422_v54  ;;  %v8437_v8 = vunpack.i.h.bf16 %v20045_v58  ;;  %v8382_v5 = vunpack.i.h.bf16 %v20048_v26  ;;  %v14242_v9 = vsel %vm2978_vm6, %v14079_v12, %v8436_v56  ;;  %v20051_v12 = vld [vmem:[#allocation156_spill] sm:$0xff] }
 0x2bf   :  { %v8381_v24 = vunpack.i.l.bf16 %v20048_v26  ;;  %v8452_v33 = vunpack.i.h.bf16 %v20049_v37  ;;  %v8451_v46 = vunpack.i.l.bf16 %v20049_v37  ;;  %v2991_v1 = vsel %vm2978_vm6, %v13829_v36, %v8401_v22  ;;  %v20053_v36 = vld [vmem:[#allocation2_spill] sm:$0xff] }
 0x2c0   :  { %v8720_v16 = vpop.permute.xlu2 %8719  ;;  %v2992_v11 = vsel %vm2978_vm6, %v13833_v57, %v8402_v17  ;;  %v8397_v56 = vunpack.i.h.bf16 %v20051_v12  ;;  %v8396_v26 = vunpack.i.l.bf16 %v20051_v12  ;;  %v3056_v28 = vsel %vm3043_vm8, %v2991_v1, %v8561_v20 }
 0x2c1   :  { %v8722_v58 = vunpack.i.h.bf16 %v8720_v16  ;;  %v8721_v54 = vunpack.i.l.bf16 %v8720_v16  ;;  %v14253_v51 = vpop.permute.xlu0 %8664  ;;  %v3057_v37 = vsel %vm3043_vm8, %v2992_v11, %v8562_v2  ;;  %v8416_v22 = vunpack.i.l.bf16 %v20053_v36 }
 0x2c2   :  { %v14269_v16 = vsel %vm2978_vm6, %v14083_v19, %v8437_v8  ;;  %v8417_v12 = vunpack.i.h.bf16 %v20053_v36  ;;  %v2983_v1 = vsel %vm2978_vm6, %v13905_v55, %v8381_v24  ;;  %v14281_v11 = vsel %vm2978_vm6, %v14105_v60, %v8451_v46 }
 0x2c3   :  { %v14262_v57 = vsel %vm3108_vm7, %v3056_v28, %v8721_v54  ;;  %v14265_v17 = vsel %vm3108_vm7, %v3057_v37, %v8722_v58  ;;  %v2984_v28 = vsel %vm2978_vm6, %v13910_v25, %v8382_v5  ;;  %v14286_v8 = vsel %vm2978_vm6, %v14112_v43, %v8452_v33  ;;  %v20058_v54 = vld [vmem:[#allocation55_spill] sm:$0xff]  ;;  %v20060_v5 = vld [vmem:[#allocation120_spill] sm:$0xff] }
 0x2c4   :  { %v14251_v18 = vpop.permute.xlu1 %8669  ;;  %20054 = vst [vmem:[#allocation74_spill] sm:$0xff] %v14262_v57  ;;  %v14290_v58 = vsel %vm2978_vm6, %v13945_v61, %v8396_v26  ;;  %v8577_v37 = vunpack.i.h.bf16 %v20058_v54  ;;  %v8576_v55 = vunpack.i.l.bf16 %v20058_v54  ;;  %v14296_v25 = vsel %vm2978_vm6, %v13963_v63, %v8397_v56  ;;  %v20067_v57 = vld [vmem:[#allocation44_spill] sm:$0xff] }
 0x2c5   :  { %20050 = vst [vmem:[#allocation141_spill] sm:$0xff] %v14251_v18  ;;  %v20056_v18 = vld [vmem:[#allocation3_spill] sm:$0xff]  ;;  %v14301_v46 = vsel %vm2978_vm6, %v14156_v21, %v8466_v34  ;;  %v2997_v43 = vsel %vm2978_vm6, %v13868_v42, %v8416_v22  ;;  %v2998_v61 = vsel %vm2978_vm6, %v13884_v38, %v8417_v12  ;;  %v8432_v24 = vunpack.i.h.bf16 %v20060_v5  ;;  %v20061_v21 = vld [vmem:[#allocation9_spill] sm:$0xff]  ;;  %v20063_v22 = vld [vmem:[#allocation124_spill] sm:$0xff] }
 0x2c6   :  { %20055 = vst [vmem:[#allocation129_spill] sm:$0xff] %v14265_v17  ;;  %v8411_v20 = vunpack.i.l.bf16 %v20056_v18  ;;  %v8412_v19 = vunpack.i.h.bf16 %v20056_v18  ;;  %v8431_v63 = vunpack.i.l.bf16 %v20060_v5  ;;  %v8426_v34 = vunpack.i.l.bf16 %v20061_v21  ;;  %v20064_v5 = vld [vmem:[#allocation135_spill] sm:$0xff] }
 0x2c7   :  { %20057 = vst [vmem:[#allocation130_spill] sm:$0xff] %v14286_v8  ;;  %v8446_v12 = vunpack.i.l.bf16 %v20063_v22  ;;  %v3063_v54 = vsel %vm3043_vm8, %v2998_v61, %v8577_v37  ;;  %v8542_v2 = vunpack.i.h.bf16 %v20064_v5  ;;  %v8536_v37 = vunpack.i.l.bf16 %v20067_v57  ;;  %v20068_v61 = vld [vmem:[#allocation60_spill] sm:$0xff] }
 0x2c8   :  { %20059 = vst [vmem:[#allocation17_spill] sm:$0xff] %v14301_v46  ;;  %v14309_v18 = vsel %vm2978_vm6, %v13993_v40, %v8411_v20  ;;  %v8735_v33 = vpop.permute.xlu2 %8734  ;;  %v14315_v56 = vsel %vm2978_vm6, %v13998_v41, %v8412_v19  ;;  %v8427_v40 = vunpack.i.h.bf16 %v20061_v21  ;;  %v3062_v20 = vsel %vm3043_vm8, %v2997_v43, %v8576_v55 }
 0x2c9   :  { %v8737_v26 = vunpack.i.h.bf16 %v8735_v33  ;;  %v8736_v42 = vunpack.i.l.bf16 %v8735_v33  ;;  %v14320_v38 = vpop.permute.xlu0 %8679  ;;  %v8541_v41 = vunpack.i.l.bf16 %v20064_v5  ;;  %v3003_v60 = vsel %vm2978_vm6, %v13897_v52, %v8431_v63 }
 0x2ca   :  { %v3004_v21 = vsel %vm2978_vm6, %v13901_v31, %v8432_v24  ;;  %v8537_v55 = vunpack.i.h.bf16 %v20067_v57  ;;  %v14342_v43 = vsel %vm2978_vm6, %v14023_v49, %v8426_v34  ;;  %v14350_v52 = vsel %vm2978_vm6, %v14031_v59, %v8427_v40  ;;  %v20069_v24 = vld [vmem:[#allocation125_spill] sm:$0xff] }
 0x2cb   :  { %v14329_v19 = vsel %vm3108_vm7, %v3062_v20, %v8736_v42  ;;  %v14332_v33 = vsel %vm3108_vm7, %v3063_v54, %v8737_v26  ;;  %v8592_v42 = vunpack.i.h.bf16 %v20068_v61  ;;  %v8591_v20 = vunpack.i.l.bf16 %v20068_v61  ;;  %v20070_v54 = vld [vmem:[#allocation12_spill] sm:$0xff]  ;;  %v20071_v34 = vld [vmem:[#allocation145_spill] sm:$0xff] }
 0x2cc   :  { %v14318_v36 = vpop.permute.xlu1 %8684  ;;  %20065 = vst [vmem:[#allocation76_spill] sm:$0xff] %v14329_v19  ;;  %v8447_v31 = vunpack.i.h.bf16 %v20063_v22  ;;  %v8442_v63 = vunpack.i.h.bf16 %v20069_v24  ;;  %v8441_v57 = vunpack.i.l.bf16 %v20069_v24  ;;  %v3009_v49 = vsel %vm2978_vm6, %v20070_v54, %v8446_v12  ;;  %v20072_v19 = vld [vmem:[#allocation159_spill] sm:$0xff] }
 0x2cd   :  { %20062 = vst [vmem:[#allocation75_spill] sm:$0xff] %v14318_v36  ;;  %v8557_v5 = vunpack.i.h.bf16 %v20071_v34  ;;  %v3048_v61 = vsel %vm3043_vm8, %v2983_v1, %v8541_v41  ;;  %v3049_v17 = vsel %vm3043_vm8, %v2984_v28, %v8542_v2  ;;  %v8556_v26 = vunpack.i.l.bf16 %v20071_v34 }
 0x2ce   :  { %20066 = vst [vmem:[#allocation77_spill] sm:$0xff] %v14332_v33  ;;  %v8552_v59 = vunpack.i.h.bf16 %v20072_v19  ;;  %v3046_v22 = vsel %vm3043_vm8, %v14167_v45, %v8536_v37  ;;  %v3047_v24 = vsel %vm3043_vm8, %v14171_v48, %v8537_v55  ;;  %v3068_v33 = vsel %vm3043_vm8, %v3003_v60, %v8591_v20  ;;  %v20073_v20 = vld [vmem:[#allocation13_spill] sm:$0xff] }
 0x2cf   :  { %v3069_v12 = vsel %vm3043_vm8, %v3004_v21, %v8592_v42  ;;  %v8551_v29 = vunpack.i.l.bf16 %v20072_v19  ;;  %v8607_v8 = vunpack.i.h.bf16 %v13970_v27  ;;  %v8606_v19 = vunpack.i.l.bf16 %v13970_v27 }
 0x2d0   :  { %v8750_v40 = vpop.permute.xlu2 %8749 }
 0x2d1   :  { %v8752_v54 = vunpack.i.h.bf16 %v8750_v40  ;;  %v8751_v36 = vunpack.i.l.bf16 %v8750_v40  ;;  %v8695_v41 = vpop.permute.xlu0 %8694  ;;  %v14393_v40 = vsel %vm2978_vm6, %v14070_v10, %v8441_v57  ;;  %v20076_v57 = vld [vmem:[#allocation5_spill] sm:$0xff] }
 0x2d2   :  { %v8697_v34 = vunpack.i.h.bf16 %v8695_v41  ;;  %v8696_v46 = vunpack.i.l.bf16 %v8695_v41  ;;  %v3053_v41 = vsel %vm3043_vm8, %v14216_v4, %v8552_v59 }
 0x2d3   :  { %v14371_v45 = vsel %vm3108_vm7, %v3068_v33, %v8751_v36  ;;  %v14374_v48 = vsel %vm3108_vm7, %v3069_v12, %v8752_v54  ;;  %v3054_v54 = vsel %vm3043_vm8, %v14290_v58, %v8556_v26 }
 0x2d4   :  { %v8700_v1 = vpop.permute.xlu1 %8699  ;;  %v3111_v60 = vsel %vm3108_vm7, %v3046_v22, %v8696_v46  ;;  %v3112_v21 = vsel %vm3108_vm7, %v3047_v24, %v8697_v34  ;;  %v3010_v46 = vsel %vm2978_vm6, %v20073_v20, %v8447_v31  ;;  %v20075_v24 = vld [vmem:[#allocation37_spill] sm:$0xff]  ;;  %v3055_v31 = vsel %vm3043_vm8, %v14296_v25, %v8557_v5 }
 0x2d5   :  { %v8702_v2 = vunpack.i.h.bf16 %v8700_v1  ;;  %v8701_v28 = vunpack.i.l.bf16 %v8700_v1  ;;  %v3174_v42 = vpack.c.bf16 %v3112_v21, %v3111_v60  ;;  %v8572_v12 = vunpack.i.h.bf16 %v20075_v24 }
 0x2d6   :  { %v8571_v10 = vunpack.i.l.bf16 %v20075_v24  ;;  %v8567_v1 = vunpack.i.h.bf16 %v20076_v57  ;;  %v8566_v20 = vunpack.i.l.bf16 %v20076_v57 }
 0x2d7   :  { %v14379_v55 = vsel %vm3108_vm7, %v3048_v61, %v8701_v28  ;;  %v14382_v37 = vsel %vm3108_vm7, %v3049_v17, %v8702_v2  ;;  %v14397_v17 = vsel %vm2978_vm6, %v14074_v7, %v8442_v63  ;;  %v20074_v61 = vld [vmem:[#allocation127_spill] sm:$0xff]  ;;  %7478 = vmatmul.msk.bf16.gmra.mxu0 %vm3225_vm9, %v3174_v42  ;;  %v3052_v63 = vsel %vm3043_vm8, %v14212_v50, %v8551_v29 }
 0x2d8   :  { %v3175_v36 = vpack.c.bf16 %v14382_v37, %v14379_v55  ;;  %v8462_v27 = vunpack.i.h.bf16 %v20074_v61  ;;  %v8461_v22 = vunpack.i.l.bf16 %v20074_v61  ;;  %v3074_v2 = vsel %vm3043_vm8, %v3009_v49, %v8606_v19 }
 0x2d9   :  { %v8765_v7 = vpop.permute.xlu2 %8764  ;;  %v3075_v28 = vsel %vm3043_vm8, %v3010_v46, %v8607_v8  ;;  %v8710_v60 = vpop.permute.xlu0 %8709  ;;  %v8622_v61 = vunpack.i.h.bf16 %v14053_v14  ;;  %v8621_v19 = vunpack.i.l.bf16 %v14053_v14  ;;  %v20080_v14 = vld [vmem:[#allocation20_spill] sm:$0xff] }
 0x2da   :  { %v8767_v34 = vunpack.i.h.bf16 %v8765_v7  ;;  %v8766_v58 = vunpack.i.l.bf16 %v8765_v7  ;;  %v8712_v21 = vunpack.i.h.bf16 %v8710_v60  ;;  %v8711_v42 = vunpack.i.l.bf16 %v8710_v60 }
 0x2db   :  { %v3015_v7 = vsel %vm2978_vm6, %v13985_v30, %v8461_v22 }
 0x2dc   :  { %v8715_v26 = vpop.permute.xlu1 %8714  ;;  %v14418_v29 = vsel %vm3108_vm7, %v3074_v2, %v8766_v58  ;;  %v14421_v50 = vsel %vm3108_vm7, %v3075_v28, %v8767_v34  ;;  %v14424_v4 = vsel %vm3108_vm7, %v3052_v63, %v8711_v42  ;;  %v14427_v8 = vsel %vm3108_vm7, %v3053_v41, %v8712_v21  ;;  %v20079_v63 = vld [vmem:[#allocation140_spill] sm:$0xff] }
 0x2dd   :  { %v8717_v25 = vunpack.i.h.bf16 %v8715_v26  ;;  %v8716_v5 = vunpack.i.l.bf16 %v8715_v26  ;;  %20077 = vst [vmem:[#allocation78_spill] sm:$0xff] %v14418_v29  ;;  %v3177_v46 = vpack.c.bf16 %v14427_v8, %v14424_v4  ;;  %v8456_v41 = vunpack.i.l.bf16 %v20079_v63  ;;  %v20081_v26 = vld [vmem:[#allocation43_spill] sm:$0xff] }
 0x2de   :  { %20078 = vst [vmem:[#allocation79_spill] sm:$0xff] %v14421_v50  ;;  %v8477_v2 = vunpack.i.h.bf16 %v20080_v14  ;;  %v8476_v28 = vunpack.i.l.bf16 %v20080_v14  ;;  %v3060_v34 = vsel %vm3043_vm8, %v14309_v18, %v8571_v10  ;;  %v3061_v58 = vsel %vm3043_vm8, %v14315_v56, %v8572_v12  ;;  %v20125_v8 = vld [vmem:[#allocation71_spill] sm:$0xff] }
 0x2df   :  { %v14430_v49 = vsel %vm3108_vm7, %v3054_v54, %v8716_v5  ;;  %v14433_v59 = vsel %vm3108_vm7, %v3055_v31, %v8717_v25  ;;  %v3016_v54 = vsel %vm2978_vm6, %v13989_v44, %v8462_v27  ;;  %v8457_v31 = vunpack.i.h.bf16 %v20079_v63 }
 0x2e0   :  { %v8587_v60 = vunpack.i.h.bf16 %v20081_v26  ;;  %v8586_v30 = vunpack.i.l.bf16 %v20081_v26  ;;  %v3058_v44 = vsel %vm3043_vm8, %v14222_v53, %v8566_v20  ;;  %v3059_v27 = vsel %vm3043_vm8, %v14226_v13, %v8567_v1  ;;  %v20082_v26 = vld [vmem:[#allocation54_spill] sm:$0xff] }
 0x2e1   :  { %v8780_v22 = vpop.permute.xlu2 %8779  ;;  %v8725_v42 = vpop.permute.xlu0 %8724  ;;  %v3080_v18 = vsel %vm3043_vm8, %v3015_v7, %v8621_v19  ;;  %v3081_v10 = vsel %vm3043_vm8, %v3016_v54, %v8622_v61  ;;  %v8582_v33 = vunpack.i.h.bf16 %v20082_v26  ;;  %v8581_v24 = vunpack.i.l.bf16 %v20082_v26 }
 0x2e2   :  { %v8782_v25 = vunpack.i.h.bf16 %v8780_v22  ;;  %v8781_v5 = vunpack.i.l.bf16 %v8780_v22  ;;  %v8727_v14 = vunpack.i.h.bf16 %v8725_v42  ;;  %v8726_v57 = vunpack.i.l.bf16 %v8725_v42 }
 0x2e3   :  { %v8637_v7 = vunpack.i.h.bf16 %v14126_v47  ;;  %v8636_v54 = vunpack.i.l.bf16 %v14126_v47  ;;  %v20083_v47 = vld [vmem:[#allocation138_spill] sm:$0xff]  ;;  %v3065_v42 = vsel %vm3043_vm8, %v14236_v39, %v8582_v33 }
 0x2e4   :  { %v8730_v21 = vpop.permute.xlu1 %8729  ;;  %v14465_v53 = vsel %vm3108_vm7, %v3080_v18, %v8781_v5  ;;  %v14468_v13 = vsel %vm3108_vm7, %v3081_v10, %v8782_v25  ;;  %v14473_v20 = vsel %vm3108_vm7, %v3058_v44, %v8726_v57  ;;  %v14476_v61 = vsel %vm3108_vm7, %v3059_v27, %v8727_v14 }
 0x2e5   :  { %v8732_v56 = vunpack.i.h.bf16 %v8730_v21  ;;  %v8731_v12 = vunpack.i.l.bf16 %v8730_v21  ;;  %v14490_v57 = vsel %vm2978_vm6, %v14096_v0, %v8456_v41  ;;  %v3021_v44 = vsel %vm2978_vm6, %v14011_v23, %v8476_v28  ;;  %v20084_v41 = vld [vmem:[#allocation117_spill] sm:$0xff] }
 0x2e6   :  { %v8492_v5 = vunpack.i.h.bf16 %v20083_v47  ;;  %v8491_v21 = vunpack.i.l.bf16 %v20083_v47  ;;  %v3066_v0 = vsel %vm3043_vm8, %v14342_v43, %v8586_v30  ;;  %v3067_v23 = vsel %vm3043_vm8, %v14350_v52, %v8587_v60 }
 0x2e7   :  { %v14479_v19 = vsel %vm3108_vm7, %v3060_v34, %v8731_v12  ;;  %v14486_v25 = vsel %vm3108_vm7, %v3061_v58, %v8732_v56  ;;  %v3022_v34 = vsel %vm2978_vm6, %v14019_v3, %v8477_v2  ;;  %7479 = vmatmul.msk.bf16.gmra.mxu0 %vm3225_vm9, %v3175_v36  ;;  %v8602_v3 = vunpack.i.h.bf16 %v20084_v41  ;;  %v20085_v12 = vld [vmem:[#allocation11_spill] sm:$0xff] }
 0x2e8   :  { %v8601_v2 = vunpack.i.l.bf16 %v20084_v41  ;;  %v3064_v58 = vsel %vm3043_vm8, %v14232_v62, %v8581_v24  ;;  %v3086_v43 = vsel %vm3043_vm8, %v3021_v44, %v8636_v54  ;;  %v3087_v30 = vsel %vm3043_vm8, %v3022_v34, %v8637_v7 }
 0x2e9   :  { %v8597_v14 = vunpack.i.h.bf16 %v20085_v12  ;;  %v8596_v26 = vunpack.i.l.bf16 %v20085_v12  ;;  %v8652_v44 = vunpack.i.h.bf16 %v14191_v6  ;;  %v8651_v34 = vunpack.i.l.bf16 %v14191_v6  ;;  %v20097_v6 = vld [vmem:[#allocation130_spill] sm:$0xff] }
 0x2ea   :  { %v8795_v28 = vpop.permute.xlu2 %8794  ;;  %v8740_v18 = vpop.permute.xlu0 %8739  ;;  %v3073_v63 = vsel %vm3043_vm8, %v14397_v17, %v8602_v3 }
 0x2eb   :  { %v8797_v55 = vunpack.i.h.bf16 %v8795_v28  ;;  %v8796_v37 = vunpack.i.l.bf16 %v8795_v28  ;;  %v8742_v10 = vunpack.i.h.bf16 %v8740_v18  ;;  %v8741_v56 = vunpack.i.l.bf16 %v8740_v18 }
 0x2ec   :  { %v8745_v36 = vpop.permute.xlu1 %8744  ;;  %v3014_v28 = vsel %vm2978_vm6, %v14100_v35, %v8457_v31  ;;  %v20089_v35 = vld [vmem:[#allocation51_spill] sm:$0xff] }
 0x2ed   :  { %v8747_v52 = vunpack.i.h.bf16 %v8745_v36  ;;  %v8746_v60 = vunpack.i.l.bf16 %v8745_v36  ;;  %v14519_v62 = vsel %vm3108_vm7, %v3086_v43, %v8796_v37  ;;  %v14522_v39 = vsel %vm3108_vm7, %v3087_v30, %v8797_v55  ;;  %v20088_v37 = vld [vmem:[#allocation146_spill] sm:$0xff] }
 0x2ee   :  { %v14527_v24 = vsel %vm3108_vm7, %v3064_v58, %v8741_v56  ;;  %v14530_v7 = vsel %vm3108_vm7, %v3065_v42, %v8742_v10  ;;  %v20086_v58 = vld [vmem:[#allocation65_spill] sm:$0xff]  ;;  %v8507_v36 = vunpack.i.h.bf16 %v20088_v37  ;;  %v8506_v18 = vunpack.i.l.bf16 %v20088_v37 }
 0x2ef   :  { %v14533_v54 = vsel %vm3108_vm7, %v3066_v0, %v8746_v60  ;;  %v14540_v41 = vsel %vm3108_vm7, %v3067_v23, %v8747_v52  ;;  %v3027_v42 = vsel %vm2978_vm6, %v20086_v58, %v8491_v21  ;;  %v20087_v0 = vld [vmem:[#allocation66_spill] sm:$0xff]  ;;  %v3072_v23 = vsel %vm3043_vm8, %v14393_v40, %v8601_v2 }
 0x2f0   :  { %v3028_v55 = vsel %vm2978_vm6, %v20087_v0, %v8492_v5  ;;  %v8617_v31 = vunpack.i.h.bf16 %v20089_v35  ;;  %v8616_v21 = vunpack.i.l.bf16 %v20089_v35  ;;  %v3070_v5 = vsel %vm3043_vm8, %v14242_v9, %v8596_v26  ;;  %v20090_v0 = vld [vmem:[#allocation62_spill] sm:$0xff] }
 0x2f1   :  { %v3071_v43 = vsel %vm3043_vm8, %v14269_v16, %v8597_v14  ;;  %v3092_v40 = vsel %vm3043_vm8, %v3027_v42, %v8651_v34  ;;  %v3093_v2 = vsel %vm3043_vm8, %v3028_v55, %v8652_v44  ;;  %v8611_v37 = vunpack.i.l.bf16 %v20090_v0 }
 0x2f2   :  { %v8810_v30 = vpop.permute.xlu2 %8809  ;;  %v8755_v56 = vpop.permute.xlu0 %8754  ;;  %v8667_v9 = vunpack.i.h.bf16 %v14253_v51  ;;  %v8666_v55 = vunpack.i.l.bf16 %v14253_v51  ;;  %v20094_v51 = vld [vmem:[#allocation151_spill] sm:$0xff] }
 0x2f3   :  { %v8812_v52 = vunpack.i.h.bf16 %v8810_v30  ;;  %v8811_v60 = vunpack.i.l.bf16 %v8810_v30  ;;  %v8757_v12 = vunpack.i.h.bf16 %v8755_v56  ;;  %v8756_v58 = vunpack.i.l.bf16 %v8755_v56 }
 0x2f4   :  { %v8760_v10 = vpop.permute.xlu1 %8759 }
 0x2f5   :  { %v8762_v17 = vunpack.i.h.bf16 %v8760_v10  ;;  %v8761_v3 = vunpack.i.l.bf16 %v8760_v10  ;;  %v14569_v26 = vsel %vm3108_vm7, %v3092_v40, %v8811_v60  ;;  %v14572_v16 = vsel %vm3108_vm7, %v3093_v2, %v8812_v52  ;;  %v20091_v52 = vld [vmem:[#allocation21_spill] sm:$0xff] }
 0x2f6   :  { %v14581_v44 = vsel %vm3108_vm7, %v3070_v5, %v8756_v58  ;;  %v14584_v42 = vsel %vm3108_vm7, %v3071_v43, %v8757_v12  ;;  %v8471_v60 = vunpack.i.l.bf16 %v20091_v52  ;;  %v20092_v5 = vld [vmem:[#allocation67_spill] sm:$0xff]  ;;  %v20093_v43 = vld [vmem:[#allocation16_spill] sm:$0xff]  ;;  %v8522_v40 = vunpack.i.h.bf16 %v20094_v51 }
 0x2f7   :  { %v14575_v14 = vsel %vm3108_vm7, %v3072_v23, %v8761_v3  ;;  %v14578_v34 = vsel %vm3108_vm7, %v3073_v63, %v8762_v17  ;;  %v8472_v63 = vunpack.i.h.bf16 %v20091_v52  ;;  %v3033_v10 = vsel %vm2978_vm6, %v20092_v5, %v8506_v18  ;;  %v20096_v58 = vld [vmem:[#allocation128_spill] sm:$0xff] }
 0x2f8   :  { %v3034_v56 = vsel %vm2978_vm6, %v20093_v43, %v8507_v36  ;;  %v8521_v2 = vunpack.i.l.bf16 %v20094_v51  ;;  %v8612_v17 = vunpack.i.h.bf16 %v20090_v0  ;;  %v20095_v3 = vpack.c.bf16 %v14203_v15, %v14200_v32 }
 0x2f9   :  { %v3078_v12 = vsel %vm3043_vm8, %v14490_v57, %v8616_v21  ;;  %v8632_v52 = vunpack.i.h.bf16 %v20096_v58  ;;  %v8631_v18 = vunpack.i.l.bf16 %v20096_v58  ;;  %v3076_v36 = vsel %vm3043_vm8, %v14281_v11, %v8611_v37 }
 0x2fa   :  { %7480 = vmatmul.msk.bf16.gmra.mxu0 %vm3225_vm9, %v20095_v3  ;;  %v8825_v5 = vpop.permute.xlu2 %8824  ;;  %v3079_v43 = vsel %vm3043_vm8, %v3014_v28, %v8617_v31  ;;  %v8770_v30 = vpop.permute.xlu0 %8769  ;;  %v3098_v32 = vsel %vm3043_vm8, %v3033_v10, %v8666_v55  ;;  %v3099_v15 = vsel %vm3043_vm8, %v3034_v56, %v8667_v9  ;;  %v8682_v58 = vunpack.i.h.bf16 %v14320_v38  ;;  %v20098_v56 = vld [vmem:[#allocation116_spill] sm:$0xff] }
 0x2fb   :  { %v8827_v51 = vunpack.i.h.bf16 %v8825_v5  ;;  %v8826_v0 = vunpack.i.l.bf16 %v8825_v5  ;;  %v8772_v21 = vunpack.i.h.bf16 %v8770_v30  ;;  %v8771_v35 = vunpack.i.l.bf16 %v8770_v30  ;;  %v20101_v5 = vld [vmem:[#allocation119_spill] sm:$0xff] }
 0x2fc   :  { %v8775_v23 = vpop.permute.xlu1 %8774  ;;  %v3077_v47 = vsel %vm3043_vm8, %v20097_v6, %v8612_v17  ;;  %v8681_v30 = vunpack.i.l.bf16 %v14320_v38  ;;  %v20099_v17 = vunpack.i.h.bf16 %v20098_v56  ;;  %v20103_v38 = vld [vmem:[#allocation69_spill] sm:$0xff]  ;;  %v20107_v56 = vld [vmem:[#allocation126_spill] sm:$0xff] }
 0x2fd   :  { %v8777_v3 = vunpack.i.h.bf16 %v8775_v23  ;;  %v8776_v57 = vunpack.i.l.bf16 %v8775_v23  ;;  %v14619_v11 = vsel %vm3108_vm7, %v3098_v32, %v8826_v0  ;;  %v14622_v28 = vsel %vm3108_vm7, %v3099_v15, %v8827_v51  ;;  %v20104_v32 = vld [vmem:[#allocation139_spill] sm:$0xff] }
 0x2fe   :  { %v3141_v31 = vsel %vm3108_vm7, %v3076_v36, %v8771_v35  ;;  %v3142_v37 = vsel %vm3108_vm7, %v3077_v47, %v8772_v21  ;;  %v20100_v35 = vld [vmem:[#allocation70_spill] sm:$0xff]  ;;  %v8481_v36 = vunpack.i.l.bf16 %v20101_v5  ;;  %v3020_v0 = vsel %vm2978_vm6, %v20103_v38, %v8472_v63 }
 0x2ff   :  { %v14627_v9 = vsel %vm3108_vm7, %v3078_v12, %v8776_v57  ;;  %v14630_v55 = vsel %vm3108_vm7, %v3079_v43, %v8777_v3  ;;  %v3189_v23 = vpack.c.bf16 %v3142_v37, %v3141_v31  ;;  %v3018_v47 = vsel %vm2978_vm6, %v20100_v35, %v20099_v17  ;;  %v20102_v43 = vld [vmem:[#allocation68_spill] sm:$0xff]  ;;  %v20106_v31 = vld [vmem:[#allocation137_spill] sm:$0xff] }
 0x300   :  { %v8482_v12 = vunpack.i.h.bf16 %v20101_v5  ;;  %v3019_v51 = vsel %vm2978_vm6, %v20102_v43, %v8471_v60  ;;  %v8487_v15 = vunpack.i.h.bf16 %v20104_v32  ;;  %v20105_v3 = vld [vmem:[#allocation64_spill] sm:$0xff]  ;;  %v3039_v37 = vsel %vm2978_vm6, %v20106_v31, %v8521_v2 }
 0x301   :  { %v8627_v57 = vunpack.i.h.bf16 %v20105_v3  ;;  %v8626_v21 = vunpack.i.l.bf16 %v20105_v3  ;;  %7493 = vmatmul.msk.bf16.vlgmr.msra.gmra.mxu2 %vm3225_vm9, %v3189_v23  ;;  %v3040_v17 = vsel %vm2978_vm6, %v20107_v56, %v8522_v40  ;;  %v3084_v60 = vsel %vm3043_vm8, %v3019_v51, %v8631_v18  ;;  %v20110_v18 = vld [vmem:[#allocation17_spill] sm:$0xff]  ;;  %v20113_v56 = vld [vmem:[#allocation56_spill] sm:$0xff] }
 0x302   :  { %v8840_v35 = vpop.permute.xlu2 %8839  ;;  %v3085_v5 = vsel %vm3043_vm8, %v3020_v0, %v8632_v52  ;;  %v3104_v63 = vsel %vm3043_vm8, %v3039_v37, %v8681_v30  ;;  %v3105_v43 = vsel %vm3043_vm8, %v3040_v17, %v8682_v58 }
 0x303   :  { %v8842_v38 = vunpack.i.h.bf16 %v8840_v35  ;;  %v8841_v10 = vunpack.i.l.bf16 %v8840_v35  ;;  %v8785_v33 = vpop.permute.xlu0 %8784  ;;  %v3082_v52 = vsel %vm3043_vm8, %v20110_v18, %v8626_v21  ;;  %v3083_v30 = vsel %vm3043_vm8, %v3018_v47, %v8627_v57  ;;  %v20111_v21 = vld [vmem:[#allocation115_spill] sm:$0xff]  ;;  %v20115_v35 = vld [vmem:[#allocation57_spill] sm:$0xff]  ;;  %v20126_v47 = vld [vmem:[#allocation72_spill] sm:$0xff] }
 0x304   :  { %v8790_v3 = vpop.permute.xlu1 %8789  ;;  %v8787_v22 = vunpack.i.h.bf16 %v8785_v33  ;;  %v8786_v2 = vunpack.i.l.bf16 %v8785_v33  ;;  %v20114_v17 = vunpack.i.h.bf16 %v20111_v21  ;;  %v3026_v37 = vsel %vm2978_vm6, %v20126_v47, %v8487_v15 }
 0x305   :  { %v8792_v23 = vunpack.i.h.bf16 %v8790_v3  ;;  %v8791_v27 = vunpack.i.l.bf16 %v8790_v3  ;;  %v14660_v31 = vsel %vm3108_vm7, %v3104_v63, %v8841_v10  ;;  %v14663_v40 = vsel %vm3108_vm7, %v3105_v43, %v8842_v38  ;;  %v20117_v43 = vld [vmem:[#allocation10_spill] sm:$0xff] }
 0x306   :  { %20108 = vst [vmem:[#allocation80_spill] sm:$0xff] %v14660_v31  ;;  %v14669_v58 = vsel %vm3108_vm7, %v3082_v52, %v8786_v2  ;;  %v14672_v51 = vsel %vm3108_vm7, %v3083_v30, %v8787_v22  ;;  %v8486_v10 = vunpack.i.l.bf16 %v20104_v32  ;;  %v20112_v22 = vunpack.i.l.bf16 %v20111_v21  ;;  %v20116_v32 = vld [vmem:[#allocation123_spill] sm:$0xff]  ;;  %v20119_v52 = vld [vmem:[#allocation122_spill] sm:$0xff] }
 0x307   :  { %20109 = vst [vmem:[#allocation22_spill] sm:$0xff] %v14663_v40  ;;  %v14675_v0 = vsel %vm3108_vm7, %v3084_v60, %v8791_v27  ;;  %v14678_v33 = vsel %vm3108_vm7, %v3085_v5, %v8792_v23  ;;  %v2959_v60 = vsel %vm2913_vm5, %v20115_v35, %v20114_v17  ;;  %v8337_v5 = vunpack.i.h.bf16 %v20116_v32  ;;  %v20118_v23 = vld [vmem:[#allocation18_spill] sm:$0xff]  ;;  %v20123_v17 = vld [vmem:[#allocation52_spill] sm:$0xff] }
 0x308   :  { %v2958_v27 = vsel %vm2913_vm5, %v20113_v56, %v20112_v22  ;;  %v8336_v63 = vunpack.i.l.bf16 %v20116_v32  ;;  %v8647_v38 = vunpack.i.h.bf16 %v20117_v43  ;;  %v8646_v3 = vunpack.i.l.bf16 %v20117_v43  ;;  %v20121_v21 = vld [vmem:[#allocation50_spill] sm:$0xff] }
 0x309   :  { %v8642_v2 = vunpack.i.h.bf16 %v20118_v23  ;;  %v8641_v18 = vunpack.i.l.bf16 %v20118_v23  ;;  %v20120_v30 = vunpack.i.l.bf16 %v20119_v52  ;;  %v20122_v56 = vunpack.i.h.bf16 %v20119_v52  ;;  %v20124_v23 = vld [vmem:[#allocation15_spill] sm:$0xff] }
 0x30a   :  { %7481 = vmatmul.msk.bf16.gmra.mxu0 %vm3225_vm9, %v3177_v46  ;;  %v3023_v32 = vsel %vm2978_vm6, %v2958_v27, %v8481_v36  ;;  %v3024_v43 = vsel %vm2978_vm6, %v2959_v60, %v8482_v12  ;;  %v8497_v57 = vunpack.i.h.bf16 %v20124_v23  ;;  %v8496_v4 = vunpack.i.l.bf16 %v20124_v23  ;;  %v20127_v23 = vld [vmem:[#allocation31_spill] sm:$0xff] }
 0x30b   :  { %v2966_v22 = vsel %vm2913_vm5, %v20121_v21, %v20120_v30  ;;  %v2967_v35 = vsel %vm2913_vm5, %v20123_v17, %v20122_v56  ;;  %v3025_v46 = vsel %vm2978_vm6, %v20125_v8, %v8486_v10  ;;  %v8800_v21 = vpop.permute.xlu0 %8799  ;;  %v3088_v36 = vsel %vm3043_vm8, %v3023_v32, %v8641_v18  ;;  %v20129_v32 = vld [vmem:[#allocation59_spill] sm:$0xff] }
 0x30c   :  { %v8805_v30 = vpop.permute.xlu1 %8804  ;;  %v8802_v6 = vunpack.i.h.bf16 %v8800_v21  ;;  %v8801_v56 = vunpack.i.l.bf16 %v8800_v21  ;;  %v3089_v12 = vsel %vm3043_vm8, %v3024_v43, %v8642_v2  ;;  %v3090_v27 = vsel %vm3043_vm8, %v3025_v46, %v8646_v3  ;;  %v20130_v43 = vld [vmem:[#allocation132_spill] sm:$0xff] }
 0x30d   :  { %v8807_v52 = vunpack.i.h.bf16 %v8805_v30  ;;  %v8806_v1 = vunpack.i.l.bf16 %v8805_v30  ;;  %v3091_v60 = vsel %vm3043_vm8, %v3026_v37, %v8647_v38  ;;  %v8502_v18 = vunpack.i.h.bf16 %v20127_v23  ;;  %v20128_v38 = vld [vmem:[#allocation58_spill] sm:$0xff]  ;;  %v20131_v30 = vld [vmem:[#allocation61_spill] sm:$0xff] }
 0x30e   :  { %v14726_v17 = vsel %vm3108_vm7, %v3088_v36, %v8801_v56  ;;  %v14729_v10 = vsel %vm3108_vm7, %v3089_v12, %v8802_v6  ;;  %v8501_v2 = vunpack.i.l.bf16 %v20127_v23  ;;  %v2964_v6 = vsel %vm2913_vm5, %v20128_v38, %v8336_v63  ;;  %v20132_v56 = vld [vmem:[#allocation73_spill] sm:$0xff] }
 0x30f   :  { %v14732_v15 = vsel %vm3108_vm7, %v3090_v27, %v8806_v1  ;;  %v14735_v47 = vsel %vm3108_vm7, %v3091_v60, %v8807_v52  ;;  %v2965_v1 = vsel %vm2913_vm5, %v20129_v32, %v8337_v5  ;;  %v8357_v8 = vunpack.i.h.bf16 %v20130_v43  ;;  %v20134_v63 = vld [vmem:[#allocation133_spill] sm:$0xff]  ;;  %v20135_v32 = vld [vmem:[#allocation136_spill] sm:$0xff] }
 0x310   :  { %v8356_v46 = vunpack.i.l.bf16 %v20130_v43  ;;  %v8662_v21 = vunpack.i.h.bf16 %v20131_v30  ;;  %v8661_v52 = vunpack.i.l.bf16 %v20131_v30  ;;  %v8657_v36 = vunpack.i.h.bf16 %v20132_v56 }
 0x311   :  { %v8656_v12 = vunpack.i.l.bf16 %v20132_v56  ;;  %v20133_v27 = vpack.c.bf16 %v14630_v55, %v14627_v9  ;;  %v8352_v60 = vunpack.i.h.bf16 %v20134_v63  ;;  %v8351_v5 = vunpack.i.l.bf16 %v20134_v63 }
 0x312   :  { %v3029_v23 = vsel %vm2978_vm6, %v2964_v6, %v8496_v4  ;;  %v3030_v38 = vsel %vm2978_vm6, %v2965_v1, %v8497_v57  ;;  %v8512_v43 = vunpack.i.h.bf16 %v20135_v32  ;;  %v8511_v30 = vunpack.i.l.bf16 %v20135_v32 }
 0x313   :  { %7494 = vmatmul.msk.bf16.gmra.mxu2 %vm3225_vm9, %v20133_v27  ;;  %v3031_v37 = vsel %vm2978_vm6, %v2966_v22, %v8501_v2  ;;  %v3032_v56 = vsel %vm2978_vm6, %v2967_v35, %v8502_v18  ;;  %v8815_v9 = vpop.permute.xlu0 %8814  ;;  %v3094_v63 = vsel %vm3043_vm8, %v3029_v23, %v8656_v12  ;;  %v3095_v4 = vsel %vm3043_vm8, %v3030_v38, %v8657_v36  ;;  %v20136_v2 = vld [vmem:[#allocation152_spill] sm:$0xff]  ;;  %v20141_v38 = vld [vmem:[#allocation29_spill] sm:$0xff] }
 0x314   :  { %v8820_v3 = vpop.permute.xlu1 %8819  ;;  %v8817_v31 = vunpack.i.h.bf16 %v8815_v9  ;;  %v8816_v40 = vunpack.i.l.bf16 %v8815_v9  ;;  %v3096_v57 = vsel %vm3043_vm8, %v3031_v37, %v8661_v52  ;;  %v3097_v6 = vsel %vm3043_vm8, %v3032_v56, %v8662_v21  ;;  %v20137_v21 = vld [vmem:[#allocation87_spill] sm:$0xff]  ;;  %v20142_v56 = vld [vmem:[#allocation90_spill] sm:$0xff] }
 0x315   :  { %v8822_v55 = vunpack.i.h.bf16 %v8820_v3  ;;  %v8821_v27 = vunpack.i.l.bf16 %v8820_v3  ;;  %v8517_v3 = vunpack.i.h.bf16 %v20136_v2  ;;  %v8516_v36 = vunpack.i.l.bf16 %v20136_v2 }
 0x316   :  { %v14770_v1 = vsel %vm3108_vm7, %v3094_v63, %v8816_v40  ;;  %v14773_v22 = vsel %vm3108_vm7, %v3095_v4, %v8817_v31  ;;  %v20138_v52 = vunpack.i.l.bf16 %v20137_v21  ;;  %v20139_v31 = vld [vmem:[#allocation27_spill] sm:$0xff]  ;;  %v20140_v23 = vunpack.i.h.bf16 %v20137_v21 }
 0x317   :  { %v14776_v35 = vsel %vm3108_vm7, %v3096_v57, %v8821_v27  ;;  %v14779_v18 = vsel %vm3108_vm7, %v3097_v6, %v8822_v55  ;;  %v8207_v9 = vunpack.i.h.bf16 %v20142_v56  ;;  %v8206_v55 = vunpack.i.l.bf16 %v20142_v56  ;;  %v20143_v27 = vld [vmem:[#allocation63_spill] sm:$0xff]  ;;  %v20144_v57 = vld [vmem:[#allocation141_spill] sm:$0xff] }
 0x318   :  { %v2905_v12 = vsel %vm2848_vm3, %v20139_v31, %v20138_v52  ;;  %v2906_v32 = vsel %vm2848_vm3, %v20141_v38, %v20140_v23  ;;  %v8677_v63 = vunpack.i.h.bf16 %v20143_v27  ;;  %v8676_v4 = vunpack.i.l.bf16 %v20143_v27  ;;  %v20146_v21 = vld [vmem:[#allocation7_spill] sm:$0xff]  ;;  %v20147_v23 = vld [vmem:[#allocation53_spill] sm:$0xff] }
 0x319   :  { %v8672_v6 = vunpack.i.h.bf16 %v20144_v57  ;;  %v8671_v2 = vunpack.i.l.bf16 %v20144_v57  ;;  %v20145_v52 = vpack.c.bf16 %v14433_v59, %v14430_v49  ;;  %v2972_v31 = vsel %vm2913_vm5, %v20146_v21, %v8356_v46 }
 0x31a   :  { %v2973_v38 = vsel %vm2913_vm5, %v20147_v23, %v8357_v8  ;;  %v2970_v56 = vsel %vm2913_vm5, %v2905_v12, %v8351_v5  ;;  %v2971_v40 = vsel %vm2913_vm5, %v2906_v32, %v8352_v60  ;;  %v3037_v57 = vsel %vm2978_vm6, %v2972_v31, %v8516_v36  ;;  %v20148_v12 = vld [vmem:[#allocation144_spill] sm:$0xff]  ;;  %v20153_v23 = vld [vmem:[#allocation157_spill] sm:$0xff] }
 0x31b   :  { %7482 = vmatmul.msk.bf16.gmra.mxu0 %vm3225_vm9, %v20145_v52  ;;  %v3035_v27 = vsel %vm2978_vm6, %v2970_v56, %v8511_v30  ;;  %v3036_v37 = vsel %vm2978_vm6, %v2971_v40, %v8512_v43  ;;  %v3038_v49 = vsel %vm2978_vm6, %v2973_v38, %v8517_v3  ;;  %v8830_v52 = vpop.permute.xlu0 %8829  ;;  %v3102_v8 = vsel %vm3043_vm8, %v3037_v57, %v8676_v4  ;;  %v20154_v56 = vld [vmem:[#allocation19_spill] sm:$0xff] }
 0x31c   :  { %v8835_v59 = vpop.permute.xlu1 %8834  ;;  %v8832_v46 = vunpack.i.h.bf16 %v8830_v52  ;;  %v8831_v21 = vunpack.i.l.bf16 %v8830_v52  ;;  %v3103_v5 = vsel %vm3043_vm8, %v3038_v49, %v8677_v63  ;;  %v3100_v60 = vsel %vm3043_vm8, %v3035_v27, %v8671_v2  ;;  %v20155_v49 = vld [vmem:[#allocation47_spill] sm:$0xff] }
 0x31d   :  { %v8837_v29 = vunpack.i.h.bf16 %v8835_v59  ;;  %v8836_v50 = vunpack.i.l.bf16 %v8835_v59  ;;  %v3101_v30 = vsel %vm3043_vm8, %v3036_v37, %v8672_v6  ;;  %v8367_v32 = vunpack.i.h.bf16 %v20148_v12  ;;  %v20149_v37 = vld [vmem:[#allocation28_spill] sm:$0xff] }
 0x31e   :  { %v14826_v3 = vsel %vm3108_vm7, %v3100_v60, %v8831_v21  ;;  %v14829_v40 = vsel %vm3108_vm7, %v3101_v30, %v8832_v46  ;;  %v8366_v63 = vunpack.i.l.bf16 %v20148_v12  ;;  %v20150_v6 = vunpack.i.l.bf16 %v20149_v37 }
 0x31f   :  { %v14820_v43 = vsel %vm3108_vm7, %v3102_v8, %v8836_v50  ;;  %v14823_v36 = vsel %vm3108_vm7, %v3103_v5, %v8837_v29  ;;  %v20151_v29 = vld [vmem:[#allocation153_spill] sm:$0xff]  ;;  %v20152_v31 = vunpack.i.h.bf16 %v20149_v37  ;;  %v8527_v27 = vunpack.i.h.bf16 %v20154_v56  ;;  %v20158_v8 = vld [vmem:[#allocation75_spill] sm:$0xff] }
 0x320   :  { %v2781_v2 = vsel %vm2718_vm1, %v20151_v29, %v20150_v6  ;;  %v8526_v57 = vunpack.i.l.bf16 %v20154_v56  ;;  %v20156_v59 = vunpack.i.l.bf16 %v20155_v49  ;;  %v20157_v46 = vunpack.i.h.bf16 %v20155_v49 }
 0x321   :  { %v2782_v38 = vsel %vm2718_vm1, %v20153_v23, %v20152_v31  ;;  %v8687_v5 = vunpack.i.h.bf16 %v20158_v8  ;;  %v8686_v60 = vunpack.i.l.bf16 %v20158_v8  ;;  %v20159_v30 = vpack.c.bf16 %v14468_v13, %v14465_v53 }
 0x322   :  { %v2846_v52 = vsel %vm2783_vm2, %v2781_v2, %v20156_v59  ;;  %v2847_v21 = vsel %vm2783_vm2, %v2782_v38, %v20157_v46  ;;  %v14886_v59 = vld [vmem:[%s19031_s1] ss:$0 sm:$0xff] }
 0x323   :  { %7495 = vmatmul.msk.bf16.gmra.mxu2 %vm3225_vm9, %v20159_v30  ;;  %v2911_v12 = vsel %vm2848_vm3, %v2846_v52, %v8206_v55  ;;  %v2912_v37 = vsel %vm2848_vm3, %v2847_v21, %v8207_v9  ;;  %v8845_v2 = vpop.permute.xlu0 %8844  ;;  %v14891_v52 = vld [vmem:[%s19032_s2] ss:$0 sm:$0xff] }
 0x324   :  { %v2976_v6 = vsel %vm2913_vm5, %v2911_v12, %v8366_v63  ;;  %v2977_v29 = vsel %vm2913_vm5, %v2912_v37, %v8367_v32  ;;  %v8847_v38 = vunpack.i.h.bf16 %v8845_v2  ;;  %v8846_v56 = vunpack.i.l.bf16 %v8845_v2  ;;  %v20160_v32 = vld [vmem:[#allocation129_spill] sm:$0xff]  ;;  %v20161_v63 = vld [vmem:[#allocation74_spill] sm:$0xff] }
 0x325   :  { %v3041_v31 = vsel %vm2978_vm6, %v2976_v6, %v8526_v57  ;;  %v3042_v23 = vsel %vm2978_vm6, %v2977_v29, %v8527_v27  ;;  %v20162_v57 = vpack.c.bf16 %v20160_v32, %v20161_v63  ;;  %v20163_v27 = vpack.c.bf16 %v14672_v51, %v14669_v58 }
 0x326   :  { %v3106_v49 = vsel %vm3043_vm8, %v3041_v31, %v8686_v60  ;;  %v3107_v53 = vsel %vm3043_vm8, %v3042_v23, %v8687_v5  ;;  %v20164_v58 = vpack.c.bf16 %v14476_v61, %v14473_v20  ;;  %v20165_v37 = vpack.c.bf16 %v14678_v33, %v14675_v0 }
 0x327   :  { %v14868_v13 = vsel %vm3108_vm7, %v3106_v49, %v8846_v56  ;;  %v14871_v9 = vsel %vm3108_vm7, %v3107_v53, %v8847_v38  ;;  %v20167_v49 = vpack.c.bf16 %v14486_v25, %v14479_v19 }
 0x32b   :  { %7483 = vmatmul.msk.bf16.gmra.mxu0 %vm3225_vm9, %v20162_v57 }
 0x333   :  { %7496 = vmatmul.msk.bf16.gmra.mxu2 %vm3225_vm9, %v20163_v27  ;;  %v3335_v46 = vpop.f32.mrf.mxu0 }
 0x334   :  { %v3499_v21 = vmul.f32 %v14886_v59, %v3335_v46 }
 0x336   :  { %v3567_v8 = vadd.f32 %v14891_v52, %v3499_v21  ;;  %v10241_v21 = vmov 0.0  }
 0x338   :  { %v3631_v51 = vmax.f32 %v3567_v8, 0.0  ;;  %v14930_v8 = vrot.slane %v10241_v21, 7 }
 0x33a   :  { %v3763_v30 = vrot.slane %v3631_v51, 7  ;;  %20170 = vst [vmem:[#allocation82_spill] sm:$0xff] %v14930_v8  ;;  %v14934_v19 = vsel %vm3760_vm10, 0.0, %v14930_v8  ;;  %v14938_v25 = vsel %vm3760_vm10, %v14930_v8, 0.0 }
 0x33b   :  { %7484 = vmatmul.msk.bf16.gmra.mxu0 %vm3225_vm9, %v20164_v58  ;;  %v3337_v5 = vpop.f32.mrf.mxu0  ;;  %20171 = vst [vmem:[#allocation83_spill] sm:$0xff] %v14934_v19  ;;  %v20172_v58 = vpack.c.bf16 %v14522_v39, %v14519_v62  ;;  %v4084_v51 = vrot.slane %v14934_v19, 1 }
 0x33c   :  { %v3500_v60 = vmul.f32 %v14886_v59, %v3337_v5  ;;  %v14906_v29 = vsel %vm3760_vm10, 0.0, %v3763_v30  ;;  %v4085_v5 = vrot.slane %v14930_v8, 1 }
 0x33d   :  { %v4089_v61 = vrot.slane %v14906_v29, 1  ;;  %v4245_v2 = vrot.slane %v14906_v29, 2 }
 0x33e   :  { %v3568_v12 = vadd.f32 %v14891_v52, %v3500_v60  ;;  %v4087_v60 = vrot.slane %v14938_v25, 1 }
 0x340   :  { %v3632_v6 = vmax.f32 %v3568_v12, 0.0  ;;  %v4088_v12 = vsel %vm4083_vm11, %v4085_v5, %v4087_v60 }
 0x342   :  { %v3764_v20 = vrot.slane %v3632_v6, 7 }
 0x343   :  { %7497 = vmatmul.msk.bf16.gmra.mxu2 %vm3225_vm9, %v20165_v37 }
 0x344   :  { %v14911_v31 = vsel %vm3760_vm10, %v3763_v30, %v3764_v20  ;;  %v3989_v23 = vsel %vm3760_vm10, %v3764_v20, 0.0  ;;  %v4086_v30 = vsel %vm4083_vm11, %v4084_v51, %v4085_v5  ;;  %v20174_v20 = vld [vmem:[#allocation77_spill] sm:$0xff] }
 0x345   :  { %20166 = vst [vmem:[#allocation134_spill] sm:$0xff] %v14911_v31  ;;  %v4092_v38 = vrot.slane %v3989_v23, 1  ;;  %v4248_v0 = vrot.slane %v3989_v23, 2  ;;  %v4090_v33 = vrot.slane %v14911_v31, 1  ;;  %v4246_v56 = vrot.slane %v14911_v31, 2 }
 0x346   :  { %v14949_v37 = vpack.i.bf16 %v4088_v12, %v4086_v30 }
 0x347   :  { %v4091_v53 = vsel %vm4083_vm11, %v4089_v61, %v4090_v33  ;;  %v4093_v32 = vsel %vm4083_vm11, %v4090_v33, %v4092_v38  ;;  %v4247_v63 = vsel %vm4239_vm12, %v4245_v2, %v4246_v56  ;;  %v4249_v57 = vsel %vm4239_vm12, %v4246_v56, %v4248_v0  ;;  %v20175_v61 = vld [vmem:[#allocation76_spill] sm:$0xff] }
 0x348   :  { %v14924_v27 = vpack.i.bf16 %v4093_v32, %v4091_v53  ;;  %v14926_v46 = vpack.i.bf16 %v4249_v57, %v4247_v63  ;;  %20173 = vst [vmem:[#allocation84_spill] sm:$0xff] %v14949_v37  ;;  %8849 = vrot.lane.b32.xlu1 %v14949_v37, %s10233_s13  ;;  %v20176_v2 = vpack.c.bf16 %v20174_v20, %v20175_v61 }
 0x34a   :  { %20168 = vst [vmem:[#allocation30_spill] sm:$0xff] %v14924_v27  ;;  %8854 = vrot.lane.b32.xlu2 %v14924_v27, %s10233_s13 }
 0x34b   :  { %7485 = vmatmul.msk.bf16.gmra.mxu0 %vm3225_vm9, %v20167_v49  ;;  %20169 = vst [vmem:[#allocation81_spill] sm:$0xff] %v14926_v46  ;;  %v20177_v49 = vpack.c.bf16 %v14729_v10, %v14726_v17 }
 0x353   :  { %7498 = vmatmul.msk.bf16.gmra.mxu2 %vm3225_vm9, %v20172_v58 }
 0x354   :  { %v3340_v6 = vpop.f32.mrf.mxu0 }
 0x355   :  { %v3501_v62 = vmul.f32 %v14886_v59, %v3340_v6 }
 0x357   :  { %v3569_v39 = vadd.f32 %v14891_v52, %v3501_v62  ;;  %v20180_v62 = vpack.c.bf16 %v14530_v7, %v14527_v24 }
 0x359   :  { %v3633_v23 = vmax.f32 %v3569_v39, 0.0 }
 0x35b   :  { %7486 = vmatmul.msk.bf16.gmra.mxu0 %vm3225_vm9, %v20176_v2  ;;  %v3766_v0 = vrot.slane %v3633_v23, 7 }
 0x35c   :  { %v3342_v38 = vpop.f32.mrf.mxu0 }
 0x35d   :  { %v3502_v33 = vmul.f32 %v14886_v59, %v3342_v38  ;;  %v14966_v53 = vsel %vm3760_vm10, 0.0, %v3766_v0 }
 0x35e   :  { %20178 = vst [vmem:[#allocation85_spill] sm:$0xff] %v14966_v53  ;;  %v4094_v57 = vrot.slane %v14966_v53, 1  ;;  %v4250_v58 = vrot.slane %v14966_v53, 2 }
 0x35f   :  { %v3570_v56 = vadd.f32 %v14891_v52, %v3502_v33 }
 0x361   :  { %v3634_v32 = vmax.f32 %v3570_v56, 0.0 }
 0x363   :  { %7499 = vmatmul.msk.bf16.gmra.mxu2 %vm3225_vm9, %v20177_v49  ;;  %v3767_v63 = vrot.slane %v3634_v32, 7  ;;  %v20183_v49 = vpack.c.bf16 %v14735_v47, %v14732_v15 }
 0x364   :  { %v3345_v21 = vpop.f32.mrf.mxu0 }
 0x365   :  { %v14971_v51 = vsel %vm3760_vm10, %v3766_v0, %v3767_v63  ;;  %v3990_v5 = vsel %vm3760_vm10, %v3767_v63, 0.0  ;;  %v3503_v60 = vmul.f32 %v14886_v59, %v3345_v21 }
 0x366   :  { %20179 = vst [vmem:[#allocation86_spill] sm:$0xff] %v14971_v51  ;;  %v4097_v17 = vrot.slane %v3990_v5, 1  ;;  %v4253_v10 = vrot.slane %v3990_v5, 2  ;;  %v4095_v30 = vrot.slane %v14971_v51, 1  ;;  %v4251_v12 = vrot.slane %v14971_v51, 2 }
 0x367   :  { %v3571_v6 = vadd.f32 %v14891_v52, %v3503_v60 }
 0x368   :  { %v4096_v39 = vsel %vm4083_vm11, %v4094_v57, %v4095_v30  ;;  %v4098_v20 = vsel %vm4083_vm11, %v4095_v30, %v4097_v17  ;;  %v4252_v61 = vsel %vm4239_vm12, %v4250_v58, %v4251_v12  ;;  %v4254_v2 = vsel %vm4239_vm12, %v4251_v12, %v4253_v10 }
 0x369   :  { %v3635_v23 = vmax.f32 %v3571_v6, 0.0  ;;  %v14986_v38 = vpack.i.bf16 %v4098_v20, %v4096_v39  ;;  %v14988_v0 = vpack.i.bf16 %v4254_v2, %v4252_v61 }
 0x36b   :  { %7487 = vmatmul.msk.bf16.gmra.mxu0 %vm3225_vm9, %v20180_v62  ;;  %20181 = vst [vmem:[#allocation88_spill] sm:$0xff] %v14986_v38  ;;  %8859 = vrot.lane.b32.xlu0 %v14986_v38, %s10233_s13  ;;  %v3769_v24 = vrot.slane %v3635_v23, 7  ;;  %v20184_v62 = vpack.c.bf16 %v14540_v41, %v14533_v54 }
 0x36c   :  { %20182 = vst [vmem:[#allocation23_spill] sm:$0xff] %v14988_v0  ;;  %v3347_v33 = vpop.f32.mrf.mxu0 }
 0x36d   :  { %v3504_v7 = vmul.f32 %v14886_v59, %v3347_v33  ;;  %v14999_v32 = vsel %vm3760_vm10, 0.0, %v3769_v24 }
 0x36e   :  { %v4099_v21 = vrot.slane %v14999_v32, 1  ;;  %v4255_v5 = vrot.slane %v14999_v32, 2 }
 0x36f   :  { %v3572_v56 = vadd.f32 %v14891_v52, %v3504_v7 }
 0x371   :  { %v3636_v63 = vmax.f32 %v3572_v56, 0.0 }
 0x373   :  { %7500 = vmatmul.msk.bf16.gmra.mxu2 %vm3225_vm9, %v20183_v49  ;;  %v3770_v57 = vrot.slane %v3636_v63, 7  ;;  %v20187_v49 = vpack.c.bf16 %v14572_v16, %v14569_v26 }
 0x375   :  { %v15004_v60 = vsel %vm3760_vm10, %v3769_v24, %v3770_v57  ;;  %v3991_v17 = vsel %vm3760_vm10, %v3770_v57, 0.0 }
 0x376   :  { %v4102_v15 = vrot.slane %v3991_v17, 1  ;;  %v4258_v47 = vrot.slane %v3991_v17, 2  ;;  %v4100_v30 = vrot.slane %v15004_v60, 1  ;;  %v4256_v12 = vrot.slane %v15004_v60, 2 }
 0x377   :  { %v3350_v58 = vpop.f32.mrf.mxu0 }
 0x378   :  { %v3505_v10 = vmul.f32 %v14886_v59, %v3350_v58  ;;  %v4101_v39 = vsel %vm4083_vm11, %v4099_v21, %v4100_v30  ;;  %v4103_v20 = vsel %vm4083_vm11, %v4100_v30, %v4102_v15  ;;  %v4257_v61 = vsel %vm4239_vm12, %v4255_v5, %v4256_v12 }
 0x379   :  { %v4259_v2 = vsel %vm4239_vm12, %v4256_v12, %v4258_v47  ;;  %v15019_v33 = vpack.i.bf16 %v4103_v20, %v4101_v39 }
 0x37a   :  { %v3573_v6 = vadd.f32 %v14891_v52, %v3505_v10  ;;  %v15021_v24 = vpack.i.bf16 %v4259_v2, %v4257_v61  ;;  %v20190_v61 = vpack.c.bf16 %v14374_v48, %v14371_v45 }
 0x37b   :  { %7488 = vmatmul.msk.bf16.gmra.mxu0 %vm3225_vm9, %v20184_v62  ;;  %20185 = vst [vmem:[#allocation24_spill] sm:$0xff] %v15019_v33  ;;  %8864 = vrot.lane.b32.xlu1 %v15019_v33, %s10233_s13 }
 0x37c   :  { %v3637_v23 = vmax.f32 %v3573_v6, 0.0  ;;  %20186 = vst [vmem:[#allocation148_spill] sm:$0xff] %v15021_v24 }
 0x37e   :  { %v3772_v54 = vrot.slane %v3637_v23, 7 }
 0x37f   :  { %v3352_v7 = vpop.f32.mrf.mxu0 }
 0x380   :  { %v3506_v41 = vmul.f32 %v14886_v59, %v3352_v7  ;;  %v15032_v63 = vsel %vm3760_vm10, 0.0, %v3772_v54 }
 0x381   :  { %20188 = vst [vmem:[#allocation32_spill] sm:$0xff] %v15032_v63  ;;  %v4104_v17 = vrot.slane %v15032_v63, 1  ;;  %v4260_v10 = vrot.slane %v15032_v63, 2 }
 0x382   :  { %v3574_v56 = vadd.f32 %v14891_v52, %v3506_v41 }
 0x383   :  { %7501 = vmatmul.msk.bf16.gmra.mxu2 %vm3225_vm9, %v20187_v49 }
 0x384   :  { %v3638_v57 = vmax.f32 %v3574_v56, 0.0  ;;  %v3415_v21 = vpop.f32.mrf.mxu2 }
 0x385   :  { %v3531_v5 = vmul.f32 %v14886_v59, %v3415_v21 }
 0x386   :  { %v3773_v58 = vrot.slane %v3638_v57, 7 }
 0x387   :  { %v3355_v15 = vpop.f32.mrf.mxu0  ;;  %v3599_v16 = vadd.f32 %v14891_v52, %v3531_v5 }
 0x388   :  { %v15038_v47 = vsel %vm3760_vm10, %v3772_v54, %v3773_v58  ;;  %v3992_v26 = vsel %vm3760_vm10, %v3773_v58, 0.0  ;;  %v3507_v30 = vmul.f32 %v14886_v59, %v3355_v15 }
 0x389   :  { %20189 = vst [vmem:[#allocation89_spill] sm:$0xff] %v15038_v47  ;;  %v4107_v12 = vrot.slane %v3992_v26, 1  ;;  %v4263_v6 = vrot.slane %v3992_v26, 2  ;;  %v4105_v62 = vrot.slane %v15038_v47, 1  ;;  %v4261_v39 = vrot.slane %v15038_v47, 2 }
 0x38a   :  { %v3575_v20 = vadd.f32 %v14891_v52, %v3507_v30  ;;  %v3663_v41 = vmax.f32 %v3599_v16, 0.0  ;;  %v20193_v16 = vpack.c.bf16 %v14773_v22, %v14770_v1 }
 0x38b   :  { %7489 = vmatmul.msk.bf16.gmra.mxu0 %vm3225_vm9, %v20190_v61  ;;  %v4106_v2 = vsel %vm4083_vm11, %v4104_v17, %v4105_v62  ;;  %v4108_v23 = vsel %vm4083_vm11, %v4105_v62, %v4107_v12  ;;  %v4262_v7 = vsel %vm4239_vm12, %v4260_v10, %v4261_v39  ;;  %v4264_v54 = vsel %vm4239_vm12, %v4261_v39, %v4263_v6 }
 0x38c   :  { %v3639_v56 = vmax.f32 %v3575_v20, 0.0  ;;  %v15054_v49 = vpack.i.bf16 %v4108_v23, %v4106_v2  ;;  %v3417_v57 = vpop.f32.mrf.mxu2  ;;  %v15056_v21 = vpack.i.bf16 %v4264_v54, %v4262_v7  ;;  %v3811_v48 = vrot.slane %v3663_v41, 7 }
 0x38d   :  { %v3532_v58 = vmul.f32 %v14886_v59, %v3417_v57 }
 0x38e   :  { %20191 = vst [vmem:[#allocation25_spill] sm:$0xff] %v15054_v49  ;;  %8869 = vrot.lane.b32.xlu2 %v15054_v49, %s10233_s13  ;;  %v3775_v5 = vrot.slane %v3639_v56, 7  ;;  %v15069_v30 = vsel %vm3760_vm10, 0.0, %v3811_v48 }
 0x38f   :  { %20192 = vst [vmem:[#allocation26_spill] sm:$0xff] %v15056_v21  ;;  %v3357_v45 = vpop.f32.mrf.mxu0  ;;  %v3600_v17 = vadd.f32 %v14891_v52, %v3532_v58  ;;  %v4164_v1 = vrot.slane %v15069_v30, 1 }
 0x390   :  { %v3508_v10 = vmul.f32 %v14886_v59, %v3357_v45  ;;  %20194 = vst [vmem:[#allocation35_spill] sm:$0xff] %v15069_v30  ;;  %v15072_v12 = vsel %vm3760_vm10, 0.0, %v3775_v5 }
 0x391   :  { %v3664_v15 = vmax.f32 %v3600_v17, 0.0  ;;  %20195 = vst [vmem:[#allocation36_spill] sm:$0xff] %v15072_v12  ;;  %v4109_v22 = vrot.slane %v15072_v12, 1 }
 0x392   :  { %v3576_v26 = vadd.f32 %v14891_v52, %v3508_v10 }
 0x393   :  { %7502 = vmatmul.msk.bf16.gmra.mxu2 %vm3225_vm9, %v20193_v16  ;;  %v3812_v6 = vrot.slane %v3664_v15, 7 }
 0x394   :  { %v3640_v62 = vmax.f32 %v3576_v26, 0.0 }
 0x395   :  { %v15075_v20 = vsel %vm3760_vm10, %v3811_v48, %v3812_v6  ;;  %v4005_v61 = vsel %vm3760_vm10, %v3812_v6, 0.0 }
 0x396   :  { %v3420_v39 = vpop.f32.mrf.mxu2  ;;  %20196 = vst [vmem:[#allocation91_spill] sm:$0xff] %v15075_v20  ;;  %v3776_v2 = vrot.slane %v3640_v62, 7  ;;  %v4167_v7 = vrot.slane %v4005_v61, 1  ;;  %v4165_v58 = vrot.slane %v15075_v20, 1  ;;  %v4321_v10 = vrot.slane %v15075_v20, 2 }
 0x397   :  { %v3533_v23 = vmul.f32 %v14886_v59, %v3420_v39  ;;  %v4323_v15 = vrot.slane %v4005_v61, 2  ;;  %v4320_v62 = vrot.slane %v15069_v30, 2 }
 0x398   :  { %v3360_v54 = vpop.f32.mrf.mxu0  ;;  %v15082_v41 = vsel %vm3760_vm10, %v3775_v5, %v3776_v2  ;;  %v3993_v56 = vsel %vm3760_vm10, %v3776_v2, 0.0  ;;  %v20198_v5 = vpack.c.bf16 %v14584_v42, %v14581_v44  ;;  %v4166_v61 = vsel %vm4083_vm11, %v4164_v1, %v4165_v58 }
 0x399   :  { %20197 = vst [vmem:[#allocation92_spill] sm:$0xff] %v15082_v41  ;;  %v3509_v57 = vmul.f32 %v14886_v59, %v3360_v54  ;;  %v4112_v45 = vrot.slane %v3993_v56, 1  ;;  %v3601_v48 = vadd.f32 %v14891_v52, %v3533_v23  ;;  %v4110_v17 = vrot.slane %v15082_v41, 1 }
 0x39a   :  { %v4268_v26 = vrot.slane %v3993_v56, 2  ;;  %v4266_v6 = vrot.slane %v15082_v41, 2  ;;  %v4265_v23 = vrot.slane %v15072_v12, 2  ;;  %v4168_v44 = vsel %vm4083_vm11, %v4165_v58, %v4167_v7 }
 0x39b   :  { %v3577_v16 = vadd.f32 %v14891_v52, %v3509_v57  ;;  %7490 = vmatmul.msk.bf16.gmra.mxu0 %vm3225_vm9, %v20198_v5  ;;  %v4111_v39 = vsel %vm4083_vm11, %v4109_v22, %v4110_v17  ;;  %v4113_v2 = vsel %vm4083_vm11, %v4110_v17, %v4112_v45  ;;  %v3665_v56 = vmax.f32 %v3601_v48, 0.0 }
 0x39c   :  { %v15100_v54 = vpack.i.bf16 %v4113_v2, %v4111_v39  ;;  %v4322_v42 = vsel %vm4239_vm12, %v4320_v62, %v4321_v10  ;;  %v4267_v22 = vsel %vm4239_vm12, %v4265_v23, %v4266_v6  ;;  %v4269_v45 = vsel %vm4239_vm12, %v4266_v6, %v4268_v26 }
 0x39d   :  { %v3641_v57 = vmax.f32 %v3577_v16, 0.0  ;;  %v4324_v17 = vsel %vm4239_vm12, %v4321_v10, %v4323_v15  ;;  %v15113_v16 = vpack.i.bf16 %v4168_v44, %v4166_v61  ;;  %v3814_v7 = vrot.slane %v3665_v56, 7 }
 0x39e   :  { %20199 = vst [vmem:[#allocation93_spill] sm:$0xff] %v15100_v54  ;;  %v3422_v55 = vpop.f32.mrf.mxu2  ;;  %8874 = vrot.lane.b32.xlu0 %v15100_v54, %s10233_s13  ;;  %v15115_v58 = vpack.i.bf16 %v4269_v45, %v4267_v22  ;;  %v20202_v26 = vpack.c.bf16 %v14779_v18, %v14776_v35 }
 0x39f   :  { %v3534_v5 = vmul.f32 %v14886_v59, %v3422_v55  ;;  %20200 = vst [vmem:[#allocation94_spill] sm:$0xff] %v15113_v16  ;;  %v15117_v55 = vpack.i.bf16 %v4324_v17, %v4322_v42  ;;  %v3778_v62 = vrot.slane %v3641_v57, 7  ;;  %v15125_v6 = vsel %vm3760_vm10, 0.0, %v3814_v7 }
 0x3a0   :  { %v3362_v39 = vpop.f32.mrf.mxu0  ;;  %20201 = vst [vmem:[#allocation95_spill] sm:$0xff] %v15115_v58  ;;  %v4325_v4 = vrot.slane %v15125_v6, 2 }
 0x3a1   :  { %v3602_v1 = vadd.f32 %v14891_v52, %v3534_v5  ;;  %v3510_v48 = vmul.f32 %v14886_v59, %v3362_v39  ;;  %20203 = vst [vmem:[#allocation96_spill] sm:$0xff] %v15125_v6  ;;  %v15128_v56 = vsel %vm3760_vm10, 0.0, %v3778_v62  ;;  %v4169_v39 = vrot.slane %v15125_v6, 1 }
 0x3a2   :  { %20204 = vst [vmem:[#allocation33_spill] sm:$0xff] %v15128_v56 }
 0x3a3   :  { %v3666_v2 = vmax.f32 %v3602_v1, 0.0  ;;  %v3578_v23 = vadd.f32 %v14891_v52, %v3510_v48  ;;  %7503 = vmatmul.msk.bf16.gmra.mxu2 %vm3225_vm9, %v20202_v26  ;;  %v4114_v1 = vrot.slane %v15128_v56, 1 }
 0x3a5   :  { %v3815_v10 = vrot.slane %v3666_v2, 7  ;;  %v3642_v15 = vmax.f32 %v3578_v23, 0.0  ;;  %v20207_v23 = vpack.c.bf16 %v14578_v34, %v14575_v14  ;;  %v4270_v14 = vrot.slane %v15128_v56, 2 }
 0x3a6   :  { %v3425_v61 = vpop.f32.mrf.mxu2 }
 0x3a7   :  { %v15131_v44 = vsel %vm3760_vm10, %v3814_v7, %v3815_v10  ;;  %v3779_v57 = vrot.slane %v3642_v15, 7  ;;  %v3535_v42 = vmul.f32 %v14886_v59, %v3425_v61  ;;  %v4006_v5 = vsel %vm3760_vm10, %v3815_v10, 0.0 }
 0x3a8   :  { %20205 = vst [vmem:[#allocation34_spill] sm:$0xff] %v15131_v44  ;;  %v3365_v35 = vpop.f32.mrf.mxu0  ;;  %v4172_v7 = vrot.slane %v4006_v5, 1  ;;  %v4170_v26 = vrot.slane %v15131_v44, 1  ;;  %v4328_v10 = vrot.slane %v4006_v5, 2 }
 0x3a9   :  { %v15136_v18 = vsel %vm3760_vm10, %v3778_v62, %v3779_v57  ;;  %v3994_v22 = vsel %vm3760_vm10, %v3779_v57, 0.0  ;;  %v3603_v45 = vadd.f32 %v14891_v52, %v3535_v42  ;;  %v3511_v17 = vmul.f32 %v14886_v59, %v3365_v35 }
 0x3aa   :  { %20206 = vst [vmem:[#allocation97_spill] sm:$0xff] %v15136_v18  ;;  %v4117_v48 = vrot.slane %v3994_v22, 1  ;;  %v4115_v62 = vrot.slane %v15136_v18, 1  ;;  %v4273_v15 = vrot.slane %v3994_v22, 2  ;;  %v4271_v57 = vrot.slane %v15136_v18, 2 }
 0x3ab   :  { %v3579_v2 = vadd.f32 %v14891_v52, %v3511_v17  ;;  %7491 = vmatmul.msk.bf16.gmra.mxu0 %vm3225_vm9, %v20207_v23  ;;  %v3667_v61 = vmax.f32 %v3603_v45, 0.0  ;;  %v4326_v17 = vrot.slane %v15131_v44, 2  ;;  %v4171_v22 = vsel %vm4083_vm11, %v4169_v39, %v4170_v26 }
 0x3ac   :  { %v4116_v35 = vsel %vm4083_vm11, %v4114_v1, %v4115_v62  ;;  %v4118_v50 = vsel %vm4083_vm11, %v4115_v62, %v4117_v48  ;;  %v4173_v45 = vsel %vm4083_vm11, %v4170_v26, %v4172_v7  ;;  %v4272_v48 = vsel %vm4239_vm12, %v4270_v14, %v4271_v57 }
 0x3ad   :  { %v3643_v42 = vmax.f32 %v3579_v2, 0.0  ;;  %v15155_v23 = vpack.i.bf16 %v4118_v50, %v4116_v35  ;;  %v3817_v2 = vrot.slane %v3667_v61, 7  ;;  %v4274_v62 = vsel %vm4239_vm12, %v4271_v57, %v4273_v15 }
 0x3ae   :  { %v3427_v34 = vpop.f32.mrf.mxu2  ;;  %v4329_v39 = vsel %vm4239_vm12, %v4326_v17, %v4328_v10  ;;  %v20209_v26 = vpack.c.bf16 %v14622_v28, %v14619_v11  ;;  %v15174_v61 = vpack.i.bf16 %v4173_v45, %v4171_v22  ;;  %v15179_v57 = vpack.i.bf16 %v4274_v62, %v4272_v48 }
 0x3af   :  { %20208 = vst [vmem:[#allocation38_spill] sm:$0xff] %v15155_v23  ;;  %v3536_v5 = vmul.f32 %v14886_v59, %v3427_v34  ;;  %v3781_v37 = vrot.slane %v3643_v42, 7  ;;  %8879 = vrot.lane.b32.xlu1 %v15155_v23, %s10233_s13  ;;  %v4327_v34 = vsel %vm4239_vm12, %v4325_v4, %v4326_v17  ;;  %v15177_v15 = vsel %vm3760_vm10, 0.0, %v3817_v2  ;;  %v20217_v23 = vld [vmem:[#allocation79_spill] sm:$0xff] }
 0x3b0   :  { %v3367_v1 = vpop.f32.mrf.mxu0  ;;  %20210 = vst [vmem:[#allocation98_spill] sm:$0xff] %v15174_v61  ;;  %v15181_v42 = vpack.i.bf16 %v4329_v39, %v4327_v34  ;;  %v4174_v45 = vrot.slane %v15177_v15, 1 }
 0x3b1   :  { %v3604_v50 = vadd.f32 %v14891_v52, %v3536_v5  ;;  %v3512_v35 = vmul.f32 %v14886_v59, %v3367_v1  ;;  %20211 = vst [vmem:[#allocation99_spill] sm:$0xff] %v15177_v15  ;;  %v15184_v4 = vsel %vm3760_vm10, 0.0, %v3781_v37 }
 0x3b2   :  { %20212 = vst [vmem:[#allocation100_spill] sm:$0xff] %v15179_v57  ;;  %v4119_v1 = vrot.slane %v15184_v4, 1  ;;  %v4275_v27 = vrot.slane %v15184_v4, 2 }
 0x3b3   :  { %v3668_v33 = vmax.f32 %v3604_v50, 0.0  ;;  %v3580_v7 = vadd.f32 %v14891_v52, %v3512_v35  ;;  %7504 = vmatmul.msk.bf16.gmra.mxu2 %vm3225_vm9, %v20209_v26  ;;  %20213 = vst [vmem:[#allocation101_spill] sm:$0xff] %v15181_v42 }
 0x3b4   :  { %20214 = vst [vmem:[#allocation102_spill] sm:$0xff] %v15184_v4 }
 0x3b5   :  { %v3818_v10 = vrot.slane %v3668_v33, 7  ;;  %v3644_v17 = vmax.f32 %v3580_v7, 0.0 }
 0x3b6   :  { %v3430_v14 = vpop.f32.mrf.mxu2 }
 0x3b7   :  { %v15187_v5 = vsel %vm3760_vm10, %v3817_v2, %v3818_v10  ;;  %v4007_v11 = vsel %vm3760_vm10, %v3818_v10, 0.0  ;;  %v3782_v28 = vrot.slane %v3644_v17, 7  ;;  %v3537_v22 = vmul.f32 %v14886_v59, %v3430_v14 }
 0x3b8   :  { %20215 = vst [vmem:[#allocation39_spill] sm:$0xff] %v15187_v5  ;;  %v4177_v48 = vrot.slane %v4007_v11, 1  ;;  %v3370_v62 = vpop.f32.mrf.mxu0  ;;  %v4175_v7 = vrot.slane %v15187_v5, 1  ;;  %v4331_v26 = vrot.slane %v15187_v5, 2  ;;  %v4333_v10 = vrot.slane %v4007_v11, 2 }
 0x3b9   :  { %v15194_v50 = vsel %vm3760_vm10, %v3781_v37, %v3782_v28  ;;  %v3995_v33 = vsel %vm3760_vm10, %v3782_v28, 0.0  ;;  %v3605_v35 = vadd.f32 %v14891_v52, %v3537_v22  ;;  %v3513_v2 = vmul.f32 %v14886_v59, %v3370_v62  ;;  %v20218_v37 = vld [vmem:[#allocation78_spill] sm:$0xff] }
 0x3ba   :  { %20216 = vst [vmem:[#allocation40_spill] sm:$0xff] %v15194_v50  ;;  %v4122_v34 = vrot.slane %v3995_v33, 1  ;;  %v4120_v39 = vrot.slane %v15194_v50, 1  ;;  %v4278_v17 = vrot.slane %v3995_v33, 2  ;;  %v20219_v54 = vpack.c.bf16 %v20217_v23, %v20218_v37 }
 0x3bb   :  { %v3581_v14 = vadd.f32 %v14891_v52, %v3513_v2  ;;  %v4276_v28 = vrot.slane %v15194_v50, 2  ;;  %v4330_v22 = vrot.slane %v15177_v15, 2  ;;  %v3669_v62 = vmax.f32 %v3605_v35, 0.0 }
 0x3bc   :  { %7492 = vmatmul.msk.bf16.gmra.mxu0 %vm3225_vm9, %v20219_v54  ;;  %v4121_v38 = vsel %vm4083_vm11, %v4119_v1, %v4120_v39  ;;  %v4123_v49 = vsel %vm4083_vm11, %v4120_v39, %v4122_v34  ;;  %v4176_v20 = vsel %vm4083_vm11, %v4174_v45, %v4175_v7  ;;  %v4178_v23 = vsel %vm4083_vm11, %v4175_v7, %v4177_v48 }
 0x3bd   :  { %v3645_v11 = vmax.f32 %v3581_v14, 0.0  ;;  %v15212_v33 = vpack.i.bf16 %v4123_v49, %v4121_v38  ;;  %v4332_v54 = vsel %vm4239_vm12, %v4330_v22, %v4331_v26  ;;  %v4277_v1 = vsel %vm4239_vm12, %v4275_v27, %v4276_v28 }
 0x3be   :  { %v3432_v2 = vpop.f32.mrf.mxu2  ;;  %v4279_v35 = vsel %vm4239_vm12, %v4276_v28, %v4278_v17  ;;  %v4334_v34 = vsel %vm4239_vm12, %v4331_v26, %v4333_v10  ;;  %v3820_v38 = vrot.slane %v3669_v62, 7  ;;  %v15225_v7 = vpack.i.bf16 %v4178_v23, %v4176_v20 }
 0x3bf   :  { %20220 = vst [vmem:[#allocation103_spill] sm:$0xff] %v15212_v33  ;;  %v3538_v37 = vmul.f32 %v14886_v59, %v3432_v2  ;;  %8884 = vrot.lane.b32.xlu2 %v15212_v33, %s10233_s13  ;;  %v3784_v39 = vrot.slane %v3645_v11, 7  ;;  %v15227_v14 = vpack.i.bf16 %v4279_v35, %v4277_v1  ;;  %v15229_v22 = vpack.i.bf16 %v4334_v34, %v4332_v54 }
 0x3c0   :  { %v3372_v49 = vpop.f32.mrf.mxu0  ;;  %20221 = vst [vmem:[#allocation104_spill] sm:$0xff] %v15225_v7  ;;  %v20224_v17 = vpack.c.bf16 %v14829_v40, %v14826_v3  ;;  %v15237_v26 = vsel %vm3760_vm10, 0.0, %v3820_v38 }
 0x3c1   :  { %v3606_v45 = vadd.f32 %v14891_v52, %v3538_v37  ;;  %v3514_v48 = vmul.f32 %v14886_v59, %v3372_v49  ;;  %20222 = vst [vmem:[#allocation41_spill] sm:$0xff] %v15227_v14  ;;  %v15240_v10 = vsel %vm3760_vm10, 0.0, %v3784_v39  ;;  %v4179_v3 = vrot.slane %v15237_v26, 1 }
 0x3c2   :  { %20223 = vst [vmem:[#allocation105_spill] sm:$0xff] %v15229_v22  ;;  %v4124_v40 = vrot.slane %v15240_v10, 1  ;;  %v4280_v5 = vrot.slane %v15240_v10, 2 }
 0x3c3   :  { %v3670_v2 = vmax.f32 %v3606_v45, 0.0  ;;  %v3582_v27 = vadd.f32 %v14891_v52, %v3514_v48  ;;  %7505 = vmatmul.msk.bf16.gmra.mxu2 %vm3225_vm9, %v20224_v17  ;;  %20225 = vst [vmem:[#allocation42_spill] sm:$0xff] %v15237_v26 }
 0x3c4   :  { %20226 = vst [vmem:[#allocation106_spill] sm:$0xff] %v15240_v10 }
 0x3c5   :  { %v3821_v20 = vrot.slane %v3670_v2, 7  ;;  %v3646_v28 = vmax.f32 %v3582_v27, 0.0 }
 0x3c6   :  { %v3435_v62 = vpop.f32.mrf.mxu2 }
 0x3c7   :  { %v15243_v11 = vsel %vm3760_vm10, %v3820_v38, %v3821_v20  ;;  %v4008_v23 = vsel %vm3760_vm10, %v3821_v20, 0.0  ;;  %v3785_v54 = vrot.slane %v3646_v28, 7  ;;  %v3539_v37 = vmul.f32 %v14886_v59, %v3435_v62 }
 0x3c8   :  { %20227 = vst [vmem:[#allocation107_spill] sm:$0xff] %v15243_v11  ;;  %v3375_v1 = vpop.f32.mrf.mxu0  ;;  %v4182_v45 = vrot.slane %v4008_v23, 1  ;;  %v4180_v27 = vrot.slane %v15243_v11, 1  ;;  %v4338_v17 = vrot.slane %v4008_v23, 2  ;;  %v4336_v62 = vrot.slane %v15243_v11, 2 }
 0x3c9   :  { %v15250_v35 = vsel %vm3760_vm10, %v3784_v39, %v3785_v54  ;;  %v3996_v34 = vsel %vm3760_vm10, %v3785_v54, 0.0  ;;  %v3607_v49 = vadd.f32 %v14891_v52, %v3539_v37  ;;  %v3515_v38 = vmul.f32 %v14886_v59, %v3375_v1 }
 0x3ca   :  { %20228 = vst [vmem:[#allocation108_spill] sm:$0xff] %v15250_v35  ;;  %v4127_v48 = vrot.slane %v3996_v34, 1  ;;  %v4125_v2 = vrot.slane %v15250_v35, 1  ;;  %v4283_v39 = vrot.slane %v3996_v34, 2  ;;  %v4281_v37 = vrot.slane %v15250_v35, 2 }
 0x3cb   :  { %v3671_v20 = vmax.f32 %v3607_v49, 0.0  ;;  %v3583_v28 = vadd.f32 %v14891_v52, %v3515_v38  ;;  %v4335_v1 = vrot.slane %v15237_v26, 2  ;;  %v4181_v49 = vsel %vm4083_vm11, %v4179_v3, %v4180_v27 }
 0x3cc   :  { %v4126_v33 = vsel %vm4083_vm11, %v4124_v40, %v4125_v2  ;;  %v4128_v54 = vsel %vm4083_vm11, %v4125_v2, %v4127_v48  ;;  %v4183_v38 = vsel %vm4083_vm11, %v4180_v27, %v4182_v45  ;;  %v4284_v2 = vsel %vm4239_vm12, %v4281_v37, %v4283_v39 }
 0x3cd   :  { %v15263_v30 = vpack.i.bf16 %v4128_v54, %v4126_v33  ;;  %v3647_v15 = vmax.f32 %v3583_v28, 0.0  ;;  %v3823_v11 = vrot.slane %v3671_v20, 7  ;;  %v4337_v40 = vsel %vm4239_vm12, %v4335_v1, %v4336_v62 }
 0x3ce   :  { %v3437_v23 = vpop.f32.mrf.mxu2  ;;  %v4282_v33 = vsel %vm4239_vm12, %v4280_v5, %v4281_v37  ;;  %v4339_v28 = vsel %vm4239_vm12, %v4336_v62, %v4338_v17  ;;  %v15277_v45 = vpack.i.bf16 %v4183_v38, %v4181_v49  ;;  %v20231_v1 = vpack.c.bf16 %v14823_v36, %v14820_v43 }
 0x3cf   :  { %20229 = vst [vmem:[#allocation109_spill] sm:$0xff] %v15263_v30  ;;  %v3540_v34 = vmul.f32 %v14886_v59, %v3437_v23  ;;  %8889 = vrot.lane.b32.xlu0 %v15263_v30, %s10233_s13  ;;  %v3787_v27 = vrot.slane %v3647_v15, 7  ;;  %v15284_v5 = vpack.i.bf16 %v4284_v2, %v4282_v33  ;;  %v15286_v39 = vpack.i.bf16 %v4339_v28, %v4337_v40 }
 0x3d0   :  { %v3377_v48 = vpop.f32.mrf.mxu0  ;;  %20230 = vst [vmem:[#allocation143_spill] sm:$0xff] %v15277_v45  ;;  %v15289_v17 = vsel %vm3760_vm10, 0.0, %v3823_v11 }
 0x3d1   :  { %v3608_v54 = vadd.f32 %v14891_v52, %v3540_v34  ;;  %v3516_v3 = vmul.f32 %v14886_v59, %v3377_v48  ;;  %20232 = vst [vmem:[#allocation158_spill] sm:$0xff] %v15284_v5  ;;  %v15292_v49 = vsel %vm3760_vm10, 0.0, %v3787_v27  ;;  %v4184_v40 = vrot.slane %v15289_v17, 1 }
 0x3d2   :  { %20233 = vst [vmem:[#allocation8_spill] sm:$0xff] %v15286_v39  ;;  %v4129_v33 = vrot.slane %v15292_v49, 1  ;;  %v4340_v26 = vrot.slane %v15289_v17, 2  ;;  %v4285_v10 = vrot.slane %v15292_v49, 2 }
 0x3d3   :  { %v3672_v20 = vmax.f32 %v3608_v54, 0.0  ;;  %v3584_v23 = vadd.f32 %v14891_v52, %v3516_v3  ;;  %7506 = vmatmul.msk.bf16.gmra.mxu2 %vm3225_vm9, %v20231_v1  ;;  %20234 = vst [vmem:[#allocation110_spill] sm:$0xff] %v15289_v17 }
 0x3d4   :  { %20235 = vst [vmem:[#allocation45_spill] sm:$0xff] %v15292_v49 }
 0x3d5   :  { %v3824_v62 = vrot.slane %v3672_v20, 7  ;;  %v3648_v37 = vmax.f32 %v3584_v23, 0.0 }
 0x3d6   :  { %v3440_v15 = vpop.f32.mrf.mxu2 }
 0x3d7   :  { %v15295_v38 = vsel %vm3760_vm10, %v3823_v11, %v3824_v62  ;;  %v4009_v43 = vsel %vm3760_vm10, %v3824_v62, 0.0  ;;  %v3788_v36 = vrot.slane %v3648_v37, 7  ;;  %v3541_v34 = vmul.f32 %v14886_v59, %v3440_v15 }
 0x3d8   :  { %20236 = vst [vmem:[#allocation111_spill] sm:$0xff] %v15295_v38  ;;  %v3380_v48 = vpop.f32.mrf.mxu0  ;;  %v4187_v3 = vrot.slane %v4009_v43, 1  ;;  %v4185_v23 = vrot.slane %v15295_v38, 1  ;;  %v4343_v1 = vrot.slane %v4009_v43, 2  ;;  %v4341_v15 = vrot.slane %v15295_v38, 2 }
 0x3d9   :  { %v15302_v2 = vsel %vm3760_vm10, %v3787_v27, %v3788_v36  ;;  %v3997_v28 = vsel %vm3760_vm10, %v3788_v36, 0.0  ;;  %v3517_v54 = vmul.f32 %v14886_v59, %v3380_v48  ;;  %v3609_v62 = vadd.f32 %v14891_v52, %v3541_v34 }
 0x3da   :  { %20237 = vst [vmem:[#allocation112_spill] sm:$0xff] %v15302_v2  ;;  %v4132_v11 = vrot.slane %v3997_v28, 1  ;;  %v4130_v20 = vrot.slane %v15302_v2, 1  ;;  %v4288_v30 = vrot.slane %v3997_v28, 2  ;;  %v4286_v48 = vrot.slane %v15302_v2, 2 }
 0x3db   :  { %v3585_v37 = vadd.f32 %v14891_v52, %v3517_v54  ;;  %v4186_v34 = vsel %vm4083_vm11, %v4184_v40, %v4185_v23  ;;  %v4188_v54 = vsel %vm4083_vm11, %v4185_v23, %v4187_v3  ;;  %v3673_v44 = vmax.f32 %v3609_v62, 0.0 }
 0x3dc   :  { %v4131_v27 = vsel %vm4083_vm11, %v4129_v33, %v4130_v20  ;;  %v4133_v36 = vsel %vm4083_vm11, %v4130_v20, %v4132_v11  ;;  %v4342_v33 = vsel %vm4239_vm12, %v4340_v26, %v4341_v15  ;;  %v4287_v20 = vsel %vm4239_vm12, %v4285_v10, %v4286_v48 }
 0x3dd   :  { %v15315_v35 = vpack.i.bf16 %v4133_v36, %v4131_v27  ;;  %v3649_v38 = vmax.f32 %v3585_v37, 0.0  ;;  %v4289_v27 = vsel %vm4239_vm12, %v4286_v48, %v4288_v30  ;;  %v4344_v36 = vsel %vm4239_vm12, %v4341_v15, %v4343_v1 }
 0x3de   :  { %v3442_v43 = vpop.f32.mrf.mxu2  ;;  %v15329_v23 = vpack.i.bf16 %v4188_v54, %v4186_v34  ;;  %v15336_v26 = vpack.i.bf16 %v4289_v27, %v4287_v20  ;;  %v15338_v10 = vpack.i.bf16 %v4344_v36, %v4342_v33  ;;  %v3826_v30 = vrot.slane %v3673_v44, 7 }
 0x3df   :  { %20238 = vst [vmem:[#allocation113_spill] sm:$0xff] %v15315_v35  ;;  %v3542_v28 = vmul.f32 %v14886_v59, %v3442_v43  ;;  %8894 = vrot.lane.b32.xlu1 %v15315_v35, %s10233_s13  ;;  %v20240_v43 = vld [vmem:[#allocation22_spill] sm:$0xff]  ;;  %v20241_v35 = vld [vmem:[#allocation80_spill] sm:$0xff]  ;;  %v3790_v1 = vrot.slane %v3649_v38, 7 }
 0x3e0   :  { %v3382_v11 = vpop.f32.mrf.mxu0  ;;  %20239 = vst [vmem:[#allocation114_spill] sm:$0xff] %v15329_v23  ;;  %v20242_v17 = vpack.c.bf16 %v20240_v43, %v20241_v35 }
 0x3e1   :  { %v3610_v40 = vadd.f32 %v14891_v52, %v3542_v28  ;;  %v3518_v3 = vmul.f32 %v14886_v59, %v3382_v11  ;;  %20243 = vst [vmem:[#allocation46_spill] sm:$0xff] %v15336_v26 }
 0x3e2   :  { %20244 = vst [vmem:[#allocation4_spill] sm:$0xff] %v15338_v10 }
 0x3e3   :  { %v3674_v62 = vmax.f32 %v3610_v40, 0.0  ;;  %v3586_v37 = vadd.f32 %v14891_v52, %v3518_v3  ;;  %7507 = vmatmul.msk.bf16.gmra.mxu2 %vm3225_vm9, %v20242_v17  ;;  %v15345_v40 = vsel %vm3760_vm10, 0.0, %v3790_v1 }
 0x3e4   :  { %20246 = vst [vmem:[#allocation14_spill] sm:$0xff] %v15345_v40  ;;  %v4134_v36 = vrot.slane %v15345_v40, 1 }
 0x3e5   :  { %v3827_v15 = vrot.slane %v3674_v62, 7  ;;  %v3650_v48 = vmax.f32 %v3586_v37, 0.0  ;;  %v15358_v37 = vsel %vm3760_vm10, 0.0, %v3826_v30 }
 0x3e6   :  { %v3445_v28 = vpop.f32.mrf.mxu2  ;;  %20248 = vst [vmem:[#allocation160_spill] sm:$0xff] %v15358_v37 }
 0x3e7   :  { %v15341_v34 = vsel %vm3760_vm10, %v3826_v30, %v3827_v15  ;;  %v3791_v54 = vrot.slane %v3650_v48, 7  ;;  %v3543_v11 = vmul.f32 %v14886_v59, %v3445_v28  ;;  %v4010_v35 = vsel %vm3760_vm10, %v3827_v15, 0.0 }
 0x3e8   :  { %20245 = vst [vmem:[#allocation149_spill] sm:$0xff] %v15341_v34  ;;  %v3385_v17 = vpop.f32.mrf.mxu0  ;;  %v4192_v43 = vrot.slane %v4010_v35, 1  ;;  %v4348_v15 = vrot.slane %v4010_v35, 2  ;;  %v4346_v12 = vrot.slane %v15341_v34, 2  ;;  %v4189_v30 = vrot.slane %v15358_v37, 1 }
 0x3e9   :  { %v15349_v33 = vsel %vm3760_vm10, %v3790_v1, %v3791_v54  ;;  %v3998_v44 = vsel %vm3760_vm10, %v3791_v54, 0.0  ;;  %v3611_v38 = vadd.f32 %v14891_v52, %v3543_v11  ;;  %v3519_v20 = vmul.f32 %v14886_v59, %v3385_v17 }
 0x3ea   :  { %20247 = vst [vmem:[#allocation118_spill] sm:$0xff] %v15349_v33  ;;  %v4137_v27 = vrot.slane %v3998_v44, 1  ;;  %v4135_v62 = vrot.slane %v15349_v33, 1  ;;  %v4190_v11 = vrot.slane %v15341_v34, 1  ;;  %v4293_v17 = vrot.slane %v3998_v44, 2 }
 0x3eb   :  { %v3587_v3 = vadd.f32 %v14891_v52, %v3519_v20  ;;  %v3675_v1 = vmax.f32 %v3611_v38, 0.0  ;;  %v4291_v20 = vrot.slane %v15349_v33, 2  ;;  %v4345_v38 = vrot.slane %v15358_v37, 2 }
 0x3ec   :  { %v4136_v28 = vsel %vm4083_vm11, %v4134_v36, %v4135_v62  ;;  %v4138_v54 = vsel %vm4083_vm11, %v4135_v62, %v4137_v27  ;;  %v4290_v36 = vrot.slane %v15345_v40, 2  ;;  %v4193_v34 = vsel %vm4083_vm11, %v4190_v11, %v4192_v43 }
 0x3ed   :  { %v3651_v48 = vmax.f32 %v3587_v3, 0.0  ;;  %v15363_v41 = vpack.i.bf16 %v4138_v54, %v4136_v28  ;;  %v3829_v3 = vrot.slane %v3675_v1, 7  ;;  %v4191_v54 = vsel %vm4083_vm11, %v4189_v30, %v4190_v11 }
 0x3ee   :  { %v3447_v6 = vpop.f32.mrf.mxu2  ;;  %v4294_v37 = vsel %vm4239_vm12, %v4291_v20, %v4293_v17  ;;  %v4347_v33 = vsel %vm4239_vm12, %v4345_v38, %v4346_v12  ;;  %v4349_v1 = vsel %vm4239_vm12, %v4346_v12, %v4348_v15  ;;  %v15392_v11 = vpack.i.bf16 %v4193_v34, %v4191_v54 }
 0x3ef   :  { %20249 = vst [vmem:[#allocation48_spill] sm:$0xff] %v15363_v41  ;;  %v3544_v35 = vmul.f32 %v14886_v59, %v3447_v6  ;;  %v3793_v27 = vrot.slane %v3651_v48, 7  ;;  %8899 = vrot.lane.b32.xlu2 %v15363_v41, %s10233_s13  ;;  %v4292_v6 = vsel %vm4239_vm12, %v4290_v36, %v4291_v20  ;;  %v15387_v30 = vsel %vm3760_vm10, 0.0, %v3829_v3 }
 0x3f0   :  { %v3387_v44 = vpop.f32.mrf.mxu0  ;;  %20251 = vst [vmem:[#allocation49_spill] sm:$0xff] %v15387_v30  ;;  %v15394_v38 = vpack.i.bf16 %v4294_v37, %v4292_v6  ;;  %v15396_v12 = vpack.i.bf16 %v4349_v1, %v4347_v33  ;;  %v15412_v37 = vld [vmem:[%s19031_s1] ss:$0 sm:$0xff] }
 0x3f1   :  { %v3612_v62 = vadd.f32 %v14891_v52, %v3544_v35  ;;  %v3520_v28 = vmul.f32 %v14886_v59, %v3387_v44  ;;  %v20250_v35 = vpack.c.bf16 %v14871_v9, %v14868_v13  ;;  %v15390_v43 = vsel %vm3760_vm10, 0.0, %v3793_v27  ;;  %20253 = vst [vmem:[#allocation131_spill] sm:$0xff] %v15392_v11  ;;  %v15419_v6 = vld [vmem:[%s19032_s2] ss:$0 sm:$0xff] }
 0x3f2   :  { %20252 = vst [vmem:[#allocation121_spill] sm:$0xff] %v15390_v43  ;;  %v4194_v44 = vrot.slane %v15387_v30, 1  ;;  %v4139_v34 = vrot.slane %v15390_v43, 1 }
 0x3f3   :  { %v3676_v48 = vmax.f32 %v3612_v62, 0.0  ;;  %v3588_v41 = vadd.f32 %v14891_v52, %v3520_v28  ;;  %7508 = vmatmul.msk.bf16.gmra.mxu2 %vm3225_vm9, %v20250_v35  ;;  %20254 = vst [vmem:[#allocation142_spill] sm:$0xff] %v15394_v38 }
 0x3f4   :  { %20255 = vst [vmem:[#allocation147_spill] sm:$0xff] %v15396_v12 }
 0x3f5   :  { %v3830_v17 = vrot.slane %v3676_v48, 7  ;;  %v3652_v20 = vmax.f32 %v3588_v41, 0.0 }
 0x3f6   :  { %v3450_v52 = vpop.f32.mrf.mxu2 }
 0x3f7   :  { %v15399_v15 = vsel %vm3760_vm10, %v3829_v3, %v3830_v17  ;;  %v4011_v13 = vsel %vm3760_vm10, %v3830_v17, 0.0  ;;  %v3794_v9 = vrot.slane %v3652_v20, 7  ;;  %v3545_v36 = vmul.f32 %v14886_v59, %v3450_v52 }
 0x3f8   :  { %20256 = vst [vmem:[#allocation155_spill] sm:$0xff] %v15399_v15  ;;  %v4197_v62 = vrot.slane %v4011_v13, 1  ;;  %v3390_v28 = vpop.f32.mrf.mxu0  ;;  %v4195_v59 = vrot.slane %v15399_v15, 1  ;;  %v4351_v48 = vrot.slane %v15399_v15, 2  ;;  %v4353_v35 = vrot.slane %v4011_v13, 2 }
 0x3f9   :  { %v15406_v41 = vsel %vm3760_vm10, %v3793_v27, %v3794_v9  ;;  %v3999_v33 = vsel %vm3760_vm10, %v3794_v9, 0.0  ;;  %v3521_v3 = vmul.f32 %v15412_v37, %v3390_v28  ;;  %v3613_v27 = vadd.f32 %v15419_v6, %v3545_v36 }
 0x3fa   :  { %20257 = vst [vmem:[#allocation6_spill] sm:$0xff] %v15406_v41  ;;  %v4142_v54 = vrot.slane %v3999_v33, 1  ;;  %v4140_v1 = vrot.slane %v15406_v41, 1  ;;  %v4298_v17 = vrot.slane %v3999_v33, 2  ;;  %v4296_v52 = vrot.slane %v15406_v41, 2 }
 0x3fb   :  { %v3589_v20 = vadd.f32 %v15419_v6, %v3521_v3  ;;  %v4350_v9 = vrot.slane %v15387_v30, 2  ;;  %v4295_v28 = vrot.slane %v15390_v43, 2  ;;  %v4196_v50 = vsel %vm4083_vm11, %v4194_v44, %v4195_v59 }
 0x3fc   :  { %v4141_v40 = vsel %vm4083_vm11, %v4139_v34, %v4140_v1  ;;  %v4143_v51 = vsel %vm4083_vm11, %v4140_v1, %v4142_v54  ;;  %v3677_v15 = vmax.f32 %v3613_v27, 0.0  ;;  %v4198_v33 = vsel %vm4083_vm11, %v4195_v59, %v4197_v62 }
 0x3fd   :  { %v3653_v53 = vmax.f32 %v3589_v20, 0.0  ;;  %v15430_v36 = vpack.i.bf16 %v4143_v51, %v4141_v40  ;;  %v4297_v3 = vsel %vm4239_vm12, %v4295_v28, %v4296_v52  ;;  %v4352_v41 = vsel %vm4239_vm12, %v4350_v9, %v4351_v48 }
 0x3fe   :  { %v3452_v13 = vpop.f32.mrf.mxu2  ;;  %v4299_v34 = vsel %vm4239_vm12, %v4296_v52, %v4298_v17  ;;  %v4354_v51 = vsel %vm4239_vm12, %v4351_v48, %v4353_v35  ;;  %v15443_v62 = vpack.i.bf16 %v4198_v33, %v4196_v50 }
 0x3ff   :  { %20258 = vst [vmem:[#allocation150_spill] sm:$0xff] %v15430_v36  ;;  %v3796_v30 = vrot.slane %v3653_v53, 7  ;;  %v3546_v43 = vmul.f32 %v15412_v37, %v3452_v13  ;;  %8904 = vrot.lane.b32.xlu0 %v15430_v36, %s10233_s13  ;;  %v15445_v59 = vpack.i.bf16 %v4299_v34, %v4297_v3  ;;  %v15447_v27 = vpack.i.bf16 %v4354_v51, %v4352_v41 }
 0x400   :  { %v3392_v40 = vpop.f32.mrf.mxu0  ;;  %20259 = vst [vmem:[#allocation154_spill] sm:$0xff] %v15443_v62  ;;  %v3832_v53 = vrot.slane %v3677_v15, 7 }
 0x401   :  { %v3614_v44 = vadd.f32 %v15419_v6, %v3546_v43  ;;  %v3522_v54 = vmul.f32 %v15412_v37, %v3392_v40  ;;  %20260 = vst [vmem:[#allocation156_spill] sm:$0xff] %v15445_v59  ;;  %v15450_v1 = vsel %vm3760_vm10, 0.0, %v3796_v30 }
 0x402   :  { %20261 = vst [vmem:[#allocation2_spill] sm:$0xff] %v15447_v27  ;;  %v15459_v41 = vsel %vm3760_vm10, 0.0, %v3832_v53  ;;  %v4144_v15 = vrot.slane %v15450_v1, 1  ;;  %v4300_v36 = vrot.slane %v15450_v1, 2 }
 0x403   :  { %20262 = vst [vmem:[#allocation3_spill] sm:$0xff] %v15450_v1  ;;  %v3678_v20 = vmax.f32 %v3614_v44, 0.0  ;;  %v3590_v17 = vadd.f32 %v15419_v6, %v3522_v54 }
 0x404   :  { %20264 = vst [vmem:[#allocation120_spill] sm:$0xff] %v15459_v41 }
 0x405   :  { %v3833_v52 = vrot.slane %v3678_v20, 7  ;;  %v3654_v48 = vmax.f32 %v3590_v17, 0.0 }
 0x406   :  { %v3455_v35 = vpop.f32.mrf.mxu2 }
 0x407   :  { %v15454_v43 = vsel %vm3760_vm10, %v3832_v53, %v3833_v52  ;;  %v4012_v50 = vsel %vm3760_vm10, %v3833_v52, 0.0  ;;  %v3797_v9 = vrot.slane %v3654_v48, 7  ;;  %v3547_v28 = vmul.f32 %v15412_v37, %v3455_v35 }
 0x408   :  { %20263 = vst [vmem:[#allocation55_spill] sm:$0xff] %v15454_v43  ;;  %v3395_v13 = vpop.f32.mrf.mxu0  ;;  %v4202_v33 = vrot.slane %v4012_v50, 1  ;;  %v4200_v20 = vrot.slane %v15454_v43, 1  ;;  %v4199_v53 = vrot.slane %v15459_v41, 1  ;;  %v4358_v17 = vrot.slane %v4012_v50, 2 }
 0x409   :  { %v15463_v3 = vsel %vm3760_vm10, %v3796_v30, %v3797_v9  ;;  %v4000_v34 = vsel %vm3760_vm10, %v3797_v9, 0.0  ;;  %v3523_v51 = vmul.f32 %v15412_v37, %v3395_v13  ;;  %v3615_v44 = vadd.f32 %v15419_v6, %v3547_v28 }
 0x40a   :  { %20265 = vst [vmem:[#allocation9_spill] sm:$0xff] %v15463_v3  ;;  %v4147_v40 = vrot.slane %v4000_v34, 1  ;;  %v4145_v54 = vrot.slane %v15463_v3, 1  ;;  %v4356_v48 = vrot.slane %v15454_v43, 2  ;;  %v4303_v30 = vrot.slane %v4000_v34, 2 }
 0x40b   :  { %v3591_v52 = vadd.f32 %v15419_v6, %v3523_v51  ;;  %v4301_v13 = vrot.slane %v15463_v3, 2  ;;  %v4355_v28 = vrot.slane %v15459_v41, 2  ;;  %v3679_v2 = vmax.f32 %v3615_v44, 0.0 }
 0x40c   :  { %v4146_v35 = vsel %vm4083_vm11, %v4144_v15, %v4145_v54  ;;  %v4148_v9 = vsel %vm4083_vm11, %v4145_v54, %v4147_v40  ;;  %v4201_v51 = vsel %vm4083_vm11, %v4199_v53, %v4200_v20  ;;  %v4203_v43 = vsel %vm4083_vm11, %v4200_v20, %v4202_v33 }
 0x40d   :  { %v15478_v4 = vpack.i.bf16 %v4148_v9, %v4146_v35  ;;  %v3655_v49 = vmax.f32 %v3591_v52, 0.0  ;;  %v4357_v15 = vsel %vm4239_vm12, %v4355_v28, %v4356_v48  ;;  %v4302_v54 = vsel %vm4239_vm12, %v4300_v36, %v4301_v13 }
 0x40e   :  { %v3457_v50 = vpop.f32.mrf.mxu2  ;;  %v4304_v35 = vsel %vm4239_vm12, %v4301_v13, %v4303_v30  ;;  %v4359_v44 = vsel %vm4239_vm12, %v4356_v48, %v4358_v17  ;;  %v15491_v9 = vpack.i.bf16 %v4203_v43, %v4201_v51  ;;  %v3835_v33 = vrot.slane %v3679_v2, 7 }
 0x40f   :  { %20266 = vst [vmem:[#allocation124_spill] sm:$0xff] %v15478_v4  ;;  %v3548_v34 = vmul.f32 %v15412_v37, %v3457_v50  ;;  %8909 = vrot.lane.b32.xlu1 %v15478_v4, %s10233_s13  ;;  %v3799_v20 = vrot.slane %v3655_v49, 7  ;;  %v15494_v41 = vpack.i.bf16 %v4304_v35, %v4302_v54  ;;  %v15496_v28 = vpack.i.bf16 %v4359_v44, %v4357_v15 }
 0x410   :  { %v3397_v40 = vpop.f32.mrf.mxu0  ;;  %20267 = vst [vmem:[#allocation135_spill] sm:$0xff] %v15491_v9  ;;  %v15499_v17 = vsel %vm3760_vm10, 0.0, %v3835_v33 }
 0x411   :  { %v3616_v52 = vadd.f32 %v15419_v6, %v3548_v34  ;;  %v3524_v53 = vmul.f32 %v15412_v37, %v3397_v40  ;;  %20268 = vst [vmem:[#allocation44_spill] sm:$0xff] %v15494_v41  ;;  %v15502_v48 = vsel %vm3760_vm10, 0.0, %v3799_v20  ;;  %v4204_v54 = vrot.slane %v15499_v17, 1 }
 0x412   :  { %20269 = vst [vmem:[#allocation60_spill] sm:$0xff] %v15496_v28  ;;  %v4305_v47 = vrot.slane %v15502_v48, 2  ;;  %v4360_v18 = vrot.slane %v15499_v17, 2 }
 0x413   :  { %v3680_v50 = vmax.f32 %v3616_v52, 0.0  ;;  %v3592_v4 = vadd.f32 %v15419_v6, %v3524_v53  ;;  %20270 = vst [vmem:[#allocation125_spill] sm:$0xff] %v15499_v17 }
 0x414   :  { %20271 = vst [vmem:[#allocation12_spill] sm:$0xff] %v15502_v48 }
 0x415   :  { %v3836_v36 = vrot.slane %v3680_v50, 7  ;;  %v3656_v3 = vmax.f32 %v3592_v4, 0.0 }
 0x416   :  { %v3460_v30 = vpop.f32.mrf.mxu2 }
 0x417   :  { %v3800_v43 = vrot.slane %v3656_v3, 7  ;;  %v3549_v2 = vmul.f32 %v15412_v37, %v3460_v30  ;;  %v15506_v49 = vsel %vm3760_vm10, %v3835_v33, %v3836_v36  ;;  %v4013_v13 = vsel %vm3760_vm10, %v3836_v36, 0.0 }
 0x418   :  { %20272 = vst [vmem:[#allocation145_spill] sm:$0xff] %v15506_v49  ;;  %v3400_v51 = vpop.f32.mrf.mxu0  ;;  %v4149_v3 = vrot.slane %v15502_v48, 1  ;;  %v4207_v44 = vrot.slane %v4013_v13, 1  ;;  %v4205_v33 = vrot.slane %v15506_v49, 1  ;;  %v4361_v1 = vrot.slane %v15506_v49, 2 }
 0x419   :  { %v15510_v34 = vsel %vm3760_vm10, %v3799_v20, %v3800_v43  ;;  %v4001_v4 = vsel %vm3760_vm10, %v3800_v43, 0.0  ;;  %v3617_v15 = vadd.f32 %v15419_v6, %v3549_v2  ;;  %v3525_v40 = vmul.f32 %v15412_v37, %v3400_v51 }
 0x41a   :  { %20273 = vst [vmem:[#allocation159_spill] sm:$0xff] %v15510_v34  ;;  %v4152_v35 = vrot.slane %v4001_v4, 1  ;;  %v4150_v53 = vrot.slane %v15510_v34, 1  ;;  %v4363_v20 = vrot.slane %v4013_v13, 2  ;;  %v4308_v50 = vrot.slane %v4001_v4, 2 }
 0x41b   :  { %v3593_v52 = vadd.f32 %v15419_v6, %v3525_v40  ;;  %v3681_v36 = vmax.f32 %v3617_v15, 0.0  ;;  %v4306_v30 = vrot.slane %v15510_v34, 2  ;;  %v4206_v4 = vsel %vm4083_vm11, %v4204_v54, %v4205_v33 }
 0x41c   :  { %v4151_v2 = vsel %vm4083_vm11, %v4149_v3, %v4150_v53  ;;  %v4153_v51 = vsel %vm4083_vm11, %v4150_v53, %v4152_v35  ;;  %v4208_v15 = vsel %vm4083_vm11, %v4205_v33, %v4207_v44  ;;  %v4364_v54 = vsel %vm4239_vm12, %v4361_v1, %v4363_v20 }
 0x41d   :  { %v3657_v43 = vmax.f32 %v3593_v52, 0.0  ;;  %v15525_v40 = vpack.i.bf16 %v4153_v51, %v4151_v2  ;;  %v3838_v52 = vrot.slane %v3681_v36, 7  ;;  %v4307_v35 = vsel %vm4239_vm12, %v4305_v47, %v4306_v30 }
 0x41e   :  { %v3462_v63 = vpop.f32.mrf.mxu2  ;;  %v4309_v53 = vsel %vm4239_vm12, %v4306_v30, %v4308_v50  ;;  %v15540_v33 = vpack.i.bf16 %v4208_v15, %v4206_v4 }
 0x41f   :  { %20274 = vst [vmem:[#allocation13_spill] sm:$0xff] %v15525_v40  ;;  %v3550_v13 = vmul.f32 %v15412_v37, %v3462_v63  ;;  %v3802_v34 = vrot.slane %v3657_v43, 7  ;;  %8914 = vrot.lane.b32.xlu2 %v15525_v40, %s10233_s13  ;;  %v4362_v63 = vsel %vm4239_vm12, %v4360_v18, %v4361_v1  ;;  %v15542_v36 = vpack.i.bf16 %v4309_v53, %v4307_v35 }
 0x420   :  { %v3402_v3 = vpop.f32.mrf.mxu0  ;;  %20275 = vst [vmem:[#allocation127_spill] sm:$0xff] %v15540_v33  ;;  %v15544_v43 = vpack.i.bf16 %v4364_v54, %v4362_v63  ;;  %v15547_v47 = vsel %vm3760_vm10, 0.0, %v3838_v52 }
 0x421   :  { %v3618_v2 = vadd.f32 %v15419_v6, %v3550_v13  ;;  %v3526_v51 = vmul.f32 %v15412_v37, %v3402_v3  ;;  %20276 = vst [vmem:[#allocation37_spill] sm:$0xff] %v15542_v36  ;;  %v15550_v50 = vsel %vm3760_vm10, 0.0, %v3802_v34  ;;  %v4209_v3 = vrot.slane %v15547_v47, 1 }
 0x422   :  { %20277 = vst [vmem:[#allocation5_spill] sm:$0xff] %v15544_v43  ;;  %v4154_v35 = vrot.slane %v15550_v50, 1  ;;  %v4365_v17 = vrot.slane %v15547_v47, 2 }
 0x423   :  { %v3682_v49 = vmax.f32 %v3618_v2, 0.0  ;;  %v3594_v44 = vadd.f32 %v15419_v6, %v3526_v51  ;;  %20278 = vst [vmem:[#allocation140_spill] sm:$0xff] %v15547_v47 }
 0x424   :  { %20279 = vst [vmem:[#allocation20_spill] sm:$0xff] %v15550_v50 }
 0x425   :  { %v3839_v30 = vrot.slane %v3682_v49, 7  ;;  %v3658_v13 = vmax.f32 %v3594_v44, 0.0 }
 0x426   :  { %v3465_v18 = vpop.f32.mrf.mxu2 }
 0x427   :  { %v15553_v1 = vsel %vm3760_vm10, %v3838_v52, %v3839_v30  ;;  %v4014_v20 = vsel %vm3760_vm10, %v3839_v30, 0.0  ;;  %v3803_v4 = vrot.slane %v3658_v13, 7  ;;  %v3551_v15 = vmul.f32 %v15412_v37, %v3465_v18  ;;  %8929 = vrot.lane.b32.xlu2 %v15113_v16, %s10233_s13 }
 0x428   :  { %20280 = vst [vmem:[#allocation43_spill] sm:$0xff] %v15553_v1  ;;  %v4212_v53 = vrot.slane %v4014_v20, 1  ;;  %v3405_v2 = vpop.f32.mrf.mxu0  ;;  %v4210_v63 = vrot.slane %v15553_v1, 1  ;;  %v4366_v13 = vrot.slane %v15553_v1, 2  ;;  %v4368_v18 = vrot.slane %v4014_v20, 2 }
 0x429   :  { %v15562_v49 = vsel %vm3760_vm10, %v3802_v34, %v3803_v4  ;;  %v4002_v52 = vsel %vm3760_vm10, %v3803_v4, 0.0  ;;  %v3527_v51 = vmul.f32 %v15412_v37, %v3405_v2  ;;  %v3619_v44 = vadd.f32 %v15419_v6, %v3551_v15 }
 0x42a   :  { %20281 = vst [vmem:[#allocation54_spill] sm:$0xff] %v15562_v49  ;;  %v4157_v54 = vrot.slane %v4002_v52, 1  ;;  %v4155_v30 = vrot.slane %v15562_v49, 1  ;;  %v4313_v40 = vrot.slane %v4002_v52, 2  ;;  %v4311_v34 = vrot.slane %v15562_v49, 2 }
 0x42b   :  { %v3595_v16 = vadd.f32 %v15419_v6, %v3527_v51  ;;  %v4310_v4 = vrot.slane %v15550_v50, 2  ;;  %v4211_v31 = vsel %vm4083_vm11, %v4209_v3, %v4210_v63  ;;  %v3683_v1 = vmax.f32 %v3619_v44, 0.0 }
 0x42c   :  { %v4156_v2 = vsel %vm4083_vm11, %v4154_v35, %v4155_v30  ;;  %v4158_v48 = vsel %vm4083_vm11, %v4155_v30, %v4157_v54  ;;  %v4213_v52 = vsel %vm4083_vm11, %v4210_v63, %v4212_v53  ;;  %v4367_v49 = vsel %vm4239_vm12, %v4365_v17, %v4366_v13 }
 0x42d   :  { %v3659_v56 = vmax.f32 %v3595_v16, 0.0  ;;  %v15576_v15 = vpack.i.bf16 %v4158_v48, %v4156_v2  ;;  %v4312_v51 = vsel %vm4239_vm12, %v4310_v4, %v4311_v34  ;;  %v4314_v16 = vsel %vm4239_vm12, %v4311_v34, %v4313_v40 }
 0x42e   :  { %v3467_v20 = vpop.f32.mrf.mxu2  ;;  %v4369_v48 = vsel %vm4239_vm12, %v4366_v13, %v4368_v18  ;;  %v15591_v63 = vpack.i.bf16 %v4213_v52, %v4211_v31  ;;  %v3841_v54 = vrot.slane %v3683_v1, 7 }
 0x42f   :  { %20282 = vst [vmem:[#allocation138_spill] sm:$0xff] %v15576_v15  ;;  %v3805_v47 = vrot.slane %v3659_v56, 7  ;;  %v3552_v50 = vmul.f32 %v15412_v37, %v3467_v20  ;;  %8919 = vrot.lane.b32.xlu0 %v15576_v15, %s10233_s13  ;;  %8944 = vrot.lane.b32.xlu2 %v15277_v45, %s10233_s13  ;;  %v15593_v56 = vpack.i.bf16 %v4314_v16, %v4312_v51 }
 0x430   :  { %v3407_v3 = vpop.f32.mrf.mxu0  ;;  %20283 = vst [vmem:[#allocation117_spill] sm:$0xff] %v15591_v63  ;;  %v15595_v17 = vpack.i.bf16 %v4369_v48, %v4367_v49  ;;  %v15609_v1 = vsel %vm3760_vm10, 0.0, %v3841_v54 }
 0x431   :  { %v3620_v35 = vadd.f32 %v15419_v6, %v3552_v50  ;;  %v3528_v53 = vmul.f32 %v15412_v37, %v3407_v3  ;;  %20284 = vst [vmem:[#allocation11_spill] sm:$0xff] %v15593_v56  ;;  %v15598_v44 = vsel %vm3760_vm10, 0.0, %v3805_v47 }
 0x432   :  { %20285 = vst [vmem:[#allocation65_spill] sm:$0xff] %v15595_v17  ;;  %v4159_v49 = vrot.slane %v15598_v44, 1 }
 0x433   :  { %20286 = vst [vmem:[#allocation66_spill] sm:$0xff] %v15598_v44  ;;  %v3684_v40 = vmax.f32 %v3620_v35, 0.0  ;;  %v3596_v30 = vadd.f32 %v15419_v6, %v3528_v53 }
 0x434   :  { %20288 = vst [vmem:[#allocation51_spill] sm:$0xff] %v15609_v1 }
 0x435   :  { %v3842_v13 = vrot.slane %v3684_v40, 7  ;;  %v3660_v18 = vmax.f32 %v3596_v30, 0.0  ;;  %v4214_v40 = vrot.slane %v15609_v1, 1 }
 0x436   :  { %v3470_v34 = vpop.f32.mrf.mxu2 }
 0x437   :  { %v15602_v50 = vsel %vm3760_vm10, %v3841_v54, %v3842_v13  ;;  %v4015_v31 = vsel %vm3760_vm10, %v3842_v13, 0.0  ;;  %v3806_v4 = vrot.slane %v3660_v18, 7  ;;  %v3553_v2 = vmul.f32 %v15412_v37, %v3470_v34  ;;  %8934 = vrot.lane.b32.xlu0 %v15174_v61, %s10233_s13  ;;  %8959 = vrot.lane.b32.xlu2 %v15443_v62, %s10233_s13 }
 0x438   :  { %20287 = vst [vmem:[#allocation146_spill] sm:$0xff] %v15602_v50  ;;  %v4217_v52 = vrot.slane %v4015_v31, 1  ;;  %v4215_v54 = vrot.slane %v15602_v50, 1  ;;  %v4315_v34 = vrot.slane %v15598_v44, 2 }
 0x439   :  { %v3410_v20 = vpop.f32.mrf.mxu0  ;;  %v15615_v51 = vsel %vm3760_vm10, %v3805_v47, %v3806_v4  ;;  %v4003_v16 = vsel %vm3760_vm10, %v3806_v4, 0.0  ;;  %v3621_v35 = vadd.f32 %v15419_v6, %v3553_v2  ;;  %v4373_v4 = vrot.slane %v4015_v31, 2 }
 0x43a   :  { %20289 = vst [vmem:[#allocation62_spill] sm:$0xff] %v15615_v51  ;;  %v3529_v48 = vmul.f32 %v15412_v37, %v3410_v20  ;;  %v4162_v3 = vrot.slane %v4003_v16, 1  ;;  %v4160_v53 = vrot.slane %v15615_v51, 1  ;;  %v4316_v18 = vrot.slane %v15615_v51, 2 }
 0x43b   :  { %v4318_v20 = vrot.slane %v4003_v16, 2  ;;  %v3685_v2 = vmax.f32 %v3621_v35, 0.0  ;;  %v4216_v45 = vsel %vm4083_vm11, %v4214_v40, %v4215_v54  ;;  %v4218_v15 = vsel %vm4083_vm11, %v4215_v54, %v4217_v52 }
 0x43c   :  { %v3597_v30 = vadd.f32 %v15419_v6, %v3529_v48  ;;  %v4161_v13 = vsel %vm4083_vm11, %v4159_v49, %v4160_v53  ;;  %v4163_v47 = vsel %vm4083_vm11, %v4160_v53, %v4162_v3  ;;  %v4371_v48 = vrot.slane %v15602_v50, 2 }
 0x43d   :  { %v15628_v61 = vpack.i.bf16 %v4163_v47, %v4161_v13  ;;  %v4370_v31 = vrot.slane %v15609_v1, 2  ;;  %v4317_v35 = vsel %vm4239_vm12, %v4315_v34, %v4316_v18  ;;  %v15645_v54 = vpack.i.bf16 %v4218_v15, %v4216_v45 }
 0x43e   :  { %v3472_v62 = vpop.f32.mrf.mxu2  ;;  %v3661_v16 = vmax.f32 %v3597_v30, 0.0  ;;  %v3844_v40 = vrot.slane %v3685_v2, 7  ;;  %v4374_v47 = vsel %vm4239_vm12, %v4371_v48, %v4373_v4 }
 0x43f   :  { %20290 = vst [vmem:[#allocation21_spill] sm:$0xff] %v15628_v61  ;;  %v3554_v49 = vmul.f32 %v15412_v37, %v3472_v62  ;;  %8949 = vrot.lane.b32.xlu0 %v15329_v23, %s10233_s13  ;;  %8924 = vrot.lane.b32.xlu1 %v15628_v61, %s10233_s13  ;;  %v4319_v62 = vsel %vm4239_vm12, %v4316_v18, %v4318_v20 }
 0x440   :  { %8974 = vrot.lane.b32.xlu2 %v15591_v63, %s10233_s13  ;;  %20291 = vst [vmem:[#allocation67_spill] sm:$0xff] %v15645_v54  ;;  %v4372_v13 = vsel %vm4239_vm12, %v4370_v31, %v4371_v48  ;;  %v3808_v63 = vrot.slane %v3661_v16, 7  ;;  %v15650_v61 = vpack.i.bf16 %v4319_v62, %v4317_v35 }
 0x441   :  { %v3412_v3 = vpop.f32.mrf.mxu0  ;;  %v3622_v52 = vadd.f32 %v15419_v6, %v3554_v49  ;;  %v15652_v49 = vpack.i.bf16 %v4374_v47, %v4372_v13 }
 0x442   :  { %v3530_v53 = vmul.f32 %v15412_v37, %v3412_v3  ;;  %20292 = vst [vmem:[#allocation16_spill] sm:$0xff] %v15650_v61  ;;  %v15655_v3 = vsel %vm3760_vm10, 0.0, %v3844_v40 }
 0x443   :  { %v3686_v30 = vmax.f32 %v3622_v52, 0.0  ;;  %20293 = vst [vmem:[#allocation151_spill] sm:$0xff] %v15652_v49  ;;  %v4219_v31 = vrot.slane %v15655_v3, 1  ;;  %v4375_v13 = vrot.slane %v15655_v3, 2 }
 0x444   :  { %v3598_v23 = vadd.f32 %v15419_v6, %v3530_v53  ;;  %20294 = vst [vmem:[#allocation128_spill] sm:$0xff] %v15655_v3 }
 0x445   :  { %v3845_v34 = vrot.slane %v3686_v30, 7 }
 0x446   :  { %v3662_v50 = vmax.f32 %v3598_v23, 0.0  ;;  %v3475_v45 = vpop.f32.mrf.mxu2  ;;  %v3971_v23 = vsel %vm3760_vm10, 0.0, %v3808_v63 }
 0x447   :  { %v15658_v15 = vsel %vm3760_vm10, %v3844_v40, %v3845_v34  ;;  %v4016_v18 = vsel %vm3760_vm10, %v3845_v34, 0.0  ;;  %v3555_v20 = vmul.f32 %v15412_v37, %v3475_v45  ;;  %8964 = vrot.lane.b32.xlu0 %v15491_v9, %s10233_s13  ;;  %8939 = vrot.lane.b32.xlu1 %v15225_v7, %s10233_s13  ;;  %v4399_v47 = vrot.slane %v3971_v23, 1 }
 0x448   :  { %20295 = vst [vmem:[#allocation130_spill] sm:$0xff] %v15658_v15  ;;  %v3809_v4 = vrot.slane %v3662_v50, 7  ;;  %v4222_v2 = vrot.slane %v4016_v18, 1  ;;  %v4220_v48 = vrot.slane %v15658_v15, 1  ;;  %v4378_v52 = vrot.slane %v4016_v18, 2 }
 0x449   :  { %v3623_v50 = vadd.f32 %v15419_v6, %v3555_v20  ;;  %v4376_v40 = vrot.slane %v15658_v15, 2 }
 0x44a   :  { %v3810_v16 = vsel %vm3760_vm10, %v3808_v63, %v3809_v4  ;;  %v4004_v35 = vsel %vm3760_vm10, %v3809_v4, 0.0  ;;  %v4221_v9 = vsel %vm4083_vm11, %v4219_v31, %v4220_v48  ;;  %v4223_v7 = vsel %vm4083_vm11, %v4220_v48, %v4222_v2 }
 0x44b   :  { %v4400_v53 = vrot.slane %v3810_v16, 1  ;;  %v4402_v62 = vrot.slane %v4004_v35, 1  ;;  %v3687_v30 = vmax.f32 %v3623_v50, 0.0  ;;  %v4410_v34 = vrot.slane %v3810_v16, 2 }
 0x44c   :  { %v4412_v45 = vrot.slane %v4004_v35, 2  ;;  %v4409_v63 = vrot.slane %v3971_v23, 2  ;;  %v4377_v4 = vsel %vm4239_vm12, %v4375_v13, %v4376_v40  ;;  %v4379_v18 = vsel %vm4239_vm12, %v4376_v40, %v4378_v52 }
 0x44d   :  { %v4401_v20 = vsel %vm4083_vm11, %v4399_v47, %v4400_v53  ;;  %v4403_v15 = vsel %vm4083_vm11, %v4400_v53, %v4402_v62  ;;  %v3847_v51 = vrot.slane %v3687_v30, 7  ;;  %v15687_v48 = vpack.i.bf16 %v4223_v7, %v4221_v9 }
 0x44e   :  { %v3477_v1 = vpop.f32.mrf.mxu2  ;;  %v15685_v2 = vpack.i.bf16 %v4403_v15, %v4401_v20  ;;  %v4411_v31 = vsel %vm4239_vm12, %v4409_v63, %v4410_v34  ;;  %v4413_v35 = vsel %vm4239_vm12, %v4410_v34, %v4412_v45  ;;  %v15694_v53 = vpack.i.bf16 %v4379_v18, %v4377_v4 }
 0x44f   :  { %v3556_v3 = vmul.f32 %v15412_v37, %v3477_v1  ;;  %8979 = vrot.lane.b32.xlu0 %v15645_v54, %s10233_s13  ;;  %8954 = vrot.lane.b32.xlu1 %v15392_v11, %s10233_s13  ;;  %20297 = vst [vmem:[#allocation70_spill] sm:$0xff] %v15687_v48  ;;  %v15692_v52 = vpack.i.bf16 %v4413_v35, %v4411_v31  ;;  %v15699_v62 = vsel %vm3760_vm10, 0.0, %v3847_v51  ;;  %v4240_v4 = vrot.slane %v14934_v19, 2 }
 0x450   :  { %20296 = vst [vmem:[#allocation116_spill] sm:$0xff] %v15685_v2  ;;  %v15696_v1 = vpack.i.bf16 %v3810_v16, %v3971_v23  ;;  %v4224_v7 = vrot.slane %v15699_v62, 1  ;;  %v4380_v13 = vrot.slane %v15699_v62, 2  ;;  %v4243_v18 = vrot.slane %v14938_v25, 2 }
 0x451   :  { %v3624_v50 = vadd.f32 %v15419_v6, %v3556_v3  ;;  %20298 = vst [vmem:[#allocation119_spill] sm:$0xff] %v15692_v52 }
 0x452   :  { %20299 = vst [vmem:[#allocation68_spill] sm:$0xff] %v15694_v53 }
 0x453   :  { %20300 = vst [vmem:[#allocation69_spill] sm:$0xff] %v15696_v1  ;;  %v3688_v40 = vmax.f32 %v3624_v50, 0.0 }
 0x455   :  { %v3848_v15 = vrot.slane %v3688_v40, 7 }
 0x456   :  { %v3480_v9 = vpop.f32.mrf.mxu2 }
 0x457   :  { %v15704_v47 = vsel %vm3760_vm10, %v3847_v51, %v3848_v15  ;;  %v4017_v3 = vsel %vm3760_vm10, %v3848_v15, 0.0  ;;  %v3557_v30 = vmul.f32 %v15412_v37, %v3480_v9  ;;  %8969 = vrot.lane.b32.xlu1 %v15540_v33, %s10233_s13  ;;  %v4241_v51 = vrot.slane %v14930_v8, 2 }
 0x458   :  { %v4227_v23 = vrot.slane %v4017_v3, 1  ;;  %v4383_v16 = vrot.slane %v4017_v3, 2  ;;  %v4225_v34 = vrot.slane %v15704_v47, 1  ;;  %v4381_v45 = vrot.slane %v15704_v47, 2 }
 0x459   :  { %v3625_v63 = vadd.f32 %v15419_v6, %v3557_v30  ;;  %v4242_v30 = vsel %vm4239_vm12, %v4240_v4, %v4241_v51  ;;  %v4244_v25 = vsel %vm4239_vm12, %v4241_v51, %v4243_v18  ;;  %v15740_v18 = vpop.permute.xlu2 %8854 }
 0x45a   :  { %v4226_v20 = vsel %vm4083_vm11, %v4224_v7, %v4225_v34  ;;  %v4228_v31 = vsel %vm4083_vm11, %v4225_v34, %v4227_v23  ;;  %v4382_v35 = vsel %vm4239_vm12, %v4380_v13, %v4381_v45  ;;  %v4384_v50 = vsel %vm4239_vm12, %v4381_v45, %v4383_v16  ;;  %20305 = vst [vmem:[#allocation17_spill] sm:$0xff] %v15740_v18 }
 0x45b   :  { %v3689_v40 = vmax.f32 %v3625_v63, 0.0  ;;  %v15720_v15 = vpack.i.bf16 %v4228_v31, %v4226_v20  ;;  %v15722_v9 = vpack.i.bf16 %v4384_v50, %v4382_v35  ;;  %v15732_v16 = vpack.i.bf16 %v4244_v25, %v4242_v30 }
 0x45d   :  { %20301 = vst [vmem:[#allocation139_spill] sm:$0xff] %v15720_v15  ;;  %8989 = vrot.lane.b32.xlu2 %v15720_v15, %s10233_s13  ;;  %v3850_v7 = vrot.slane %v3689_v40, 7 }
 0x45e   :  { %20302 = vst [vmem:[#allocation64_spill] sm:$0xff] %v15722_v9  ;;  %v3482_v3 = vpop.f32.mrf.mxu2 }
 0x45f   :  { %v3558_v23 = vmul.f32 %v15412_v37, %v3482_v3  ;;  %8984 = vrot.lane.b32.xlu1 %v15687_v48, %s10233_s13  ;;  %20303 = vst [vmem:[#allocation137_spill] sm:$0xff] %v15732_v16  ;;  %v15735_v34 = vsel %vm3760_vm10, 0.0, %v3850_v7 }
 0x460   :  { %20304 = vst [vmem:[#allocation126_spill] sm:$0xff] %v15735_v34  ;;  %v4229_v4 = vrot.slane %v15735_v34, 1  ;;  %v4385_v20 = vrot.slane %v15735_v34, 2 }
 0x461   :  { %v3626_v13 = vadd.f32 %v15419_v6, %v3558_v23 }
 0x463   :  { %v3690_v45 = vmax.f32 %v3626_v13, 0.0 }
 0x465   :  { %v3851_v63 = vrot.slane %v3690_v45, 7  ;;  %9004 = vrot.lane.b32.xlu2 %v15732_v16, %s10234_s24 }
 0x466   :  { %v3485_v51 = vpop.f32.mrf.mxu2 }
 0x467   :  { %v15744_v31 = vsel %vm3760_vm10, %v3850_v7, %v3851_v63  ;;  %v4018_v35 = vsel %vm3760_vm10, %v3851_v63, 0.0  ;;  %v3559_v50 = vmul.f32 %v15412_v37, %v3485_v51 }
 0x468   :  { %20306 = vst [vmem:[#allocation115_spill] sm:$0xff] %v15744_v31  ;;  %v4232_v40 = vrot.slane %v4018_v35, 1  ;;  %v4388_v3 = vrot.slane %v4018_v35, 2  ;;  %v4230_v30 = vrot.slane %v15744_v31, 1  ;;  %v4386_v25 = vrot.slane %v15744_v31, 2 }
 0x469   :  { %v3627_v23 = vadd.f32 %v15419_v6, %v3559_v50  ;;  %v15763_v50 = vpop.permute.xlu2 %8869 }
 0x46a   :  { %v4231_v13 = vsel %vm4083_vm11, %v4229_v4, %v4230_v30  ;;  %v4233_v45 = vsel %vm4083_vm11, %v4230_v30, %v4232_v40  ;;  %v4387_v16 = vsel %vm4239_vm12, %v4385_v20, %v4386_v25  ;;  %v4389_v7 = vsel %vm4239_vm12, %v4386_v25, %v4388_v3  ;;  %20309 = vst [vmem:[#allocation123_spill] sm:$0xff] %v15763_v50 }
 0x46b   :  { %v3691_v19 = vmax.f32 %v3627_v23, 0.0  ;;  %v15755_v63 = vpack.i.bf16 %v4233_v45, %v4231_v13  ;;  %v15757_v51 = vpack.i.bf16 %v4389_v7, %v4387_v16 }
 0x46d   :  { %20307 = vst [vmem:[#allocation56_spill] sm:$0xff] %v15755_v63  ;;  %9019 = vrot.lane.b32.xlu2 %v15021_v24, %s10234_s24  ;;  %8994 = vrot.lane.b32.xlu0 %v15755_v63, %s10233_s13  ;;  %v3853_v4 = vrot.slane %v3691_v19, 7 }
 0x46e   :  { %20308 = vst [vmem:[#allocation57_spill] sm:$0xff] %v15757_v51  ;;  %v3487_v35 = vpop.f32.mrf.mxu2 }
 0x46f   :  { %v3560_v40 = vmul.f32 %v15412_v37, %v3487_v35  ;;  %v15768_v3 = vsel %vm3760_vm10, 0.0, %v3853_v4 }
 0x470   :  { %v4234_v25 = vrot.slane %v15768_v3, 1  ;;  %v4390_v19 = vrot.slane %v15768_v3, 2 }
 0x471   :  { %v3628_v20 = vadd.f32 %v15419_v6, %v3560_v40  ;;  %v15775_v13 = vpop.permute.xlu2 %8884 }
 0x472   :  { %20310 = vst [vmem:[#allocation10_spill] sm:$0xff] %v15775_v13 }
 0x473   :  { %v3692_v30 = vmax.f32 %v3628_v20, 0.0 }
 0x475   :  { %v3854_v16 = vrot.slane %v3692_v30, 7  ;;  %9034 = vrot.lane.b32.xlu2 %v15179_v57, %s10234_s24  ;;  %9009 = vrot.lane.b32.xlu0 %v14926_v46, %s10234_s24 }
 0x476   :  { %v3490_v23 = vpop.f32.mrf.mxu2 }
 0x477   :  { %v15779_v45 = vsel %vm3760_vm10, %v3853_v4, %v3854_v16  ;;  %v4019_v7 = vsel %vm3760_vm10, %v3854_v16, 0.0  ;;  %v3561_v35 = vmul.f32 %v15412_v37, %v3490_v23 }
 0x478   :  { %v4237_v40 = vrot.slane %v4019_v7, 1  ;;  %v4393_v20 = vrot.slane %v4019_v7, 2  ;;  %v4235_v30 = vrot.slane %v15779_v45, 1  ;;  %v4391_v8 = vrot.slane %v15779_v45, 2 }
 0x479   :  { %v3629_v50 = vadd.f32 %v15419_v6, %v3561_v35  ;;  %v15800_v7 = vpop.permute.xlu2 %8899 }
 0x47a   :  { %v4236_v18 = vsel %vm4083_vm11, %v4234_v25, %v4235_v30  ;;  %v4238_v13 = vsel %vm4083_vm11, %v4235_v30, %v4237_v40  ;;  %v4392_v52 = vsel %vm4239_vm12, %v4390_v19, %v4391_v8  ;;  %v4394_v4 = vsel %vm4239_vm12, %v4391_v8, %v4393_v20  ;;  %20313 = vst [vmem:[#allocation50_spill] sm:$0xff] %v15800_v7 }
 0x47b   :  { %v15790_v46 = vpack.i.bf16 %v4238_v13, %v4236_v18  ;;  %v3693_v16 = vmax.f32 %v3629_v50, 0.0  ;;  %v15792_v23 = vpack.i.bf16 %v4394_v4, %v4392_v52 }
 0x47d   :  { %20311 = vst [vmem:[#allocation18_spill] sm:$0xff] %v15790_v46  ;;  %9049 = vrot.lane.b32.xlu2 %v15336_v26, %s10234_s24  ;;  %9024 = vrot.lane.b32.xlu0 %v15056_v21, %s10234_s24  ;;  %v3856_v8 = vrot.slane %v3693_v16, 7 }
 0x47e   :  { %20312 = vst [vmem:[#allocation122_spill] sm:$0xff] %v15792_v23  ;;  %8999 = vrot.lane.b32.xlu1 %v15790_v46, %s10233_s13  ;;  %v3492_v25 = vpop.f32.mrf.mxu2 }
 0x47f   :  { %v3562_v19 = vmul.f32 %v15412_v37, %v3492_v25  ;;  %v3987_v52 = vsel %vm3760_vm10, 0.0, %v3856_v8 }
 0x480   :  { %v4404_v35 = vrot.slane %v3987_v52, 1  ;;  %v4414_v40 = vrot.slane %v3987_v52, 2 }
 0x481   :  { %v3630_v18 = vadd.f32 %v15419_v6, %v3562_v19  ;;  %v15811_v20 = vpop.permute.xlu2 %8914 }
 0x482   :  { %20314 = vst [vmem:[#allocation52_spill] sm:$0xff] %v15811_v20 }
 0x483   :  { %v3694_v50 = vmax.f32 %v3630_v18, 0.0 }
 0x485   :  { %v3857_v13 = vrot.slane %v3694_v50, 7  ;;  %9064 = vrot.lane.b32.xlu2 %v15494_v41, %s10234_s24  ;;  %9039 = vrot.lane.b32.xlu0 %v15227_v14, %s10234_s24 }
 0x486   :  { %9014 = vrot.lane.b32.xlu1 %v14988_v0, %s10234_s24 }
 0x487   :  { %v3858_v37 = vsel %vm3760_vm10, %v3856_v8, %v3857_v13  ;;  %v4020_v6 = vsel %vm3760_vm10, %v3857_v13, 0.0  ;;  %v15831_v8 = vpop.permute.xlu0 %8859 }
 0x488   :  { %v4405_v30 = vrot.slane %v3858_v37, 1  ;;  %v4407_v4 = vrot.slane %v4020_v6, 1  ;;  %v4415_v16 = vrot.slane %v3858_v37, 2  ;;  %v4417_v25 = vrot.slane %v4020_v6, 2 }
 0x489   :  { %v15815_v19 = vpack.i.bf16 %v3858_v37, %v3987_v52  ;;  %v15833_v52 = vpop.permute.xlu2 %8929 }
 0x48a   :  { %v4406_v18 = vsel %vm4083_vm11, %v4404_v35, %v4405_v30  ;;  %v4408_v50 = vsel %vm4083_vm11, %v4405_v30, %v4407_v4  ;;  %v4416_v7 = vsel %vm4239_vm12, %v4414_v40, %v4415_v16  ;;  %v4418_v14 = vsel %vm4239_vm12, %v4415_v16, %v4417_v25  ;;  %20318 = vst [vmem:[#allocation31_spill] sm:$0xff] %v15833_v52 }
 0x48b   :  { %20315 = vst [vmem:[#allocation15_spill] sm:$0xff] %v15815_v19  ;;  %v15821_v41 = vpack.i.bf16 %v4408_v50, %v4406_v18  ;;  %v15823_v20 = vpack.i.bf16 %v4418_v14, %v4416_v7  ;;  %v15839_v14 = vpop.permute.xlu1 %8849 }
 0x48d   :  { %20316 = vst [vmem:[#allocation71_spill] sm:$0xff] %v15821_v41  ;;  %9054 = vrot.lane.b32.xlu0 %v15394_v38, %s10234_s24  ;;  %9079 = vrot.lane.b32.xlu2 %v15650_v61, %s10234_s24 }
 0x48e   :  { %20317 = vst [vmem:[#allocation72_spill] sm:$0xff] %v15823_v20  ;;  %9029 = vrot.lane.b32.xlu1 %v15115_v58, %s10234_s24 }
 0x48f   :  { %v15843_v7 = vpop.permute.xlu0 %8874 }
 0x491   :  { %v15845_v13 = vpop.permute.xlu2 %8944 }
 0x492   :  { %20319 = vst [vmem:[#allocation58_spill] sm:$0xff] %v15845_v13  ;;  %v20335_v13 = vld [vmem:[#allocation97_spill] sm:$0xff] }
 0x493   :  { %v15855_v40 = vpop.permute.xlu1 %8864 }
 0x495   :  { %9069 = vrot.lane.b32.xlu0 %v15542_v36, %s10234_s24  ;;  %9094 = vrot.lane.b32.xlu2 %v15229_v22, %s10234_s24 }
 0x496   :  { %9044 = vrot.lane.b32.xlu1 %v15284_v5, %s10234_s24 }
 0x497   :  { %v15853_v35 = vpop.permute.xlu0 %8889 }
 0x498   :  { %20320 = vst [vmem:[#allocation59_spill] sm:$0xff] %v15853_v35  ;;  %v20354_v35 = vld [vmem:[#allocation85_spill] sm:$0xff] }
 0x499   :  { %v15857_v37 = vpop.permute.xlu2 %8959 }
 0x49a   :  { %20321 = vst [vmem:[#allocation132_spill] sm:$0xff] %v15857_v37 }
 0x49b   :  { %v15867_v30 = vpop.permute.xlu1 %8879 }
 0x49d   :  { %9084 = vrot.lane.b32.xlu0 %v15117_v55, %s10234_s24  ;;  %9109 = vrot.lane.b32.xlu2 %v15396_v12, %s10234_s24  ;;  %v20350_v12 = vld [vmem:[#allocation3_spill] sm:$0xff] }
 0x49e   :  { %9059 = vrot.lane.b32.xlu1 %v15445_v59, %s10234_s24 }
 0x49f   :  { %v15865_v6 = vpop.permute.xlu0 %8904 }
 0x4a0   :  { %20322 = vst [vmem:[#allocation61_spill] sm:$0xff] %v15865_v6  ;;  %v20342_v6 = vld [vmem:[#allocation45_spill] sm:$0xff] }
 0x4a1   :  { %v15875_v4 = vpop.permute.xlu2 %8974 }
 0x4a2   :  { %20323 = vst [vmem:[#allocation73_spill] sm:$0xff] %v15875_v4 }
 0x4a3   :  { %v15879_v25 = vpop.permute.xlu1 %8894 }
 0x4a4   :  { %20325 = vst [vmem:[#allocation136_spill] sm:$0xff] %v15879_v25  ;;  %v20343_v25 = vld [vmem:[#allocation112_spill] sm:$0xff] }
 0x4a5   :  { %9099 = vrot.lane.b32.xlu0 %v15286_v39, %s10234_s24  ;;  %9124 = vrot.lane.b32.xlu2 %v15544_v43, %s10234_s24  ;;  %v20334_v43 = vld [vmem:[#allocation33_spill] sm:$0xff] }
 0x4a6   :  { %9074 = vrot.lane.b32.xlu1 %v15593_v56, %s10234_s24  ;;  %v15913_v52 = vpack.i.bf16 %v20335_v13, %v20334_v43  ;;  %v15930_v43 = vpack.i.bf16 %v20343_v25, %v20342_v6  ;;  %v20351_v6 = vld [vmem:[#allocation9_spill] sm:$0xff] }
 0x4a7   :  { %v15877_v16 = vpop.permute.xlu0 %8919  ;;  %v15948_v25 = vpack.i.bf16 %v20351_v6, %v20350_v12  ;;  %v20362_v12 = vld [vmem:[#allocation62_spill] sm:$0xff] }
 0x4a8   :  { %20324 = vst [vmem:[#allocation133_spill] sm:$0xff] %v15877_v16  ;;  %v15895_v16 = vpack.i.bf16 %v15004_v60, %v14999_v32  ;;  %v15972_v6 = vpack.i.bf16 %v20362_v12, %v15598_v44  ;;  %v20370_v44 = vld [vmem:[#allocation12_spill] sm:$0xff]  ;;  %v20371_v12 = vld [vmem:[#allocation159_spill] sm:$0xff] }
 0x4a9   :  { %20336 = vst [vmem:[#allocation7_spill] sm:$0xff] %v15913_v52 }
 0x4aa   :  { %20329 = vst [vmem:[#allocation29_spill] sm:$0xff] %v15895_v16 }
 0x4ab   :  { %v15889_v50 = vpop.permute.xlu1 %8909  ;;  %20344 = vst [vmem:[#allocation153_spill] sm:$0xff] %v15930_v43 }
 0x4ac   :  { %20327 = vst [vmem:[#allocation87_spill] sm:$0xff] %v15889_v50 }
 0x4ad   :  { %9114 = vrot.lane.b32.xlu0 %v15447_v27, %s10234_s24  ;;  %9139 = vrot.lane.b32.xlu2 %v15694_v53, %s10234_s24  ;;  %20352 = vst [vmem:[#allocation75_spill] sm:$0xff] %v15948_v25 }
 0x4ae   :  { %9089 = vrot.lane.b32.xlu1 %v15181_v42, %s10234_s24  ;;  %20363 = vst [vmem:[#allocation78_spill] sm:$0xff] %v15972_v6 }
 0x4af   :  { %v15891_v53 = vpop.permute.xlu0 %8934 }
 0x4b0   :  { %20328 = vst [vmem:[#allocation27_spill] sm:$0xff] %v15891_v53  ;;  %v20333_v53 = vld [vmem:[#allocation134_spill] sm:$0xff] }
 0x4b1   :  { %v9158_v37 = vpack.i.bf16 %v20333_v53, %v14906_v29 }
 0x4b5   :  { %9129 = vrot.lane.b32.xlu0 %v15595_v17, %s10234_s24  ;;  %9154 = vrot.lane.b32.xlu2 %v15792_v23, %s10234_s24 }
 0x4b6   :  { %9104 = vrot.lane.b32.xlu1 %v15338_v10, %s10234_s24 }
 0x4b7   :  { %v15887_v18 = vpop.permute.xlu2 %8989  ;;  %v15907_v4 = vpop.permute.xlu0 %8949 }
 0x4b8   :  { %20326 = vst [vmem:[#allocation152_spill] sm:$0xff] %v15887_v18  ;;  %v15905_v18 = vpop.permute.xlu1 %8924 }
 0x4b9   :  { %20331 = vst [vmem:[#allocation63_spill] sm:$0xff] %v15905_v18  ;;  %v20339_v18 = vld [vmem:[#allocation32_spill] sm:$0xff] }
 0x4ba   :  { %20332 = vst [vmem:[#allocation141_spill] sm:$0xff] %v15907_v4  ;;  %v20340_v4 = vld [vmem:[#allocation89_spill] sm:$0xff] }
 0x4bb   :  { %v15926_v50 = vpack.i.bf16 %v20340_v4, %v20339_v18 }
 0x4bd   :  { %9144 = vrot.lane.b32.xlu0 %v15722_v9, %s10234_s24  ;;  %9169 = vrot.lane.b32.xlu2 %v15895_v16, %s10235_s8  ;;  %20341 = vst [vmem:[#allocation28_spill] sm:$0xff] %v15926_v50 }
 0x4be   :  { %9119 = vrot.lane.b32.xlu1 %v15496_v28, %s10234_s24 }
 0x4bf   :  { %v15903_v23 = vpop.permute.xlu2 %9004  ;;  %v15932_v13 = vpop.permute.xlu0 %8964 }
 0x4c0   :  { %20330 = vst [vmem:[#allocation90_spill] sm:$0xff] %v15903_v23  ;;  %v15922_v23 = vpop.permute.xlu1 %8939 }
 0x4c1   :  { %20338 = vst [vmem:[#allocation144_spill] sm:$0xff] %v15922_v23 }
 0x4c2   :  { %20345 = vst [vmem:[#allocation157_spill] sm:$0xff] %v15932_v13 }
 0x4c5   :  { %9159 = vrot.lane.b32.xlu0 %v9158_v37, %s10235_s8  ;;  %9184 = vrot.lane.b32.xlu2 %v15913_v52, %s10235_s8  ;;  %v20347_v52 = vld [vmem:[#allocation102_spill] sm:$0xff] }
 0x4c6   :  { %9134 = vrot.lane.b32.xlu1 %v15652_v49, %s10234_s24 }
 0x4c7   :  { %v15920_v16 = vpop.permute.xlu2 %9019 }
 0x4c8   :  { %20337 = vst [vmem:[#allocation53_spill] sm:$0xff] %v15920_v16  ;;  %v20348_v16 = vld [vmem:[#allocation40_spill] sm:$0xff]  ;;  %v15950_v13 = vpop.permute.xlu1 %8954 }
 0x4c9   :  { %v15944_v23 = vpack.i.bf16 %v20348_v16, %v20347_v52  ;;  %20353 = vst [vmem:[#allocation129_spill] sm:$0xff] %v15950_v13  ;;  %v15962_v52 = vpop.permute.xlu0 %8979 }
 0x4ca   :  { %20357 = vst [vmem:[#allocation77_spill] sm:$0xff] %v15962_v52 }
 0x4cb   :  { %20349 = vst [vmem:[#allocation47_spill] sm:$0xff] %v15944_v23 }
 0x4cd   :  { %9174 = vrot.lane.b32.xlu0 %v15926_v50, %s10235_s8  ;;  %9199 = vrot.lane.b32.xlu2 %v15930_v43, %s10235_s8  ;;  %v20355_v50 = vld [vmem:[#allocation86_spill] sm:$0xff] }
 0x4ce   :  { %9149 = vrot.lane.b32.xlu1 %v15757_v51, %s10234_s24  ;;  %v15954_v20 = vpack.i.bf16 %v20355_v50, %v20354_v35  ;;  %v20359_v43 = vld [vmem:[#allocation14_spill] sm:$0xff]  ;;  %v20364_v51 = vld [vmem:[#allocation36_spill] sm:$0xff] }
 0x4cf   :  { %v15940_v37 = vpop.permute.xlu2 %9034 }
 0x4d0   :  { %20346 = vst [vmem:[#allocation19_spill] sm:$0xff] %v15940_v37  ;;  %v20360_v37 = vld [vmem:[#allocation118_spill] sm:$0xff] }
 0x4d1   :  { %20356 = vst [vmem:[#allocation74_spill] sm:$0xff] %v15954_v20  ;;  %v15968_v13 = vpack.i.bf16 %v20360_v37, %v20359_v43  ;;  %v20373_v43 = vld [vmem:[#allocation96_spill] sm:$0xff]  ;;  %v20374_v37 = vld [vmem:[#allocation34_spill] sm:$0xff] }
 0x4d3   :  { %20361 = vst [vmem:[#allocation79_spill] sm:$0xff] %v15968_v13 }
 0x4d5   :  { %9189 = vrot.lane.b32.xlu0 %v15944_v23, %s10235_s8  ;;  %9214 = vrot.lane.b32.xlu2 %v15948_v25, %s10235_s8  ;;  %v20365_v23 = vld [vmem:[#allocation92_spill] sm:$0xff]  ;;  %v15982_v25 = vpop.permute.xlu1 %8969 }
 0x4d6   :  { %9164 = vrot.lane.b32.xlu1 %v15954_v20, %s10235_s8  ;;  %v15976_v49 = vpack.i.bf16 %v20365_v23, %v20364_v51  ;;  %20367 = vst [vmem:[#allocation80_spill] sm:$0xff] %v15982_v25  ;;  %v15992_v20 = vpack.i.bf16 %v20371_v12, %v20370_v44  ;;  %v15996_v51 = vpack.i.bf16 %v20374_v37, %v20373_v43  ;;  %v20377_v23 = vld [vmem:[#allocation108_spill] sm:$0xff]  ;;  %v20382_v25 = vld [vmem:[#allocation110_spill] sm:$0xff]  ;;  %v20383_v43 = vld [vmem:[#allocation111_spill] sm:$0xff] }
 0x4d7   :  { %v15964_v16 = vpop.permute.xlu2 %9049  ;;  %v16016_v37 = vpack.i.bf16 %v20383_v43, %v20382_v25  ;;  %v20385_v44 = vld [vmem:[#allocation121_spill] sm:$0xff]  ;;  %v20386_v12 = vld [vmem:[#allocation6_spill] sm:$0xff]  ;;  %v20394_v25 = vld [vmem:[#allocation99_spill] sm:$0xff] }
 0x4d8   :  { %20358 = vst [vmem:[#allocation76_spill] sm:$0xff] %v15964_v16  ;;  %v20395_v43 = vld [vmem:[#allocation39_spill] sm:$0xff] }
 0x4d9   :  { %20366 = vst [vmem:[#allocation22_spill] sm:$0xff] %v15976_v49 }
 0x4da   :  { %20372 = vst [vmem:[#allocation89_spill] sm:$0xff] %v15992_v20 }
 0x4db   :  { %20375 = vst [vmem:[#allocation85_spill] sm:$0xff] %v15996_v51 }
 0x4dc   :  { %20384 = vst [vmem:[#allocation163_spill] sm:$0xff] %v16016_v37 }
 0x4dd   :  { %9204 = vrot.lane.b32.xlu0 %v15968_v13, %s10235_s8  ;;  %9229 = vrot.lane.b32.xlu2 %v15972_v6, %s10235_s8  ;;  %v20376_v13 = vld [vmem:[#allocation106_spill] sm:$0xff] }
 0x4de   :  { %9179 = vrot.lane.b32.xlu1 %v15976_v49, %s10235_s8  ;;  %v16000_v6 = vpack.i.bf16 %v20377_v23, %v20376_v13  ;;  %v16012_v49 = vpop.permute.xlu1 %8984  ;;  %v16020_v13 = vpack.i.bf16 %v20386_v12, %v20385_v44  ;;  %v16040_v44 = vpack.i.bf16 %v20395_v43, %v20394_v25  ;;  %v20398_v12 = vld [vmem:[#allocation54_spill] sm:$0xff] }
 0x4df   :  { %v15986_v16 = vpop.permute.xlu2 %9064  ;;  %v15988_v52 = vpop.permute.xlu0 %8994  ;;  %20381 = vst [vmem:[#allocation162_spill] sm:$0xff] %v16012_v49  ;;  %v20404_v25 = vld [vmem:[#allocation146_spill] sm:$0xff] }
 0x4e0   :  { %20368 = vst [vmem:[#allocation134_spill] sm:$0xff] %v15986_v16 }
 0x4e1   :  { %20369 = vst [vmem:[#allocation32_spill] sm:$0xff] %v15988_v52 }
 0x4e2   :  { %20378 = vst [vmem:[#allocation86_spill] sm:$0xff] %v16000_v6 }
 0x4e3   :  { %20387 = vst [vmem:[#allocation164_spill] sm:$0xff] %v16020_v13 }
 0x4e4   :  { %20396 = vst [vmem:[#allocation169_spill] sm:$0xff] %v16040_v44 }
 0x4e5   :  { %9219 = vrot.lane.b32.xlu0 %v15992_v20, %s10235_s8  ;;  %9244 = vrot.lane.b32.xlu2 %v15996_v51, %s10235_s8 }
 0x4e6   :  { %9194 = vrot.lane.b32.xlu1 %v16000_v6, %s10235_s8  ;;  %v20391_v6 = vld [vmem:[#allocation120_spill] sm:$0xff] }
 0x4e7   :  { %v16008_v52 = vpop.permute.xlu0 %9009  ;;  %v16010_v16 = vpop.permute.xlu2 %9079 }
 0x4e8   :  { %20379 = vst [vmem:[#allocation108_spill] sm:$0xff] %v16008_v52 }
 0x4e9   :  { %20380 = vst [vmem:[#allocation161_spill] sm:$0xff] %v16010_v16  ;;  %v20392_v16 = vld [vmem:[#allocation55_spill] sm:$0xff] }
 0x4ea   :  { %v16036_v49 = vpack.i.bf16 %v20392_v16, %v20391_v6  ;;  %v20406_v6 = vld [vmem:[#allocation160_spill] sm:$0xff]  ;;  %v20407_v16 = vld [vmem:[#allocation149_spill] sm:$0xff] }
 0x4ec   :  { %20393 = vst [vmem:[#allocation168_spill] sm:$0xff] %v16036_v49 }
 0x4ed   :  { %9259 = vrot.lane.b32.xlu2 %v16016_v37, %s10235_s8  ;;  %9234 = vrot.lane.b32.xlu0 %v15696_v1, %s10235_s8  ;;  %v20397_v37 = vld [vmem:[#allocation20_spill] sm:$0xff] }
 0x4ee   :  { %9209 = vrot.lane.b32.xlu1 %v16020_v13, %s10235_s8  ;;  %v16044_v1 = vpack.i.bf16 %v20398_v12, %v20397_v37  ;;  %v16064_v37 = vpack.i.bf16 %v20407_v16, %v20406_v6  ;;  %v20410_v12 = vld [vmem:[#allocation91_spill] sm:$0xff]  ;;  %v20415_v6 = vld [vmem:[#allocation125_spill] sm:$0xff] }
 0x4ef   :  { %v16028_v52 = vpop.permute.xlu0 %9024  ;;  %v16030_v51 = vpop.permute.xlu2 %9094  ;;  %v20416_v16 = vld [vmem:[#allocation145_spill] sm:$0xff] }
 0x4f0   :  { %20388 = vst [vmem:[#allocation165_spill] sm:$0xff] %v16028_v52  ;;  %v16032_v20 = vpop.permute.xlu1 %8999 }
 0x4f1   :  { %20389 = vst [vmem:[#allocation166_spill] sm:$0xff] %v16030_v51  ;;  %v20403_v51 = vld [vmem:[#allocation51_spill] sm:$0xff] }
 0x4f2   :  { %20390 = vst [vmem:[#allocation167_spill] sm:$0xff] %v16032_v20  ;;  %v16060_v43 = vpack.i.bf16 %v20404_v25, %v20403_v51  ;;  %v16085_v51 = vpack.i.bf16 %v20416_v16, %v20415_v6  ;;  %v20419_v25 = vld [vmem:[#allocation107_spill] sm:$0xff] }
 0x4f3   :  { %20399 = vst [vmem:[#allocation170_spill] sm:$0xff] %v16044_v1  ;;  %v20428_v6 = vld [vmem:[#allocation155_spill] sm:$0xff] }
 0x4f4   :  { %20405 = vst [vmem:[#allocation174_spill] sm:$0xff] %v16060_v43 }
 0x4f5   :  { %9274 = vrot.lane.b32.xlu2 %v16036_v49, %s10235_s8  ;;  %9249 = vrot.lane.b32.xlu0 %v16040_v44, %s10235_s8  ;;  %20408 = vst [vmem:[#allocation175_spill] sm:$0xff] %v16064_v37  ;;  %v20409_v49 = vld [vmem:[#allocation35_spill] sm:$0xff] }
 0x4f6   :  { %9224 = vrot.lane.b32.xlu1 %v16044_v1, %s10235_s8  ;;  %v9238_v44 = vpack.i.bf16 %v20410_v12, %v20409_v49  ;;  %20417 = vst [vmem:[#allocation179_spill] sm:$0xff] %v16085_v51 }
 0x4f7   :  { %v16052_v52 = vpop.permute.xlu0 %9039  ;;  %v16054_v13 = vpop.permute.xlu2 %9109 }
 0x4f8   :  { %20400 = vst [vmem:[#allocation171_spill] sm:$0xff] %v16052_v52  ;;  %v16056_v20 = vpop.permute.xlu1 %9014 }
 0x4f9   :  { %20401 = vst [vmem:[#allocation172_spill] sm:$0xff] %v16054_v13  ;;  %v16081_v13 = vpack.i.bf16 %v15744_v31, %v15735_v34 }
 0x4fa   :  { %20402 = vst [vmem:[#allocation173_spill] sm:$0xff] %v16056_v20 }
 0x4fb   :  { %20414 = vst [vmem:[#allocation178_spill] sm:$0xff] %v16081_v13 }
 0x4fd   :  { %9289 = vrot.lane.b32.xlu2 %v16060_v43, %s10235_s8  ;;  %9264 = vrot.lane.b32.xlu0 %v16064_v37, %s10235_s8  ;;  %v20418_v43 = vld [vmem:[#allocation42_spill] sm:$0xff]  ;;  %v20424_v37 = vld [vmem:[#allocation128_spill] sm:$0xff] }
 0x4fe   :  { %9239 = vrot.lane.b32.xlu1 %v9238_v44, %s10235_s8  ;;  %v16089_v49 = vpack.i.bf16 %v20419_v25, %v20418_v43 }
 0x4ff   :  { %v16073_v52 = vpop.permute.xlu0 %9054  ;;  %v16075_v1 = vpop.permute.xlu2 %9124 }
 0x500   :  { %20411 = vst [vmem:[#allocation91_spill] sm:$0xff] %v16073_v52  ;;  %v16077_v20 = vpop.permute.xlu1 %9029  ;;  %v20427_v52 = vld [vmem:[#allocation49_spill] sm:$0xff] }
 0x501   :  { %20412 = vst [vmem:[#allocation176_spill] sm:$0xff] %v16075_v1  ;;  %v16109_v16 = vpack.i.bf16 %v20428_v6, %v20427_v52 }
 0x502   :  { %20413 = vst [vmem:[#allocation177_spill] sm:$0xff] %v16077_v20  ;;  %v20425_v20 = vld [vmem:[#allocation130_spill] sm:$0xff] }
 0x503   :  { %20420 = vst [vmem:[#allocation42_spill] sm:$0xff] %v16089_v49  ;;  %v16105_v1 = vpack.i.bf16 %v20425_v20, %v20424_v37  ;;  %v20436_v37 = vld [vmem:[#allocation43_spill] sm:$0xff] }
 0x504   :  { %20429 = vst [vmem:[#allocation49_spill] sm:$0xff] %v16109_v16 }
 0x505   :  { %9304 = vrot.lane.b32.xlu2 %v16081_v13, %s10235_s8  ;;  %9279 = vrot.lane.b32.xlu0 %v16085_v51, %s10235_s8  ;;  %20426 = vst [vmem:[#allocation182_spill] sm:$0xff] %v16105_v1  ;;  %v20430_v13 = vld [vmem:[#allocation30_spill] sm:$0xff] }
 0x506   :  { %9254 = vrot.lane.b32.xlu1 %v16089_v49, %s10235_s8 }
 0x507   :  { %v16097_v44 = vpop.permute.xlu0 %9069  ;;  %v16099_v34 = vpop.permute.xlu2 %9139 }
 0x508   :  { %20421 = vst [vmem:[#allocation107_spill] sm:$0xff] %v16097_v44  ;;  %v16101_v31 = vpop.permute.xlu1 %9044  ;;  %v20435_v44 = vld [vmem:[#allocation140_spill] sm:$0xff] }
 0x509   :  { %20422 = vst [vmem:[#allocation180_spill] sm:$0xff] %v16099_v34  ;;  %v16125_v34 = vpack.i.bf16 %v15779_v45, %v15768_v3  ;;  %v16129_v20 = vpack.i.bf16 %v20436_v37, %v20435_v44 }
 0x50a   :  { %20423 = vst [vmem:[#allocation181_spill] sm:$0xff] %v16101_v31 }
 0x50b   :  { %20434 = vst [vmem:[#allocation184_spill] sm:$0xff] %v16125_v34 }
 0x50c   :  { %20437 = vst [vmem:[#allocation140_spill] sm:$0xff] %v16129_v20 }
 0x50d   :  { %9319 = vrot.lane.b32.xlu2 %v20430_v13, %s10236_s22  ;;  %9294 = vrot.lane.b32.xlu0 %v16105_v1, %s10235_s8  ;;  %v20438_v13 = vld [vmem:[#allocation25_spill] sm:$0xff] }
 0x50e   :  { %9269 = vrot.lane.b32.xlu1 %v16109_v16, %s10235_s8 }
 0x50f   :  { %v16117_v51 = vpop.permute.xlu0 %9084  ;;  %v16119_v49 = vpop.permute.xlu2 %9154 }
 0x510   :  { %20431 = vst [vmem:[#allocation155_spill] sm:$0xff] %v16117_v51  ;;  %v16121_v31 = vpop.permute.xlu1 %9059  ;;  %v20443_v51 = vld [vmem:[#allocation103_spill] sm:$0xff] }
 0x511   :  { %20432 = vst [vmem:[#allocation30_spill] sm:$0xff] %v16119_v49  ;;  %v16145_v49 = vpack.i.bf16 %v15704_v47, %v15699_v62 }
 0x512   :  { %20433 = vst [vmem:[#allocation183_spill] sm:$0xff] %v16121_v31 }
 0x513   :  { %20442 = vst [vmem:[#allocation187_spill] sm:$0xff] %v16145_v49 }
 0x515   :  { %9334 = vrot.lane.b32.xlu2 %v20438_v13, %s10236_s22  ;;  %9309 = vrot.lane.b32.xlu0 %v16125_v34, %s10235_s8  ;;  %v20444_v13 = vld [vmem:[#allocation88_spill] sm:$0xff] }
 0x516   :  { %9284 = vrot.lane.b32.xlu1 %v16129_v20, %s10235_s8 }
 0x517   :  { %v16137_v1 = vpop.permute.xlu0 %9099  ;;  %v16139_v16 = vpop.permute.xlu2 %9169 }
 0x518   :  { %20439 = vst [vmem:[#allocation43_spill] sm:$0xff] %v16137_v1  ;;  %v16141_v31 = vpop.permute.xlu1 %9074  ;;  %v20449_v1 = vld [vmem:[#allocation93_spill] sm:$0xff] }
 0x519   :  { %20440 = vst [vmem:[#allocation185_spill] sm:$0xff] %v16139_v16 }
 0x51a   :  { %20441 = vst [vmem:[#allocation186_spill] sm:$0xff] %v16141_v31  ;;  %v20448_v31 = vld [vmem:[#allocation48_spill] sm:$0xff] }
 0x51d   :  { %9349 = vrot.lane.b32.xlu2 %v20443_v51, %s10236_s22  ;;  %9324 = vrot.lane.b32.xlu0 %v20444_v13, %s10236_s22 }
 0x51e   :  { %9299 = vrot.lane.b32.xlu1 %v16145_v49, %s10235_s8 }
 0x51f   :  { %v16153_v34 = vpop.permute.xlu0 %9114  ;;  %v16155_v20 = vpop.permute.xlu2 %9184 }
 0x520   :  { %20445 = vst [vmem:[#allocation188_spill] sm:$0xff] %v16153_v34  ;;  %v16157_v16 = vpop.permute.xlu1 %9089  ;;  %v20453_v34 = vld [vmem:[#allocation13_spill] sm:$0xff] }
 0x521   :  { %20446 = vst [vmem:[#allocation189_spill] sm:$0xff] %v16155_v20 }
 0x522   :  { %20447 = vst [vmem:[#allocation190_spill] sm:$0xff] %v16157_v16  ;;  %v20454_v16 = vld [vmem:[#allocation109_spill] sm:$0xff] }
 0x525   :  { %9364 = vrot.lane.b32.xlu2 %v20448_v31, %s10236_s22  ;;  %9339 = vrot.lane.b32.xlu0 %v20449_v1, %s10236_s22  ;;  %v20455_v31 = vld [vmem:[#allocation24_spill] sm:$0xff] }
 0x526   :  { %9314 = vrot.lane.b32.xlu1 %v15815_v19, %s10235_s8 }
 0x527   :  { %v16165_v51 = vpop.permute.xlu0 %9129  ;;  %v16167_v13 = vpop.permute.xlu2 %9199 }
 0x528   :  { %20450 = vst [vmem:[#allocation191_spill] sm:$0xff] %v16165_v51  ;;  %v16169_v49 = vpop.permute.xlu1 %9104  ;;  %v20459_v51 = vld [vmem:[#allocation150_spill] sm:$0xff] }
 0x529   :  { %20451 = vst [vmem:[#allocation192_spill] sm:$0xff] %v16167_v13  ;;  %v20619_v13 = vld [vmem:[#allocation122_spill] sm:$0xff] }
 0x52a   :  { %20452 = vst [vmem:[#allocation193_spill] sm:$0xff] %v16169_v49 }
 0x52d   :  { %9379 = vrot.lane.b32.xlu2 %v20453_v34, %s10236_s22  ;;  %9354 = vrot.lane.b32.xlu0 %v20454_v16, %s10236_s22  ;;  %v20460_v34 = vld [vmem:[#allocation38_spill] sm:$0xff] }
 0x52e   :  { %9329 = vrot.lane.b32.xlu1 %v20455_v31, %s10236_s22 }
 0x52f   :  { %v16177_v20 = vpop.permute.xlu0 %9144  ;;  %v16179_v1 = vpop.permute.xlu2 %9214 }
 0x530   :  { %20456 = vst [vmem:[#allocation194_spill] sm:$0xff] %v16177_v20  ;;  %v16181_v19 = vpop.permute.xlu1 %9119  ;;  %v20464_v20 = vld [vmem:[#allocation138_spill] sm:$0xff] }
 0x531   :  { %20457 = vst [vmem:[#allocation195_spill] sm:$0xff] %v16179_v1 }
 0x532   :  { %20458 = vst [vmem:[#allocation196_spill] sm:$0xff] %v16181_v19  ;;  %v20465_v19 = vld [vmem:[#allocation104_spill] sm:$0xff] }
 0x535   :  { %9369 = vrot.lane.b32.xlu0 %v20459_v51, %s10236_s22  ;;  %9394 = vrot.lane.b32.xlu2 %v15685_v2, %s10236_s22  ;;  %v20466_v51 = vld [vmem:[#allocation113_spill] sm:$0xff] }
 0x536   :  { %9344 = vrot.lane.b32.xlu1 %v20460_v34, %s10236_s22 }
 0x537   :  { %v16189_v49 = vpop.permute.xlu0 %9159  ;;  %v16191_v16 = vpop.permute.xlu2 %9229 }
 0x538   :  { %20461 = vst [vmem:[#allocation197_spill] sm:$0xff] %v16189_v49  ;;  %v16193_v31 = vpop.permute.xlu1 %9134  ;;  %v20470_v49 = vld [vmem:[#allocation94_spill] sm:$0xff] }
 0x539   :  { %20462 = vst [vmem:[#allocation198_spill] sm:$0xff] %v16191_v16  ;;  %v20575_v16 = vld [vmem:[#allocation157_spill] sm:$0xff] }
 0x53a   :  { %20463 = vst [vmem:[#allocation199_spill] sm:$0xff] %v16193_v31 }
 0x53d   :  { %9384 = vrot.lane.b32.xlu0 %v20464_v20, %s10236_s22  ;;  %9409 = vrot.lane.b32.xlu2 %v20465_v19, %s10236_s22  ;;  %v20471_v20 = vld [vmem:[#allocation124_spill] sm:$0xff] }
 0x53e   :  { %9359 = vrot.lane.b32.xlu1 %v20466_v51, %s10236_s22 }
 0x53f   :  { %v16201_v1 = vpop.permute.xlu0 %9174  ;;  %v16203_v2 = vpop.permute.xlu2 %9244 }
 0x540   :  { %20467 = vst [vmem:[#allocation200_spill] sm:$0xff] %v16201_v1  ;;  %v16205_v34 = vpop.permute.xlu1 %9149  ;;  %v20475_v1 = vld [vmem:[#allocation143_spill] sm:$0xff] }
 0x541   :  { %20468 = vst [vmem:[#allocation201_spill] sm:$0xff] %v16203_v2  ;;  %v20565_v2 = vld [vmem:[#allocation35_spill] sm:$0xff] }
 0x542   :  { %20469 = vst [vmem:[#allocation202_spill] sm:$0xff] %v16205_v34 }
 0x545   :  { %9399 = vrot.lane.b32.xlu0 %v20470_v49, %s10236_s22  ;;  %9424 = vrot.lane.b32.xlu2 %v15392_v11, %s10236_s22  ;;  %v20476_v49 = vld [vmem:[#allocation21_spill] sm:$0xff] }
 0x546   :  { %9374 = vrot.lane.b32.xlu1 %v20471_v20, %s10236_s22 }
 0x547   :  { %v16213_v31 = vpop.permute.xlu0 %9189  ;;  %v16215_v19 = vpop.permute.xlu2 %9259 }
 0x548   :  { %20472 = vst [vmem:[#allocation94_spill] sm:$0xff] %v16213_v31  ;;  %v16217_v51 = vpop.permute.xlu1 %9164  ;;  %v20480_v31 = vld [vmem:[#allocation154_spill] sm:$0xff] }
 0x549   :  { %20473 = vst [vmem:[#allocation203_spill] sm:$0xff] %v16215_v19  ;;  %v20557_v19 = vld [vmem:[#allocation159_spill] sm:$0xff] }
 0x54a   :  { %20474 = vst [vmem:[#allocation204_spill] sm:$0xff] %v16217_v51  ;;  %v20481_v51 = vld [vmem:[#allocation98_spill] sm:$0xff] }
 0x54d   :  { %9414 = vrot.lane.b32.xlu0 %v20475_v1, %s10236_s22  ;;  %9439 = vrot.lane.b32.xlu2 %v15540_v33, %s10236_s22 }
 0x54e   :  { %9389 = vrot.lane.b32.xlu1 %v20476_v49, %s10236_s22 }
 0x54f   :  { %v16225_v34 = vpop.permute.xlu0 %9204  ;;  %v16227_v11 = vpop.permute.xlu2 %9274 }
 0x550   :  { %20477 = vst [vmem:[#allocation205_spill] sm:$0xff] %v16225_v34  ;;  %v16229_v20 = vpop.permute.xlu1 %9179  ;;  %v20485_v34 = vld [vmem:[#allocation117_spill] sm:$0xff] }
 0x551   :  { %20478 = vst [vmem:[#allocation206_spill] sm:$0xff] %v16227_v11  ;;  %v20555_v11 = vld [vmem:[#allocation5_spill] sm:$0xff] }
 0x552   :  { %20479 = vst [vmem:[#allocation207_spill] sm:$0xff] %v16229_v20  ;;  %v20486_v20 = vld [vmem:[#allocation114_spill] sm:$0xff] }
 0x555   :  { %9429 = vrot.lane.b32.xlu0 %v20480_v31, %s10236_s22  ;;  %9454 = vrot.lane.b32.xlu2 %v15687_v48, %s10236_s22 }
 0x556   :  { %9404 = vrot.lane.b32.xlu1 %v20481_v51, %s10236_s22 }
 0x557   :  { %v16237_v1 = vpop.permute.xlu0 %9219  ;;  %v16239_v33 = vpop.permute.xlu2 %9289 }
 0x558   :  { %20482 = vst [vmem:[#allocation208_spill] sm:$0xff] %v16237_v1  ;;  %v16241_v49 = vpop.permute.xlu1 %9194 }
 0x559   :  { %20483 = vst [vmem:[#allocation209_spill] sm:$0xff] %v16239_v33  ;;  %v20545_v33 = vld [vmem:[#allocation14_spill] sm:$0xff] }
 0x55a   :  { %20484 = vst [vmem:[#allocation210_spill] sm:$0xff] %v16241_v49 }
 0x55d   :  { %9444 = vrot.lane.b32.xlu0 %v20485_v34, %s10236_s22  ;;  %9469 = vrot.lane.b32.xlu2 %v15790_v46, %s10236_s22  ;;  %v20489_v34 = vld [vmem:[#allocation135_spill] sm:$0xff] }
 0x55e   :  { %9419 = vrot.lane.b32.xlu1 %v20486_v20, %s10236_s22 }
 0x55f   :  { %v16249_v31 = vpop.permute.xlu2 %9304  ;;  %v16251_v48 = vpop.permute.xlu0 %9234 }
 0x560   :  { %20487 = vst [vmem:[#allocation211_spill] sm:$0xff] %v16249_v31  ;;  %v16253_v51 = vpop.permute.xlu1 %9209 }
 0x561   :  { %20488 = vst [vmem:[#allocation212_spill] sm:$0xff] %v16251_v48 }
 0x565   :  { %9459 = vrot.lane.b32.xlu0 %v15720_v15, %s10236_s22  ;;  %9484 = vrot.lane.b32.xlu2 %v14988_v0, %s10237_s30 }
 0x566   :  { %9434 = vrot.lane.b32.xlu1 %v20489_v34, %s10236_s22 }
 0x567   :  { %v16261_v49 = vpop.permute.xlu2 %9319  ;;  %v16263_v46 = vpop.permute.xlu0 %9249 }
 0x568   :  { %20490 = vst [vmem:[#allocation213_spill] sm:$0xff] %v16261_v49  ;;  %v16265_v20 = vpop.permute.xlu1 %9224 }
 0x569   :  { %20491 = vst [vmem:[#allocation214_spill] sm:$0xff] %v16263_v46  ;;  %v20541_v46 = vld [vmem:[#allocation106_spill] sm:$0xff] }
 0x56d   :  { %9474 = vrot.lane.b32.xlu0 %v15821_v41, %s10236_s22  ;;  %9499 = vrot.lane.b32.xlu2 %v15115_v58, %s10237_s30 }
 0x56e   :  { %9449 = vrot.lane.b32.xlu1 %v15645_v54, %s10236_s22 }
 0x56f   :  { %v16273_v15 = vpop.permute.xlu2 %9334  ;;  %v16275_v31 = vpop.permute.xlu0 %9264 }
 0x570   :  { %20492 = vst [vmem:[#allocation215_spill] sm:$0xff] %v16273_v15  ;;  %v16277_v34 = vpop.permute.xlu1 %9239  ;;  %v20496_v15 = vld [vmem:[#allocation81_spill] sm:$0xff] }
 0x571   :  { %20493 = vst [vmem:[#allocation216_spill] sm:$0xff] %v16275_v31  ;;  %v8851_v31 = vunpack.i.l.bf16 %v15839_v14 }
 0x575   :  { %9489 = vrot.lane.b32.xlu0 %v15021_v24, %s10237_s30  ;;  %9514 = vrot.lane.b32.xlu2 %v15284_v5, %s10237_s30 }
 0x576   :  { %9464 = vrot.lane.b32.xlu1 %v15755_v63, %s10236_s22 }
 0x577   :  { %v16285_v41 = vpop.permute.xlu2 %9349  ;;  %v16287_v49 = vpop.permute.xlu0 %9279 }
 0x578   :  { %20494 = vst [vmem:[#allocation217_spill] sm:$0xff] %v16285_v41  ;;  %v16289_v54 = vpop.permute.xlu1 %9254 }
 0x579   :  { %20495 = vst [vmem:[#allocation218_spill] sm:$0xff] %v16287_v49 }
 0x57d   :  { %9504 = vrot.lane.b32.xlu0 %v15179_v57, %s10237_s30  ;;  %9529 = vrot.lane.b32.xlu2 %v15445_v59, %s10237_s30 }
 0x57e   :  { %9479 = vrot.lane.b32.xlu1 %v20496_v15, %s10237_s30 }
 0x57f   :  { %v16297_v58 = vpop.permute.xlu2 %9364  ;;  %v16299_v5 = vpop.permute.xlu0 %9294 }
 0x580   :  { %20497 = vst [vmem:[#allocation81_spill] sm:$0xff] %v16297_v58  ;;  %v16301_v63 = vpop.permute.xlu1 %9269  ;;  %v20503_v58 = vld [vmem:[#allocation44_spill] sm:$0xff] }
 0x581   :  { %20498 = vst [vmem:[#allocation219_spill] sm:$0xff] %v16299_v5 }
 0x582   :  { %20499 = vst [vmem:[#allocation220_spill] sm:$0xff] %v16301_v63  ;;  %v20585_v63 = vld [vmem:[#allocation111_spill] sm:$0xff] }
 0x585   :  { %9519 = vrot.lane.b32.xlu0 %v15336_v26, %s10237_s30  ;;  %9544 = vrot.lane.b32.xlu2 %v15593_v56, %s10237_s30  ;;  %v20504_v26 = vld [vmem:[#allocation41_spill] sm:$0xff] }
 0x586   :  { %9494 = vrot.lane.b32.xlu1 %v15056_v21, %s10237_s30  ;;  %v8862_v21 = vunpack.i.h.bf16 %v15831_v8 }
 0x587   :  { %v16309_v41 = vpop.permute.xlu2 %9379  ;;  %v16311_v59 = vpop.permute.xlu0 %9309 }
 0x588   :  { %20500 = vst [vmem:[#allocation221_spill] sm:$0xff] %v16309_v41  ;;  %v16313_v15 = vpop.permute.xlu1 %9284  ;;  %v20547_v41 = vld [vmem:[#allocation58_spill] sm:$0xff] }
 0x589   :  { %20501 = vst [vmem:[#allocation222_spill] sm:$0xff] %v16311_v59  ;;  %v8947_v1 = vunpack.i.h.bf16 %v20547_v41 }
 0x58a   :  { %20502 = vst [vmem:[#allocation223_spill] sm:$0xff] %v16313_v15 }
 0x58d   :  { %9534 = vrot.lane.b32.xlu0 %v20503_v58, %s10237_s30  ;;  %9559 = vrot.lane.b32.xlu2 %v15117_v55, %s10237_s30 }
 0x58e   :  { %9509 = vrot.lane.b32.xlu1 %v20504_v26, %s10237_s30 }
 0x58f   :  { %v16321_v5 = vpop.permute.xlu0 %9324  ;;  %v16323_v56 = vpop.permute.xlu2 %9394 }
 0x590   :  { %20505 = vst [vmem:[#allocation224_spill] sm:$0xff] %v16321_v5  ;;  %v16325_v49 = vpop.permute.xlu1 %9299 }
 0x591   :  { %20506 = vst [vmem:[#allocation225_spill] sm:$0xff] %v16323_v56 }
 0x592   :  { %20507 = vst [vmem:[#allocation226_spill] sm:$0xff] %v16325_v49 }
 0x595   :  { %9549 = vrot.lane.b32.xlu0 %v15650_v61, %s10237_s30  ;;  %9574 = vrot.lane.b32.xlu2 %v15286_v39, %s10237_s30 }
 0x596   :  { %9524 = vrot.lane.b32.xlu1 %v15394_v38, %s10237_s30 }
 0x597   :  { %v16333_v58 = vpop.permute.xlu0 %9339  ;;  %v16335_v55 = vpop.permute.xlu2 %9409 }
 0x598   :  { %20508 = vst [vmem:[#allocation227_spill] sm:$0xff] %v16333_v58  ;;  %v16337_v26 = vpop.permute.xlu1 %9314  ;;  %v20514_v58 = vld [vmem:[#allocation119_spill] sm:$0xff] }
 0x599   :  { %20509 = vst [vmem:[#allocation228_spill] sm:$0xff] %v16335_v55  ;;  %v20537_v55 = vld [vmem:[#allocation50_spill] sm:$0xff] }
 0x59a   :  { %20510 = vst [vmem:[#allocation229_spill] sm:$0xff] %v16337_v26 }
 0x59d   :  { %9564 = vrot.lane.b32.xlu0 %v15181_v42, %s10237_s30  ;;  %9589 = vrot.lane.b32.xlu2 %v15447_v27, %s10237_s30  ;;  %v8967_v42 = vunpack.i.h.bf16 %v20575_v16 }
 0x59e   :  { %9539 = vrot.lane.b32.xlu1 %v15542_v36, %s10237_s30 }
 0x59f   :  { %v16345_v61 = vpop.permute.xlu0 %9354  ;;  %v16347_v5 = vpop.permute.xlu2 %9424 }
 0x5a0   :  { %20511 = vst [vmem:[#allocation230_spill] sm:$0xff] %v16345_v61  ;;  %v16349_v38 = vpop.permute.xlu1 %9329  ;;  %v20517_v61 = vld [vmem:[#allocation17_spill] sm:$0xff] }
 0x5a1   :  { %20512 = vst [vmem:[#allocation231_spill] sm:$0xff] %v16347_v5  ;;  %v8857_v39 = vunpack.i.h.bf16 %v20517_v61  ;;  %v8856_v57 = vunpack.i.l.bf16 %v20517_v61  ;;  %v8852_v5 = vunpack.i.h.bf16 %v15839_v14  ;;  %v8861_v61 = vunpack.i.l.bf16 %v15831_v8  ;;  %v20520_v14 = vld [vmem:[#allocation123_spill] sm:$0xff] }
 0x5a2   :  { %20513 = vst [vmem:[#allocation232_spill] sm:$0xff] %v16349_v38  ;;  %v16399_v8 = vsel %vm2653_vm0, %v20355_v50, %v8862_v21  ;;  %v8882_v50 = vunpack.i.h.bf16 %v15867_v30  ;;  %v20542_v38 = vld [vmem:[#allocation52_spill] sm:$0xff] }
 0x5a3   :  { %v8917_v56 = vunpack.i.h.bf16 %v20542_v38 }
 0x5a5   :  { %9579 = vrot.lane.b32.xlu0 %v15338_v10, %s10237_s30  ;;  %9604 = vrot.lane.b32.xlu2 %v15595_v17, %s10237_s30  ;;  %v16378_v17 = vsel %vm2653_vm0, %v14906_v29, %v8856_v57  ;;  %v8866_v29 = vunpack.i.l.bf16 %v15855_v40 }
 0x5a6   :  { %9554 = vrot.lane.b32.xlu1 %v20514_v58, %s10237_s30  ;;  %v16374_v58 = vsel %vm2653_vm0, %v20333_v53, %v8857_v39  ;;  %20519 = vst [vmem:[#allocation235_spill] sm:$0xff] %v16378_v17  ;;  %v20522_v39 = vld [vmem:[#allocation82_spill] sm:$0xff]  ;;  %v20524_v17 = vld [vmem:[#allocation83_spill] sm:$0xff] }
 0x5a7   :  { %v16357_v59 = vpop.permute.xlu0 %9369  ;;  %v16359_v27 = vpop.permute.xlu2 %9439  ;;  %20518 = vst [vmem:[#allocation17_spill] sm:$0xff] %v16374_v58  ;;  %v16392_v53 = vsel %vm2653_vm0, %v20522_v39, %v8852_v5  ;;  %v16407_v58 = vsel %vm2653_vm0, %v20354_v35, %v8861_v61  ;;  %v8876_v5 = vunpack.i.l.bf16 %v15843_v7  ;;  %v16425_v35 = vsel %vm2653_vm0, %v14999_v32, %v8866_v29  ;;  %v20527_v61 = vld [vmem:[#allocation151_spill] sm:$0xff] }
 0x5a8   :  { %20515 = vst [vmem:[#allocation233_spill] sm:$0xff] %v16359_v27  ;;  %v16361_v36 = vpop.permute.xlu1 %9344  ;;  %v8872_v27 = vunpack.i.h.bf16 %v20520_v14  ;;  %v20531_v32 = vld [vmem:[#allocation59_spill] sm:$0xff] }
 0x5a9   :  { %20516 = vst [vmem:[#allocation234_spill] sm:$0xff] %v16361_v36  ;;  %v8867_v36 = vunpack.i.h.bf16 %v15855_v40  ;;  %v20532_v29 = vld [vmem:[#allocation147_spill] sm:$0xff] }
 0x5aa   :  { %v16413_v40 = vsel %vm2653_vm0, %v20340_v4, %v8872_v27  ;;  %v20528_v27 = vld [vmem:[#allocation72_spill] sm:$0xff] }
 0x5ab   :  { %20525 = vst [vmem:[#allocation83_spill] sm:$0xff] %v16413_v40  ;;  %v8891_v40 = vunpack.i.l.bf16 %v20531_v32 }
 0x5ad   :  { %9594 = vrot.lane.b32.xlu0 %v15496_v28, %s10237_s30  ;;  %9619 = vrot.lane.b32.xlu2 %v15722_v9, %s10237_s30  ;;  %v8871_v28 = vunpack.i.l.bf16 %v20520_v14  ;;  %v16403_v14 = vsel %vm2653_vm0, %v20524_v17, %v8851_v31  ;;  %v16421_v31 = vsel %vm2653_vm0, %v15004_v60, %v8867_v36  ;;  %v20530_v60 = vld [vmem:[#allocation36_spill] sm:$0xff] }
 0x5ae   :  { %9569 = vrot.lane.b32.xlu1 %v15229_v22, %s10237_s30  ;;  %v16439_v36 = vsel %vm2653_vm0, %v20530_v60, %v8876_v5  ;;  %v20536_v5 = vld [vmem:[#allocation33_spill] sm:$0xff]  ;;  %v20543_v22 = vld [vmem:[#allocation118_spill] sm:$0xff] }
 0x5af   :  { %v16386_v9 = vpop.permute.xlu0 %9384  ;;  %v16388_v0 = vpop.permute.xlu2 %9454  ;;  %v16417_v21 = vsel %vm2653_vm0, %v20339_v18, %v8871_v28  ;;  %v20529_v28 = vld [vmem:[#allocation92_spill] sm:$0xff]  ;;  %v8892_v18 = vunpack.i.h.bf16 %v20531_v32 }
 0x5b0   :  { %20521 = vst [vmem:[#allocation123_spill] sm:$0xff] %v16388_v0  ;;  %v16395_v57 = vpop.permute.xlu1 %9359  ;;  %v8877_v0 = vunpack.i.h.bf16 %v15843_v7  ;;  %v8881_v7 = vunpack.i.l.bf16 %v15867_v30 }
 0x5b1   :  { %20523 = vst [vmem:[#allocation82_spill] sm:$0xff] %v16395_v57  ;;  %v16465_v32 = vsel %vm2653_vm0, %v20377_v23, %v8892_v18  ;;  %v20544_v18 = vld [vmem:[#allocation87_spill] sm:$0xff] }
 0x5b2   :  { %20526 = vst [vmem:[#allocation236_spill] sm:$0xff] %v16417_v21  ;;  %v16435_v4 = vsel %vm2653_vm0, %v20529_v28, %v8877_v0  ;;  %v20535_v0 = vld [vmem:[#allocation97_spill] sm:$0xff]  ;;  %v16457_v60 = vsel %vm2653_vm0, %v20536_v5, %v8881_v7  ;;  %v20539_v21 = vld [vmem:[#allocation136_spill] sm:$0xff]  ;;  %v16472_v7 = vsel %vm2653_vm0, %v20541_v46, %v8891_v40  ;;  %v8912_v48 = vunpack.i.h.bf16 %v20544_v18  ;;  %v20546_v46 = vld [vmem:[#allocation31_spill] sm:$0xff] }
 0x5b3   :  { %v16453_v28 = vsel %vm2653_vm0, %v20535_v0, %v8882_v50  ;;  %v8897_v30 = vunpack.i.h.bf16 %v20539_v21  ;;  %v20540_v50 = vld [vmem:[#allocation61_spill] sm:$0xff]  ;;  %v8932_v40 = vunpack.i.h.bf16 %v20546_v46 }
 0x5b4   :  { %v8907_v0 = vunpack.i.h.bf16 %v20540_v50  ;;  %v8906_v5 = vunpack.i.l.bf16 %v20540_v50  ;;  %v8931_v50 = vunpack.i.l.bf16 %v20546_v46  ;;  %v8946_v46 = vunpack.i.l.bf16 %v20547_v41 }
 0x5b5   :  { %9609 = vrot.lane.b32.xlu0 %v20527_v61, %s10237_s30  ;;  %9634 = vrot.lane.b32.xlu2 %v20528_v27, %s10237_s30  ;;  %v8901_v61 = vunpack.i.l.bf16 %v20537_v55 }
 0x5b6   :  { %9584 = vrot.lane.b32.xlu1 %v20532_v29, %s10237_s30  ;;  %v8902_v29 = vunpack.i.h.bf16 %v20537_v55  ;;  %v8916_v55 = vunpack.i.l.bf16 %v20542_v38  ;;  %v20548_v38 = vld [vmem:[#allocation57_spill] sm:$0xff] }
 0x5b7   :  { %v16447_v27 = vpop.permute.xlu0 %9399  ;;  %v16449_v57 = vpop.permute.xlu2 %9469  ;;  %v16485_v26 = vsel %vm2653_vm0, %v20545_v33, %v8901_v61  ;;  %v20554_v61 = vld [vmem:[#allocation6_spill] sm:$0xff] }
 0x5b8   :  { %20534 = vst [vmem:[#allocation92_spill] sm:$0xff] %v16449_v57  ;;  %v16460_v10 = vpop.permute.xlu1 %9374  ;;  %v8896_v57 = vunpack.i.l.bf16 %v20539_v21  ;;  %v16479_v23 = vsel %vm2653_vm0, %v20543_v22, %v8902_v29  ;;  %v8911_v21 = vunpack.i.l.bf16 %v20544_v18  ;;  %v20549_v22 = vld [vmem:[#allocation28_spill] sm:$0xff]  ;;  %v20552_v18 = vld [vmem:[#allocation45_spill] sm:$0xff]  ;;  %v16504_v49 = vsel %vm2653_vm0, %v20554_v61, %v8907_v0 }
 0x5b9   :  { %20538 = vst [vmem:[#allocation36_spill] sm:$0xff] %v16460_v10  ;;  %v20550_v29 = vld [vmem:[#allocation112_spill] sm:$0xff] }
 0x5ba   :  { %v16496_v24 = vsel %vm2653_vm0, %v20550_v29, %v8897_v30  ;;  %v16500_v33 = vsel %vm2653_vm0, %v20552_v18, %v8896_v57  ;;  %v16515_v30 = vsel %vm2653_vm0, %v20557_v19, %v8917_v56  ;;  %v20558_v29 = vld [vmem:[#allocation12_spill] sm:$0xff]  ;;  %v20563_v19 = vld [vmem:[#allocation73_spill] sm:$0xff] }
 0x5bb   :  { %20551 = vst [vmem:[#allocation59_spill] sm:$0xff] %v16496_v24  ;;  %v16519_v57 = vsel %vm2653_vm0, %v20558_v29, %v8916_v55  ;;  %v20559_v18 = vld [vmem:[#allocation132_spill] sm:$0xff]  ;;  %v16540_v29 = vsel %vm2653_vm0, %v20410_v12, %v8932_v40  ;;  %v20567_v12 = vld [vmem:[#allocation27_spill] sm:$0xff] }
 0x5bc   :  { %20553 = vst [vmem:[#allocation97_spill] sm:$0xff] %v16500_v33  ;;  %v8962_v0 = vunpack.i.h.bf16 %v20559_v18  ;;  %v20561_v33 = vld [vmem:[#allocation9_spill] sm:$0xff]  ;;  %v8961_v56 = vunpack.i.l.bf16 %v20559_v18  ;;  %v8937_v40 = vunpack.i.h.bf16 %v20567_v12 }
 0x5bd   :  { %9624 = vrot.lane.b32.xlu0 %v20548_v38, %s10237_s30  ;;  %9649 = vrot.lane.b32.xlu2 %v20549_v22, %s10238_s16  ;;  %v20556_v38 = vld [vmem:[#allocation121_spill] sm:$0xff]  ;;  %v16528_v24 = vsel %vm2653_vm0, %v20561_v33, %v8912_v48  ;;  %v16548_v48 = vsel %vm2653_vm0, %v20419_v25, %v8947_v1  ;;  %v16553_v33 = vsel %vm2653_vm0, %v20418_v43, %v8946_v46 }
 0x5be   :  { %9599 = vrot.lane.b32.xlu1 %v20555_v11, %s10237_s30  ;;  %v16511_v22 = vsel %vm2653_vm0, %v20556_v38, %v8906_v5  ;;  %v20562_v5 = vld [vmem:[#allocation3_spill] sm:$0xff]  ;;  %v8977_v11 = vunpack.i.h.bf16 %v20563_v19  ;;  %v20566_v18 = vld [vmem:[#allocation133_spill] sm:$0xff]  ;;  %v16567_v43 = vsel %vm2653_vm0, %v20427_v52, %v8961_v56  ;;  %v20576_v52 = vld [vmem:[#allocation74_spill] sm:$0xff] }
 0x5bf   :  { %v16522_v61 = vpop.permute.xlu0 %9414  ;;  %v16524_v41 = vpop.permute.xlu2 %9484  ;;  %v16532_v38 = vsel %vm2653_vm0, %v20562_v5, %v8911_v21  ;;  %v8976_v21 = vunpack.i.l.bf16 %v20563_v19  ;;  %v8922_v5 = vunpack.i.h.bf16 %v20566_v18  ;;  %v20569_v1 = vld [vmem:[#allocation141_spill] sm:$0xff]  ;;  %20570 = vst [vmem:[#allocation61_spill] sm:$0xff] %v16567_v43  ;;  %v20593_v43 = vld [vmem:[#allocation66_spill] sm:$0xff] }
 0x5c0   :  { %20560 = vst [vmem:[#allocation33_spill] sm:$0xff] %v16524_v41  ;;  %v16536_v55 = vpop.permute.xlu1 %9389  ;;  %v16544_v41 = vsel %vm2653_vm0, %v20565_v2, %v8931_v50  ;;  %v16560_v2 = vsel %vm2653_vm0, %v20428_v6, %v8962_v0  ;;  %v8936_v50 = vunpack.i.l.bf16 %v20567_v12  ;;  %v8952_v25 = vunpack.i.h.bf16 %v20569_v1  ;;  %v20574_v0 = vld [vmem:[#allocation152_spill] sm:$0xff] }
 0x5c1   :  { %20564 = vst [vmem:[#allocation50_spill] sm:$0xff] %v16536_v55  ;;  %v8921_v55 = vunpack.i.l.bf16 %v20566_v18  ;;  %v8951_v19 = vunpack.i.l.bf16 %v20569_v1  ;;  %v16571_v46 = vsel %vm2653_vm0, %v20436_v37, %v8977_v11  ;;  %v20572_v18 = vld [vmem:[#allocation63_spill] sm:$0xff]  ;;  %v16577_v6 = vsel %vm2653_vm0, %v20435_v44, %v8976_v21  ;;  %v20578_v37 = vld [vmem:[#allocation54_spill] sm:$0xff] }
 0x5c2   :  { %20568 = vst [vmem:[#allocation136_spill] sm:$0xff] %v16560_v2  ;;  %v8927_v10 = vunpack.i.h.bf16 %v20572_v18  ;;  %v8926_v15 = vunpack.i.l.bf16 %v20572_v18  ;;  %v8992_v12 = vunpack.i.h.bf16 %v20574_v0  ;;  %v8991_v1 = vunpack.i.l.bf16 %v20574_v0  ;;  %v20577_v11 = vld [vmem:[#allocation47_spill] sm:$0xff]  ;;  %v20579_v18 = vld [vmem:[#allocation20_spill] sm:$0xff]  ;;  %v20580_v21 = vld [vmem:[#allocation34_spill] sm:$0xff] }
 0x5c3   :  { %20571 = vst [vmem:[#allocation106_spill] sm:$0xff] %v16571_v46  ;;  %v16588_v56 = vsel %vm2653_vm0, %v20578_v37, %v8922_v5  ;;  %v16592_v44 = vsel %vm2653_vm0, %v20579_v18, %v8921_v55  ;;  %v8966_v0 = vunpack.i.l.bf16 %v20575_v16  ;;  %v20582_v46 = vld [vmem:[#allocation68_spill] sm:$0xff]  ;;  %v16607_v5 = vsel %vm2653_vm0, %v20585_v63, %v8952_v25  ;;  %v20587_v37 = vld [vmem:[#allocation110_spill] sm:$0xff] }
 0x5c4   :  { %20573 = vst [vmem:[#allocation52_spill] sm:$0xff] %v16577_v6  ;;  %v16596_v6 = vsel %vm2653_vm0, %v20580_v21, %v8937_v40  ;;  %v16611_v55 = vsel %vm2653_vm0, %v20587_v37, %v8951_v19  ;;  %v20589_v18 = vld [vmem:[#allocation144_spill] sm:$0xff]  ;;  %v20594_v63 = vld [vmem:[#allocation90_spill] sm:$0xff]  ;;  %v16628_v19 = vsel %vm2653_vm0, %v15704_v47, %v8992_v12  ;;  %v16632_v37 = vsel %vm2653_vm0, %v15699_v62, %v8991_v1  ;;  %v20603_v47 = vld [vmem:[#allocation129_spill] sm:$0xff] }
 0x5c5   :  { %9639 = vrot.lane.b32.xlu0 %v20576_v52, %s10238_s16  ;;  %9664 = vrot.lane.b32.xlu2 %v20577_v11, %s10238_s16  ;;  %20581 = vst [vmem:[#allocation118_spill] sm:$0xff] %v16596_v6  ;;  %v20583_v52 = vld [vmem:[#allocation96_spill] sm:$0xff]  ;;  %v8942_v40 = vunpack.i.h.bf16 %v20589_v18  ;;  %v20592_v6 = vld [vmem:[#allocation62_spill] sm:$0xff]  ;;  %v9007_v25 = vunpack.i.h.bf16 %v20594_v63  ;;  %v8957_v12 = vunpack.i.h.bf16 %v20603_v47  ;;  %v8956_v1 = vunpack.i.l.bf16 %v20603_v47 }
 0x5c6   :  { %9614 = vrot.lane.b32.xlu1 %v20582_v46, %s10237_s30  ;;  %v16603_v11 = vsel %vm2653_vm0, %v20583_v52, %v8936_v50  ;;  %20586 = vst [vmem:[#allocation14_spill] sm:$0xff] %v16607_v5  ;;  %v5956_v46 = vsel %vm2653_vm0, %v20592_v6, %v8927_v10  ;;  %v5955_v50 = vsel %vm2653_vm0, %v20593_v43, %v8926_v15  ;;  %v8941_v52 = vunpack.i.l.bf16 %v20589_v18  ;;  %v20600_v43 = vld [vmem:[#allocation120_spill] sm:$0xff]  ;;  %v20602_v18 = vld [vmem:[#allocation77_spill] sm:$0xff] }
 0x5c7   :  { %20584 = vst [vmem:[#allocation87_spill] sm:$0xff] %v16603_v11  ;;  %v16614_v21 = vpop.permute.xlu0 %9429  ;;  %v16616_v16 = vpop.permute.xlu2 %9499  ;;  %v9006_v15 = vunpack.i.l.bf16 %v20594_v63  ;;  %v16641_v6 = vsel %vm2653_vm0, %v20600_v43, %v8966_v0  ;;  %v16659_v43 = vsel %vm2718_vm1, %v16392_v53, %v9007_v25  ;;  %v20613_v53 = vld [vmem:[#allocation79_spill] sm:$0xff]  ;;  %v20614_v25 = vld [vmem:[#allocation146_spill] sm:$0xff] }
 0x5c8   :  { %20588 = vst [vmem:[#allocation31_spill] sm:$0xff] %v16611_v55  ;;  %v16624_v5 = vpop.permute.xlu1 %9404  ;;  %v8981_v55 = vunpack.i.l.bf16 %v20602_v18 }
 0x5c9   :  { %20590 = vst [vmem:[#allocation58_spill] sm:$0xff] %v16614_v21  ;;  %v20611_v21 = vld [vmem:[#allocation162_spill] sm:$0xff] }
 0x5ca   :  { %20591 = vst [vmem:[#allocation28_spill] sm:$0xff] %v16616_v16  ;;  %v20598_v16 = vld [vmem:[#allocation55_spill] sm:$0xff]  ;;  %v8987_v11 = vunpack.i.h.bf16 %v20611_v21 }
 0x5cb   :  { %20595 = vst [vmem:[#allocation112_spill] sm:$0xff] %v16624_v5  ;;  %v16636_v10 = vsel %vm2653_vm0, %v20598_v16, %v8967_v42  ;;  %v8982_v5 = vunpack.i.h.bf16 %v20602_v18  ;;  %v20605_v42 = vld [vmem:[#allocation53_spill] sm:$0xff]  ;;  %v20608_v18 = vld [vmem:[#allocation80_spill] sm:$0xff] }
 0x5cc   :  { %20596 = vst [vmem:[#allocation45_spill] sm:$0xff] %v16628_v19  ;;  %v20604_v19 = vld [vmem:[#allocation39_spill] sm:$0xff]  ;;  %v9022_v16 = vunpack.i.h.bf16 %v20605_v42  ;;  %v9021_v63 = vunpack.i.l.bf16 %v20605_v42 }
 0x5cd   :  { %20597 = vst [vmem:[#allocation6_spill] sm:$0xff] %v16632_v37  ;;  %v16648_v62 = vsel %vm2653_vm0, %v20604_v19, %v8942_v40  ;;  %v8971_v37 = vunpack.i.l.bf16 %v20608_v18  ;;  %v16665_v40 = vsel %vm2718_vm1, %v16403_v14, %v9006_v15  ;;  %v20610_v19 = vld [vmem:[#allocation19_spill] sm:$0xff]  ;;  %9679 = vrot.lane.b32.xlu2 %v20613_v53, %s10238_s16  ;;  %v20618_v15 = vld [vmem:[#allocation149_spill] sm:$0xff] }
 0x5ce   :  { %20599 = vst [vmem:[#allocation121_spill] sm:$0xff] %v16636_v10  ;;  %v20606_v10 = vld [vmem:[#allocation99_spill] sm:$0xff]  ;;  %v9037_v47 = vunpack.i.h.bf16 %v20610_v19  ;;  %v9036_v42 = vunpack.i.l.bf16 %v20610_v19  ;;  %v16684_v2 = vsel %vm2653_vm0, %v20618_v15, %v8957_v12  ;;  %v8986_v19 = vunpack.i.l.bf16 %v20611_v21  ;;  %9629 = vrot.lane.b32.xlu1 %v20619_v13, %s10237_s30  ;;  %v20625_v21 = vld [vmem:[#allocation145_spill] sm:$0xff] }
 0x5cf   :  { %20601 = vst [vmem:[#allocation159_spill] sm:$0xff] %v16641_v6  ;;  %v16655_v0 = vsel %vm2653_vm0, %v20606_v10, %v8941_v52  ;;  %v8972_v6 = vunpack.i.h.bf16 %v20608_v18  ;;  %v20612_v52 = vld [vmem:[#allocation22_spill] sm:$0xff]  ;;  %v16676_v10 = vsel %vm2653_vm0, %v20614_v25, %v8982_v5  ;;  %v20616_v18 = vld [vmem:[#allocation51_spill] sm:$0xff]  ;;  %v16693_v5 = vsel %vm2718_vm1, %v16421_v31, %v9022_v16  ;;  %v16700_v12 = vpop.permute.xlu0 %9444  ;;  %v16702_v15 = vpop.permute.xlu2 %9514  ;;  %v20627_v16 = vld [vmem:[#allocation161_spill] sm:$0xff] }
 0x5d0   :  { %20607 = vst [vmem:[#allocation12_spill] sm:$0xff] %v16659_v43  ;;  %9654 = vrot.lane.b32.xlu0 %v20612_v52, %s10238_s16  ;;  %v16680_v14 = vsel %vm2653_vm0, %v20616_v18, %v8981_v55  ;;  %v20620_v52 = vld [vmem:[#allocation160_spill] sm:$0xff]  ;;  %v16697_v55 = vsel %vm2718_vm1, %v16425_v35, %v9021_v63  ;;  %v20623_v25 = vld [vmem:[#allocation134_spill] sm:$0xff]  ;;  %v16714_v35 = vpop.permute.xlu1 %9419  ;;  %v16718_v63 = vsel %vm2718_vm1, %v16453_v28, %v9037_v47  ;;  %v9372_v47 = vunpack.i.h.bf16 %v16357_v59 }
 0x5d1   :  { %20609 = vst [vmem:[#allocation132_spill] sm:$0xff] %v16665_v40  ;;  %v5967_v53 = vsel %vm2653_vm0, %v20620_v52, %v8956_v1  ;;  %v9067_v18 = vunpack.i.h.bf16 %v20623_v25  ;;  %v16706_v13 = vsel %vm2653_vm0, %v20625_v21, %v8972_v6  ;;  %v9066_v31 = vunpack.i.l.bf16 %v20623_v25  ;;  %v20631_v6 = vld [vmem:[#allocation130_spill] sm:$0xff] }
 0x5d2   :  { %20615 = vst [vmem:[#allocation9_spill] sm:$0xff] %v16676_v10  ;;  %v9081_v52 = vunpack.i.l.bf16 %v20627_v16  ;;  %v16726_v21 = vsel %vm2653_vm0, %v20631_v6, %v8987_v11  ;;  %v20635_v11 = vld [vmem:[#allocation91_spill] sm:$0xff]  ;;  %v9212_v10 = vunpack.i.h.bf16 %v16253_v51 }
 0x5d3   :  { %20617 = vst [vmem:[#allocation3_spill] sm:$0xff] %v16680_v14  ;;  %v20626_v14 = vld [vmem:[#allocation125_spill] sm:$0xff]  ;;  %v9057_v6 = vunpack.i.h.bf16 %v20635_v11 }
 0x5d4   :  { %20621 = vst [vmem:[#allocation73_spill] sm:$0xff] %v16693_v5  ;;  %v16710_v1 = vsel %vm2653_vm0, %v20626_v14, %v8971_v37  ;;  %v9082_v37 = vunpack.i.h.bf16 %v20627_v16  ;;  %v20632_v14 = vld [vmem:[#allocation128_spill] sm:$0xff]  ;;  %v9056_v16 = vunpack.i.l.bf16 %v20635_v11  ;;  %v9211_v5 = vunpack.i.l.bf16 %v16253_v51 }
 0x5d5   :  { %20622 = vst [vmem:[#allocation35_spill] sm:$0xff] %v16697_v55  ;;  %v16731_v25 = vsel %vm2653_vm0, %v20632_v14, %v8986_v19  ;;  %v16745_v19 = vsel %vm2718_vm1, %v16532_v38, %v9066_v31  ;;  %v16748_v14 = vsel %vm2718_vm1, %v5955_v50, %v9081_v52  ;;  %v9371_v11 = vunpack.i.l.bf16 %v16357_v59  ;;  %v20640_v55 = vld [vmem:[#allocation86_spill] sm:$0xff]  ;;  %v20641_v38 = vld [vmem:[#allocation89_spill] sm:$0xff]  ;;  %v20642_v31 = vld [vmem:[#allocation167_spill] sm:$0xff] }
 0x5d6   :  { %20624 = vst [vmem:[#allocation133_spill] sm:$0xff] %v16702_v15  ;;  %v16722_v15 = vsel %vm2718_vm1, %v16457_v60, %v9036_v42  ;;  %v16738_v60 = vsel %vm2718_vm1, %v16528_v24, %v9067_v18  ;;  %v16753_v24 = vsel %vm2718_vm1, %v5956_v46, %v9082_v37  ;;  %v20639_v18 = vld [vmem:[#allocation166_spill] sm:$0xff]  ;;  %9694 = vrot.lane.b32.xlu2 %v20641_v38, %s10238_s16  ;;  %v9002_v52 = vunpack.i.h.bf16 %v20642_v31  ;;  %v20643_v46 = vld [vmem:[#allocation172_spill] sm:$0xff]  ;;  %v20645_v59 = vld [vmem:[#allocation173_spill] sm:$0xff] }
 0x5d7   :  { %20628 = vst [vmem:[#allocation27_spill] sm:$0xff] %v16714_v35  ;;  %v9096_v42 = vunpack.i.l.bf16 %v20639_v18  ;;  %v9097_v50 = vunpack.i.h.bf16 %v20639_v18  ;;  %v9001_v51 = vunpack.i.l.bf16 %v20642_v31  ;;  %v9112_v37 = vunpack.i.h.bf16 %v20643_v46  ;;  %v16774_v18 = vpop.permute.xlu0 %9459 }
 0x5d8   :  { %20629 = vst [vmem:[#allocation141_spill] sm:$0xff] %v16718_v63  ;;  %9669 = vrot.lane.b32.xlu0 %v20640_v55, %s10238_s16  ;;  %v9111_v63 = vunpack.i.l.bf16 %v20643_v46  ;;  %v9017_v28 = vunpack.i.h.bf16 %v20645_v59  ;;  %v6008_v55 = vsel %vm2718_vm1, %v16479_v23, %v9057_v6  ;;  %v6007_v38 = vsel %vm2718_vm1, %v16485_v26, %v9056_v16  ;;  %v16778_v35 = vpop.permute.xlu1 %9434 }
 0x5d9   :  { %20630 = vst [vmem:[#allocation63_spill] sm:$0xff] %v16722_v15  ;;  %v20644_v15 = vld [vmem:[#allocation29_spill] sm:$0xff]  ;;  %v6070_v31 = vsel %vm2783_vm2, %v6008_v55, %v9212_v10  ;;  %v16782_v46 = vsel %vm2718_vm1, %v16655_v0, %v9096_v42  ;;  %v9016_v23 = vunpack.i.l.bf16 %v20645_v59  ;;  %v16789_v16 = vsel %vm2718_vm1, %v16648_v62, %v9097_v50 }
 0x5da   :  { %20636 = vst [vmem:[#allocation152_spill] sm:$0xff] %v16745_v19  ;;  %9644 = vrot.lane.b32.xlu1 %v20644_v15, %s10238_s16  ;;  %v6134_v6 = vsel %vm2848_vm3, %v6070_v31, %v9372_v47  ;;  %v16793_v10 = vsel %vm2653_vm0, %v15779_v45, %v9002_v52  ;;  %v16803_v42 = vsel %vm2653_vm0, %v15768_v3, %v9001_v51  ;;  %v9226_v3 = vunpack.i.l.bf16 %v16265_v20 }
 0x5db   :  { %20637 = vst [vmem:[#allocation157_spill] sm:$0xff] %v16748_v14  ;;  %v9530_v14 = vpop.permute.xlu2 %9529  ;;  %v16806_v47 = vsel %vm2718_vm1, %v5967_v53, %v9111_v63  ;;  %v16812_v45 = vsel %vm2718_vm1, %v16684_v2, %v9112_v37  ;;  %v16822_v53 = vsel %vm2718_vm1, %v16407_v58, %v9016_v23  ;;  %v20649_v63 = vld [vmem:[#allocation176_spill] sm:$0xff]  ;;  %v9387_v52 = vunpack.i.h.bf16 %v16386_v9  ;;  %v20652_v37 = vld [vmem:[#allocation177_spill] sm:$0xff] }
 0x5dc   :  { %20638 = vst [vmem:[#allocation74_spill] sm:$0xff] %v16753_v24  ;;  %v6069_v24 = vsel %vm2783_vm2, %v6007_v38, %v9211_v5  ;;  %v9532_v15 = vunpack.i.h.bf16 %v9530_v14  ;;  %v9531_v19 = vunpack.i.l.bf16 %v9530_v14  ;;  %v20648_v14 = vld [vmem:[#allocation107_spill] sm:$0xff]  ;;  %v9126_v50 = vunpack.i.l.bf16 %v20649_v63  ;;  %v20650_v2 = vld [vmem:[#allocation164_spill] sm:$0xff]  ;;  %v20655_v23 = vld [vmem:[#allocation181_spill] sm:$0xff] }
 0x5dd   :  { %v6133_v26 = vsel %vm2848_vm3, %v6069_v24, %v9371_v11  ;;  %v9072_v62 = vunpack.i.h.bf16 %v20648_v14  ;;  %v9071_v24 = vunpack.i.l.bf16 %v20648_v14  ;;  %v16816_v11 = vsel %vm2718_vm1, %v16399_v8, %v9017_v28  ;;  %v20651_v8 = vld [vmem:[#allocation69_spill] sm:$0xff]  ;;  %v20653_v58 = vld [vmem:[#allocation180_spill] sm:$0xff]  ;;  %v20654_v38 = vld [vmem:[#allocation7_spill] sm:$0xff] }
 0x5de   :  { %v16796_v5 = vsel %vm2913_vm5, %v6134_v6, %v9532_v15  ;;  %v16799_v0 = vsel %vm2913_vm5, %v6133_v26, %v9531_v19  ;;  %v9227_v19 = vunpack.i.h.bf16 %v16265_v20  ;;  %v9386_v51 = vunpack.i.l.bf16 %v16386_v9  ;;  %9709 = vrot.lane.b32.xlu2 %v20651_v8, %s10238_s16 }
 0x5df   :  { %20646 = vst [vmem:[#allocation47_spill] sm:$0xff] %v16796_v5  ;;  %v9127_v28 = vunpack.i.h.bf16 %v20649_v63  ;;  %v9032_v20 = vunpack.i.h.bf16 %v20652_v37  ;;  %v9031_v59 = vunpack.i.l.bf16 %v20652_v37  ;;  %v9142_v55 = vunpack.i.h.bf16 %v20653_v58  ;;  %v16843_v26 = vpop.permute.xlu0 %9474 }
 0x5e0   :  { %20647 = vst [vmem:[#allocation54_spill] sm:$0xff] %v16799_v0  ;;  %9684 = vrot.lane.b32.xlu0 %v20650_v2, %s10238_s16  ;;  %v6014_v9 = vsel %vm2718_vm1, %v16515_v30, %v9072_v62  ;;  %v6013_v31 = vsel %vm2718_vm1, %v16519_v57, %v9071_v24  ;;  %v9141_v15 = vunpack.i.l.bf16 %v20653_v58  ;;  %v9047_v6 = vunpack.i.h.bf16 %v20655_v23  ;;  %v16847_v8 = vpop.permute.xlu1 %9449 }
 0x5e1   :  { %v6076_v63 = vsel %vm2783_vm2, %v6014_v9, %v9227_v19  ;;  %v6075_v2 = vsel %vm2783_vm2, %v6013_v31, %v9226_v3  ;;  %v16851_v30 = vsel %vm2718_vm1, %v16710_v1, %v9126_v50  ;;  %v9046_v57 = vunpack.i.l.bf16 %v20655_v23  ;;  %v20656_v19 = vld [vmem:[#allocation155_spill] sm:$0xff] }
 0x5e2   :  { %9659 = vrot.lane.b32.xlu1 %v20654_v38, %s10238_s16  ;;  %v6140_v62 = vsel %vm2848_vm3, %v6076_v63, %v9387_v52  ;;  %v6139_v24 = vsel %vm2848_vm3, %v6075_v2, %v9386_v51  ;;  %v16858_v58 = vsel %vm2718_vm1, %v16706_v13, %v9127_v28  ;;  %v9087_v3 = vunpack.i.h.bf16 %v20656_v19  ;;  %v20663_v63 = vld [vmem:[#allocation153_spill] sm:$0xff]  ;;  %v20664_v2 = vld [vmem:[#allocation43_spill] sm:$0xff] }
 0x5e3   :  { %v9545_v14 = vpop.permute.xlu2 %9544  ;;  %v16869_v1 = vsel %vm2718_vm1, %v16435_v4, %v9032_v20  ;;  %v16873_v50 = vsel %vm2718_vm1, %v16439_v36, %v9031_v59  ;;  %v16877_v13 = vsel %vm2718_vm1, %v16731_v25, %v9141_v15  ;;  %v9086_v52 = vunpack.i.l.bf16 %v20656_v19  ;;  %v20659_v25 = vld [vmem:[#allocation30_spill] sm:$0xff] }
 0x5e4   :  { %v9547_v37 = vunpack.i.h.bf16 %v9545_v14  ;;  %v9546_v38 = vunpack.i.l.bf16 %v9545_v14  ;;  %v16882_v51 = vsel %vm2718_vm1, %v16726_v21, %v9142_v55  ;;  %v16886_v28 = vsel %vm2718_vm1, %v16465_v32, %v9047_v6  ;;  %v20660_v21 = vld [vmem:[#allocation170_spill] sm:$0xff]  ;;  %v20661_v32 = vld [vmem:[#allocation169_spill] sm:$0xff] }
 0x5e5   :  { %v9242_v4 = vunpack.i.h.bf16 %v16277_v34  ;;  %v9241_v20 = vunpack.i.l.bf16 %v16277_v34  ;;  %v16892_v36 = vsel %vm2718_vm1, %v16472_v7, %v9046_v57  ;;  %v9157_v59 = vunpack.i.h.bf16 %v20659_v25  ;;  %v20662_v7 = vld [vmem:[#allocation183_spill] sm:$0xff]  ;;  %v20665_v57 = vld [vmem:[#allocation185_spill] sm:$0xff] }
 0x5e6   :  { %v16862_v9 = vsel %vm2913_vm5, %v6140_v62, %v9547_v37  ;;  %v16865_v31 = vsel %vm2913_vm5, %v6139_v24, %v9546_v38  ;;  %v9402_v15 = vunpack.i.h.bf16 %v16447_v27  ;;  %v9401_v23 = vunpack.i.l.bf16 %v16447_v27  ;;  %9724 = vrot.lane.b32.xlu2 %v20661_v32, %s10238_s16 }
 0x5e7   :  { %20657 = vst [vmem:[#allocation20_spill] sm:$0xff] %v16862_v9  ;;  %v16903_v55 = vsel %vm2718_vm1, %v16540_v29, %v9087_v3  ;;  %v9156_v34 = vunpack.i.l.bf16 %v20659_v25  ;;  %v9062_v6 = vunpack.i.h.bf16 %v20662_v7  ;;  %v9061_v14 = vunpack.i.l.bf16 %v20662_v7  ;;  %v16917_v62 = vpop.permute.xlu0 %9489 }
 0x5e8   :  { %20658 = vst [vmem:[#allocation34_spill] sm:$0xff] %v16865_v31  ;;  %9699 = vrot.lane.b32.xlu0 %v20660_v21, %s10238_s16  ;;  %v16912_v27 = vsel %vm2718_vm1, %v16544_v41, %v9086_v52  ;;  %v9102_v37 = vunpack.i.h.bf16 %v20664_v2  ;;  %v9101_v38 = vunpack.i.l.bf16 %v20664_v2  ;;  %v9172_v29 = vunpack.i.h.bf16 %v20665_v57  ;;  %v16923_v25 = vpop.permute.xlu1 %9464  ;;  %v20666_v2 = vld [vmem:[#allocation186_spill] sm:$0xff] }
 0x5e9   :  { %v6082_v19 = vsel %vm2783_vm2, %v16659_v43, %v9242_v4  ;;  %v6081_v3 = vsel %vm2783_vm2, %v16665_v40, %v9241_v20  ;;  %v9171_v52 = vunpack.i.l.bf16 %v20665_v57  ;;  %v9077_v9 = vunpack.i.h.bf16 %v20666_v2  ;;  %v20695_v40 = vld [vmem:[#allocation31_spill] sm:$0xff] }
 0x5ea   :  { %9674 = vrot.lane.b32.xlu1 %v20663_v63, %s10238_s16  ;;  %v6146_v32 = vsel %vm2848_vm3, %v6082_v19, %v9402_v15  ;;  %v6145_v7 = vsel %vm2848_vm3, %v6081_v3, %v9401_v23  ;;  %v9713_v63 = vpack.i.bf16 %v20522_v39, %v20524_v17  ;;  %v9076_v4 = vunpack.i.l.bf16 %v20666_v2 }
 0x5eb   :  { %v9560_v24 = vpop.permute.xlu2 %9559  ;;  %v16940_v57 = vsel %vm2718_vm1, %v16803_v42, %v9156_v34  ;;  %v16944_v15 = vsel %vm2718_vm1, %v16793_v10, %v9157_v59  ;;  %v16948_v17 = vsel %vm2718_vm1, %v16504_v49, %v9062_v6  ;;  %v16952_v39 = vsel %vm2718_vm1, %v16511_v22, %v9061_v14  ;;  %v20670_v6 = vld [vmem:[#allocation188_spill] sm:$0xff] }
 0x5ec   :  { %v9562_v21 = vunpack.i.h.bf16 %v9560_v24  ;;  %v9561_v41 = vunpack.i.l.bf16 %v9560_v24  ;;  %v16956_v23 = vsel %vm2718_vm1, %v16548_v48, %v9102_v37  ;;  %v16960_v42 = vsel %vm2718_vm1, %v16553_v33, %v9101_v38  ;;  %v20669_v33 = vld [vmem:[#allocation175_spill] sm:$0xff]  ;;  %v20673_v24 = vld [vmem:[#allocation190_spill] sm:$0xff] }
 0x5ed   :  { %v9257_v34 = vunpack.i.h.bf16 %v16289_v54  ;;  %v9256_v10 = vunpack.i.l.bf16 %v16289_v54  ;;  %v16966_v49 = vsel %vm2783_vm2, %v16822_v53, %v9171_v52  ;;  %v16970_v22 = vsel %vm2783_vm2, %v16816_v11, %v9172_v29  ;;  %v20671_v37 = vld [vmem:[#allocation75_spill] sm:$0xff] }
 0x5ee   :  { %v16933_v43 = vsel %vm2913_vm5, %v6146_v32, %v9562_v21  ;;  %v16936_v20 = vsel %vm2913_vm5, %v6145_v7, %v9561_v41  ;;  %v9417_v59 = vunpack.i.h.bf16 %v16522_v61  ;;  %v9416_v48 = vunpack.i.l.bf16 %v16522_v61  ;;  %9739 = vrot.lane.b32.xlu2 %v20669_v33, %s10238_s16  ;;  %v20672_v61 = vld [vmem:[#allocation189_spill] sm:$0xff]  ;;  %v20675_v7 = vld [vmem:[#allocation191_spill] sm:$0xff] }
 0x5ef   :  { %20667 = vst [vmem:[#allocation96_spill] sm:$0xff] %v16933_v43  ;;  %v16979_v54 = vsel %vm2718_vm1, %v16588_v56, %v9077_v9  ;;  %v16983_v53 = vsel %vm2718_vm1, %v16592_v44, %v9076_v4  ;;  %v9117_v11 = vunpack.i.h.bf16 %v20670_v6  ;;  %v9116_v14 = vunpack.i.l.bf16 %v20670_v6  ;;  %v16993_v9 = vpop.permute.xlu0 %9504  ;;  %v20676_v6 = vld [vmem:[#allocation192_spill] sm:$0xff] }
 0x5f0   :  { %20668 = vst [vmem:[#allocation111_spill] sm:$0xff] %v16936_v20  ;;  %9714 = vrot.lane.b32.xlu0 %v9713_v63, %s10238_s16  ;;  %v9187_v38 = vunpack.i.h.bf16 %v20672_v61  ;;  %v9186_v29 = vunpack.i.l.bf16 %v20672_v61  ;;  %v9092_v19 = vunpack.i.h.bf16 %v20673_v24  ;;  %v9091_v56 = vunpack.i.l.bf16 %v20673_v24  ;;  %v16999_v41 = vpop.permute.xlu1 %9479  ;;  %v20680_v24 = vld [vmem:[#allocation61_spill] sm:$0xff] }
 0x5f1   :  { %v6087_v44 = vsel %vm2783_vm2, %v16782_v46, %v9256_v10  ;;  %v6088_v21 = vsel %vm2783_vm2, %v16789_v16, %v9257_v34  ;;  %20674 = vst [vmem:[#allocation110_spill] sm:$0xff] %v16999_v41  ;;  %v9132_v63 = vunpack.i.h.bf16 %v20675_v7  ;;  %v9131_v2 = vunpack.i.l.bf16 %v20675_v7  ;;  %v20679_v34 = vld [vmem:[#allocation136_spill] sm:$0xff] }
 0x5f2   :  { %9689 = vrot.lane.b32.xlu1 %v20671_v37, %s10238_s16  ;;  %v6152_v4 = vsel %vm2848_vm3, %v6088_v21, %v9417_v59  ;;  %v6151_v33 = vsel %vm2848_vm3, %v6087_v44, %v9416_v48  ;;  %v9202_v37 = vunpack.i.h.bf16 %v20676_v6  ;;  %v9201_v61 = vunpack.i.l.bf16 %v20676_v6  ;;  %v20681_v44 = vld [vmem:[#allocation118_spill] sm:$0xff] }
 0x5f3   :  { %v9575_v3 = vpop.permute.xlu2 %9574  ;;  %v17015_v10 = vsel %vm2718_vm1, %v20679_v34, %v9117_v11  ;;  %v17023_v59 = vsel %vm2783_vm2, %v16873_v50, %v9186_v29  ;;  %v17027_v48 = vsel %vm2783_vm2, %v16869_v1, %v9187_v38  ;;  %v17031_v21 = vsel %vm2718_vm1, %v20681_v44, %v9092_v19  ;;  %v20685_v29 = vld [vmem:[#allocation58_spill] sm:$0xff]  ;;  %v20687_v19 = vld [vmem:[#allocation101_spill] sm:$0xff] }
 0x5f4   :  { %v9577_v52 = vunpack.i.h.bf16 %v9575_v3  ;;  %v9576_v32 = vunpack.i.l.bf16 %v9575_v3  ;;  %v17019_v3 = vsel %vm2718_vm1, %v20680_v24, %v9116_v14  ;;  %v9432_v6 = vunpack.i.h.bf16 %v20685_v29  ;;  %v20686_v38 = vld [vmem:[#allocation42_spill] sm:$0xff]  ;;  %v20689_v24 = vld [vmem:[#allocation52_spill] sm:$0xff] }
 0x5f5   :  { %v9431_v1 = vunpack.i.l.bf16 %v20685_v29  ;;  %v17053_v44 = vsel %vm2718_vm1, %v20689_v24, %v9131_v2  ;;  %v20691_v29 = vld [vmem:[#allocation195_spill] sm:$0xff]  ;;  %v9446_v20 = vunpack.i.l.bf16 %v16700_v12 }
 0x5f6   :  { %v17008_v46 = vsel %vm2913_vm5, %v6152_v4, %v9577_v52  ;;  %v17011_v16 = vsel %vm2913_vm5, %v6151_v33, %v9576_v32  ;;  %v20682_v52 = vld [vmem:[#allocation87_spill] sm:$0xff]  ;;  %v20683_v32 = vld [vmem:[#allocation220_spill] sm:$0xff]  ;;  %v20684_v4 = vld [vmem:[#allocation193_spill] sm:$0xff]  ;;  %9754 = vrot.lane.b32.xlu2 %v20687_v19, %s10240_s23 }
 0x5f7   :  { %20677 = vst [vmem:[#allocation144_spill] sm:$0xff] %v17008_v46  ;;  %v17035_v11 = vsel %vm2718_vm1, %v20682_v52, %v9091_v56  ;;  %v9272_v7 = vunpack.i.h.bf16 %v20683_v32  ;;  %v9271_v14 = vunpack.i.l.bf16 %v20683_v32  ;;  %v9107_v33 = vunpack.i.h.bf16 %v20684_v4  ;;  %v20688_v56 = vld [vmem:[#allocation106_spill] sm:$0xff]  ;;  %v17069_v24 = vpop.permute.xlu0 %9519 }
 0x5f8   :  { %20678 = vst [vmem:[#allocation62_spill] sm:$0xff] %v17011_v16  ;;  %v9106_v50 = vunpack.i.l.bf16 %v20684_v4  ;;  %9729 = vrot.lane.b32.xlu0 %v20686_v38, %s10238_s16  ;;  %v17049_v34 = vsel %vm2718_vm1, %v20688_v56, %v9132_v63  ;;  %v17057_v52 = vsel %vm2783_vm2, %v16892_v36, %v9201_v61  ;;  %v17061_v32 = vsel %vm2783_vm2, %v16886_v28, %v9202_v37  ;;  %v20690_v4 = vld [vmem:[#allocation78_spill] sm:$0xff]  ;;  %v17075_v37 = vpop.permute.xlu1 %9494 }
 0x5f9   :  { %v9217_v38 = vunpack.i.h.bf16 %v20691_v29  ;;  %v9216_v63 = vunpack.i.l.bf16 %v20691_v29  ;;  %v20692_v19 = vld [vmem:[#allocation198_spill] sm:$0xff]  ;;  %v6093_v36 = vsel %vm2783_vm2, %v16806_v47, %v9271_v14  ;;  %v6094_v28 = vsel %vm2783_vm2, %v16812_v45, %v9272_v7  ;;  %20693 = vst [vmem:[#allocation66_spill] sm:$0xff] %v17075_v37 }
 0x5fa   :  { %9704 = vrot.lane.b32.xlu1 %v20690_v4, %s10238_s16  ;;  %v9232_v56 = vunpack.i.h.bf16 %v20692_v19  ;;  %v9231_v2 = vunpack.i.l.bf16 %v20692_v19  ;;  %v20694_v16 = vld [vmem:[#allocation14_spill] sm:$0xff]  ;;  %v17083_v19 = vsel %vm2718_vm1, %v20695_v40, %v9106_v50  ;;  %v6158_v41 = vsel %vm2848_vm3, %v6094_v28, %v9432_v6  ;;  %v20700_v40 = vld [vmem:[#allocation223_spill] sm:$0xff]  ;;  %v20701_v28 = vld [vmem:[#allocation36_spill] sm:$0xff] }
 0x5fb   :  { %v9590_v46 = vpop.permute.xlu2 %9589  ;;  %v17079_v29 = vsel %vm2718_vm1, %v20694_v16, %v9107_v33  ;;  %v6157_v43 = vsel %vm2848_vm3, %v6093_v36, %v9431_v1  ;;  %v20696_v47 = vld [vmem:[#allocation194_spill] sm:$0xff]  ;;  %v20699_v16 = vld [vmem:[#allocation196_spill] sm:$0xff]  ;;  %v9287_v50 = vunpack.i.h.bf16 %v20700_v40  ;;  %v9286_v6 = vunpack.i.l.bf16 %v20700_v40 }
 0x5fc   :  { %v9592_v61 = vunpack.i.h.bf16 %v9590_v46  ;;  %v9591_v4 = vunpack.i.l.bf16 %v9590_v46  ;;  %v6071_v1 = vsel %vm2783_vm2, %v16952_v39, %v9216_v63  ;;  %v6072_v36 = vsel %vm2783_vm2, %v16948_v17, %v9217_v38  ;;  %v20702_v39 = vld [vmem:[#allocation49_spill] sm:$0xff]  ;;  %v20703_v17 = vld [vmem:[#allocation104_spill] sm:$0xff]  ;;  %v20707_v33 = vld [vmem:[#allocation206_spill] sm:$0xff] }
 0x5fd   :  { %v9447_v40 = vunpack.i.h.bf16 %v16700_v12  ;;  %v9277_v45 = vunpack.i.h.bf16 %v20707_v33  ;;  %v9276_v12 = vunpack.i.l.bf16 %v20707_v33 }
 0x5fe   :  { %v17090_v7 = vsel %vm2913_vm5, %v6158_v41, %v9592_v61  ;;  %v17093_v46 = vsel %vm2913_vm5, %v6157_v43, %v9591_v4  ;;  %v17105_v41 = vsel %vm2783_vm2, %v16983_v53, %v9231_v2  ;;  %v17109_v43 = vsel %vm2783_vm2, %v16979_v54, %v9232_v56  ;;  %9769 = vrot.lane.b32.xlu2 %v20703_v17, %s10239_s11  ;;  %v20704_v53 = vld [vmem:[#allocation201_spill] sm:$0xff]  ;;  %v20705_v54 = vld [vmem:[#allocation203_spill] sm:$0xff] }
 0x5ff   :  { %20697 = vst [vmem:[#allocation90_spill] sm:$0xff] %v17090_v7  ;;  %v9377_v61 = vunpack.i.h.bf16 %v20701_v28  ;;  %v9376_v4 = vunpack.i.l.bf16 %v20701_v28  ;;  %v9247_v38 = vunpack.i.h.bf16 %v20704_v53  ;;  %v9246_v63 = vunpack.i.l.bf16 %v20704_v53  ;;  %v20706_v28 = vld [vmem:[#allocation85_spill] sm:$0xff]  ;;  %v9535_v14 = vpop.permute.xlu0 %9534 }
 0x600   :  { %20698 = vst [vmem:[#allocation55_spill] sm:$0xff] %v17093_v46  ;;  %9744 = vrot.lane.b32.xlu0 %v20702_v39, %s10238_s16  ;;  %v9262_v56 = vunpack.i.h.bf16 %v20705_v54  ;;  %v9261_v2 = vunpack.i.l.bf16 %v20705_v54  ;;  %v6099_v39 = vsel %vm2783_vm2, %v16851_v30, %v9286_v6  ;;  %v6100_v17 = vsel %vm2783_vm2, %v16858_v58, %v9287_v50  ;;  %v17131_v53 = vpop.permute.xlu1 %9509 }
 0x601   :  { %v9537_v46 = vunpack.i.h.bf16 %v9535_v14  ;;  %v9536_v31 = vunpack.i.l.bf16 %v9535_v14  ;;  %v6136_v0 = vsel %vm2848_vm3, %v6072_v36, %v9377_v61  ;;  %v6164_v33 = vsel %vm2848_vm3, %v6100_v17, %v9447_v40 }
 0x602   :  { %9719 = vrot.lane.b32.xlu1 %v20706_v28, %s10238_s16  ;;  %v6135_v28 = vsel %vm2848_vm3, %v6071_v1, %v9376_v4  ;;  %v6163_v37 = vsel %vm2848_vm3, %v6099_v39, %v9446_v20  ;;  %v6083_v6 = vsel %vm2783_vm2, %v16912_v27, %v9246_v63  ;;  %v20708_v1 = vld [vmem:[#allocation226_spill] sm:$0xff]  ;;  %v9462_v61 = vunpack.i.h.bf16 %v16774_v18  ;;  %v20710_v4 = vld [vmem:[#allocation88_spill] sm:$0xff] }
 0x603   :  { %v9605_v7 = vpop.permute.xlu2 %9604  ;;  %v17138_v30 = vsel %vm2913_vm5, %v6136_v0, %v9537_v46  ;;  %v17141_v58 = vsel %vm2913_vm5, %v6135_v28, %v9536_v31  ;;  %v9302_v20 = vunpack.i.h.bf16 %v20708_v1  ;;  %v9301_v0 = vunpack.i.l.bf16 %v20708_v1  ;;  %v20709_v27 = vld [vmem:[#allocation50_spill] sm:$0xff] }
 0x604   :  { %v9607_v54 = vunpack.i.h.bf16 %v9605_v7  ;;  %v9606_v5 = vunpack.i.l.bf16 %v9605_v7  ;;  %v6084_v7 = vsel %vm2783_vm2, %v16903_v55, %v9247_v38  ;;  %v17157_v31 = vsel %vm2783_vm2, %v16956_v23, %v9262_v56  ;;  %v20714_v56 = vld [vmem:[#allocation163_spill] sm:$0xff] }
 0x605   :  { %v17161_v46 = vsel %vm2783_vm2, %v16960_v42, %v9261_v2  ;;  %v17169_v55 = vsel %vm2783_vm2, %v17019_v3, %v9276_v12  ;;  %v9391_v36 = vunpack.i.l.bf16 %v20709_v27  ;;  %v9461_v23 = vunpack.i.l.bf16 %v16774_v18  ;;  %v20711_v42 = vld [vmem:[#allocation148_spill] sm:$0xff]  ;;  %v20713_v3 = vld [vmem:[#allocation221_spill] sm:$0xff] }
 0x606   :  { %v17144_v50 = vsel %vm2913_vm5, %v6164_v33, %v9607_v54  ;;  %v17147_v14 = vsel %vm2913_vm5, %v6163_v37, %v9606_v5  ;;  %v17165_v5 = vsel %vm2783_vm2, %v17015_v10, %v9277_v45  ;;  %v9392_v37 = vunpack.i.h.bf16 %v20709_v27  ;;  %9784 = vrot.lane.b32.xlu2 %v20711_v42, %s10240_s23  ;;  %v20712_v10 = vld [vmem:[#allocation208_spill] sm:$0xff]  ;;  %v20715_v12 = vld [vmem:[#allocation229_spill] sm:$0xff] }
 0x607   :  { %v9222_v45 = vunpack.i.h.bf16 %v20712_v10  ;;  %v9221_v40 = vunpack.i.l.bf16 %v20712_v10  ;;  %v9382_v38 = vunpack.i.h.bf16 %v20713_v3  ;;  %v9381_v63 = vunpack.i.l.bf16 %v20713_v3  ;;  %v9550_v54 = vpop.permute.xlu0 %9549 }
 0x608   :  { %9759 = vrot.lane.b32.xlu0 %v20710_v4, %s10239_s11  ;;  %v6105_v18 = vsel %vm2783_vm2, %v16877_v13, %v9301_v0  ;;  %v6106_v2 = vsel %vm2783_vm2, %v16882_v51, %v9302_v20  ;;  %v9317_v39 = vunpack.i.h.bf16 %v20715_v12  ;;  %v9316_v17 = vunpack.i.l.bf16 %v20715_v12  ;;  %v17191_v33 = vpop.permute.xlu1 %9524 }
 0x609   :  { %v9552_v1 = vunpack.i.h.bf16 %v9550_v54  ;;  %v9551_v27 = vunpack.i.l.bf16 %v9550_v54  ;;  %v6141_v10 = vsel %vm2848_vm3, %v17105_v41, %v9391_v36  ;;  %v6142_v13 = vsel %vm2848_vm3, %v17109_v43, %v9392_v37  ;;  %v20718_v41 = vld [vmem:[#allocation209_spill] sm:$0xff]  ;;  %v20719_v37 = vld [vmem:[#allocation112_spill] sm:$0xff] }
 0x60a   :  { %9734 = vrot.lane.b32.xlu1 %v20714_v56, %s10238_s16  ;;  %v6170_v51 = vsel %vm2848_vm3, %v6106_v2, %v9462_v61  ;;  %v6169_v20 = vsel %vm2848_vm3, %v6105_v18, %v9461_v23  ;;  %v9407_v61 = vunpack.i.h.bf16 %v20719_v37  ;;  %v9406_v23 = vunpack.i.l.bf16 %v20719_v37  ;;  %v20720_v2 = vld [vmem:[#allocation152_spill] sm:$0xff] }
 0x60b   :  { %v9620_v28 = vpop.permute.xlu2 %9619  ;;  %v17200_v0 = vsel %vm2913_vm5, %v6142_v13, %v9552_v1  ;;  %v17203_v3 = vsel %vm2913_vm5, %v6141_v10, %v9551_v27  ;;  %v6074_v18 = vsel %vm2783_vm2, %v16738_v60, %v9222_v45  ;;  %v6073_v54 = vsel %vm2783_vm2, %v20720_v2, %v9221_v40  ;;  %v20723_v60 = vld [vmem:[#allocation25_spill] sm:$0xff] }
 0x60c   :  { %v9622_v4 = vunpack.i.h.bf16 %v9620_v28  ;;  %v9621_v42 = vunpack.i.l.bf16 %v9620_v28  ;;  %v20721_v28 = vld [vmem:[#allocation212_spill] sm:$0xff]  ;;  %v9477_v10 = vunpack.i.h.bf16 %v16843_v26  ;;  %v9476_v13 = vunpack.i.l.bf16 %v16843_v26  ;;  %v20724_v45 = vld [vmem:[#allocation225_spill] sm:$0xff] }
 0x60d   :  { %v9237_v1 = vunpack.i.h.bf16 %v20721_v28  ;;  %v9236_v27 = vunpack.i.l.bf16 %v20721_v28  ;;  %v9397_v40 = vunpack.i.h.bf16 %v20724_v45  ;;  %v6111_v37 = vsel %vm2783_vm2, %v16940_v57, %v9316_v17  ;;  %v20726_v26 = vld [vmem:[#allocation232_spill] sm:$0xff] }
 0x60e   :  { %v17206_v56 = vsel %vm2913_vm5, %v6170_v51, %v9622_v4  ;;  %v17209_v12 = vsel %vm2913_vm5, %v6169_v20, %v9621_v42  ;;  %v6138_v4 = vsel %vm2848_vm3, %v6074_v18, %v9382_v38  ;;  %v6137_v42 = vsel %vm2848_vm3, %v6073_v54, %v9381_v63  ;;  %v20722_v51 = vld [vmem:[#allocation105_spill] sm:$0xff]  ;;  %9799 = vrot.lane.b32.xlu2 %v20723_v60, %s10239_s11  ;;  %v20725_v63 = vld [vmem:[#allocation98_spill] sm:$0xff] }
 0x60f   :  { %20716 = vst [vmem:[#allocation120_spill] sm:$0xff] %v17206_v56  ;;  %v9396_v20 = vunpack.i.l.bf16 %v20724_v45  ;;  %v6112_v38 = vsel %vm2783_vm2, %v16944_v15, %v9317_v39  ;;  %v9332_v18 = vunpack.i.h.bf16 %v20726_v26  ;;  %v9331_v2 = vunpack.i.l.bf16 %v20726_v26 }
 0x610   :  { %20717 = vst [vmem:[#allocation77_spill] sm:$0xff] %v17209_v12  ;;  %9774 = vrot.lane.b32.xlu0 %v20722_v51, %s10240_s23  ;;  %v6148_v54 = vsel %vm2848_vm3, %v6084_v7, %v9407_v61  ;;  %v6147_v28 = vsel %vm2848_vm3, %v6083_v6, %v9406_v23  ;;  %v9565_v51 = vpop.permute.xlu0 %9564  ;;  %v9540_v45 = vpop.permute.xlu1 %9539  ;;  %v6176_v15 = vsel %vm2848_vm3, %v6112_v38, %v9477_v10  ;;  %v20727_v23 = vld [vmem:[#allocation27_spill] sm:$0xff]  ;;  %v20729_v38 = vld [vmem:[#allocation157_spill] sm:$0xff] }
 0x611   :  { %v9567_v43 = vunpack.i.h.bf16 %v9565_v51  ;;  %v9566_v36 = vunpack.i.l.bf16 %v9565_v51  ;;  %v6175_v39 = vsel %vm2848_vm3, %v6111_v37, %v9476_v13  ;;  %v9541_v56 = vunpack.i.l.bf16 %v9540_v45 }
 0x612   :  { %9749 = vrot.lane.b32.xlu1 %v20725_v63, %s10239_s11  ;;  %v9542_v63 = vunpack.i.h.bf16 %v9540_v45  ;;  %v9422_v26 = vunpack.i.h.bf16 %v20727_v23  ;;  %v9421_v10 = vunpack.i.l.bf16 %v20727_v23 }
 0x613   :  { %v9635_v60 = vpop.permute.xlu2 %9634  ;;  %v17244_v12 = vsel %vm2913_vm5, %v6148_v54, %v9567_v43  ;;  %v17247_v7 = vsel %vm2913_vm5, %v6147_v28, %v9566_v36  ;;  %v17261_v37 = vsel %vm2913_vm5, %v6137_v42, %v9541_v56  ;;  %v20728_v43 = vld [vmem:[#allocation74_spill] sm:$0xff]  ;;  %v6079_v54 = vsel %vm2783_vm2, %v20729_v38, %v9236_v27  ;;  %v20731_v56 = vld [vmem:[#allocation143_spill] sm:$0xff]  ;;  %v20733_v42 = vld [vmem:[#allocation228_spill] sm:$0xff] }
 0x614   :  { %v9637_v57 = vunpack.i.h.bf16 %v9635_v60  ;;  %v9636_v17 = vunpack.i.l.bf16 %v9635_v60  ;;  %v17258_v13 = vsel %vm2913_vm5, %v6138_v4, %v9542_v63  ;;  %v6080_v36 = vsel %vm2783_vm2, %v20728_v43, %v9237_v1  ;;  %v20730_v28 = vld [vmem:[#allocation214_spill] sm:$0xff]  ;;  %v20732_v1 = vld [vmem:[#allocation4_spill] sm:$0xff] }
 0x615   :  { %v9252_v51 = vunpack.i.h.bf16 %v20730_v28  ;;  %v9251_v60 = vunpack.i.l.bf16 %v20730_v28  ;;  %v6144_v45 = vsel %vm2848_vm3, %v6080_v36, %v9397_v40  ;;  %v9492_v4 = vunpack.i.h.bf16 %v16917_v62 }
 0x616   :  { %v17250_v6 = vsel %vm2913_vm5, %v6176_v15, %v9637_v57  ;;  %v17253_v61 = vsel %vm2913_vm5, %v6175_v39, %v9636_v17  ;;  %v6143_v57 = vsel %vm2848_vm3, %v6079_v54, %v9396_v20  ;;  %v9491_v17 = vunpack.i.l.bf16 %v16917_v62  ;;  %9814 = vrot.lane.b32.xlu2 %v20732_v1, %s10240_s23  ;;  %v20734_v20 = vld [vmem:[#allocation23_spill] sm:$0xff]  ;;  %v20735_v62 = vld [vmem:[#allocation234_spill] sm:$0xff] }
 0x617   :  { %v9412_v27 = vunpack.i.h.bf16 %v20733_v42  ;;  %v9411_v15 = vunpack.i.l.bf16 %v20733_v42  ;;  %v6117_v39 = vsel %vm2848_vm3, %v16966_v49, %v9331_v2  ;;  %v6118_v40 = vsel %vm2848_vm3, %v16970_v22, %v9332_v18 }
 0x618   :  { %9789 = vrot.lane.b32.xlu0 %v20731_v56, %s10239_s11  ;;  %v9347_v63 = vunpack.i.h.bf16 %v20735_v62  ;;  %v9346_v23 = vunpack.i.l.bf16 %v20735_v62  ;;  %v6154_v43 = vsel %vm2848_vm3, %v17157_v31, %v9422_v26  ;;  %v6153_v36 = vsel %vm2848_vm3, %v17161_v46, %v9421_v10  ;;  %v9580_v38 = vpop.permute.xlu0 %9579  ;;  %v9555_v2 = vpop.permute.xlu1 %9554 }
 0x619   :  { %v9582_v28 = vunpack.i.h.bf16 %v9580_v38  ;;  %v9581_v49 = vunpack.i.l.bf16 %v9580_v38  ;;  %v6182_v18 = vsel %vm2913_vm5, %v6118_v40, %v9492_v4  ;;  %v6181_v1 = vsel %vm2913_vm5, %v6117_v39, %v9491_v17 }
 0x61a   :  { %9764 = vrot.lane.b32.xlu1 %v20734_v20, %s10240_s23  ;;  %v9557_v42 = vunpack.i.h.bf16 %v9555_v2  ;;  %v9556_v20 = vunpack.i.l.bf16 %v9555_v2  ;;  %v9437_v10 = vunpack.i.h.bf16 %v16778_v35  ;;  %v9436_v4 = vunpack.i.l.bf16 %v16778_v35 }
 0x61b   :  { %v9650_v54 = vpop.permute.xlu2 %9649  ;;  %v17294_v62 = vsel %vm2913_vm5, %v6154_v43, %v9582_v28  ;;  %v17297_v31 = vsel %vm2913_vm5, %v6153_v36, %v9581_v49  ;;  %v6086_v40 = vsel %vm2783_vm2, %v17031_v21, %v9252_v51  ;;  %v6085_v43 = vsel %vm2783_vm2, %v17035_v11, %v9251_v60  ;;  %v20736_v36 = vld [vmem:[#allocation216_spill] sm:$0xff]  ;;  %v20738_v21 = vld [vmem:[#allocation131_spill] sm:$0xff] }
 0x61c   :  { %v9652_v56 = vunpack.i.h.bf16 %v9650_v54  ;;  %v9651_v22 = vunpack.i.l.bf16 %v9650_v54  ;;  %v17308_v17 = vsel %vm2913_vm5, %v6143_v57, %v9556_v20  ;;  %v17311_v39 = vsel %vm2913_vm5, %v6144_v45, %v9557_v42  ;;  %v20737_v45 = vld [vmem:[#allocation26_spill] sm:$0xff]  ;;  %v20739_v51 = vld [vmem:[#allocation231_spill] sm:$0xff] }
 0x61d   :  { %v9267_v38 = vunpack.i.h.bf16 %v20736_v36  ;;  %v9266_v54 = vunpack.i.l.bf16 %v20736_v36  ;;  %v6150_v28 = vsel %vm2848_vm3, %v6086_v40, %v9412_v27  ;;  %v6149_v35 = vsel %vm2848_vm3, %v6085_v43, %v9411_v15  ;;  %v20740_v15 = vld [vmem:[#allocation24_spill] sm:$0xff] }
 0x61e   :  { %v17300_v46 = vsel %vm2978_vm6, %v6182_v18, %v9652_v56  ;;  %v17303_v26 = vsel %vm2978_vm6, %v6181_v1, %v9651_v22  ;;  %v9507_v57 = vunpack.i.h.bf16 %v16993_v9  ;;  %v9506_v49 = vunpack.i.l.bf16 %v16993_v9  ;;  %9829 = vrot.lane.b32.xlu2 %v20738_v21, %s10239_s11  ;;  %v20741_v9 = vld [vmem:[#allocation82_spill] sm:$0xff] }
 0x61f   :  { %v9427_v11 = vunpack.i.h.bf16 %v20739_v51  ;;  %v9426_v60 = vunpack.i.l.bf16 %v20739_v51  ;;  %v6123_v2 = vsel %vm2848_vm3, %v17023_v59, %v9346_v23  ;;  %v6124_v27 = vsel %vm2848_vm3, %v17027_v48, %v9347_v63 }
 0x620   :  { %9804 = vrot.lane.b32.xlu0 %v20737_v45, %s10240_s23  ;;  %v9362_v56 = vunpack.i.h.bf16 %v20741_v9  ;;  %v9361_v22 = vunpack.i.l.bf16 %v20741_v9  ;;  %v6160_v18 = vsel %vm2848_vm3, %v17165_v5, %v9437_v10  ;;  %v6159_v1 = vsel %vm2848_vm3, %v17169_v55, %v9436_v4  ;;  %v9595_v42 = vpop.permute.xlu0 %9594  ;;  %v9570_v23 = vpop.permute.xlu1 %9569 }
 0x621   :  { %v9597_v40 = vunpack.i.h.bf16 %v9595_v42  ;;  %v9596_v59 = vunpack.i.l.bf16 %v9595_v42  ;;  %v6188_v63 = vsel %vm2913_vm5, %v6124_v27, %v9507_v57  ;;  %v6187_v36 = vsel %vm2913_vm5, %v6123_v2, %v9506_v49 }
 0x622   :  { %9779 = vrot.lane.b32.xlu1 %v20740_v15, %s10239_s11  ;;  %v9572_v45 = vunpack.i.h.bf16 %v9570_v23  ;;  %v9571_v21 = vunpack.i.l.bf16 %v9570_v23  ;;  %v9452_v4 = vunpack.i.h.bf16 %v16847_v8  ;;  %v9451_v57 = vunpack.i.l.bf16 %v16847_v8 }
 0x623   :  { %v9665_v20 = vpop.permute.xlu2 %9664  ;;  %v17344_v51 = vsel %vm2913_vm5, %v6160_v18, %v9597_v40  ;;  %v17347_v5 = vsel %vm2913_vm5, %v6159_v1, %v9596_v59  ;;  %v20742_v27 = vunpack.i.h.bf16 %v20718_v41  ;;  %v20743_v9 = vunpack.i.l.bf16 %v20718_v41  ;;  %v20744_v1 = vld [vmem:[#allocation211_spill] sm:$0xff]  ;;  %v20746_v41 = vld [vmem:[#allocation100_spill] sm:$0xff] }
 0x624   :  { %v9667_v43 = vunpack.i.h.bf16 %v9665_v20  ;;  %v9666_v48 = vunpack.i.l.bf16 %v9665_v20  ;;  %v17358_v49 = vsel %vm2913_vm5, %v6149_v35, %v9571_v21  ;;  %v17361_v2 = vsel %vm2913_vm5, %v6150_v28, %v9572_v45 }
 0x625   :  { %v6102_v15 = vsel %vm2783_vm2, %v17049_v34, %v20742_v27  ;;  %v6101_v18 = vsel %vm2783_vm2, %v17053_v44, %v20743_v9  ;;  %v9307_v42 = vunpack.i.h.bf16 %v20744_v1  ;;  %v9306_v8 = vunpack.i.l.bf16 %v20744_v1  ;;  %v20745_v34 = vld [vmem:[#allocation93_spill] sm:$0xff]  ;;  %v20747_v44 = vld [vmem:[#allocation218_spill] sm:$0xff] }
 0x626   :  { %v17350_v55 = vsel %vm2978_vm6, %v6188_v63, %v9667_v43  ;;  %v17353_v10 = vsel %vm2978_vm6, %v6187_v36, %v9666_v48  ;;  %v6092_v35 = vsel %vm2783_vm2, %v17079_v29, %v9267_v38  ;;  %v6091_v28 = vsel %vm2783_vm2, %v17083_v19, %v9266_v54  ;;  %9844 = vrot.lane.b32.xlu2 %v20746_v41, %s10240_s23  ;;  %v20748_v19 = vld [vmem:[#allocation8_spill] sm:$0xff] }
 0x627   :  { %v9522_v20 = vunpack.i.h.bf16 %v17069_v24  ;;  %v9521_v40 = vunpack.i.l.bf16 %v17069_v24  ;;  %v9282_v59 = vunpack.i.h.bf16 %v20747_v44  ;;  %v9281_v23 = vunpack.i.l.bf16 %v20747_v44 }
 0x628   :  { %9819 = vrot.lane.b32.xlu0 %v20745_v34, %s10239_s11  ;;  %v6156_v43 = vsel %vm2848_vm3, %v6092_v35, %v9427_v11  ;;  %v6155_v29 = vsel %vm2848_vm3, %v6091_v28, %v9426_v60  ;;  %v6129_v24 = vsel %vm2848_vm3, %v17057_v52, %v9361_v22  ;;  %v6130_v38 = vsel %vm2848_vm3, %v17061_v32, %v9362_v56  ;;  %v9610_v63 = vpop.permute.xlu0 %9609  ;;  %v9585_v11 = vpop.permute.xlu1 %9584 }
 0x629   :  { %v6166_v54 = vsel %vm2848_vm3, %v6102_v15, %v9452_v4  ;;  %v6165_v48 = vsel %vm2848_vm3, %v6101_v18, %v9451_v57  ;;  %v9612_v45 = vunpack.i.h.bf16 %v9610_v63  ;;  %v9611_v21 = vunpack.i.l.bf16 %v9610_v63  ;;  %v20751_v57 = vld [vmem:[#allocation233_spill] sm:$0xff] }
 0x62a   :  { %9794 = vrot.lane.b32.xlu1 %v20748_v19, %s10240_s23  ;;  %v6194_v9 = vsel %vm2913_vm5, %v6130_v38, %v9522_v20  ;;  %v6193_v1 = vsel %vm2913_vm5, %v6129_v24, %v9521_v40  ;;  %v9587_v35 = vunpack.i.h.bf16 %v9585_v11  ;;  %v9586_v52 = vunpack.i.l.bf16 %v9585_v11  ;;  %v20752_v40 = vld [vmem:[#allocation108_spill] sm:$0xff]  ;;  %v20754_v19 = vld [vmem:[#allocation45_spill] sm:$0xff] }
 0x62b   :  { %v9680_v36 = vpop.permute.xlu2 %9679  ;;  %v17398_v22 = vsel %vm2913_vm5, %v6166_v54, %v9612_v45  ;;  %v17401_v32 = vsel %vm2913_vm5, %v6165_v48, %v9611_v21  ;;  %v9442_v15 = vunpack.i.h.bf16 %v20751_v57  ;;  %v9441_v18 = vunpack.i.l.bf16 %v20751_v57  ;;  %v20756_v54 = vld [vmem:[#allocation6_spill] sm:$0xff]  ;;  %v20758_v63 = vld [vmem:[#allocation121_spill] sm:$0xff]  ;;  %v20760_v45 = vld [vmem:[#allocation159_spill] sm:$0xff] }
 0x62c   :  { %v9682_v27 = vunpack.i.h.bf16 %v9680_v36  ;;  %v9681_v60 = vunpack.i.l.bf16 %v9680_v36  ;;  %20749 = vst [vmem:[#allocation129_spill] sm:$0xff] %v17398_v22  ;;  %v17412_v28 = vsel %vm2913_vm5, %v6155_v29, %v9586_v52  ;;  %v17415_v20 = vsel %vm2913_vm5, %v6156_v43, %v9587_v35  ;;  %v20764_v57 = vld [vmem:[#allocation114_spill] sm:$0xff] }
 0x62d   :  { %20750 = vst [vmem:[#allocation39_spill] sm:$0xff] %v17401_v32  ;;  %v9012_v34 = vunpack.i.h.bf16 %v20752_v40  ;;  %v9011_v41 = vunpack.i.l.bf16 %v20752_v40  ;;  %v20753_v44 = vunpack.i.h.bf16 %v20696_v47  ;;  %v20755_v38 = vunpack.i.l.bf16 %v20696_v47  ;;  %v20762_v47 = vld [vmem:[#allocation103_spill] sm:$0xff] }
 0x62e   :  { %v17404_v56 = vsel %vm2978_vm6, %v6194_v9, %v9682_v27  ;;  %v17407_v4 = vsel %vm2978_vm6, %v6193_v1, %v9681_v60  ;;  %v20757_v29 = vunpack.i.h.bf16 %v20699_v16  ;;  %v20759_v36 = vunpack.i.l.bf16 %v20699_v16  ;;  %v20761_v60 = vld [vmem:[#allocation147_spill] sm:$0xff]  ;;  %9859 = vrot.lane.b32.xlu2 %v20762_v47, %s10239_s11 }
 0x62f   :  { %v6044_v24 = vsel %vm2718_vm1, %v20754_v19, %v20753_v44  ;;  %v6043_v48 = vsel %vm2718_vm1, %v20756_v54, %v20755_v38  ;;  %v9467_v11 = vunpack.i.h.bf16 %v16923_v25  ;;  %v9466_v27 = vunpack.i.l.bf16 %v16923_v25  ;;  %v20763_v9 = vld [vmem:[#allocation199_spill] sm:$0xff] }
 0x630   :  { %v6034_v43 = vsel %vm2718_vm1, %v20758_v63, %v20757_v29  ;;  %v6033_v21 = vsel %vm2718_vm1, %v20760_v45, %v20759_v36  ;;  %9834 = vrot.lane.b32.xlu0 %v20761_v60, %s10240_s23  ;;  %v9137_v1 = vunpack.i.h.bf16 %v20763_v9  ;;  %v9136_v35 = vunpack.i.l.bf16 %v20763_v9  ;;  %v9625_v38 = vpop.permute.xlu0 %9624  ;;  %v9600_v36 = vpop.permute.xlu1 %9599  ;;  %v20770_v9 = vld [vmem:[#allocation32_spill] sm:$0xff] }
 0x631   :  { %v6098_v52 = vsel %vm2783_vm2, %v6034_v43, %v9282_v59  ;;  %v6097_v16 = vsel %vm2783_vm2, %v6033_v21, %v9281_v23  ;;  %v6108_v40 = vsel %vm2783_vm2, %v6044_v24, %v9307_v42  ;;  %v6107_v25 = vsel %vm2783_vm2, %v6043_v48, %v9306_v8  ;;  %v20769_v24 = vld [vmem:[#allocation200_spill] sm:$0xff] }
 0x632   :  { %9809 = vrot.lane.b32.xlu1 %v20764_v57, %s10239_s11  ;;  %v6162_v44 = vsel %vm2848_vm3, %v6098_v52, %v9442_v15  ;;  %v6161_v19 = vsel %vm2848_vm3, %v6097_v16, %v9441_v18  ;;  %v9627_v29 = vunpack.i.h.bf16 %v9625_v38  ;;  %v9626_v63 = vunpack.i.l.bf16 %v9625_v38  ;;  %v20772_v16 = vld [vmem:[#allocation115_spill] sm:$0xff] }
 0x633   :  { %v9695_v54 = vpop.permute.xlu2 %9694  ;;  %v6172_v23 = vsel %vm2848_vm3, %v6108_v40, %v9467_v11  ;;  %v6171_v43 = vsel %vm2848_vm3, %v6107_v25, %v9466_v27  ;;  %v9602_v21 = vunpack.i.h.bf16 %v9600_v36  ;;  %v9601_v60 = vunpack.i.l.bf16 %v9600_v36  ;;  %v20774_v40 = vld [vmem:[#allocation126_spill] sm:$0xff]  ;;  %v20775_v25 = vld [vmem:[#allocation17_spill] sm:$0xff]  ;;  %v20778_v36 = vld [vmem:[#allocation219_spill] sm:$0xff] }
 0x634   :  { %v9697_v45 = vunpack.i.h.bf16 %v9695_v54  ;;  %v9696_v59 = vunpack.i.l.bf16 %v9695_v54  ;;  %v17454_v42 = vsel %vm2913_vm5, %v6172_v23, %v9627_v29  ;;  %v17457_v8 = vsel %vm2913_vm5, %v6171_v43, %v9626_v63  ;;  %v20776_v54 = vld [vmem:[#allocation235_spill] sm:$0xff]  ;;  %v20779_v23 = vld [vmem:[#allocation154_spill] sm:$0xff] }
 0x635   :  { %20765 = vst [vmem:[#allocation53_spill] sm:$0xff] %v17454_v42  ;;  %v9177_v48 = vunpack.i.h.bf16 %v20769_v24  ;;  %v9176_v11 = vunpack.i.l.bf16 %v20769_v24  ;;  %v17470_v27 = vsel %vm2913_vm5, %v6161_v19, %v9601_v60  ;;  %v17473_v47 = vsel %vm2913_vm5, %v6162_v44, %v9602_v21  ;;  %v20777_v44 = vld [vmem:[#allocation165_spill] sm:$0xff]  ;;  %v20780_v43 = vld [vmem:[#allocation135_spill] sm:$0xff] }
 0x636   :  { %20766 = vst [vmem:[#allocation99_spill] sm:$0xff] %v17457_v8  ;;  %v17461_v15 = vsel %vm2978_vm6, %v17138_v30, %v9697_v45  ;;  %v17465_v18 = vsel %vm2978_vm6, %v17141_v58, %v9696_v59  ;;  %v20771_v52 = vunpack.i.h.bf16 %v20770_v9  ;;  %v20773_v57 = vunpack.i.l.bf16 %v20770_v9  ;;  %9874 = vrot.lane.b32.xlu2 %v20780_v43, %s10239_s11  ;;  %v20782_v60 = vld [vmem:[#allocation3_spill] sm:$0xff] }
 0x637   :  { %20767 = vst [vmem:[#allocation80_spill] sm:$0xff] %v17461_v15  ;;  %v17485_v38 = vsel %vm2718_vm1, %v20775_v25, %v9012_v34  ;;  %v17489_v19 = vsel %vm2718_vm1, %v20776_v54, %v9011_v41  ;;  %v9297_v45 = vunpack.i.h.bf16 %v20778_v36  ;;  %v9296_v59 = vunpack.i.l.bf16 %v20778_v36  ;;  %v20781_v34 = vld [vmem:[#allocation9_spill] sm:$0xff]  ;;  %v20783_v24 = vld [vmem:[#allocation123_spill] sm:$0xff]  ;;  %v20787_v36 = vld [vmem:[#allocation202_spill] sm:$0xff] }
 0x638   :  { %20768 = vst [vmem:[#allocation19_spill] sm:$0xff] %v17465_v18  ;;  %v5984_v30 = vsel %vm2653_vm0, %v20772_v16, %v20771_v52  ;;  %v5983_v58 = vsel %vm2653_vm0, %v20774_v40, %v20773_v57  ;;  %9849 = vrot.lane.b32.xlu0 %v20779_v23, %s10239_s11  ;;  %v6040_v21 = vsel %vm2718_vm1, %v20781_v34, %v9137_v1  ;;  %v9457_v9 = vunpack.i.h.bf16 %v20783_v24  ;;  %v20784_v16 = vld [vmem:[#allocation95_spill] sm:$0xff]  ;;  %v20785_v57 = vld [vmem:[#allocation73_spill] sm:$0xff]  ;;  %v17513_v43 = vpop.permute.xlu0 %9639  ;;  %v9615_v63 = vpop.permute.xlu1 %9614  ;;  %v20791_v15 = vld [vmem:[#allocation222_spill] sm:$0xff] }
 0x639   :  { %v6039_v41 = vsel %vm2718_vm1, %v20782_v60, %v9136_v35  ;;  %v9456_v52 = vunpack.i.l.bf16 %v20783_v24  ;;  %v6056_v40 = vsel %vm2783_vm2, %v20785_v57, %v9177_v48  ;;  %v20786_v25 = vld [vmem:[#allocation35_spill] sm:$0xff]  ;;  %v9152_v23 = vunpack.i.h.bf16 %v20787_v36 }
 0x63a   :  { %9824 = vrot.lane.b32.xlu1 %v20784_v16, %s10240_s23  ;;  %v6055_v54 = vsel %vm2783_vm2, %v20786_v25, %v9176_v11  ;;  %v9151_v1 = vunpack.i.l.bf16 %v20787_v36  ;;  %v20788_v34 = vld [vmem:[#allocation215_spill] sm:$0xff]  ;;  %v6104_v42 = vsel %vm2783_vm2, %v6040_v21, %v9297_v45  ;;  %v6103_v48 = vsel %vm2783_vm2, %v6039_v41, %v9296_v59 }
 0x63b   :  { %v9710_v35 = vpop.permute.xlu2 %9709  ;;  %v9337_v60 = vunpack.i.h.bf16 %v20788_v34  ;;  %v9336_v24 = vunpack.i.l.bf16 %v20788_v34  ;;  %v9617_v57 = vunpack.i.h.bf16 %v9615_v63  ;;  %v9616_v11 = vunpack.i.l.bf16 %v9615_v63 }
 0x63c   :  { %v9712_v29 = vunpack.i.h.bf16 %v9710_v35  ;;  %v9711_v16 = vunpack.i.l.bf16 %v9710_v35  ;;  %v6168_v25 = vsel %vm2848_vm3, %v6104_v42, %v9457_v9  ;;  %v6167_v36 = vsel %vm2848_vm3, %v6103_v48, %v9456_v52 }
 0x63d   :  { %v9312_v35 = vunpack.i.h.bf16 %v20791_v15  ;;  %v9311_v45 = vunpack.i.l.bf16 %v20791_v15  ;;  %v17532_v59 = vsel %vm2913_vm5, %v6167_v36, %v9616_v11  ;;  %v17535_v63 = vsel %vm2913_vm5, %v6168_v25, %v9617_v57  ;;  %v20797_v11 = vld [vmem:[#allocation41_spill] sm:$0xff]  ;;  %v20798_v57 = vld [vmem:[#allocation158_spill] sm:$0xff] }
 0x63e   :  { %v17523_v8 = vsel %vm2978_vm6, %v17200_v0, %v9712_v29  ;;  %v17527_v34 = vsel %vm2978_vm6, %v17203_v3, %v9711_v16  ;;  %20792 = vst [vmem:[#allocation79_spill] sm:$0xff] %v17532_v59  ;;  %v6046_v42 = vsel %vm2718_vm1, %v5984_v30, %v9152_v23  ;;  %v6045_v21 = vsel %vm2718_vm1, %v5983_v58, %v9151_v1  ;;  %v20794_v0 = vld [vmem:[#allocation94_spill] sm:$0xff]  ;;  %v20795_v3 = vld [vmem:[#allocation204_spill] sm:$0xff] }
 0x63f   :  { %20789 = vst [vmem:[#allocation162_spill] sm:$0xff] %v17523_v8  ;;  %v9192_v29 = vunpack.i.h.bf16 %v20794_v0  ;;  %v9191_v41 = vunpack.i.l.bf16 %v20794_v0  ;;  %v9167_v9 = vunpack.i.h.bf16 %v20795_v3  ;;  %v9166_v52 = vunpack.i.l.bf16 %v20795_v3  ;;  %v20796_v16 = vld [vmem:[#allocation66_spill] sm:$0xff]  ;;  %9889 = vrot.lane.b32.xlu2 %v20798_v57, %s10240_s23  ;;  %v20799_v23 = vld [vmem:[#allocation92_spill] sm:$0xff]  ;;  %v20801_v0 = vld [vmem:[#allocation217_spill] sm:$0xff] }
 0x640   :  { %20790 = vst [vmem:[#allocation22_spill] sm:$0xff] %v17527_v34  ;;  %v9497_v15 = vunpack.i.h.bf16 %v20796_v16  ;;  %v9496_v48 = vunpack.i.l.bf16 %v20796_v16  ;;  %9864 = vrot.lane.b32.xlu0 %v20797_v11, %s10240_s23  ;;  %v6120_v30 = vsel %vm2848_vm3, %v6056_v40, %v9337_v60  ;;  %v6119_v58 = vsel %vm2848_vm3, %v6055_v54, %v9336_v24  ;;  %v20800_v36 = vld [vmem:[#allocation38_spill] sm:$0xff]  ;;  %v20802_v40 = vld [vmem:[#allocation224_spill] sm:$0xff] }
 0x641   :  { %20793 = vst [vmem:[#allocation146_spill] sm:$0xff] %v17535_v63  ;;  %v9472_v1 = vunpack.i.h.bf16 %v20799_v23  ;;  %v9471_v25 = vunpack.i.l.bf16 %v20799_v23  ;;  %v9352_v3 = vunpack.i.h.bf16 %v20801_v0  ;;  %v9351_v16 = vunpack.i.l.bf16 %v20801_v0  ;;  %v9630_v63 = vpop.permute.xlu1 %9629 }
 0x642   :  { %9839 = vrot.lane.b32.xlu1 %v20800_v36, %s10239_s11  ;;  %v6110_v11 = vsel %vm2783_vm2, %v6046_v42, %v9312_v35  ;;  %v6109_v8 = vsel %vm2783_vm2, %v6045_v21, %v9311_v45  ;;  %v9655_v57 = vpop.permute.xlu0 %9654  ;;  %v9327_v54 = vunpack.i.h.bf16 %v20802_v40  ;;  %v9326_v60 = vunpack.i.l.bf16 %v20802_v40  ;;  %v20803_v40 = vld [vmem:[#allocation33_spill] sm:$0xff] }
 0x643   :  { %v17559_v34 = vpop.permute.xlu2 %9724  ;;  %v9657_v24 = vunpack.i.h.bf16 %v9655_v57  ;;  %v9656_v23 = vunpack.i.l.bf16 %v9655_v57  ;;  %v6184_v36 = vsel %vm2913_vm5, %v6120_v30, %v9497_v15  ;;  %v6183_v59 = vsel %vm2913_vm5, %v6119_v58, %v9496_v48 }
 0x644   :  { %v9632_v18 = vunpack.i.h.bf16 %v9630_v63  ;;  %v9631_v0 = vunpack.i.l.bf16 %v9630_v63  ;;  %v6174_v35 = vsel %vm2848_vm3, %v6110_v11, %v9472_v1  ;;  %v6173_v45 = vsel %vm2848_vm3, %v6109_v8, %v9471_v25  ;;  %v20806_v63 = vld [vmem:[#allocation141_spill] sm:$0xff]  ;;  %v20807_v8 = vld [vmem:[#allocation63_spill] sm:$0xff] }
 0x645   :  { %v17568_v42 = vsel %vm2978_vm6, %v6184_v36, %v9657_v24  ;;  %v17571_v21 = vsel %vm2978_vm6, %v6183_v59, %v9656_v23  ;;  %v9487_v22 = vunpack.i.h.bf16 %v20803_v40  ;;  %v9486_v57 = vunpack.i.l.bf16 %v20803_v40  ;;  %v20808_v25 = vld [vmem:[#allocation205_spill] sm:$0xff]  ;;  %v20809_v36 = vld [vmem:[#allocation60_spill] sm:$0xff] }
 0x646   :  { %v17576_v15 = vsel %vm2913_vm5, %v6173_v45, %v9631_v0  ;;  %v17579_v48 = vsel %vm2913_vm5, %v6174_v35, %v9632_v18  ;;  %v6062_v30 = vsel %vm2783_vm2, %v20806_v63, %v9192_v29  ;;  %v6061_v58 = vsel %vm2783_vm2, %v20807_v8, %v9191_v41  ;;  %v20810_v29 = vld [vmem:[#allocation5_spill] sm:$0xff]  ;;  %v20811_v41 = vld [vmem:[#allocation207_spill] sm:$0xff] }
 0x647   :  { %20804 = vst [vmem:[#allocation51_spill] sm:$0xff] %v17576_v15  ;;  %v6052_v59 = vsel %vm2783_vm2, %v17485_v38, %v9167_v9  ;;  %v6051_v1 = vsel %vm2783_vm2, %v17489_v19, %v9166_v52  ;;  %v9207_v11 = vunpack.i.h.bf16 %v20808_v25  ;;  %v9206_v24 = vunpack.i.l.bf16 %v20808_v25  ;;  %9904 = vrot.lane.b32.xlu2 %v20810_v29, %s10240_s23  ;;  %v20812_v52 = vld [vmem:[#allocation2_spill] sm:$0xff] }
 0x648   :  { %20805 = vst [vmem:[#allocation149_spill] sm:$0xff] %v17579_v48  ;;  %v9512_v23 = vunpack.i.h.bf16 %v17131_v53  ;;  %v9511_v18 = vunpack.i.l.bf16 %v17131_v53  ;;  %9879 = vrot.lane.b32.xlu0 %v20809_v36, %s10240_s23  ;;  %v9182_v0 = vunpack.i.h.bf16 %v20811_v41  ;;  %v9181_v38 = vunpack.i.l.bf16 %v20811_v41 }
 0x649   :  { %v6116_v19 = vsel %vm2848_vm3, %v6052_v59, %v9327_v54  ;;  %v6115_v9 = vsel %vm2848_vm3, %v6051_v1, %v9326_v60  ;;  %v6126_v35 = vsel %vm2848_vm3, %v6062_v30, %v9352_v3  ;;  %v6125_v53 = vsel %vm2848_vm3, %v6061_v58, %v9351_v16  ;;  %v20813_v30 = vld [vmem:[#allocation81_spill] sm:$0xff] }
 0x64a   :  { %9854 = vrot.lane.b32.xlu1 %v20812_v52, %s10240_s23  ;;  %v6180_v45 = vsel %vm2913_vm5, %v6116_v19, %v9487_v22  ;;  %v6179_v40 = vsel %vm2913_vm5, %v6115_v9, %v9486_v57  ;;  %v9670_v63 = vpop.permute.xlu0 %9669  ;;  %v6190_v60 = vsel %vm2913_vm5, %v6126_v35, %v9512_v23  ;;  %v6189_v59 = vsel %vm2913_vm5, %v6125_v53, %v9511_v18  ;;  %v20814_v9 = vld [vmem:[#allocation76_spill] sm:$0xff]  ;;  %v20816_v53 = vld [vmem:[#allocation59_spill] sm:$0xff] }
 0x64b   :  { %v9740_v8 = vpop.permute.xlu2 %9739  ;;  %v9672_v25 = vunpack.i.h.bf16 %v9670_v63  ;;  %v9671_v36 = vunpack.i.l.bf16 %v9670_v63  ;;  %v9367_v58 = vunpack.i.h.bf16 %v20813_v30  ;;  %v9366_v23 = vunpack.i.l.bf16 %v20813_v30  ;;  %v20824_v30 = vld [vmem:[#allocation179_spill] sm:$0xff] }
 0x64c   :  { %v9645_v29 = vpop.permute.xlu1 %9644  ;;  %v9742_v41 = vunpack.i.h.bf16 %v9740_v8  ;;  %v9741_v54 = vunpack.i.l.bf16 %v9740_v8  ;;  %v20815_v35 = vunpack.i.h.bf16 %v20814_v9  ;;  %v20817_v63 = vunpack.i.l.bf16 %v20814_v9  ;;  %v20818_v8 = vld [vmem:[#allocation97_spill] sm:$0xff]  ;;  %v20825_v9 = vld [vmem:[#allocation140_spill] sm:$0xff] }
 0x64d   :  { %v9647_v1 = vunpack.i.h.bf16 %v9645_v29  ;;  %v9646_v52 = vunpack.i.l.bf16 %v9645_v29  ;;  %v17610_v3 = vsel %vm2978_vm6, %v6190_v60, %v9672_v25  ;;  %v17613_v22 = vsel %vm2978_vm6, %v6189_v59, %v9671_v36  ;;  %v20819_v25 = vld [vmem:[#allocation227_spill] sm:$0xff]  ;;  %v20823_v60 = vld [vmem:[#allocation236_spill] sm:$0xff] }
 0x64e   :  { %v17617_v16 = vsel %vm2978_vm6, %v17294_v62, %v9742_v41  ;;  %v17621_v57 = vsel %vm2978_vm6, %v17297_v31, %v9741_v54  ;;  %v6006_v62 = vsel %vm2718_vm1, %v20816_v53, %v20815_v35  ;;  %v6005_v31 = vsel %vm2718_vm1, %v20818_v8, %v20817_v63  ;;  %v20821_v41 = vld [vmem:[#allocation83_spill] sm:$0xff]  ;;  %v20826_v63 = vld [vmem:[#allocation28_spill] sm:$0xff] }
 0x64f   :  { %v17626_v18 = vsel %vm2978_vm6, %v6179_v40, %v9646_v52  ;;  %v17629_v19 = vsel %vm2978_vm6, %v6180_v45, %v9647_v1  ;;  %v9342_v36 = vunpack.i.h.bf16 %v20819_v25  ;;  %v9341_v29 = vunpack.i.l.bf16 %v20819_v25  ;;  %9919 = vrot.lane.b32.xlu2 %v20825_v9, %s10238_s16  ;;  %v20827_v25 = vld [vmem:[#allocation168_spill] sm:$0xff] }
 0x650   :  { %v20820_v40 = vunpack.i.h.bf16 %v20777_v44  ;;  %v20822_v54 = vunpack.i.l.bf16 %v20777_v44  ;;  %v9527_v1 = vunpack.i.h.bf16 %v17191_v33  ;;  %v9526_v52 = vunpack.i.l.bf16 %v17191_v33  ;;  %9894 = vrot.lane.b32.xlu0 %v20824_v30, %s10238_s16 }
 0x651   :  { %v6068_v35 = vsel %vm2783_vm2, %v6006_v62, %v9207_v11  ;;  %v6067_v53 = vsel %vm2783_vm2, %v6005_v31, %v9206_v24  ;;  %v9502_v8 = vunpack.i.h.bf16 %v20826_v63  ;;  %v9501_v44 = vunpack.i.l.bf16 %v20826_v63 }
 0x652   :  { %v5996_v45 = vsel %vm2718_vm1, %v20821_v41, %v20820_v40  ;;  %v5995_v59 = vsel %vm2718_vm1, %v20823_v60, %v20822_v54  ;;  %9869 = vrot.lane.b32.xlu1 %v20827_v25, %s10238_s16  ;;  %v6132_v41 = vsel %vm2848_vm3, %v6068_v35, %v9367_v58  ;;  %v6131_v54 = vsel %vm2848_vm3, %v6067_v53, %v9366_v23  ;;  %v9685_v60 = vpop.permute.xlu0 %9684  ;;  %v20830_v25 = vld [vmem:[#allocation210_spill] sm:$0xff] }
 0x653   :  { %v6058_v40 = vsel %vm2783_vm2, %v5996_v45, %v9182_v0  ;;  %v6057_v33 = vsel %vm2783_vm2, %v5995_v59, %v9181_v38  ;;  %v17665_v30 = vpop.permute.xlu2 %9754  ;;  %v9687_v62 = vunpack.i.h.bf16 %v9685_v60  ;;  %v9686_v31 = vunpack.i.l.bf16 %v9685_v60  ;;  %v20833_v60 = vld [vmem:[#allocation48_spill] sm:$0xff] }
 0x654   :  { %v6122_v11 = vsel %vm2848_vm3, %v6058_v40, %v9342_v36  ;;  %v6121_v24 = vsel %vm2848_vm3, %v6057_v33, %v9341_v29  ;;  %v9660_v9 = vpop.permute.xlu1 %9659  ;;  %v6196_v63 = vsel %vm2913_vm5, %v6132_v41, %v9527_v1  ;;  %v6195_v0 = vsel %vm2913_vm5, %v6131_v54, %v9526_v52  ;;  %v20829_v29 = vld [vmem:[#allocation171_spill] sm:$0xff]  ;;  %v20831_v40 = vld [vmem:[#allocation230_spill] sm:$0xff]  ;;  %v20832_v54 = vld [vmem:[#allocation113_spill] sm:$0xff] }
 0x655   :  { %v9662_v45 = vunpack.i.h.bf16 %v9660_v9  ;;  %v9661_v38 = vunpack.i.l.bf16 %v9660_v9  ;;  %v6186_v58 = vsel %vm2913_vm5, %v6122_v11, %v9502_v8  ;;  %v6185_v23 = vsel %vm2913_vm5, %v6121_v24, %v9501_v44  ;;  %v20834_v11 = vld [vmem:[#allocation10_spill] sm:$0xff] }
 0x656   :  { %v17674_v59 = vsel %vm2978_vm6, %v6196_v63, %v9687_v62  ;;  %v17677_v36 = vsel %vm2978_vm6, %v6195_v0, %v9686_v31  ;;  %v9042_v35 = vunpack.i.h.bf16 %v20829_v29  ;;  %v9041_v53 = vunpack.i.l.bf16 %v20829_v29  ;;  %v20836_v62 = vld [vmem:[#allocation40_spill] sm:$0xff]  ;;  %v20838_v63 = vld [vmem:[#allocation102_spill] sm:$0xff] }
 0x657   :  { %20828 = vst [vmem:[#allocation160_spill] sm:$0xff] %v17677_v36  ;;  %v17682_v1 = vsel %vm2978_vm6, %v6185_v23, %v9661_v38  ;;  %v17685_v52 = vsel %vm2978_vm6, %v6186_v58, %v9662_v45  ;;  %v9197_v8 = vunpack.i.h.bf16 %v20830_v25  ;;  %v9196_v44 = vunpack.i.l.bf16 %v20830_v25  ;;  %9934 = vrot.lane.b32.xlu2 %v20833_v60, %s10239_s11  ;;  %v20839_v45 = vld [vmem:[#allocation133_spill] sm:$0xff] }
 0x658   :  { %v9357_v33 = vunpack.i.h.bf16 %v20831_v40  ;;  %v9356_v41 = vunpack.i.l.bf16 %v20831_v40  ;;  %9909 = vrot.lane.b32.xlu0 %v20832_v54, %s10239_s11  ;;  %v20835_v24 = vunpack.i.h.bf16 %v20834_v11  ;;  %v20837_v9 = vunpack.i.l.bf16 %v20834_v11  ;;  %v20840_v23 = vld [vmem:[#allocation109_spill] sm:$0xff] }
 0x659   :  { %v9517_v38 = vunpack.i.h.bf16 %v20839_v45  ;;  %v9516_v58 = vunpack.i.l.bf16 %v20839_v45 }
 0x65a   :  { %v5940_v31 = vsel %vm2653_vm0, %v20836_v62, %v20835_v24  ;;  %v5939_v0 = vsel %vm2653_vm0, %v20838_v63, %v20837_v9  ;;  %9884 = vrot.lane.b32.xlu1 %v20840_v23, %s10239_s11  ;;  %v9700_v40 = vpop.permute.xlu0 %9699 }
 0x65b   :  { %v6002_v29 = vsel %vm2718_vm1, %v5940_v31, %v9042_v35  ;;  %v6001_v25 = vsel %vm2718_vm1, %v5939_v0, %v9041_v53  ;;  %v17709_v54 = vpop.permute.xlu2 %9769  ;;  %v9702_v24 = vunpack.i.h.bf16 %v9700_v40  ;;  %v9701_v62 = vunpack.i.l.bf16 %v9700_v40 }
 0x65c   :  { %v6064_v60 = vsel %vm2783_vm2, %v6002_v29, %v9197_v8  ;;  %v6063_v11 = vsel %vm2783_vm2, %v6001_v25, %v9196_v44  ;;  %v9675_v9 = vpop.permute.xlu1 %9674 }
 0x65d   :  { %v6128_v63 = vsel %vm2848_vm3, %v6064_v60, %v9357_v33  ;;  %v6127_v45 = vsel %vm2848_vm3, %v6063_v11, %v9356_v41  ;;  %v9677_v48 = vunpack.i.h.bf16 %v9675_v9  ;;  %v9676_v23 = vunpack.i.l.bf16 %v9675_v9  ;;  %v6469_v41 = vld [vmem:[%s19033_s6 + $0x10] sm:$0x3] }
 0x65e   :  { %v6192_v35 = vsel %vm2913_vm5, %v6128_v63, %v9517_v38  ;;  %v6191_v53 = vsel %vm2913_vm5, %v6127_v45, %v9516_v58  ;;  %v17719_v31 = vsel %vm2978_vm6, %v17258_v13, %v9702_v24  ;;  %v17723_v8 = vsel %vm2978_vm6, %v17261_v37, %v9701_v62  ;;  %v20843_v38 = vld [vmem:[#allocation117_spill] sm:$0xff]  ;;  %v20844_v13 = vld [vmem:[#allocation67_spill] sm:$0xff] }
 0x65f   :  { %20841 = vst [vmem:[#allocation134_spill] sm:$0xff] %v17719_v31  ;;  %v17726_v44 = vsel %vm2978_vm6, %v6191_v53, %v9676_v23  ;;  %v17729_v33 = vsel %vm2978_vm6, %v6192_v35, %v9677_v48  ;;  %v6479_v0 = vunpack.c.l.b16 %v6469_v41  ;;  %9949 = vrot.lane.b32.xlu2 %v20844_v13, %s10239_s11  ;;  %v20845_v37 = vld [vmem:[#allocation127_spill] sm:$0xff]  ;;  %v20850_v53 = vld [vmem:[#allocation54_spill] sm:$0xff] }
 0x660   :  { %20842 = vst [vmem:[#allocation145_spill] sm:$0xff] %v17723_v8  ;;  %9924 = vrot.lane.b32.xlu0 %v20843_v38, %s10239_s11  ;;  %v7552_v35 = vld [vmem:[%s19033_s6 + $0x8] sm:$0xff]  ;;  %v7551_v38 = vld [vmem:[%s19033_s6] sm:$0xff] }
 0x661   :  { %v6482_v58 = vpack.c.b16 %v6479_v0, %v6479_v0  ;;  %v20852_v41 = vld [vmem:[#allocation47_spill] sm:$0xff]  ;;  %v20856_v0 = vld [vmem:[#allocation46_spill] sm:$0xff] }
 0x662   :  { %9899 = vrot.lane.b32.xlu1 %v20845_v37, %s10239_s11  ;;  %v9715_v29 = vpop.permute.xlu0 %9714 }
 0x663   :  { %v17740_v25 = vpop.permute.xlu2 %9784  ;;  %v9717_v48 = vunpack.i.h.bf16 %v9715_v29  ;;  %v9716_v40 = vunpack.i.l.bf16 %v9715_v29  ;;  %v6582_v62 = vsel %vm3322_vm4, %v6482_v58, 0 }
 0x664   :  { %v9690_v60 = vpop.permute.xlu1 %9689  ;;  %7556 = vmatpush.bf16.msra.mxu3 %v6582_v62  ;;  %6589 = vmatpush.bf16.msra.mxu1 %v6582_v62  ;;  %v20861_v62 = vld [vmem:[#allocation151_spill] sm:$0xff] }
 0x665   :  { %v9692_v11 = vunpack.i.h.bf16 %v9690_v60  ;;  %v9691_v24 = vunpack.i.l.bf16 %v9690_v60  ;;  %v17745_v9 = vsel %vm2978_vm6, %v17308_v17, %v9716_v40  ;;  %v17749_v63 = vsel %vm2978_vm6, %v17311_v39, %v9717_v48 }
 0x666   :  { %20846 = vst [vmem:[#allocation125_spill] sm:$0xff] %v17745_v9  ;;  %v17753_v45 = vsel %vm2978_vm6, %v17253_v61, %v9716_v40  ;;  %v17757_v23 = vsel %vm2978_vm6, %v17250_v6, %v9717_v48  ;;  %v20854_v61 = vld [vmem:[#allocation142_spill] sm:$0xff]  ;;  %v20855_v6 = vld [vmem:[#allocation156_spill] sm:$0xff] }
 0x667   :  { %20847 = vst [vmem:[#allocation161_spill] sm:$0xff] %v17749_v63  ;;  %v17764_v17 = vsel %vm2978_vm6, %v20850_v53, %v9691_v24  ;;  %v17768_v39 = vsel %vm2978_vm6, %v20852_v41, %v9692_v11  ;;  %9964 = vrot.lane.b32.xlu2 %v20855_v6, %s10240_s23  ;;  %v20857_v40 = vld [vmem:[#allocation34_spill] sm:$0xff]  ;;  %v20859_v11 = vld [vmem:[#allocation20_spill] sm:$0xff] }
 0x668   :  { %20848 = vst [vmem:[#allocation130_spill] sm:$0xff] %v17753_v45  ;;  %9939 = vrot.lane.b32.xlu0 %v20854_v61, %s10240_s23  ;;  %7557 = vmatpush.bf16.msra.mxu3 %v7552_v35  ;;  %v20862_v53 = vld [vmem:[#allocation68_spill] sm:$0xff]  ;;  %v20870_v63 = vld [vmem:[#allocation150_spill] sm:$0xff] }
 0x669   :  { %20849 = vst [vmem:[#allocation128_spill] sm:$0xff] %v17757_v23  ;;  %6590 = vmatpush.bf16.msra.mxu1 %v7552_v35  ;;  %v20863_v35 = vld [vmem:[#allocation65_spill] sm:$0xff] }
 0x66a   :  { %20851 = vst [vmem:[#allocation91_spill] sm:$0xff] %v17764_v17  ;;  %9914 = vrot.lane.b32.xlu1 %v20856_v0, %s10240_s23  ;;  %v17779_v13 = vpop.permute.xlu0 %9729 }
 0x66b   :  { %20853 = vst [vmem:[#allocation166_spill] sm:$0xff] %v17768_v39  ;;  %v17781_v37 = vpop.permute.xlu2 %9799 }
 0x66c   :  { %v9705_v58 = vpop.permute.xlu1 %9704  ;;  %7558 = vmatpush.bf16.msra.mxu3 %v7551_v38 }
 0x66d   :  { %v9707_v29 = vunpack.i.h.bf16 %v9705_v58  ;;  %v9706_v48 = vunpack.i.l.bf16 %v9705_v58  ;;  %6591 = vmatpush.bf16.msra.mxu1 %v7551_v38 }
 0x66f   :  { %v17785_v60 = vsel %vm2978_vm6, %v20857_v40, %v9706_v48  ;;  %v17789_v24 = vsel %vm2978_vm6, %v20859_v11, %v9707_v29  ;;  %9979 = vrot.lane.b32.xlu2 %v20862_v53, %s10240_s23  ;;  %v20864_v48 = vld [vmem:[#allocation182_spill] sm:$0xff]  ;;  %v20865_v40 = vld [vmem:[#allocation187_spill] sm:$0xff] }
 0x670   :  { %20858 = vst [vmem:[#allocation86_spill] sm:$0xff] %v17785_v60  ;;  %9954 = vrot.lane.b32.xlu0 %v20861_v62, %s10240_s23  ;;  %v20866_v11 = vld [vmem:[#allocation174_spill] sm:$0xff]  ;;  %v9756_v60 = vunpack.i.l.bf16 %v17665_v30 }
 0x671   :  { %20860 = vst [vmem:[#allocation89_spill] sm:$0xff] %v17789_v24 }
 0x672   :  { %9929 = vrot.lane.b32.xlu1 %v20863_v35, %s10240_s23  ;;  %v9745_v41 = vpop.permute.xlu0 %9744 }
 0x673   :  { %v17797_v61 = vpop.permute.xlu2 %9814  ;;  %v9747_v6 = vunpack.i.h.bf16 %v9745_v41  ;;  %v9746_v0 = vunpack.i.l.bf16 %v9745_v41  ;;  %v9772_v41 = vunpack.i.h.bf16 %v17709_v54 }
 0x674   :  { %v9720_v58 = vpop.permute.xlu1 %9719 }
 0x675   :  { %v17801_v29 = vsel %vm2978_vm6, %v17412_v28, %v9746_v0  ;;  %v17805_v38 = vsel %vm2978_vm6, %v17415_v20, %v9747_v6  ;;  %v9727_v28 = vunpack.i.h.bf16 %v17559_v34  ;;  %v9726_v20 = vunpack.i.l.bf16 %v17559_v34  ;;  %v20867_v0 = vld [vmem:[#allocation124_spill] sm:$0xff]  ;;  %v20871_v34 = vld [vmem:[#allocation213_spill] sm:$0xff] }
 0x676   :  { %v9771_v6 = vunpack.i.l.bf16 %v17709_v54  ;;  %v9722_v23 = vunpack.i.h.bf16 %v9720_v58  ;;  %v9721_v45 = vunpack.i.l.bf16 %v9720_v58  ;;  %v9322_v15 = vunpack.i.h.bf16 %v20871_v34 }
 0x677   :  { %9994 = vrot.lane.b32.xlu2 %v20865_v40, %s10238_s16  ;;  %v20869_v40 = vld [vmem:[#allocation197_spill] sm:$0xff]  ;;  %v6276_v54 = vsel %vm2978_vm6, %v17244_v12, %v9727_v28  ;;  %v20872_v12 = vld [vmem:[#allocation111_spill] sm:$0xff] }
 0x678   :  { %9969 = vrot.lane.b32.xlu0 %v20864_v48, %s10238_s16  ;;  %v20868_v48 = vld [vmem:[#allocation13_spill] sm:$0xff]  ;;  %v9161_v9 = vunpack.i.l.bf16 %v20869_v40  ;;  %v6273_v28 = vsel %vm2978_vm6, %v20872_v12, %v9721_v45 }
 0x67a   :  { %9944 = vrot.lane.b32.xlu1 %v20866_v11, %s10238_s16  ;;  %v17813_v62 = vpop.permute.xlu0 %9759  ;;  %v9162_v11 = vunpack.i.h.bf16 %v20869_v40  ;;  %v6340_v40 = vsel %vm3043_vm8, %v6276_v54, %v9772_v41  ;;  %v20874_v54 = vld [vmem:[#allocation110_spill] sm:$0xff] }
 0x67b   :  { %v17815_v53 = vpop.permute.xlu2 %9829  ;;  %v9482_v45 = vunpack.i.h.bf16 %v20874_v54 }
 0x67c   :  { %v17817_v35 = vpop.permute.xlu1 %9734 }
 0x67f   :  { %10009 = vrot.lane.b32.xlu2 %v20868_v48, %s10239_s11  ;;  %v9757_v48 = vunpack.i.h.bf16 %v17665_v30 }
 0x680   :  { %9984 = vrot.lane.b32.xlu0 %v20867_v0, %s10239_s11  ;;  %v6275_v0 = vsel %vm2978_vm6, %v17247_v7, %v9726_v20  ;;  %v20873_v7 = vld [vmem:[#allocation96_spill] sm:$0xff] }
 0x681   :  { %v6274_v20 = vsel %vm2978_vm6, %v20873_v7, %v9722_v23 }
 0x682   :  { %9959 = vrot.lane.b32.xlu1 %v20870_v63, %s10239_s11  ;;  %v9775_v24 = vpop.permute.xlu0 %9774  ;;  %v6339_v63 = vsel %vm3043_vm8, %v6275_v0, %v9771_v6  ;;  %v9481_v0 = vunpack.i.l.bf16 %v20874_v54 }
 0x683   :  { %v9777_v8 = vunpack.i.h.bf16 %v9775_v24  ;;  %v9776_v58 = vunpack.i.l.bf16 %v9775_v24  ;;  %v17838_v39 = vpop.permute.xlu2 %9844  ;;  %v9321_v24 = vunpack.i.l.bf16 %v20871_v34  ;;  %v20875_v34 = vld [vmem:[#allocation139_spill] sm:$0xff] }
 0x684   :  { %v9750_v31 = vpop.permute.xlu1 %9749 }
 0x685   :  { %v9752_v17 = vunpack.i.h.bf16 %v9750_v31  ;;  %v9751_v32 = vunpack.i.l.bf16 %v9750_v31  ;;  %v17847_v36 = vsel %vm3108_vm7, %v6339_v63, %v9776_v58  ;;  %v17850_v30 = vsel %vm3108_vm7, %v6340_v40, %v9777_v8  ;;  %v20877_v40 = vld [vmem:[#allocation12_spill] sm:$0xff] }
 0x686   :  { %v6450_v31 = vpack.c.bf16 %v17850_v30, %v17847_v36  ;;  %v9642_v8 = vunpack.i.h.bf16 %v17513_v43  ;;  %v9641_v63 = vunpack.i.l.bf16 %v17513_v43  ;;  %v6050_v12 = vsel %vm2783_vm2, %v20877_v40, %v9162_v11 }
 0x687   :  { %v6337_v6 = vsel %vm3043_vm8, %v6273_v28, %v9751_v32  ;;  %v6338_v41 = vsel %vm3043_vm8, %v6274_v20, %v9752_v17  ;;  %v20876_v32 = vld [vmem:[#allocation56_spill] sm:$0xff]  ;;  %v20879_v20 = vld [vmem:[#allocation70_spill] sm:$0xff]  ;;  %v6114_v43 = vsel %vm2848_vm3, %v6050_v12, %v9322_v15  ;;  %v9801_v12 = vunpack.i.l.bf16 %v17781_v37 }
 0x688   :  { %v6401_v23 = vsel %vm3108_vm7, %v6337_v6, %v9756_v60  ;;  %v6402_v58 = vsel %vm3108_vm7, %v6338_v41, %v9757_v48  ;;  %9999 = vrot.lane.b32.xlu0 %v20875_v34, %s10239_s11  ;;  %10024 = vrot.lane.b32.xlu2 %v20876_v32, %s10239_s11  ;;  %v20878_v28 = vld [vmem:[#allocation132_spill] sm:$0xff]  ;;  %v9762_v60 = vunpack.i.h.bf16 %v17813_v62  ;;  %v9761_v48 = vunpack.i.l.bf16 %v17813_v62 }
 0x689   :  { %v6449_v17 = vpack.c.bf16 %v6402_v58, %v6401_v23  ;;  %v6049_v7 = vsel %vm2783_vm2, %v20878_v28, %v9161_v9  ;;  %v6178_v54 = vsel %vm2913_vm5, %v6114_v43, %v9482_v45  ;;  %v20882_v28 = vld [vmem:[#allocation44_spill] sm:$0xff]  ;;  %v6309_v43 = vsel %vm3043_vm8, %v17303_v26, %v9801_v12 }
 0x68a   :  { %9974 = vrot.lane.b32.xlu1 %v20879_v20, %s10239_s11  ;;  %v6113_v6 = vsel %vm2848_vm3, %v6049_v7, %v9321_v24  ;;  %v9790_v41 = vpop.permute.xlu0 %9789  ;;  %v6242_v9 = vsel %vm2978_vm6, %v6178_v54, %v9642_v8  ;;  %v20880_v8 = vld [vmem:[#allocation37_spill] sm:$0xff]  ;;  %v20885_v12 = vld [vmem:[#allocation64_spill] sm:$0xff] }
 0x68b   :  { %7533 = vmatmul.msk.bf16.vlgmr.msra.gmra.mxu3 %vm3225_vm9, %v6449_v17  ;;  %v6177_v11 = vsel %vm2913_vm5, %v6113_v6, %v9481_v0  ;;  %v6306_v15 = vsel %vm3043_vm8, %v6242_v9, %v9762_v60  ;;  %v17884_v40 = vpop.permute.xlu2 %9859  ;;  %v9802_v0 = vunpack.i.h.bf16 %v17781_v37 }
 0x68c   :  { %v9765_v23 = vpop.permute.xlu1 %9764  ;;  %v6241_v58 = vsel %vm2978_vm6, %v6177_v11, %v9641_v63  ;;  %v20881_v63 = vld [vmem:[#allocation11_spill] sm:$0xff]  ;;  %v9787_v11 = vunpack.i.h.bf16 %v17740_v25 }
 0x68d   :  { %v9767_v62 = vunpack.i.h.bf16 %v9765_v23  ;;  %v9766_v34 = vunpack.i.l.bf16 %v9765_v23  ;;  %v6305_v32 = vsel %vm3043_vm8, %v6241_v58, %v9761_v48  ;;  %v6310_v37 = vsel %vm3043_vm8, %v17300_v46, %v9802_v0 }
 0x68e   :  { %v9786_v23 = vunpack.i.l.bf16 %v17740_v25  ;;  %v9791_v0 = vunpack.i.l.bf16 %v9790_v41 }
 0x68f   :  { %v6369_v24 = vsel %vm3108_vm7, %v6305_v32, %v9766_v34  ;;  %v6370_v17 = vsel %vm3108_vm7, %v6306_v15, %v9767_v62  ;;  %v9732_v15 = vunpack.i.h.bf16 %v17779_v13 }
 0x690   :  { %v6433_v45 = vpack.c.bf16 %v6370_v17, %v6369_v24  ;;  %10014 = vrot.lane.b32.xlu0 %v20880_v8, %s10240_s23  ;;  %10039 = vrot.lane.b32.xlu2 %v20881_v63, %s10240_s23  ;;  %v9731_v24 = vunpack.i.l.bf16 %v17779_v13  ;;  %v20883_v17 = vld [vmem:[#allocation57_spill] sm:$0xff] }
 0x692   :  { %9989 = vrot.lane.b32.xlu1 %v20882_v28, %s10240_s23  ;;  %7517 = vmatmul.msk.bf16.vlgmr.msra.gmra.mxu1 %vm3225_vm9, %v6433_v45  ;;  %v9805_v7 = vpop.permute.xlu0 %9804  ;;  %v9792_v45 = vunpack.i.h.bf16 %v9790_v41  ;;  %v6277_v13 = vsel %vm2978_vm6, %v17358_v49, %v9731_v24  ;;  %v6278_v28 = vsel %vm2978_vm6, %v17361_v2, %v9732_v15  ;;  %v20886_v49 = vld [vmem:[#allocation184_spill] sm:$0xff]  ;;  %v20887_v2 = vld [vmem:[#allocation15_spill] sm:$0xff] }
 0x693   :  { %v9807_v60 = vunpack.i.h.bf16 %v9805_v7  ;;  %v9806_v48 = vunpack.i.l.bf16 %v9805_v7  ;;  %v17915_v34 = vpop.permute.xlu2 %9874  ;;  %v6341_v41 = vsel %vm3043_vm8, %v6277_v13, %v9791_v0 }
 0x694   :  { %v9780_v20 = vpop.permute.xlu1 %9779 }
 0x695   :  { %v9782_v6 = vunpack.i.h.bf16 %v9780_v20  ;;  %v9781_v54 = vunpack.i.l.bf16 %v9780_v20  ;;  %v17904_v9 = vsel %vm3108_vm7, %v6309_v43, %v9806_v48  ;;  %v17907_v58 = vsel %vm3108_vm7, %v6310_v37, %v9807_v60 }
 0x696   :  { %v6435_v46 = vpack.c.bf16 %v17907_v58, %v17904_v9  ;;  %v6342_v48 = vsel %vm3043_vm8, %v6278_v28, %v9792_v45  ;;  %v9831_v43 = vunpack.i.l.bf16 %v17815_v53  ;;  %v9737_v37 = vunpack.i.h.bf16 %v17817_v35 }
 0x697   :  { %v6307_v62 = vsel %vm3043_vm8, %v17626_v18, %v9781_v54  ;;  %v6308_v26 = vsel %vm3043_vm8, %v17629_v19, %v9782_v6  ;;  %v20884_v18 = vld [vmem:[#allocation122_spill] sm:$0xff]  ;;  %v9736_v6 = vunpack.i.l.bf16 %v17817_v35 }
 0x698   :  { %v6371_v32 = vsel %vm3108_vm7, %v6307_v62, %v9786_v23  ;;  %v6372_v25 = vsel %vm3108_vm7, %v6308_v26, %v9787_v11  ;;  %10029 = vrot.lane.b32.xlu0 %v20883_v17, %s10240_s23  ;;  %10054 = vrot.lane.b32.xlu2 %v20884_v18, %s10240_s23  ;;  %v20888_v11 = vld [vmem:[#allocation178_spill] sm:$0xff]  ;;  %v9816_v62 = vunpack.i.l.bf16 %v17797_v61  ;;  %v6345_v15 = vsel %vm3043_vm8, %v17621_v57, %v9831_v43 }
 0x699   :  { %v6434_v19 = vpack.c.bf16 %v6372_v25, %v6371_v32  ;;  %v20889_v18 = vld [vmem:[#allocation62_spill] sm:$0xff] }
 0x69a   :  { %10004 = vrot.lane.b32.xlu1 %v20885_v12, %s10240_s23  ;;  %v9820_v8 = vpop.permute.xlu0 %9819  ;;  %v6279_v45 = vsel %vm2978_vm6, %v20889_v18, %v9736_v6  ;;  %v9847_v18 = vunpack.i.h.bf16 %v17838_v39 }
 0x69b   :  { %7534 = vmatmul.msk.bf16.gmra.mxu3 %vm3225_vm9, %v6450_v31  ;;  %v9832_v31 = vunpack.i.h.bf16 %v17815_v53  ;;  %v17947_v54 = vpop.permute.xlu2 %9889  ;;  %v9817_v53 = vunpack.i.h.bf16 %v17797_v61 }
 0x69c   :  { %v9795_v63 = vpop.permute.xlu1 %9794 }
 0x69d   :  { %v9797_v7 = vunpack.i.h.bf16 %v9795_v63  ;;  %v9796_v60 = vunpack.i.l.bf16 %v9795_v63  ;;  %v6346_v35 = vsel %vm3043_vm8, %v17617_v16, %v9832_v31 }
 0x69f   :  { %v6405_v20 = vsel %vm3108_vm7, %v6341_v41, %v9796_v60  ;;  %v6406_v36 = vsel %vm3108_vm7, %v6342_v48, %v9797_v7  ;;  %v20891_v7 = vld [vmem:[#allocation21_spill] sm:$0xff]  ;;  %v20892_v60 = vld [vmem:[#allocation116_spill] sm:$0xff]  ;;  %v9822_v48 = vunpack.i.h.bf16 %v9820_v8 }
 0x6a0   :  { %v6451_v30 = vpack.c.bf16 %v6406_v36, %v6405_v20  ;;  %10044 = vrot.lane.b32.xlu0 %v20886_v49, %s10238_s16  ;;  %10069 = vrot.lane.b32.xlu2 %v20887_v2, %s10238_s16  ;;  %v9821_v20 = vunpack.i.l.bf16 %v9820_v8  ;;  %v20893_v36 = vld [vmem:[#allocation138_spill] sm:$0xff] }
 0x6a2   :  { %10019 = vrot.lane.b32.xlu1 %v20888_v11, %s10238_s16  ;;  %7518 = vmatmul.msk.bf16.gmra.mxu1 %vm3225_vm9, %v6434_v19  ;;  %v9835_v23 = vpop.permute.xlu0 %9834  ;;  %v20890_v19 = vld [vmem:[#allocation144_spill] sm:$0xff]  ;;  %v6311_v6 = vsel %vm3043_vm8, %v17571_v21, %v9821_v20  ;;  %v6312_v11 = vsel %vm3043_vm8, %v17568_v42, %v9822_v48 }
 0x6a3   :  { %v9837_v26 = vunpack.i.h.bf16 %v9835_v23  ;;  %v9836_v32 = vunpack.i.l.bf16 %v9835_v23  ;;  %v6280_v0 = vsel %vm2978_vm6, %v20890_v19, %v9737_v37  ;;  %v17981_v43 = vpop.permute.xlu2 %9904 }
 0x6a4   :  { %v9810_v25 = vpop.permute.xlu1 %9809 }
 0x6a5   :  { %v9812_v24 = vunpack.i.h.bf16 %v9810_v25  ;;  %v9811_v17 = vunpack.i.l.bf16 %v9810_v25  ;;  %v17963_v12 = vsel %vm3108_vm7, %v6345_v15, %v9836_v32  ;;  %v17966_v61 = vsel %vm3108_vm7, %v6346_v35, %v9837_v26  ;;  %v20894_v26 = vld [vmem:[#allocation71_spill] sm:$0xff]  ;;  %v20895_v32 = vld [vmem:[#allocation18_spill] sm:$0xff] }
 0x6a6   :  { %v6453_v16 = vpack.c.bf16 %v17966_v61, %v17963_v12 }
 0x6a7   :  { %v6343_v63 = vsel %vm3043_vm8, %v6279_v45, %v9811_v17  ;;  %v6344_v57 = vsel %vm3043_vm8, %v6280_v0, %v9812_v24  ;;  %v9846_v45 = vunpack.i.l.bf16 %v17838_v39 }
 0x6a8   :  { %v6407_v13 = vsel %vm3108_vm7, %v6343_v63, %v9816_v62  ;;  %v6408_v28 = vsel %vm3108_vm7, %v6344_v57, %v9817_v53  ;;  %10059 = vrot.lane.b32.xlu0 %v20891_v7, %s10239_s11  ;;  %10084 = vrot.lane.b32.xlu2 %v20892_v60, %s10239_s11  ;;  %v9862_v62 = vunpack.i.h.bf16 %v17884_v40  ;;  %v20896_v63 = vld [vmem:[#allocation119_spill] sm:$0xff]  ;;  %v20897_v7 = vld [vmem:[#allocation16_spill] sm:$0xff] }
 0x6a9   :  { %v6452_v41 = vpack.c.bf16 %v6408_v28, %v6407_v13 }
 0x6aa   :  { %10034 = vrot.lane.b32.xlu1 %v20893_v36, %s10239_s11  ;;  %v9850_v31 = vpop.permute.xlu0 %9849 }
 0x6ab   :  { %7535 = vmatmul.msk.bf16.gmra.mxu3 %vm3225_vm9, %v6451_v30  ;;  %v9861_v30 = vunpack.i.l.bf16 %v17884_v40  ;;  %v6316_v40 = vsel %vm3043_vm8, %v17350_v55, %v9862_v62  ;;  %v18005_v19 = vpop.permute.xlu2 %9919  ;;  %v9852_v13 = vunpack.i.h.bf16 %v9850_v31  ;;  %v9851_v28 = vunpack.i.l.bf16 %v9850_v31 }
 0x6ac   :  { %v9825_v49 = vpop.permute.xlu1 %9824  ;;  %v9876_v62 = vunpack.i.l.bf16 %v17915_v34 }
 0x6ad   :  { %v9827_v2 = vunpack.i.h.bf16 %v9825_v49  ;;  %v9826_v37 = vunpack.i.l.bf16 %v9825_v49  ;;  %v6315_v35 = vsel %vm3043_vm8, %v17353_v10, %v9861_v30  ;;  %v6347_v20 = vsel %vm3043_vm8, %v17801_v29, %v9851_v28 }
 0x6ae   :  { %v6348_v36 = vsel %vm3043_vm8, %v17805_v38, %v9852_v13  ;;  %v9877_v38 = vunpack.i.h.bf16 %v17915_v34  ;;  %v20902_v34 = vld [vmem:[#allocation84_spill] sm:$0xff] }
 0x6af   :  { %v6375_v23 = vsel %vm3108_vm7, %v6311_v6, %v9826_v37  ;;  %v6376_v8 = vsel %vm3108_vm7, %v6312_v11, %v9827_v2  ;;  %v20898_v6 = vld [vmem:[#allocation72_spill] sm:$0xff] }
 0x6b0   :  { %v6436_v53 = vpack.c.bf16 %v6376_v8, %v6375_v23  ;;  %10074 = vrot.lane.b32.xlu0 %v20894_v26, %s10239_s11  ;;  %v20899_v23 = vld [vmem:[#allocation137_spill] sm:$0xff] }
 0x6b1   :  { %10099 = vrot.lane.b32.xlu2 %v20899_v23, %s10240_s23 }
 0x6b2   :  { %10049 = vrot.lane.b32.xlu1 %v20895_v32, %s10239_s11  ;;  %7519 = vmatmul.msk.bf16.gmra.mxu1 %vm3225_vm9, %v6435_v46  ;;  %v9865_v42 = vpop.permute.xlu0 %9864  ;;  %v20900_v32 = vld [vmem:[#allocation55_spill] sm:$0xff] }
 0x6b3   :  { %v9867_v21 = vunpack.i.h.bf16 %v9865_v42  ;;  %v9866_v25 = vunpack.i.l.bf16 %v9865_v42  ;;  %v18032_v31 = vpop.permute.xlu2 %9934 }
 0x6b4   :  { %v9840_v15 = vpop.permute.xlu1 %9839 }
 0x6b5   :  { %v9842_v24 = vunpack.i.h.bf16 %v9840_v15  ;;  %v9841_v17 = vunpack.i.l.bf16 %v9840_v15  ;;  %v18008_v9 = vsel %vm3108_vm7, %v6315_v35, %v9866_v25  ;;  %v18011_v58 = vsel %vm3108_vm7, %v6316_v40, %v9867_v21  ;;  %v20901_v21 = vld [vmem:[#allocation90_spill] sm:$0xff] }
 0x6b6   :  { %v6438_v46 = vpack.c.bf16 %v18011_v58, %v18008_v9 }
 0x6b7   :  { %v6313_v10 = vsel %vm3043_vm8, %v17682_v1, %v9841_v17  ;;  %v6314_v55 = vsel %vm3043_vm8, %v17685_v52, %v9842_v24 }
 0x6b8   :  { %v6377_v0 = vsel %vm3108_vm7, %v6313_v10, %v9846_v45  ;;  %v6378_v39 = vsel %vm3108_vm7, %v6314_v55, %v9847_v18  ;;  %10089 = vrot.lane.b32.xlu0 %v20896_v63, %s10240_s23 }
 0x6b9   :  { %v6437_v57 = vpack.c.bf16 %v6378_v39, %v6377_v0  ;;  %v9892_v0 = vunpack.i.h.bf16 %v17947_v54  ;;  %v9891_v39 = vunpack.i.l.bf16 %v17947_v54 }
 0x6ba   :  { %10064 = vrot.lane.b32.xlu1 %v20897_v7, %s10240_s23  ;;  %v9880_v1 = vpop.permute.xlu0 %9879 }
 0x6bb   :  { %7536 = vmatmul.msk.bf16.gmra.mxu3 %vm3225_vm9, %v6452_v41  ;;  %v9882_v30 = vunpack.i.h.bf16 %v9880_v1  ;;  %v9881_v26 = vunpack.i.l.bf16 %v9880_v1  ;;  %v18053_v24 = vpop.permute.xlu2 %9949 }
 0x6bc   :  { %v9855_v52 = vpop.permute.xlu1 %9854 }
 0x6bd   :  { %v9857_v60 = vunpack.i.h.bf16 %v9855_v52  ;;  %v9856_v48 = vunpack.i.l.bf16 %v9855_v52 }
 0x6bf   :  { %v6411_v49 = vsel %vm3108_vm7, %v6347_v20, %v9856_v48  ;;  %v6412_v2 = vsel %vm3108_vm7, %v6348_v36, %v9857_v60  ;;  %v9906_v48 = vunpack.i.l.bf16 %v17981_v43 }
 0x6c0   :  { %v6454_v37 = vpack.c.bf16 %v6412_v2, %v6411_v49 }
 0x6c2   :  { %10079 = vrot.lane.b32.xlu1 %v20898_v6, %s10240_s23  ;;  %7520 = vmatmul.msk.bf16.gmra.mxu1 %vm3225_vm9, %v6436_v53  ;;  %v9895_v41 = vpop.permute.xlu0 %9894 }
 0x6c3   :  { %v9896_v7 = vunpack.i.l.bf16 %v9895_v41  ;;  %v18078_v1 = vpop.permute.xlu2 %9964 }
 0x6c4   :  { %v9870_v11 = vpop.permute.xlu1 %9869 }
 0x6c5   :  { %v9872_v29 = vunpack.i.h.bf16 %v9870_v11  ;;  %v9871_v8 = vunpack.i.l.bf16 %v9870_v11  ;;  %v6287_v20 = vsel %vm2978_vm6, %v17347_v5, %v9896_v7 }
 0x6c7   :  { %v6285_v42 = vsel %vm2978_vm6, %v20900_v32, %v9871_v8  ;;  %v6286_v25 = vsel %vm2978_vm6, %v20901_v21, %v9872_v29 }
 0x6c8   :  { %v6349_v53 = vsel %vm3043_vm8, %v6285_v42, %v9876_v62  ;;  %v6350_v15 = vsel %vm3043_vm8, %v6286_v25, %v9877_v38 }
 0x6c9   :  { %v18048_v35 = vsel %vm3108_vm7, %v6349_v53, %v9881_v26  ;;  %v18051_v40 = vsel %vm3108_vm7, %v6350_v15, %v9882_v30  ;;  %v9922_v53 = vunpack.i.h.bf16 %v18005_v19  ;;  %v9921_v15 = vunpack.i.l.bf16 %v18005_v19 }
 0x6ca   :  { %10094 = vrot.lane.b32.xlu1 %v20902_v34, %s10239_s11  ;;  %v6455_v17 = vpack.c.bf16 %v18051_v40, %v18048_v35  ;;  %v9910_v18 = vpop.permute.xlu0 %9909 }
 0x6cb   :  { %7537 = vmatmul.msk.bf16.gmra.mxu3 %vm3225_vm9, %v6453_v16  ;;  %v9897_v16 = vunpack.i.h.bf16 %v9895_v41  ;;  %v9937_v41 = vunpack.i.h.bf16 %v18032_v31  ;;  %v9912_v11 = vunpack.i.h.bf16 %v9910_v18  ;;  %v9911_v23 = vunpack.i.l.bf16 %v9910_v18  ;;  %v18107_v21 = vpop.permute.xlu2 %9979 }
 0x6cc   :  { %v9885_v45 = vpop.permute.xlu1 %9884 }
 0x6cd   :  { %v9887_v10 = vunpack.i.h.bf16 %v9885_v45  ;;  %v9886_v55 = vunpack.i.l.bf16 %v9885_v45  ;;  %v6288_v36 = vsel %vm2978_vm6, %v17344_v51, %v9897_v16  ;;  %v6322_v30 = vsel %vm3043_vm8, %v17404_v56, %v9937_v41 }
 0x6ce   :  { %v6320_v42 = vsel %vm3043_vm8, %v17729_v33, %v9912_v11  ;;  %v9966_v11 = vunpack.i.l.bf16 %v18078_v1 }
 0x6cf   :  { %v6318_v63 = vsel %vm3043_vm8, %v17610_v3, %v9887_v10  ;;  %v6317_v13 = vsel %vm3043_vm8, %v17613_v22, %v9886_v55  ;;  %v9907_v22 = vunpack.i.h.bf16 %v17981_v43  ;;  %v9936_v43 = vunpack.i.l.bf16 %v18032_v31 }
 0x6d0   :  { %v18070_v28 = vsel %vm3108_vm7, %v6317_v13, %v9891_v39  ;;  %v18073_v12 = vsel %vm3108_vm7, %v6318_v63, %v9892_v0  ;;  %v6319_v31 = vsel %vm3043_vm8, %v17726_v44, %v9911_v23  ;;  %v6289_v55 = vsel %vm2978_vm6, %v17470_v27, %v9921_v15  ;;  %v20905_v15 = vld [vmem:[#allocation129_spill] sm:$0xff] }
 0x6d1   :  { %v6439_v61 = vpack.c.bf16 %v18073_v12, %v18070_v28  ;;  %v6321_v62 = vsel %vm3043_vm8, %v17407_v4, %v9936_v43  ;;  %v6290_v0 = vsel %vm2978_vm6, %v17473_v47, %v9922_v53  ;;  %v9967_v43 = vunpack.i.h.bf16 %v18078_v1 }
 0x6d2   :  { %7521 = vmatmul.msk.bf16.gmra.mxu1 %vm3225_vm9, %v6437_v57  ;;  %v9925_v54 = vpop.permute.xlu0 %9924 }
 0x6d3   :  { %v9927_v34 = vunpack.i.h.bf16 %v9925_v54  ;;  %v9926_v18 = vunpack.i.l.bf16 %v9925_v54  ;;  %v18143_v58 = vpop.permute.xlu2 %9994 }
 0x6d4   :  { %v9900_v3 = vpop.permute.xlu1 %9899 }
 0x6d5   :  { %v9902_v52 = vunpack.i.h.bf16 %v9900_v3  ;;  %v9901_v60 = vunpack.i.l.bf16 %v9900_v3  ;;  %v6353_v13 = vsel %vm3043_vm8, %v6289_v55, %v9926_v18  ;;  %v6354_v19 = vsel %vm3043_vm8, %v6290_v0, %v9927_v34 }
 0x6d6   :  { %v9952_v3 = vunpack.i.h.bf16 %v18053_v24 }
 0x6d7   :  { %v6352_v49 = vsel %vm3043_vm8, %v6288_v36, %v9902_v52  ;;  %v6351_v57 = vsel %vm3043_vm8, %v6287_v20, %v9901_v60  ;;  %v9951_v52 = vunpack.i.l.bf16 %v18053_v24 }
 0x6d8   :  { %v18089_v2 = vsel %vm3108_vm7, %v6351_v57, %v9906_v48  ;;  %v18092_v6 = vsel %vm3108_vm7, %v6352_v49, %v9907_v22 }
 0x6d9   :  { %v6456_v5 = vpack.c.bf16 %v18092_v6, %v18089_v2 }
 0x6da   :  { %v9940_v51 = vpop.permute.xlu0 %9939 }
 0x6db   :  { %7538 = vmatmul.msk.bf16.gmra.mxu3 %vm3225_vm9, %v6454_v37  ;;  %v9942_v29 = vunpack.i.h.bf16 %v9940_v51  ;;  %v9941_v8 = vunpack.i.l.bf16 %v9940_v51  ;;  %v10010_v49 = vpop.permute.xlu2 %10009  ;;  %v20903_v51 = vld [vmem:[#allocation160_spill] sm:$0xff] }
 0x6dc   :  { %v9915_v38 = vpop.permute.xlu1 %9914 }
 0x6dd   :  { %v9917_v26 = vunpack.i.h.bf16 %v9915_v38  ;;  %v9916_v32 = vunpack.i.l.bf16 %v9915_v38  ;;  %v18110_v37 = vsel %vm3108_vm7, %v6321_v62, %v9941_v8  ;;  %v18113_v25 = vsel %vm3108_vm7, %v6322_v30, %v9942_v29 }
 0x6de   :  { %v6441_v44 = vpack.c.bf16 %v18113_v25, %v18110_v37  ;;  %v10170_v37 = vld [vmem:[%s19029_s0 + $0x19] sm:$0xff] }
 0x6df   :  { %v18116_v4 = vsel %vm3108_vm7, %v6319_v31, %v9916_v32  ;;  %v18119_v56 = vsel %vm3108_vm7, %v6320_v42, %v9917_v26  ;;  %v9982_v32 = vunpack.i.h.bf16 %v18107_v21  ;;  %v9981_v31 = vunpack.i.l.bf16 %v18107_v21  ;;  %v20904_v42 = vld [vmem:[#allocation39_spill] sm:$0xff] }
 0x6e0   :  { %v6440_v33 = vpack.c.bf16 %v18119_v56, %v18116_v4  ;;  %v20909_v4 = vld [vmem:[#allocation166_spill] sm:$0xff] }
 0x6e2   :  { %7522 = vmatmul.msk.bf16.gmra.mxu1 %vm3225_vm9, %v6438_v46  ;;  %v9955_v45 = vpop.permute.xlu0 %9954 }
 0x6e3   :  { %v9957_v60 = vunpack.i.h.bf16 %v9955_v45  ;;  %v9956_v22 = vunpack.i.l.bf16 %v9955_v45  ;;  %v18189_v1 = vpop.permute.xlu2 %10024  ;;  %v10012_v45 = vunpack.i.h.bf16 %v10010_v49 }
 0x6e4   :  { %v9930_v10 = vpop.permute.xlu1 %9929 }
 0x6e5   :  { %v9932_v39 = vunpack.i.h.bf16 %v9930_v10  ;;  %v9931_v63 = vunpack.i.l.bf16 %v9930_v10  ;;  %v10011_v10 = vunpack.i.l.bf16 %v10010_v49 }
 0x6e7   :  { %v18138_v16 = vsel %vm3108_vm7, %v6353_v13, %v9931_v63  ;;  %v18141_v9 = vsel %vm3108_vm7, %v6354_v19, %v9932_v39 }
 0x6e8   :  { %v6457_v27 = vpack.c.bf16 %v18141_v9, %v18138_v16  ;;  %v18255_v16 = vld [vmem:[%s19035_s5] ss:$0 sm:$0xff] }
 0x6ea   :  { %v9970_v47 = vpop.permute.xlu0 %9969 }
 0x6eb   :  { %7539 = vmatmul.msk.bf16.gmra.mxu3 %vm3225_vm9, %v6455_v17  ;;  %v9972_v8 = vunpack.i.h.bf16 %v9970_v47  ;;  %v9971_v38 = vunpack.i.l.bf16 %v9970_v47  ;;  %v20906_v47 = vld [vmem:[#allocation19_spill] sm:$0xff] }
 0x6ec   :  { %v9945_v46 = vpop.permute.xlu1 %9944 }
 0x6ed   :  { %v9947_v7 = vunpack.i.h.bf16 %v9945_v46  ;;  %v9946_v54 = vunpack.i.l.bf16 %v9945_v46  ;;  %v6293_v53 = vsel %vm2978_vm6, %v20904_v42, %v9971_v38  ;;  %v6294_v34 = vsel %vm2978_vm6, %v20905_v15, %v9972_v8  ;;  %v20911_v38 = vld [vmem:[#allocation146_spill] sm:$0xff] }
 0x6ee   :  { %v6327_v46 = vsel %vm3043_vm8, %v20906_v47, %v10011_v10  ;;  %v10027_v47 = vunpack.i.h.bf16 %v18189_v1 }
 0x6ef   :  { %v6291_v48 = vsel %vm2978_vm6, %v17147_v14, %v9946_v54  ;;  %v6292_v20 = vsel %vm2978_vm6, %v17144_v50, %v9947_v7  ;;  %v20907_v7 = vld [vmem:[#allocation80_spill] sm:$0xff] }
 0x6f0   :  { %v6355_v35 = vsel %vm3043_vm8, %v6291_v48, %v9951_v52  ;;  %v6356_v40 = vsel %vm3043_vm8, %v6292_v20, %v9952_v3  ;;  %v6328_v54 = vsel %vm3043_vm8, %v20907_v7, %v10012_v45 }
 0x6f1   :  { %v18160_v17 = vsel %vm3108_vm7, %v6355_v35, %v9956_v22  ;;  %v18163_v36 = vsel %vm3108_vm7, %v6356_v40, %v9957_v60  ;;  %v18215_v60 = vpop.permute.xlu2 %10039  ;;  %v20908_v22 = vld [vmem:[#allocation91_spill] sm:$0xff] }
 0x6f2   :  { %7523 = vmatmul.msk.bf16.gmra.mxu1 %vm3225_vm9, %v6439_v61  ;;  %v6458_v14 = vpack.c.bf16 %v18163_v36, %v18160_v17  ;;  %v9985_v50 = vpop.permute.xlu0 %9984  ;;  %v10172_v17 = vld [vmem:[%s19029_s0 + $0x21] sm:$0xff] }
 0x6f3   :  { %v9987_v55 = vunpack.i.h.bf16 %v9985_v50  ;;  %v9986_v0 = vunpack.i.l.bf16 %v9985_v50 }
 0x6f4   :  { %v9960_v24 = vpop.permute.xlu1 %9959 }
 0x6f5   :  { %v9962_v57 = vunpack.i.h.bf16 %v9960_v24  ;;  %v9961_v41 = vunpack.i.l.bf16 %v9960_v24  ;;  %v6325_v48 = vsel %vm3043_vm8, %v20908_v22, %v9986_v0  ;;  %v6326_v56 = vsel %vm3043_vm8, %v20909_v4, %v9987_v55  ;;  %v20913_v22 = vld [vmem:[#allocation120_spill] sm:$0xff] }
 0x6f6   :  { %v9997_v24 = vunpack.i.h.bf16 %v18143_v58 }
 0x6f7   :  { %v6324_v23 = vsel %vm3043_vm8, %v17674_v59, %v9962_v57  ;;  %v6323_v29 = vsel %vm3043_vm8, %v20903_v51, %v9961_v41  ;;  %v9996_v57 = vunpack.i.l.bf16 %v18143_v58 }
 0x6f8   :  { %v18178_v28 = vsel %vm3108_vm7, %v6323_v29, %v9966_v11  ;;  %v18181_v12 = vsel %vm3108_vm7, %v6324_v23, %v9967_v43  ;;  %v18246_v23 = vld [vmem:[%s19034_s4] ss:$0 sm:$0xff]  ;;  %v20910_v29 = vld [vmem:[#allocation79_spill] sm:$0xff]  ;;  %v6296_v58 = vsel %vm2978_vm6, %v20911_v38, %v9997_v24 }
 0x6f9   :  { %v6442_v61 = vpack.c.bf16 %v18181_v12, %v18178_v28  ;;  %v6295_v8 = vsel %vm2978_vm6, %v20910_v29, %v9996_v57  ;;  %v20916_v28 = vld [vmem:[#allocation99_spill] sm:$0xff] }
 0x6fa   :  { %v10000_v59 = vpop.permute.xlu0 %9999 }
 0x6fb   :  { %7540 = vmatmul.msk.bf16.gmra.mxu3 %vm3225_vm9, %v6456_v5  ;;  %v10002_v41 = vunpack.i.h.bf16 %v10000_v59  ;;  %v10001_v43 = vunpack.i.l.bf16 %v10000_v59 }
 0x6fc   :  { %v9975_v62 = vpop.permute.xlu1 %9974 }
 0x6fd   :  { %v9977_v30 = vunpack.i.h.bf16 %v9975_v62  ;;  %v9976_v26 = vunpack.i.l.bf16 %v9975_v62  ;;  %v6359_v9 = vsel %vm3043_vm8, %v6295_v8, %v10001_v43 }
 0x6ff   :  { %v6358_v2 = vsel %vm3043_vm8, %v6294_v34, %v9977_v30  ;;  %v6357_v6 = vsel %vm3043_vm8, %v6293_v53, %v9976_v26  ;;  %v18266_v53 = vpop.permute.xlu2 %10054 }
 0x700   :  { %v18200_v5 = vsel %vm3108_vm7, %v6357_v6, %v9981_v31  ;;  %v18203_v18 = vsel %vm3108_vm7, %v6358_v2, %v9982_v32 }
 0x701   :  { %v6459_v21 = vpack.c.bf16 %v18203_v18, %v18200_v5  ;;  %v20921_v18 = vld [vmem:[#allocation89_spill] sm:$0xff] }
 0x702   :  { %7524 = vmatmul.msk.bf16.gmra.mxu1 %vm3225_vm9, %v6440_v33  ;;  %v10015_v39 = vpop.permute.xlu0 %10014 }
 0x703   :  { %v10017_v63 = vunpack.i.h.bf16 %v10015_v39  ;;  %v10016_v13 = vunpack.i.l.bf16 %v10015_v39  ;;  %v10169_v39 = vld [vmem:[%s19029_s0 + $0x1c9] sm:$0xff] }
 0x704   :  { %v9990_v19 = vpop.permute.xlu1 %9989 }
 0x705   :  { %v9992_v3 = vunpack.i.h.bf16 %v9990_v19  ;;  %v9991_v52 = vunpack.i.l.bf16 %v9990_v19  ;;  %v18222_v33 = vsel %vm3108_vm7, %v6327_v46, %v10016_v13  ;;  %v18225_v20 = vsel %vm3108_vm7, %v6328_v54, %v10017_v63 }
 0x706   :  { %v6444_v49 = vpack.c.bf16 %v18225_v20, %v18222_v33  ;;  %v10026_v46 = vunpack.i.l.bf16 %v18189_v1 }
 0x707   :  { %v18228_v35 = vsel %vm3108_vm7, %v6325_v48, %v9991_v52  ;;  %v18231_v40 = vsel %vm3108_vm7, %v6326_v56, %v9992_v3  ;;  %v20912_v3 = vld [vmem:[#allocation77_spill] sm:$0xff] }
 0x708   :  { %v6443_v50 = vpack.c.bf16 %v18231_v40, %v18228_v35 }
 0x70a   :  { %v10030_v11 = vpop.permute.xlu0 %10029 }
 0x70b   :  { %7541 = vmatmul.msk.bf16.gmra.mxu3 %vm3225_vm9, %v6457_v27  ;;  %v6360_v27 = vsel %vm3043_vm8, %v6296_v58, %v10002_v41  ;;  %v10032_v7 = vunpack.i.h.bf16 %v10030_v11  ;;  %v10031_v54 = vunpack.i.l.bf16 %v10030_v11 }
 0x70c   :  { %v10005_v51 = vpop.permute.xlu1 %10004 }
 0x70d   :  { %v10007_v62 = vunpack.i.h.bf16 %v10005_v51  ;;  %v10006_v59 = vunpack.i.l.bf16 %v10005_v51  ;;  %v18310_v51 = vpop.permute.xlu2 %10069 }
 0x70e   :  { %v6673_v30 = vpop.f32.mrf.mxu3 }
 0x70f   :  { %v6789_v26 = vmul.f32 %v18246_v23, %v6673_v30  ;;  %v6593_v32 = vpop.f32.mrf.mxu1  ;;  %v18261_v31 = vsel %vm3108_vm7, %v6359_v9, %v10006_v59  ;;  %v18264_v42 = vsel %vm3108_vm7, %v6360_v27, %v10007_v62  ;;  %v10171_v9 = vld [vmem:[%s19029_s0 + $0x1d1] sm:$0xff] }
 0x710   :  { %v6757_v15 = vmul.f32 %v18246_v23, %v6593_v32  ;;  %v6460_v34 = vpack.c.bf16 %v18264_v42, %v18261_v31  ;;  %v10042_v32 = vunpack.i.h.bf16 %v18215_v60  ;;  %v20924_v31 = vld [vmem:[#allocation125_spill] sm:$0xff] }
 0x711   :  { %v6857_v2 = vadd.f32 %v18255_v16, %v6789_v26 }
 0x712   :  { %v6825_v6 = vadd.f32 %v18255_v16, %v6757_v15  ;;  %7525 = vmatmul.msk.bf16.gmra.mxu1 %vm3225_vm9, %v6441_v44  ;;  %v18277_v10 = vpop.permute.xlu0 %10044  ;;  %v10041_v15 = vunpack.i.l.bf16 %v18215_v60 }
 0x713   :  { %v6921_v45 = vmax.f32 %v6857_v2, 0.0  ;;  %v20914_v2 = vld [vmem:[#allocation134_spill] sm:$0xff] }
 0x714   :  { %v6889_v55 = vmax.f32 %v6825_v6, 0.0  ;;  %v10020_v0 = vpop.permute.xlu1 %10019 }
 0x715   :  { %v6985_v63 = vadd.f32 %v10169_v39, %v6921_v45  ;;  %v10022_v13 = vunpack.i.h.bf16 %v10020_v0  ;;  %v10021_v19 = vunpack.i.l.bf16 %v10020_v0  ;;  %v20915_v45 = vld [vmem:[#allocation145_spill] sm:$0xff] }
 0x716   :  { %v6953_v25 = vadd.f32 %v10170_v37, %v6889_v55  ;;  %v6675_v44 = vpop.f32.mrf.mxu3 }
 0x717   :  { %7049 = vst.msk [vmem:[%s19036_s7 + $0x100] sm:$0xff] %vm2653_vm0, %v6985_v63  ;;  %v6297_v52 = vsel %vm2978_vm6, %v20912_v3, %v10021_v19  ;;  %v6298_v48 = vsel %vm2978_vm6, %v20913_v22, %v10022_v13  ;;  %v6790_v1 = vmul.f32 %v18246_v23, %v6675_v44  ;;  %v6595_v4 = vpop.f32.mrf.mxu1  ;;  %v10057_v22 = vunpack.i.h.bf16 %v18266_v53 }
 0x718   :  { %7017 = vst.msk [vmem:[%s19036_s7] sm:$0xff] %vm2653_vm0, %v6953_v25  ;;  %v6361_v56 = vsel %vm3043_vm8, %v6297_v52, %v10026_v46  ;;  %v6362_v24 = vsel %vm3043_vm8, %v6298_v48, %v10027_v47  ;;  %v6758_v57 = vmul.f32 %v18246_v23, %v6595_v4  ;;  %v10047_v46 = vunpack.i.h.bf16 %v18277_v10  ;;  %v10173_v48 = vld [vmem:[%s19029_s0 + $0x1e1] sm:$0xff] }
 0x719   :  { %v6858_v41 = vadd.f32 %v18255_v16, %v6790_v1  ;;  %v18305_v43 = vsel %vm3108_vm7, %v6361_v56, %v10031_v54  ;;  %v18308_v11 = vsel %vm3108_vm7, %v6362_v24, %v10032_v7  ;;  %v10046_v7 = vunpack.i.l.bf16 %v18277_v10  ;;  %v10085_v54 = vpop.permute.xlu2 %10084 }
 0x71a   :  { %v6826_v29 = vadd.f32 %v18255_v16, %v6758_v57  ;;  %v6461_v8 = vpack.c.bf16 %v18308_v11, %v18305_v43  ;;  %v18319_v58 = vpop.permute.xlu0 %10059  ;;  %v10056_v56 = vunpack.i.l.bf16 %v18266_v53  ;;  %v10174_v57 = vld [vmem:[%s19029_s0 + $0x31] sm:$0xff] }
 0x71b   :  { %v6922_v38 = vmax.f32 %v6858_v41, 0.0  ;;  %7542 = vmatmul.msk.bf16.gmra.mxu3 %vm3225_vm9, %v6458_v14  ;;  %v6299_v12 = vsel %vm2978_vm6, %v20916_v28, %v10046_v7 }
 0x71c   :  { %v6890_v62 = vmax.f32 %v6826_v29, 0.0  ;;  %v10035_v59 = vpop.permute.xlu1 %10034 }
 0x71d   :  { %v6986_v27 = vadd.f32 %v10171_v9, %v6922_v38  ;;  %v10037_v30 = vunpack.i.h.bf16 %v10035_v59  ;;  %v10036_v26 = vunpack.i.l.bf16 %v10035_v59  ;;  %v10086_v38 = vunpack.i.l.bf16 %v10085_v54 }
 0x71e   :  { %v6954_v36 = vadd.f32 %v10172_v17, %v6890_v62  ;;  %v6678_v14 = vpop.f32.mrf.mxu3 }
 0x71f   :  { %7050 = vst.msk [vmem:[%s19036_s7 + $0x108] sm:$0xff] %vm2653_vm0, %v6986_v27  ;;  %v6330_v6 = vsel %vm3043_vm8, %v20914_v2, %v10037_v30  ;;  %v6329_v55 = vsel %vm3043_vm8, %v20915_v45, %v10036_v26  ;;  %v6791_v0 = vmul.f32 %v18246_v23, %v6678_v14  ;;  %v6598_v60 = vpop.f32.mrf.mxu1  ;;  %v10087_v27 = vunpack.i.h.bf16 %v10085_v54  ;;  %v10175_v54 = vld [vmem:[%s19029_s0 + $0x1e9] sm:$0xff] }
 0x720   :  { %7018 = vst.msk [vmem:[%s19036_s7 + $0x8] sm:$0xff] %vm2653_vm0, %v6954_v36  ;;  %v6759_v39 = vmul.f32 %v18246_v23, %v6598_v60  ;;  %v18344_v63 = vsel %vm3108_vm7, %v6329_v55, %v10041_v15  ;;  %v18347_v13 = vsel %vm3108_vm7, %v6330_v6, %v10042_v32  ;;  %v10061_v15 = vunpack.i.l.bf16 %v18319_v58  ;;  %v20918_v6 = vld [vmem:[#allocation22_spill] sm:$0xff] }
 0x721   :  { %v6859_v19 = vadd.f32 %v18255_v16, %v6791_v0  ;;  %v6445_v47 = vpack.c.bf16 %v18347_v13, %v18344_v63  ;;  %v10062_v14 = vunpack.i.h.bf16 %v18319_v58  ;;  %v6333_v45 = vsel %vm3043_vm8, %v20918_v6, %v10086_v38  ;;  %v20919_v60 = vld [vmem:[#allocation162_spill] sm:$0xff] }
 0x722   :  { %v6827_v37 = vadd.f32 %v18255_v16, %v6759_v39  ;;  %7526 = vmatmul.msk.bf16.gmra.mxu1 %vm3225_vm9, %v6442_v61  ;;  %v18359_v44 = vpop.permute.xlu0 %10074  ;;  %v20917_v61 = vld [vmem:[#allocation53_spill] sm:$0xff]  ;;  %v6334_v39 = vsel %vm3043_vm8, %v20919_v60, %v10087_v27  ;;  %v20920_v58 = vld [vmem:[#allocation86_spill] sm:$0xff]  ;;  %v10072_v38 = vunpack.i.h.bf16 %v18310_v51 }
 0x723   :  { %v6923_v25 = vmax.f32 %v6859_v19, 0.0  ;;  %v6300_v24 = vsel %vm2978_vm6, %v20917_v61, %v10047_v46 }
 0x724   :  { %v6891_v3 = vmax.f32 %v6827_v37, 0.0  ;;  %v10050_v52 = vpop.permute.xlu1 %10049 }
 0x725   :  { %v6987_v10 = vadd.f32 %v10173_v48, %v6923_v25  ;;  %v10052_v1 = vunpack.i.h.bf16 %v10050_v52  ;;  %v10051_v4 = vunpack.i.l.bf16 %v10050_v52  ;;  %v6331_v25 = vsel %vm3043_vm8, %v20920_v58, %v10061_v15 }
 0x726   :  { %v6955_v41 = vadd.f32 %v10174_v57, %v6891_v3  ;;  %v6680_v29 = vpop.f32.mrf.mxu3  ;;  %v10071_v57 = vunpack.i.l.bf16 %v18310_v51  ;;  %v20923_v51 = vld [vmem:[#allocation149_spill] sm:$0xff] }
 0x727   :  { %7051 = vst.msk [vmem:[%s19036_s7 + $0x110] sm:$0xff] %vm2653_vm0, %v6987_v10  ;;  %v6364_v53 = vsel %vm3043_vm8, %v6300_v24, %v10052_v1  ;;  %v6363_v62 = vsel %vm3043_vm8, %v6299_v12, %v10051_v4  ;;  %v6792_v59 = vmul.f32 %v18246_v23, %v6680_v29  ;;  %v6600_v9 = vpop.f32.mrf.mxu1 }
 0x728   :  { %7019 = vst.msk [vmem:[%s19036_s7 + $0x10] sm:$0xff] %vm2653_vm0, %v6955_v41  ;;  %v6760_v30 = vmul.f32 %v18246_v23, %v6600_v9  ;;  %v18386_v26 = vsel %vm3108_vm7, %v6363_v62, %v10056_v56  ;;  %v18389_v32 = vsel %vm3108_vm7, %v6364_v53, %v10057_v22  ;;  %v10176_v22 = vld [vmem:[%s19029_s0 + $0x39] sm:$0xff]  ;;  %v10077_v62 = vunpack.i.h.bf16 %v18359_v44 }
 0x729   :  { %v6860_v17 = vadd.f32 %v18255_v16, %v6792_v59  ;;  %v6462_v36 = vpack.c.bf16 %v18389_v32, %v18386_v26  ;;  %v10076_v59 = vunpack.i.l.bf16 %v18359_v44  ;;  %v10177_v44 = vld [vmem:[%s19029_s0 + $0x1f9] sm:$0xff] }
 0x72a   :  { %v6828_v2 = vadd.f32 %v18255_v16, %v6760_v30  ;;  %v10090_v0 = vpop.permute.xlu0 %10089  ;;  %v20922_v30 = vld [vmem:[#allocation51_spill] sm:$0xff] }
 0x72b   :  { %v6924_v55 = vmax.f32 %v6860_v17, 0.0  ;;  %7543 = vmatmul.msk.bf16.gmra.mxu3 %vm3225_vm9, %v6459_v21  ;;  %v10092_v46 = vunpack.i.h.bf16 %v10090_v0  ;;  %v10091_v7 = vunpack.i.l.bf16 %v10090_v0  ;;  %v6332_v21 = vsel %vm3043_vm8, %v20921_v18, %v10062_v14 }
 0x72c   :  { %v6892_v19 = vmax.f32 %v6828_v2, 0.0  ;;  %v10065_v37 = vpop.permute.xlu1 %10064  ;;  %v6301_v15 = vsel %vm2978_vm6, %v20922_v30, %v10071_v57  ;;  %v6302_v2 = vsel %vm2978_vm6, %v20923_v51, %v10072_v38  ;;  %v10180_v57 = vld [vmem:[%s19029_s0 + $0x51] sm:$0xff] }
 0x72d   :  { %v6988_v3 = vadd.f32 %v10175_v54, %v6924_v55  ;;  %v10067_v52 = vunpack.i.h.bf16 %v10065_v37  ;;  %v10066_v5 = vunpack.i.l.bf16 %v10065_v37  ;;  %v18416_v10 = vsel %vm3108_vm7, %v6333_v45, %v10091_v7  ;;  %v10100_v54 = vpop.permute.xlu2 %10099 }
 0x72e   :  { %v6956_v48 = vadd.f32 %v10176_v22, %v6892_v19  ;;  %v18419_v1 = vsel %vm3108_vm7, %v6334_v39, %v10092_v46  ;;  %v6683_v4 = vpop.f32.mrf.mxu3  ;;  %v6365_v35 = vsel %vm3043_vm8, %v6301_v15, %v10076_v59  ;;  %v6366_v40 = vsel %vm3043_vm8, %v6302_v2, %v10077_v62  ;;  %v20926_v62 = vld [vmem:[#allocation130_spill] sm:$0xff] }
 0x72f   :  { %7052 = vst.msk [vmem:[%s19036_s7 + $0x118] sm:$0xff] %vm2653_vm0, %v6988_v3  ;;  %v6447_v56 = vpack.c.bf16 %v18419_v1, %v18416_v10  ;;  %v18428_v28 = vsel %vm3108_vm7, %v6331_v25, %v10066_v5  ;;  %v18431_v12 = vsel %vm3108_vm7, %v6332_v21, %v10067_v52  ;;  %v6793_v61 = vmul.f32 %v18246_v23, %v6683_v4  ;;  %v6603_v24 = vpop.f32.mrf.mxu1 }
 0x730   :  { %7020 = vst.msk [vmem:[%s19036_s7 + $0x18] sm:$0xff] %vm2653_vm0, %v6956_v48  ;;  %v6446_v41 = vpack.c.bf16 %v18431_v12, %v18428_v28  ;;  %v6761_v29 = vmul.f32 %v18246_v23, %v6603_v24  ;;  %v10102_v21 = vunpack.i.h.bf16 %v10100_v54  ;;  %v10101_v22 = vunpack.i.l.bf16 %v10100_v54  ;;  %v10179_v48 = vld [vmem:[%s19029_s0 + $0x201] sm:$0xff] }
 0x731   :  { %v6861_v53 = vadd.f32 %v18255_v16, %v6793_v61 }
 0x732   :  { %v6829_v9 = vadd.f32 %v18255_v16, %v6761_v29  ;;  %7527 = vmatmul.msk.bf16.gmra.mxu1 %vm3225_vm9, %v6443_v50  ;;  %v10178_v50 = vld [vmem:[%s19029_s0 + $0x49] sm:$0xff] }
 0x733   :  { %v6925_v27 = vmax.f32 %v6861_v53, 0.0 }
 0x734   :  { %v6893_v17 = vmax.f32 %v6829_v9, 0.0  ;;  %v10080_v14 = vpop.permute.xlu1 %10079  ;;  %v20927_v9 = vld [vmem:[#allocation128_spill] sm:$0xff] }
 0x735   :  { %v6989_v6 = vadd.f32 %v10177_v44, %v6925_v27  ;;  %v10082_v45 = vunpack.i.h.bf16 %v10080_v14  ;;  %v10081_v55 = vunpack.i.l.bf16 %v10080_v14 }
 0x736   :  { %v6957_v0 = vadd.f32 %v10178_v50, %v6893_v17  ;;  %v6685_v60 = vpop.f32.mrf.mxu3 }
 0x737   :  { %7053 = vst.msk [vmem:[%s19036_s7 + $0x120] sm:$0xff] %vm2653_vm0, %v6989_v6  ;;  %v18468_v39 = vsel %vm3108_vm7, %v6365_v35, %v10081_v55  ;;  %v18471_v19 = vsel %vm3108_vm7, %v6366_v40, %v10082_v45  ;;  %v6794_v46 = vmul.f32 %v18246_v23, %v6685_v60  ;;  %v6605_v7 = vpop.f32.mrf.mxu1  ;;  %v10181_v60 = vld [vmem:[%s19029_s0 + $0x211] sm:$0xff] }
 0x738   :  { %7021 = vst.msk [vmem:[%s19036_s7 + $0x20] sm:$0xff] %vm2653_vm0, %v6957_v0  ;;  %v6463_v37 = vpack.c.bf16 %v18471_v19, %v18468_v39  ;;  %v6762_v58 = vmul.f32 %v18246_v23, %v6605_v7  ;;  %v10182_v7 = vld [vmem:[%s19029_s0 + $0x61] sm:$0xff] }
 0x739   :  { %v6862_v25 = vadd.f32 %v18255_v16, %v6794_v46 }
 0x73a   :  { %v6830_v3 = vadd.f32 %v18255_v16, %v6762_v58 }
 0x73b   :  { %v6926_v52 = vmax.f32 %v6862_v25, 0.0  ;;  %7544 = vmatmul.msk.bf16.gmra.mxu3 %vm3225_vm9, %v6460_v34  ;;  %v20925_v34 = vld [vmem:[#allocation161_spill] sm:$0xff] }
 0x73c   :  { %v6894_v5 = vmax.f32 %v6830_v3, 0.0  ;;  %v10095_v18 = vpop.permute.xlu1 %10094 }
 0x73d   :  { %v6990_v4 = vadd.f32 %v10179_v48, %v6926_v52  ;;  %v10097_v61 = vunpack.i.h.bf16 %v10095_v18  ;;  %v10096_v24 = vunpack.i.l.bf16 %v10095_v18 }
 0x73e   :  { %v6958_v29 = vadd.f32 %v10180_v57, %v6894_v5  ;;  %v6688_v38 = vpop.f32.mrf.mxu3  ;;  %v10183_v5 = vld [vmem:[%s19029_s0 + $0x219] sm:$0xff] }
 0x73f   :  { %7054 = vst.msk [vmem:[%s19036_s7 + $0x128] sm:$0xff] %vm2653_vm0, %v6990_v4  ;;  %v6335_v42 = vsel %vm3043_vm8, %v20924_v31, %v10096_v24  ;;  %v6336_v53 = vsel %vm3043_vm8, %v20925_v34, %v10097_v61  ;;  %v6367_v59 = vsel %vm3043_vm8, %v20926_v62, %v10096_v24  ;;  %v6368_v27 = vsel %vm3043_vm8, %v20927_v9, %v10097_v61  ;;  %v6608_v30 = vpop.f32.mrf.mxu1  ;;  %v10186_v31 = vld [vmem:[%s19029_s0 + $0x79] sm:$0xff] }
 0x740   :  { %7022 = vst.msk [vmem:[%s19036_s7 + $0x28] sm:$0xff] %vm2653_vm0, %v6958_v29  ;;  %v18510_v15 = vsel %vm3108_vm7, %v6335_v42, %v10101_v22  ;;  %v18513_v17 = vsel %vm3108_vm7, %v6336_v53, %v10102_v21  ;;  %v18516_v14 = vsel %vm3108_vm7, %v6367_v59, %v10101_v22  ;;  %v18519_v51 = vsel %vm3108_vm7, %v6368_v27, %v10102_v21  ;;  %v10184_v21 = vld [vmem:[%s19029_s0 + $0x69] sm:$0xff]  ;;  %v10187_v27 = vld [vmem:[%s19029_s0 + $0x231] sm:$0xff] }
 0x741   :  { %v6448_v2 = vpack.c.bf16 %v18513_v17, %v18510_v15  ;;  %v6464_v44 = vpack.c.bf16 %v18519_v51, %v18516_v14  ;;  %v6795_v6 = vmul.f32 %v18246_v23, %v6688_v38  ;;  %v6763_v45 = vmul.f32 %v18246_v23, %v6608_v30  ;;  %v10185_v29 = vld [vmem:[%s19029_s0 + $0x229] sm:$0xff] }
 0x742   :  { %7528 = vmatmul.msk.bf16.gmra.mxu1 %vm3225_vm9, %v6444_v49 }
 0x743   :  { %v6863_v55 = vadd.f32 %v18255_v16, %v6795_v6  ;;  %v6831_v35 = vadd.f32 %v18255_v16, %v6763_v45  ;;  %v10188_v6 = vld [vmem:[%s19029_s0 + $0x81] sm:$0xff] }
 0x745   :  { %v6927_v40 = vmax.f32 %v6863_v55, 0.0  ;;  %v6895_v50 = vmax.f32 %v6831_v35, 0.0 }
 0x746   :  { %v6690_v0 = vpop.f32.mrf.mxu3 }
 0x747   :  { %v6991_v46 = vadd.f32 %v10181_v60, %v6927_v40  ;;  %v6959_v58 = vadd.f32 %v10182_v7, %v6895_v50  ;;  %v6796_v33 = vmul.f32 %v18246_v23, %v6690_v0  ;;  %v6610_v20 = vpop.f32.mrf.mxu1  ;;  %v10189_v60 = vld [vmem:[%s19029_s0 + $0x241] sm:$0xff]  ;;  %v10190_v7 = vld [vmem:[%s19029_s0 + $0x91] sm:$0xff] }
 0x748   :  { %v6764_v49 = vmul.f32 %v18246_v23, %v6610_v20 }
 0x749   :  { %7055 = vst.msk [vmem:[%s19036_s7 + $0x130] sm:$0xff] %vm2653_vm0, %v6991_v46  ;;  %v6864_v25 = vadd.f32 %v18255_v16, %v6796_v33 }
 0x74a   :  { %7023 = vst.msk [vmem:[%s19036_s7 + $0x30] sm:$0xff] %vm2653_vm0, %v6959_v58  ;;  %v6832_v54 = vadd.f32 %v18255_v16, %v6764_v49 }
 0x74b   :  { %v6928_v3 = vmax.f32 %v6864_v25, 0.0  ;;  %7545 = vmatmul.msk.bf16.gmra.mxu3 %vm3225_vm9, %v6461_v8 }
 0x74c   :  { %v6896_v52 = vmax.f32 %v6832_v54, 0.0 }
 0x74d   :  { %v6992_v18 = vadd.f32 %v10183_v5, %v6928_v3  ;;  %v10191_v3 = vld [vmem:[%s19029_s0 + $0x249] sm:$0xff]  ;;  %v10192_v5 = vld [vmem:[%s19029_s0 + $0x99] sm:$0xff] }
 0x74e   :  { %v6960_v22 = vadd.f32 %v10184_v21, %v6896_v52  ;;  %v6693_v48 = vpop.f32.mrf.mxu3 }
 0x74f   :  { %7056 = vst.msk [vmem:[%s19036_s7 + $0x138] sm:$0xff] %vm2653_vm0, %v6992_v18  ;;  %v6797_v43 = vmul.f32 %v18246_v23, %v6693_v48  ;;  %v6613_v11 = vpop.f32.mrf.mxu1 }
 0x750   :  { %7024 = vst.msk [vmem:[%s19036_s7 + $0x38] sm:$0xff] %vm2653_vm0, %v6960_v22  ;;  %v6765_v8 = vmul.f32 %v18246_v23, %v6613_v11 }
 0x751   :  { %v6865_v4 = vadd.f32 %v18255_v16, %v6797_v43 }
 0x752   :  { %v6833_v61 = vadd.f32 %v18255_v16, %v6765_v8  ;;  %7529 = vmatmul.msk.bf16.gmra.mxu1 %vm3225_vm9, %v6445_v47  ;;  %v10193_v8 = vld [vmem:[%s19029_s0 + $0x259] sm:$0xff] }
 0x753   :  { %v6929_v24 = vmax.f32 %v6865_v4, 0.0 }
 0x754   :  { %v6897_v57 = vmax.f32 %v6833_v61, 0.0  ;;  %v10194_v61 = vld [vmem:[%s19029_s0 + $0xa9] sm:$0xff] }
 0x755   :  { %v6993_v38 = vadd.f32 %v10185_v29, %v6929_v24 }
 0x756   :  { %v6961_v42 = vadd.f32 %v10186_v31, %v6897_v57  ;;  %v6695_v34 = vpop.f32.mrf.mxu3 }
 0x757   :  { %7057 = vst.msk [vmem:[%s19036_s7 + $0x140] sm:$0xff] %vm2653_vm0, %v6993_v38  ;;  %v6798_v63 = vmul.f32 %v18246_v23, %v6695_v34  ;;  %v6615_v13 = vpop.f32.mrf.mxu1  ;;  %v10195_v34 = vld [vmem:[%s19029_s0 + $0x261] sm:$0xff] }
 0x758   :  { %7025 = vst.msk [vmem:[%s19036_s7 + $0x40] sm:$0xff] %vm2653_vm0, %v6961_v42  ;;  %v6766_v47 = vmul.f32 %v18246_v23, %v6615_v13  ;;  %v10196_v13 = vld [vmem:[%s19029_s0 + $0xb1] sm:$0xff] }
 0x759   :  { %v6866_v53 = vadd.f32 %v18255_v16, %v6798_v63 }
 0x75a   :  { %v6834_v62 = vadd.f32 %v18255_v16, %v6766_v47 }
 0x75b   :  { %v6930_v59 = vmax.f32 %v6866_v53, 0.0  ;;  %7546 = vmatmul.msk.bf16.gmra.mxu3 %vm3225_vm9, %v6462_v36 }
 0x75c   :  { %v6898_v9 = vmax.f32 %v6834_v62, 0.0 }
 0x75d   :  { %v6994_v30 = vadd.f32 %v10187_v27, %v6930_v59 }
 0x75e   :  { %v6962_v45 = vadd.f32 %v10188_v6, %v6898_v9  ;;  %v6698_v55 = vpop.f32.mrf.mxu3 }
 0x75f   :  { %7058 = vst.msk [vmem:[%s19036_s7 + $0x148] sm:$0xff] %vm2653_vm0, %v6994_v30  ;;  %v6799_v26 = vmul.f32 %v18246_v23, %v6698_v55  ;;  %v6618_v32 = vpop.f32.mrf.mxu1  ;;  %v10197_v30 = vld [vmem:[%s19029_s0 + $0x271] sm:$0xff] }
 0x760   :  { %7026 = vst.msk [vmem:[%s19036_s7 + $0x48] sm:$0xff] %vm2653_vm0, %v6962_v45  ;;  %v6767_v36 = vmul.f32 %v18246_v23, %v6618_v32  ;;  %v10198_v45 = vld [vmem:[%s19029_s0 + $0xc1] sm:$0xff] }
 0x761   :  { %v6867_v35 = vadd.f32 %v18255_v16, %v6799_v26 }
 0x762   :  { %v6835_v40 = vadd.f32 %v18255_v16, %v6767_v36  ;;  %7530 = vmatmul.msk.bf16.gmra.mxu1 %vm3225_vm9, %v6446_v41 }
 0x763   :  { %v6931_v50 = vmax.f32 %v6867_v35, 0.0 }
 0x764   :  { %v6899_v0 = vmax.f32 %v6835_v40, 0.0 }
 0x765   :  { %v6995_v46 = vadd.f32 %v10189_v60, %v6931_v50  ;;  %v10199_v50 = vld [vmem:[%s19029_s0 + $0x279] sm:$0xff]  ;;  %v10200_v60 = vld [vmem:[%s19029_s0 + $0xc9] sm:$0xff] }
 0x766   :  { %v6963_v58 = vadd.f32 %v10190_v7, %v6899_v0  ;;  %v6700_v33 = vpop.f32.mrf.mxu3 }
 0x767   :  { %7059 = vst.msk [vmem:[%s19036_s7 + $0x150] sm:$0xff] %vm2653_vm0, %v6995_v46  ;;  %v6800_v28 = vmul.f32 %v18246_v23, %v6700_v33  ;;  %v6620_v12 = vpop.f32.mrf.mxu1 }
 0x768   :  { %7027 = vst.msk [vmem:[%s19036_s7 + $0x50] sm:$0xff] %vm2653_vm0, %v6963_v58  ;;  %v6768_v41 = vmul.f32 %v18246_v23, %v6620_v12 }
 0x769   :  { %v6868_v20 = vadd.f32 %v18255_v16, %v6800_v28 }
 0x76a   :  { %v6836_v49 = vadd.f32 %v18255_v16, %v6768_v41 }
 0x76b   :  { %v6932_v25 = vmax.f32 %v6868_v20, 0.0  ;;  %7547 = vmatmul.msk.bf16.gmra.mxu3 %vm3225_vm9, %v6463_v37 }
 0x76c   :  { %v6900_v54 = vmax.f32 %v6836_v49, 0.0 }
 0x76d   :  { %v6996_v52 = vadd.f32 %v10191_v3, %v6932_v25  ;;  %v10201_v25 = vld [vmem:[%s19029_s0 + $0x289] sm:$0xff]  ;;  %v10202_v3 = vld [vmem:[%s19029_s0 + $0xd9] sm:$0xff] }
 0x76e   :  { %v6964_v18 = vadd.f32 %v10192_v5, %v6900_v54  ;;  %v6703_v21 = vpop.f32.mrf.mxu3 }
 0x76f   :  { %7060 = vst.msk [vmem:[%s19036_s7 + $0x158] sm:$0xff] %vm2653_vm0, %v6996_v52  ;;  %v6801_v39 = vmul.f32 %v18246_v23, %v6703_v21  ;;  %v6623_v19 = vpop.f32.mrf.mxu1 }
 0x770   :  { %7028 = vst.msk [vmem:[%s19036_s7 + $0x58] sm:$0xff] %vm2653_vm0, %v6964_v18  ;;  %v6769_v37 = vmul.f32 %v18246_v23, %v6623_v19 }
 0x771   :  { %v6869_v22 = vadd.f32 %v18255_v16, %v6801_v39 }
 0x772   :  { %v6837_v48 = vadd.f32 %v18255_v16, %v6769_v37  ;;  %7531 = vmatmul.msk.bf16.gmra.mxu1 %vm3225_vm9, %v6447_v56 }
 0x773   :  { %v6933_v43 = vmax.f32 %v6869_v22, 0.0 }
 0x774   :  { %v6901_v11 = vmax.f32 %v6837_v48, 0.0 }
 0x775   :  { %v6997_v4 = vadd.f32 %v10193_v8, %v6933_v43  ;;  %v10203_v43 = vld [vmem:[%s19029_s0 + $0x291] sm:$0xff]  ;;  %v10204_v8 = vld [vmem:[%s19029_s0 + $0xe1] sm:$0xff] }
 0x776   :  { %v6965_v24 = vadd.f32 %v10194_v61, %v6901_v11  ;;  %v6705_v57 = vpop.f32.mrf.mxu3 }
 0x777   :  { %7061 = vst.msk [vmem:[%s19036_s7 + $0x160] sm:$0xff] %vm2653_vm0, %v6997_v4  ;;  %v6802_v10 = vmul.f32 %v18246_v23, %v6705_v57  ;;  %v6625_v1 = vpop.f32.mrf.mxu1 }
 0x778   :  { %7029 = vst.msk [vmem:[%s19036_s7 + $0x60] sm:$0xff] %vm2653_vm0, %v6965_v24  ;;  %v6770_v56 = vmul.f32 %v18246_v23, %v6625_v1 }
 0x779   :  { %v6870_v29 = vadd.f32 %v18255_v16, %v6802_v10 }
 0x77a   :  { %v6838_v38 = vadd.f32 %v18255_v16, %v6770_v56 }
 0x77b   :  { %v6934_v31 = vmax.f32 %v6870_v29, 0.0  ;;  %7548 = vmatmul.msk.bf16.gmra.mxu3 %vm3225_vm9, %v6464_v44 }
 0x77c   :  { %v6902_v42 = vmax.f32 %v6838_v38, 0.0 }
 0x77d   :  { %v6998_v63 = vadd.f32 %v10195_v34, %v6934_v31  ;;  %v10205_v31 = vld [vmem:[%s19029_s0 + $0x2a1] sm:$0xff]  ;;  %v10206_v34 = vld [vmem:[%s19029_s0 + $0xf1] sm:$0xff] }
 0x77e   :  { %v6966_v47 = vadd.f32 %v10196_v13, %v6902_v42  ;;  %v6708_v53 = vpop.f32.mrf.mxu3 }
 0x77f   :  { %7062 = vst.msk [vmem:[%s19036_s7 + $0x168] sm:$0xff] %vm2653_vm0, %v6998_v63  ;;  %v6803_v14 = vmul.f32 %v18246_v23, %v6708_v53  ;;  %v6628_v51 = vpop.f32.mrf.mxu1 }
 0x780   :  { %7030 = vst.msk [vmem:[%s19036_s7 + $0x68] sm:$0xff] %vm2653_vm0, %v6966_v47  ;;  %v6771_v44 = vmul.f32 %v18246_v23, %v6628_v51 }
 0x781   :  { %v6871_v62 = vadd.f32 %v18255_v16, %v6803_v14 }
 0x782   :  { %v6839_v59 = vadd.f32 %v18255_v16, %v6771_v44  ;;  %7532 = vmatmul.msk.bf16.gmra.mxu1 %vm3225_vm9, %v6448_v2 }
 0x783   :  { %v6935_v9 = vmax.f32 %v6871_v62, 0.0 }
 0x784   :  { %v6903_v27 = vmax.f32 %v6839_v59, 0.0 }
 0x785   :  { %v6999_v6 = vadd.f32 %v10197_v30, %v6935_v9  ;;  %v10207_v9 = vld [vmem:[%s19029_s0 + $0x2a9] sm:$0xff]  ;;  %v10208_v30 = vld [vmem:[%s19029_s0 + $0xf9] sm:$0xff] }
 0x786   :  { %v6967_v55 = vadd.f32 %v10198_v45, %v6903_v27  ;;  %v6710_v26 = vpop.f32.mrf.mxu3 }
 0x787   :  { %7063 = vst.msk [vmem:[%s19036_s7 + $0x170] sm:$0xff] %vm2653_vm0, %v6999_v6  ;;  %v6804_v15 = vmul.f32 %v18246_v23, %v6710_v26  ;;  %v6630_v17 = vpop.f32.mrf.mxu1 }
 0x788   :  { %7031 = vst.msk [vmem:[%s19036_s7 + $0x70] sm:$0xff] %vm2653_vm0, %v6967_v55  ;;  %v6772_v2 = vmul.f32 %v18246_v23, %v6630_v17 }
 0x789   :  { %v6872_v32 = vadd.f32 %v18255_v16, %v6804_v15 }
 0x78a   :  { %v6840_v36 = vadd.f32 %v18255_v16, %v6772_v2 }
 0x78b   :  { %v6936_v35 = vmax.f32 %v6872_v32, 0.0 }
 0x78c   :  { %v6904_v40 = vmax.f32 %v6840_v36, 0.0 }
 0x78d   :  { %v7000_v0 = vadd.f32 %v10199_v50, %v6936_v35  ;;  %v10209_v35 = vld [vmem:[%s19029_s0 + $0x2b9] sm:$0xff]  ;;  %v10210_v50 = vld [vmem:[%s19029_s0 + $0x109] sm:$0xff] }
 0x78e   :  { %v6968_v46 = vadd.f32 %v10200_v60, %v6904_v40  ;;  %v6713_v7 = vpop.f32.mrf.mxu3 }
 0x78f   :  { %7064 = vst.msk [vmem:[%s19036_s7 + $0x178] sm:$0xff] %vm2653_vm0, %v7000_v0  ;;  %v6805_v58 = vmul.f32 %v18246_v23, %v6713_v7  ;;  %v6633_v33 = vpop.f32.mrf.mxu1 }
 0x790   :  { %7032 = vst.msk [vmem:[%s19036_s7 + $0x78] sm:$0xff] %vm2653_vm0, %v6968_v46  ;;  %v6773_v28 = vmul.f32 %v18246_v23, %v6633_v33 }
 0x791   :  { %v6873_v12 = vadd.f32 %v18255_v16, %v6805_v58 }
 0x792   :  { %v6841_v41 = vadd.f32 %v18255_v16, %v6773_v28 }
 0x793   :  { %v6937_v20 = vmax.f32 %v6873_v12, 0.0 }
 0x794   :  { %v6905_v49 = vmax.f32 %v6841_v41, 0.0 }
 0x795   :  { %v7001_v54 = vadd.f32 %v10201_v25, %v6937_v20  ;;  %v10211_v20 = vld [vmem:[%s19029_s0 + $0x2c1] sm:$0xff]  ;;  %v10212_v25 = vld [vmem:[%s19029_s0 + $0x111] sm:$0xff] }
 0x796   :  { %v6969_v52 = vadd.f32 %v10202_v3, %v6905_v49  ;;  %v6715_v5 = vpop.f32.mrf.mxu3 }
 0x797   :  { %7065 = vst.msk [vmem:[%s19036_s7 + $0x180] sm:$0xff] %vm2653_vm0, %v7001_v54  ;;  %v6806_v18 = vmul.f32 %v18246_v23, %v6715_v5  ;;  %v6635_v21 = vpop.f32.mrf.mxu1 }
 0x798   :  { %7033 = vst.msk [vmem:[%s19036_s7 + $0x80] sm:$0xff] %vm2653_vm0, %v6969_v52  ;;  %v6774_v39 = vmul.f32 %v18246_v23, %v6635_v21 }
 0x799   :  { %v6874_v19 = vadd.f32 %v18255_v16, %v6806_v18 }
 0x79a   :  { %v6842_v37 = vadd.f32 %v18255_v16, %v6774_v39 }
 0x79b   :  { %v6938_v22 = vmax.f32 %v6874_v19, 0.0 }
 0x79c   :  { %v6906_v48 = vmax.f32 %v6842_v37, 0.0 }
 0x79d   :  { %v7002_v11 = vadd.f32 %v10203_v43, %v6938_v22  ;;  %v10213_v22 = vld [vmem:[%s19029_s0 + $0x2d1] sm:$0xff]  ;;  %v10214_v43 = vld [vmem:[%s19029_s0 + $0x121] sm:$0xff] }
 0x79e   :  { %v6970_v4 = vadd.f32 %v10204_v8, %v6906_v48  ;;  %v6718_v61 = vpop.f32.mrf.mxu3 }
 0x79f   :  { %7066 = vst.msk [vmem:[%s19036_s7 + $0x188] sm:$0xff] %vm2653_vm0, %v7002_v11  ;;  %v6807_v24 = vmul.f32 %v18246_v23, %v6718_v61  ;;  %v6638_v57 = vpop.f32.mrf.mxu1 }
 0x7a0   :  { %7034 = vst.msk [vmem:[%s19036_s7 + $0x88] sm:$0xff] %vm2653_vm0, %v6970_v4  ;;  %v6775_v10 = vmul.f32 %v18246_v23, %v6638_v57 }
 0x7a1   :  { %v6875_v1 = vadd.f32 %v18255_v16, %v6807_v24 }
 0x7a2   :  { %v6843_v56 = vadd.f32 %v18255_v16, %v6775_v10 }
 0x7a3   :  { %v6939_v29 = vmax.f32 %v6875_v1, 0.0 }
 0x7a4   :  { %v6907_v38 = vmax.f32 %v6843_v56, 0.0 }
 0x7a5   :  { %v7003_v42 = vadd.f32 %v10205_v31, %v6939_v29  ;;  %v10215_v29 = vld [vmem:[%s19029_s0 + $0x2d9] sm:$0xff]  ;;  %v10216_v31 = vld [vmem:[%s19029_s0 + $0x129] sm:$0xff] }
 0x7a6   :  { %v6971_v63 = vadd.f32 %v10206_v34, %v6907_v38  ;;  %v6720_v13 = vpop.f32.mrf.mxu3 }
 0x7a7   :  { %7067 = vst.msk [vmem:[%s19036_s7 + $0x190] sm:$0xff] %vm2653_vm0, %v7003_v42  ;;  %v6808_v47 = vmul.f32 %v18246_v23, %v6720_v13  ;;  %v6640_v53 = vpop.f32.mrf.mxu1 }
 0x7a8   :  { %7035 = vst.msk [vmem:[%s19036_s7 + $0x90] sm:$0xff] %vm2653_vm0, %v6971_v63  ;;  %v6776_v14 = vmul.f32 %v18246_v23, %v6640_v53 }
 0x7a9   :  { %v6876_v51 = vadd.f32 %v18255_v16, %v6808_v47 }
 0x7aa   :  { %v6844_v44 = vadd.f32 %v18255_v16, %v6776_v14 }
 0x7ab   :  { %v6940_v62 = vmax.f32 %v6876_v51, 0.0 }
 0x7ac   :  { %v6908_v59 = vmax.f32 %v6844_v44, 0.0 }
 0x7ad   :  { %v7004_v27 = vadd.f32 %v10207_v9, %v6940_v62  ;;  %v10217_v62 = vld [vmem:[%s19029_s0 + $0x2e9] sm:$0xff]  ;;  %v10218_v9 = vld [vmem:[%s19029_s0 + $0x139] sm:$0xff] }
 0x7ae   :  { %v6972_v6 = vadd.f32 %v10208_v30, %v6908_v59  ;;  %v6723_v45 = vpop.f32.mrf.mxu3 }
 0x7af   :  { %7068 = vst.msk [vmem:[%s19036_s7 + $0x198] sm:$0xff] %vm2653_vm0, %v7004_v27  ;;  %v6809_v55 = vmul.f32 %v18246_v23, %v6723_v45  ;;  %v6643_v26 = vpop.f32.mrf.mxu1 }
 0x7b0   :  { %7036 = vst.msk [vmem:[%s19036_s7 + $0x98] sm:$0xff] %vm2653_vm0, %v6972_v6  ;;  %v6777_v15 = vmul.f32 %v18246_v23, %v6643_v26 }
 0x7b1   :  { %v6877_v17 = vadd.f32 %v18255_v16, %v6809_v55 }
 0x7b2   :  { %v6845_v2 = vadd.f32 %v18255_v16, %v6777_v15 }
 0x7b3   :  { %v6941_v32 = vmax.f32 %v6877_v17, 0.0 }
 0x7b4   :  { %v6909_v36 = vmax.f32 %v6845_v2, 0.0 }
 0x7b5   :  { %v7005_v40 = vadd.f32 %v10209_v35, %v6941_v32  ;;  %v10219_v32 = vld [vmem:[%s19029_s0 + $0x2f1] sm:$0xff]  ;;  %v10220_v35 = vld [vmem:[%s19029_s0 + $0x141] sm:$0xff] }
 0x7b6   :  { %v6973_v0 = vadd.f32 %v10210_v50, %v6909_v36  ;;  %v6725_v60 = vpop.f32.mrf.mxu3 }
 0x7b7   :  { %7069 = vst.msk [vmem:[%s19036_s7 + $0x1a0] sm:$0xff] %vm2653_vm0, %v7005_v40  ;;  %v6810_v46 = vmul.f32 %v18246_v23, %v6725_v60  ;;  %v6645_v7 = vpop.f32.mrf.mxu1 }
 0x7b8   :  { %7037 = vst.msk [vmem:[%s19036_s7 + $0xa0] sm:$0xff] %vm2653_vm0, %v6973_v0  ;;  %v6778_v58 = vmul.f32 %v18246_v23, %v6645_v7 }
 0x7b9   :  { %v6878_v33 = vadd.f32 %v18255_v16, %v6810_v46 }
 0x7ba   :  { %v6846_v28 = vadd.f32 %v18255_v16, %v6778_v58 }
 0x7bb   :  { %v6942_v12 = vmax.f32 %v6878_v33, 0.0 }
 0x7bc   :  { %v6910_v41 = vmax.f32 %v6846_v28, 0.0 }
 0x7bd   :  { %v7006_v49 = vadd.f32 %v10211_v20, %v6942_v12  ;;  %v10221_v12 = vld [vmem:[%s19029_s0 + $0x301] sm:$0xff]  ;;  %v10222_v20 = vld [vmem:[%s19029_s0 + $0x151] sm:$0xff] }
 0x7be   :  { %v6974_v54 = vadd.f32 %v10212_v25, %v6910_v41  ;;  %v6728_v3 = vpop.f32.mrf.mxu3 }
 0x7bf   :  { %7070 = vst.msk [vmem:[%s19036_s7 + $0x1a8] sm:$0xff] %vm2653_vm0, %v7006_v49  ;;  %v6811_v52 = vmul.f32 %v18246_v23, %v6728_v3  ;;  %v6648_v5 = vpop.f32.mrf.mxu1 }
 0x7c0   :  { %7038 = vst.msk [vmem:[%s19036_s7 + $0xa8] sm:$0xff] %vm2653_vm0, %v6974_v54  ;;  %v6779_v18 = vmul.f32 %v18246_v23, %v6648_v5 }
 0x7c1   :  { %v6879_v21 = vadd.f32 %v18255_v16, %v6811_v52 }
 0x7c2   :  { %v6847_v39 = vadd.f32 %v18255_v16, %v6779_v18 }
 0x7c3   :  { %v6943_v19 = vmax.f32 %v6879_v21, 0.0 }
 0x7c4   :  { %v6911_v37 = vmax.f32 %v6847_v39, 0.0 }
 0x7c5   :  { %v7007_v48 = vadd.f32 %v10213_v22, %v6943_v19  ;;  %v10223_v19 = vld [vmem:[%s19029_s0 + $0x309] sm:$0xff]  ;;  %v10224_v22 = vld [vmem:[%s19029_s0 + $0x159] sm:$0xff] }
 0x7c6   :  { %v6975_v11 = vadd.f32 %v10214_v43, %v6911_v37  ;;  %v6730_v8 = vpop.f32.mrf.mxu3 }
 0x7c7   :  { %7071 = vst.msk [vmem:[%s19036_s7 + $0x1b0] sm:$0xff] %vm2653_vm0, %v7007_v48  ;;  %v6812_v4 = vmul.f32 %v18246_v23, %v6730_v8  ;;  %v6650_v61 = vpop.f32.mrf.mxu1 }
 0x7c8   :  { %7039 = vst.msk [vmem:[%s19036_s7 + $0xb0] sm:$0xff] %vm2653_vm0, %v6975_v11  ;;  %v6780_v24 = vmul.f32 %v18246_v23, %v6650_v61 }
 0x7c9   :  { %v6880_v57 = vadd.f32 %v18255_v16, %v6812_v4 }
 0x7ca   :  { %v6848_v10 = vadd.f32 %v18255_v16, %v6780_v24 }
 0x7cb   :  { %v6944_v1 = vmax.f32 %v6880_v57, 0.0 }
 0x7cc   :  { %v6912_v56 = vmax.f32 %v6848_v10, 0.0 }
 0x7cd   :  { %v7008_v38 = vadd.f32 %v10215_v29, %v6944_v1  ;;  %v10225_v1 = vld [vmem:[%s19029_s0 + $0x319] sm:$0xff]  ;;  %v10226_v29 = vld [vmem:[%s19029_s0 + $0x169] sm:$0xff] }
 0x7ce   :  { %v6976_v42 = vadd.f32 %v10216_v31, %v6912_v56  ;;  %v6733_v34 = vpop.f32.mrf.mxu3 }
 0x7cf   :  { %7072 = vst.msk [vmem:[%s19036_s7 + $0x1b8] sm:$0xff] %vm2653_vm0, %v7008_v38  ;;  %v6813_v63 = vmul.f32 %v18246_v23, %v6733_v34  ;;  %v6653_v13 = vpop.f32.mrf.mxu1 }
 0x7d0   :  { %7040 = vst.msk [vmem:[%s19036_s7 + $0xb8] sm:$0xff] %vm2653_vm0, %v6976_v42  ;;  %v6781_v47 = vmul.f32 %v18246_v23, %v6653_v13 }
 0x7d1   :  { %v6881_v53 = vadd.f32 %v18255_v16, %v6813_v63 }
 0x7d2   :  { %v6849_v14 = vadd.f32 %v18255_v16, %v6781_v47 }
 0x7d3   :  { %v6945_v51 = vmax.f32 %v6881_v53, 0.0 }
 0x7d4   :  { %v6913_v44 = vmax.f32 %v6849_v14, 0.0 }
 0x7d5   :  { %v7009_v59 = vadd.f32 %v10217_v62, %v6945_v51  ;;  %v10227_v51 = vld [vmem:[%s19029_s0 + $0x321] sm:$0xff]  ;;  %v10228_v62 = vld [vmem:[%s19029_s0 + $0x171] sm:$0xff] }
 0x7d6   :  { %v6977_v27 = vadd.f32 %v10218_v9, %v6913_v44  ;;  %v6735_v30 = vpop.f32.mrf.mxu3 }
 0x7d7   :  { %7073 = vst.msk [vmem:[%s19036_s7 + $0x1c0] sm:$0xff] %vm2653_vm0, %v7009_v59  ;;  %v6814_v6 = vmul.f32 %v18246_v23, %v6735_v30  ;;  %v6655_v45 = vpop.f32.mrf.mxu1 }
 0x7d8   :  { %7041 = vst.msk [vmem:[%s19036_s7 + $0xc0] sm:$0xff] %vm2653_vm0, %v6977_v27  ;;  %v6782_v55 = vmul.f32 %v18246_v23, %v6655_v45 }
 0x7d9   :  { %v6882_v26 = vadd.f32 %v18255_v16, %v6814_v6 }
 0x7da   :  { %v6850_v15 = vadd.f32 %v18255_v16, %v6782_v55 }
 0x7db   :  { %v6946_v17 = vmax.f32 %v6882_v26, 0.0 }
 0x7dc   :  { %v6914_v2 = vmax.f32 %v6850_v15, 0.0 }
 0x7dd   :  { %v7010_v36 = vadd.f32 %v10219_v32, %v6946_v17  ;;  %v10229_v17 = vld [vmem:[%s19029_s0 + $0x331] sm:$0xff]  ;;  %v10230_v32 = vld [vmem:[%s19029_s0 + $0x181] sm:$0xff] }
 0x7de   :  { %v6978_v40 = vadd.f32 %v10220_v35, %v6914_v2  ;;  %v6738_v50 = vpop.f32.mrf.mxu3 }
 0x7df   :  { %7074 = vst.msk [vmem:[%s19036_s7 + $0x1c8] sm:$0xff] %vm2653_vm0, %v7010_v36  ;;  %v6815_v0 = vmul.f32 %v18246_v23, %v6738_v50  ;;  %v6658_v60 = vpop.f32.mrf.mxu1 }
 0x7e0   :  { %7042 = vst.msk [vmem:[%s19036_s7 + $0xc8] sm:$0xff] %vm2653_vm0, %v6978_v40  ;;  %v6783_v46 = vmul.f32 %v18246_v23, %v6658_v60 }
 0x7e1   :  { %v6883_v7 = vadd.f32 %v18255_v16, %v6815_v0 }
 0x7e2   :  { %v6851_v58 = vadd.f32 %v18255_v16, %v6783_v46 }
 0x7e3   :  { %v6947_v33 = vmax.f32 %v6883_v7, 0.0 }
 0x7e4   :  { %v6915_v28 = vmax.f32 %v6851_v58, 0.0 }
 0x7e5   :  { %v7011_v41 = vadd.f32 %v10221_v12, %v6947_v33  ;;  %v10231_v33 = vld [vmem:[%s19029_s0 + $0x339] sm:$0xff]  ;;  %v10232_v12 = vld [vmem:[%s19029_s0 + $0x189] sm:$0xff] }
 0x7e6   :  { %v6979_v49 = vadd.f32 %v10222_v20, %v6915_v28  ;;  %v6740_v25 = vpop.f32.mrf.mxu3 }
 0x7e7   :  { %7075 = vst.msk [vmem:[%s19036_s7 + $0x1d0] sm:$0xff] %vm2653_vm0, %v7011_v41  ;;  %v6816_v54 = vmul.f32 %v18246_v23, %v6740_v25  ;;  %v6660_v3 = vpop.f32.mrf.mxu1 }
 0x7e8   :  { %7043 = vst.msk [vmem:[%s19036_s7 + $0xd0] sm:$0xff] %vm2653_vm0, %v6979_v49  ;;  %v6784_v52 = vmul.f32 %v18246_v23, %v6660_v3 }
 0x7e9   :  { %v6884_v5 = vadd.f32 %v18255_v16, %v6816_v54 }
 0x7ea   :  { %v6852_v18 = vadd.f32 %v18255_v16, %v6784_v52 }
 0x7eb   :  { %v6948_v21 = vmax.f32 %v6884_v5, 0.0 }
 0x7ec   :  { %v6916_v39 = vmax.f32 %v6852_v18, 0.0 }
 0x7ed   :  { %v7012_v37 = vadd.f32 %v10223_v19, %v6948_v21 }
 0x7ee   :  { %v6980_v48 = vadd.f32 %v10224_v22, %v6916_v39  ;;  %v6743_v43 = vpop.f32.mrf.mxu3 }
 0x7ef   :  { %7076 = vst.msk [vmem:[%s19036_s7 + $0x1d8] sm:$0xff] %vm2653_vm0, %v7012_v37  ;;  %v6817_v11 = vmul.f32 %v18246_v23, %v6743_v43  ;;  %v6663_v8 = vpop.f32.mrf.mxu1 }
 0x7f0   :  { %7044 = vst.msk [vmem:[%s19036_s7 + $0xd8] sm:$0xff] %vm2653_vm0, %v6980_v48  ;;  %v6785_v4 = vmul.f32 %v18246_v23, %v6663_v8 }
 0x7f1   :  { %v6885_v61 = vadd.f32 %v18255_v16, %v6817_v11 }
 0x7f2   :  { %v6853_v24 = vadd.f32 %v18255_v16, %v6785_v4 }
 0x7f3   :  { %v6949_v57 = vmax.f32 %v6885_v61, 0.0 }
 0x7f4   :  { %v6917_v10 = vmax.f32 %v6853_v24, 0.0 }
 0x7f5   :  { %v7013_v56 = vadd.f32 %v10225_v1, %v6949_v57 }
 0x7f6   :  { %v6981_v38 = vadd.f32 %v10226_v29, %v6917_v10  ;;  %v6745_v31 = vpop.f32.mrf.mxu3 }
 0x7f7   :  { %7077 = vst.msk [vmem:[%s19036_s7 + $0x1e0] sm:$0xff] %vm2653_vm0, %v7013_v56  ;;  %v6818_v42 = vmul.f32 %v18246_v23, %v6745_v31  ;;  %v6665_v34 = vpop.f32.mrf.mxu1 }
 0x7f8   :  { %7045 = vst.msk [vmem:[%s19036_s7 + $0xe0] sm:$0xff] %vm2653_vm0, %v6981_v38  ;;  %v6786_v63 = vmul.f32 %v18246_v23, %v6665_v34 }
 0x7f9   :  { %v6886_v13 = vadd.f32 %v18255_v16, %v6818_v42 }
 0x7fa   :  { %v6854_v47 = vadd.f32 %v18255_v16, %v6786_v63 }
 0x7fb   :  { %v6950_v53 = vmax.f32 %v6886_v13, 0.0 }
 0x7fc   :  { %v6918_v14 = vmax.f32 %v6854_v47, 0.0 }
 0x7fd   :  { %v7014_v44 = vadd.f32 %v10227_v51, %v6950_v53 }
 0x7fe   :  { %v6982_v59 = vadd.f32 %v10228_v62, %v6918_v14  ;;  %v6748_v9 = vpop.f32.mrf.mxu3 }
 0x7ff   :  { %7078 = vst.msk [vmem:[%s19036_s7 + $0x1e8] sm:$0xff] %vm2653_vm0, %v7014_v44  ;;  %v6819_v27 = vmul.f32 %v18246_v23, %v6748_v9  ;;  %v6668_v30 = vpop.f32.mrf.mxu1 }
 0x800   :  { %7046 = vst.msk [vmem:[%s19036_s7 + $0xe8] sm:$0xff] %vm2653_vm0, %v6982_v59  ;;  %v6787_v6 = vmul.f32 %v18246_v23, %v6668_v30 }
 0x801   :  { %v6887_v45 = vadd.f32 %v18255_v16, %v6819_v27 }
 0x802   :  { %v6855_v55 = vadd.f32 %v18255_v16, %v6787_v6 }
 0x803   :  { %v6951_v26 = vmax.f32 %v6887_v45, 0.0 }
 0x804   :  { %v6919_v15 = vmax.f32 %v6855_v55, 0.0 }
 0x805   :  { %v7015_v2 = vadd.f32 %v10229_v17, %v6951_v26 }
 0x806   :  { %v6983_v36 = vadd.f32 %v10230_v32, %v6919_v15  ;;  %v6750_v35 = vpop.f32.mrf.mxu3 }
 0x807   :  { %7079 = vst.msk [vmem:[%s19036_s7 + $0x1f0] sm:$0xff] %vm2653_vm0, %v7015_v2  ;;  %v6820_v40 = vmul.f32 %v18246_v23, %v6750_v35  ;;  %v6670_v50 = vpop.f32.mrf.mxu1 }
 0x808   :  { %7047 = vst.msk [vmem:[%s19036_s7 + $0xf0] sm:$0xff] %vm2653_vm0, %v6983_v36  ;;  %v6788_v0 = vmul.f32 %v18246_v23, %v6670_v50 }
 0x809   :  { %v6888_v60 = vadd.f32 %v18255_v16, %v6820_v40 }
 0x80a   :  { %v6856_v46 = vadd.f32 %v18255_v16, %v6788_v0 }
 0x80b   :  { %v6952_v7 = vmax.f32 %v6888_v60, 0.0 }
 0x80c   :  { %v6920_v58 = vmax.f32 %v6856_v46, 0.0 }
 0x80d   :  { %v7016_v28 = vadd.f32 %v10231_v33, %v6952_v7 }
 0x80e   :  { %v6984_v41 = vadd.f32 %v10232_v12, %v6920_v58 }
 0x80f   :  { %7080 = vst.msk [vmem:[%s19036_s7 + $0x1f8] sm:$0xff] %vm2653_vm0, %v7016_v28 }
 0x810   :  { %7048 = vst.msk [vmem:[%s19036_s7 + $0xf8] sm:$0xff] %vm2653_vm0, %v6984_v41 }

</bundles_post_ra>
